<compile_context>
chip_gen: v7x
topology: tpu7x:2x2x1
jax: 0.10.0
libtpu: 0.0.40
codegen_flags: <defaults>
</compile_context>

<pallas_src>
import functools

import jax
import jax.numpy as jnp
from jax.experimental import pallas as pl
from jax.experimental.pallas import tpu as pltpu

# ----------------------------- config ------------------------------------------------
HIDDEN = 32            # config.hidden_size
VOCAB = 100            # config.vocab_size
PAD_ID = 0             # config.pad_token_id
MAX_POS = 64           # config.max_position_embeddings
TYPE_VOCAB = 2         # config.type_vocab_size
LN_EPS = 1e-12         # config.layer_norm_eps
BN_EPS = 1e-5

C_IN, C_MID, C_OUT = 2048, 512, 128   # fixed by Img_Feature_Embedding
IMG_H = IMG_W = 10
HW = IMG_H * IMG_W                    # 100 -> fc input = 128 * 100 (as in the module)


# ----------------------------- kernels ------------------------------------------------
def _conv_bn_relu_kernel(x_ref, w1_ref, t1_ref, w2_ref, t2_ref, o_ref):
    # x_ref: (T*HW, C_IN) bf16 -- several images' spatial positions batched in M so the
    # MXU rows are well filled.  1x1 conv == matmul over channels; the eval-BatchNorm
    # scale is pre-folded into w1/w2, only the per-channel shift + ReLU remain here.
    h1 = jnp.dot(x_ref[...], w1_ref[...], preferred_element_type=jnp.float32)
    h1 = jnp.maximum(h1 + t1_ref[...], 0.0)                               # (T*HW, C_MID)
    h2 = jnp.dot(h1.astype(jnp.bfloat16), w2_ref[...],
                 preferred_element_type=jnp.float32)
    h2 = jnp.maximum(h2 + t2_ref[...], 0.0)                               # (T*HW, C_OUT)
    o_ref[...] = h2.astype(o_ref.dtype)


def _ln_kernel(x_ref, g_ref, b_ref, o_ref, *, eps):
    x = x_ref[...]                                                        # (TM, H)
    mean = jnp.mean(x, axis=-1, keepdims=True)
    xc = x - mean
    var = jnp.mean(xc * xc, axis=-1, keepdims=True)
    o_ref[...] = xc * jax.lax.rsqrt(var + eps) * g_ref[...] + b_ref[...]


# ----------------------------- pallas_call wrappers -----------------------------------
def _pick_img_tile(n_img):
    # Images per grid step.  T*HW must be a multiple of 16 (bf16 sublane packing) unless
    # the block spans the whole array, i.e. T % 4 == 0 or T == n_img.  Cap at 8 images
    # so the double-buffered bf16 input block stays ~2 x 3.2 MB.
    for t in (8, 4):
        if t < n_img and n_img % t == 0:
            return t
    return n_img


def img_conv_stack(x_rows, w1f, t1, w2f, t2):
    """x_rows: (N*HW, C_IN) bf16 channel-last rows.  Returns (N*HW, C_OUT) bf16."""
    m = x_rows.shape[0]
    t_img = _pick_img_tile(m // HW)
    tm = t_img * HW
    return pl.pallas_call(
        _conv_bn_relu_kernel,
        out_shape=jax.ShapeDtypeStruct((m, C_OUT), jnp.bfloat16),
        grid=(m // tm,),
        in_specs=[pl.BlockSpec((tm, C_IN), lambda i: (i, 0)),
                  # NOTE(v7x): constant-index weights are still double-buffered; with
                  # larger image tiles, single-buffer w1f if VMEM gets tight.
                  pl.BlockSpec((C_IN, C_MID), lambda i: (0, 0)),
                  pl.BlockSpec((1, C_MID), lambda i: (0, 0)),
                  pl.BlockSpec((C_MID, C_OUT), lambda i: (0, 0)),
                  pl.BlockSpec((1, C_OUT), lambda i: (0, 0))],
        out_specs=pl.BlockSpec((tm, C_OUT), lambda i: (i, 0)),
        compiler_params=pltpu.CompilerParams(
            dimension_semantics=("parallel",),     # megacore split over image blocks (v7x)
            vmem_limit_bytes=32 << 20),            # working set ~10 MB; keep headroom on v7x
    )(x_rows, w1f, t1, w2f, t2)


def _pick_row_tile(m):
    if m <= 1024:
        return m
    for t in (1024, 512, 256, 128, 64, 32, 16, 8):
        if m % t == 0:
            return t
    return m


def layernorm_rows(x2d, gamma, beta, eps=LN_EPS):
    """Row-wise LayerNorm over (M, H); one kernel for all three embedding branches."""
    m, h = x2d.shape
    tm = _pick_row_tile(m)
    return pl.pallas_call(
        functools.partial(_ln_kernel, eps=eps),
        out_shape=jax.ShapeDtypeStruct((m, h), jnp.float32),
        grid=(m // tm,),
        in_specs=[pl.BlockSpec((tm, h), lambda i: (i, 0)),
                  pl.BlockSpec((1, h), lambda i: (0, 0)),
                  pl.BlockSpec((1, h), lambda i: (0, 0))],
        out_specs=pl.BlockSpec((tm, h), lambda i: (i, 0)),
        compiler_params=pltpu.CompilerParams(dimension_semantics=("parallel",)),
    )(x2d, gamma.reshape(1, h), beta.reshape(1, h))


# ----------------------------- one-time parameter prep (hoisted) ----------------------
def prepare_kernel_params(params):
    # Fold eval-BN scales into the conv weights, permute the fc weight from PyTorch's
    # C-major flatten (c*HW + hw) to the kernel's HW-major flatten (hw*C_OUT + c), and
    # cast matmul operands to bf16 (f32 accumulation in the kernel / XLA dot).
    w1f = (params["w1"] * params["s1"]).astype(jnp.bfloat16)              # (C_IN, C_MID)
    w2f = (params["w2"] * params["s2"]).astype(jnp.bfloat16)              # (C_MID, C_OUT)
    fc_w_k = jnp.transpose(params["fc_w"].reshape(HIDDEN, C_OUT, HW),
                           (2, 1, 0)).reshape(HW * C_OUT, HIDDEN)
    return dict(w1f=w1f, t1=params["t1"], w2f=w2f, t2=params["t2"],
                fc_w_k=fc_w_k.astype(jnp.bfloat16), fc_b=params["fc_b"])


# ----------------------------- full forward -------------------------------------------
def vln_embeddings_forward(params, kparams, input_ids, obj_input_ids, img_feat,
                           act_seq, act_dist, act_step, view_idx, view_step):
    B, L_txt = input_ids.shape
    word = params["word_emb"]

    # --- instruction branch (pre-LayerNorm sum; buffered token_type ids are all zero) ---
    instr_pre = (word[input_ids] + params["type_emb"][0]
                 + params["pos_emb"][:L_txt][None, :, :])                  # (B, L_txt, H)

    # --- visual branch: Img_Feature_Embedding on channel-last rows ---
    Bf, N_img, C, Hh, Ww = img_feat.shape
    N = Bf * N_img
    x = jnp.transpose(img_feat.reshape(N, C, Hh * Ww), (0, 2, 1))          # NCHW -> (N, HW, C)
    x = x.reshape(N * Hh * Ww, C).astype(jnp.bfloat16)                     # (N*HW, C_IN) bf16
    h2 = img_conv_stack(x, kparams["w1f"], kparams["t1"],
                        kparams["w2f"], kparams["t2"])                     # (N*HW, C_OUT) bf16
    # fc on the kernel's bf16 output; the reshape to (N, HW*C_OUT) is a free contiguous view.
    img_flat = h2.reshape(N, HW * C_OUT)
    img_emb = (jnp.dot(img_flat, kparams["fc_w_k"],
                       preferred_element_type=jnp.float32)
               + params["fc_b"]).reshape(Bf, N_img, HIDDEN)

    obj_emb = word[obj_input_ids]                                          # (B, L_obj, H)
    vis = jnp.concatenate([img_emb, obj_emb], axis=1)
    vis_pre = (vis + params["view_step_emb"][view_step]
               + params["view_idx_emb"][view_idx])                         # (B, L_vis, H)

    # --- action branch ---
    act_pre = (word[act_seq] + params["dist_emb"][act_dist]
               + params["act_step_emb"][act_step])                         # (B, L_act, H)

    # --- single LayerNorm kernel over all three branches (dropout == identity) ---
    pre = jnp.concatenate([instr_pre, vis_pre, act_pre], axis=1)           # (B, L_total, H)
    L_total = pre.shape[1]
    out = layernorm_rows(pre.reshape(B * L_total, HIDDEN),
                         params["ln_gamma"], params["ln_beta"])
    return out.reshape(B, L_total, HIDDEN)


# ----------------------------- pure-JAX reference (PyTorch semantics) -----------------
def reference_forward(params, input_ids, obj_input_ids, img_feat,
                      act_seq, act_dist, act_step, view_idx, view_step):
    def ln(x):
        mean = jnp.mean(x, axis=-1, keepdims=True)
        var = jnp.mean((x - mean) ** 2, axis=-1, keepdims=True)
        return (x - mean) / jnp.sqrt(var + LN_EPS) * params["ln_gamma"] + params["ln_beta"]

    word = params["word_emb"]
    B, L = input_ids.shape
    instr = ln(word[input_ids] + params["type_emb"][0] + params["pos_emb"][:L][None])

    Bf, N_img, C, Hh, Ww = img_feat.shape
    x = jnp.transpose(img_feat.reshape(Bf * N_img, C, Hh * Ww), (0, 2, 1))   # (N, HW, C)
    h1 = jnp.maximum(jnp.einsum("npc,cm->npm", x, params["w1"]) * params["s1"] + params["t1"], 0.0)
    h2 = jnp.maximum(jnp.einsum("npm,mo->npo", h1, params["w2"]) * params["s2"] + params["t2"], 0.0)
    # PyTorch flatten: (N, C_OUT, HW) C-major
    h2_cm = jnp.transpose(h2, (0, 2, 1)).reshape(Bf * N_img, C_OUT * HW)
    img = (h2_cm @ params["fc_w"].T + params["fc_b"]).reshape(Bf, N_img, HIDDEN)

    vis = jnp.concatenate([img, word[obj_input_ids]], axis=1)
    visual = ln(vis + params["view_step_emb"][view_step] + params["view_idx_emb"][view_idx])
    action = ln(word[act_seq] + params["dist_emb"][act_dist] + params["act_step_emb"][act_step])
    return jnp.concatenate([instr, visual, action], axis=1)


# ----------------------------- deterministic parameter init ---------------------------
def init_params(key):
    ks = jax.random.split(key, 24)
    n = lambda i, shape, s=0.02: s * jax.random.normal(ks[i], shape, jnp.float32)

    word_emb = n(0, (VOCAB, HIDDEN)).at[PAD_ID].set(0.0)   # padding_idx=0

    # conv1: PyTorch weight (512, 2048, 1, 1) -> matmul layout (2048, 512)
    w1 = jax.random.normal(ks[1], (C_IN, C_MID), jnp.float32) / jnp.sqrt(C_IN)
    b1 = n(2, (C_MID,), 0.01)
    bn1_g = 1.0 + n(3, (C_MID,), 0.1)
    bn1_b = n(4, (C_MID,), 0.1)
    bn1_m = n(5, (C_MID,), 0.1)
    bn1_v = 1.0 + 0.1 * jnp.abs(jax.random.normal(ks[6], (C_MID,), jnp.float32))

    w2 = jax.random.normal(ks[7], (C_MID, C_OUT), jnp.float32) / jnp.sqrt(C_MID)
    b2 = n(8, (C_OUT,), 0.01)
    bn2_g = 1.0 + n(9, (C_OUT,), 0.1)
    bn2_b = n(10, (C_OUT,), 0.1)
    bn2_m = n(11, (C_OUT,), 0.1)
    bn2_v = 1.0 + 0.1 * jnp.abs(jax.random.normal(ks[12], (C_OUT,), jnp.float32))

    # fold eval-mode BatchNorm (+ conv bias) into per-channel scale/shift
    s1 = bn1_g / jnp.sqrt(bn1_v + BN_EPS)
    t1 = (b1 - bn1_m) * s1 + bn1_b
    s2 = bn2_g / jnp.sqrt(bn2_v + BN_EPS)
    t2 = (b2 - bn2_m) * s2 + bn2_b

    fc_w = jax.random.normal(ks[13], (HIDDEN, C_OUT * HW), jnp.float32) / jnp.sqrt(C_OUT * HW)
    fc_b = n(14, (HIDDEN,), 0.01)

    return dict(
        word_emb=word_emb,
        pos_emb=n(15, (MAX_POS, HIDDEN)),
        type_emb=n(16, (TYPE_VOCAB, HIDDEN)),
        view_idx_emb=n(17, (5, HIDDEN)),
        view_step_emb=n(18, (3, HIDDEN)),
        dist_emb=n(19, (41, HIDDEN)),
        act_step_emb=n(20, (15, HIDDEN)),
        ln_gamma=1.0 + n(21, (HIDDEN,), 0.05),
        ln_beta=n(22, (HIDDEN,), 0.05),
        w1=w1, s1=s1.reshape(1, C_MID), t1=t1.reshape(1, C_MID),
        w2=w2, s2=s2.reshape(1, C_OUT), t2=t2.reshape(1, C_OUT),
        fc_w=fc_w, fc_b=fc_b,
    )


# ----------------------------- main ----------------------------------------------------
if __name__ == "__main__":
    key = jax.random.PRNGKey(0)
    pkey, dkey = jax.random.split(key)
    params = init_params(pkey)
    kparams = prepare_kernel_params(params)     # one-time: BN fold, fc_w permute, bf16 cast

    B, L_TXT, L_OBJ, N_IMG, L_ACT = 2, 8, 4, 2, 4
    L_VIS = N_IMG + L_OBJ

    dks = jax.random.split(dkey, 8)
    input_ids = jax.random.randint(dks[0], (B, L_TXT), 0, VOCAB, jnp.int32)
    obj_input_ids = jax.random.randint(dks[1], (B, L_OBJ), 0, VOCAB, jnp.int32)
    img_feat = jax.random.normal(dks[2], (B, N_IMG, C_IN, IMG_H, IMG_W), jnp.float32)
    act_seq = jax.random.randint(dks[3], (B, L_ACT), 0, VOCAB, jnp.int32)
    act_dist = jax.random.randint(dks[4], (B, L_ACT), 0, 41, jnp.int32)
    act_step = jax.random.randint(dks[5], (B, L_ACT), 0, 15, jnp.int32)
    view_idx = jax.random.randint(dks[6], (B, L_VIS), 0, 5, jnp.int32)
    view_step = jax.random.randint(dks[7], (B, L_VIS), 0, 3, jnp.int32)

    forward = jax.jit(vln_embeddings_forward)
    out = forward(params, kparams, input_ids, obj_input_ids, img_feat,
                  act_seq, act_dist, act_step, view_idx, view_step)
    out = jax.block_until_ready(out)

    ref = reference_forward(params, input_ids, obj_input_ids, img_feat,
                            act_seq, act_dist, act_step, view_idx, view_step)
    ref = jax.block_until_ready(ref)

    assert out.shape == (B, L_TXT + L_VIS + L_ACT, HIDDEN), out.shape
    assert jnp.allclose(out, ref, rtol=5e-2, atol=5e-2), float(jnp.max(jnp.abs(out - ref)))

    print("KERNEL_OK")
</pallas_src>

<mosaic_0001>
module attributes {stable_mosaic.version = 11 : i64} {
  func.func @_conv_bn_relu_kernel(%arg0: i32, %arg1: memref<400x2048xbf16, #tpu.memory_space<vmem>>, %arg2: memref<2048x512xbf16, #tpu.memory_space<vmem>>, %arg3: memref<1x512xf32, #tpu.memory_space<vmem>>, %arg4: memref<512x128xbf16, #tpu.memory_space<vmem>>, %arg5: memref<1x128xf32, #tpu.memory_space<vmem>>, %arg6: memref<400x128xbf16, #tpu.memory_space<vmem>>) attributes {dimension_semantics = [#tpu.dimension_semantics<parallel>], iteration_bounds = array<i64: 1>, scalar_prefetch = 0 : i64, scratch_operands = 0 : i64, tpu.core_type = #tpu.core_type<tc>, window_params = [{transform_indices = @transform_0, window_bounds = array<i64: 400, 2048>}, {pipeline_mode = #tpu.pipeline_mode<synchronous>, transform_indices = @transform_1, window_bounds = array<i64: 2048, 512>}, {pipeline_mode = #tpu.pipeline_mode<synchronous>, transform_indices = @transform_2, window_bounds = array<i64: 1, 512>}, {pipeline_mode = #tpu.pipeline_mode<synchronous>, transform_indices = @transform_3, window_bounds = array<i64: 512, 128>}, {pipeline_mode = #tpu.pipeline_mode<synchronous>, transform_indices = @transform_4, window_bounds = array<i64: 1, 128>}, {transform_indices = @transform_5, window_bounds = array<i64: 400, 128>}]} {
    %c0 = arith.constant 0 : index
    %c0_0 = arith.constant 0 : index
    %0 = vector.load %arg1[%c0, %c0_0] : memref<400x2048xbf16, #tpu.memory_space<vmem>>, vector<400x2048xbf16>
    %c0_1 = arith.constant 0 : index
    %c0_2 = arith.constant 0 : index
    %1 = vector.load %arg2[%c0_1, %c0_2] : memref<2048x512xbf16, #tpu.memory_space<vmem>>, vector<2048x512xbf16>
    %cst = arith.constant dense<0.000000e+00> : vector<400x512xf32>
    %2 = tpu.matmul %0, %1, %cst {dimension_numbers = #tpu.dot_dimension_numbers<[1], [0], [0], [1], [0, 0, 1, 1], [], []>} : vector<400x2048xbf16>, vector<2048x512xbf16>, vector<400x512xf32> -> vector<400x512xf32>
    %c0_3 = arith.constant 0 : index
    %c0_4 = arith.constant 0 : index
    %3 = vector.load %arg3[%c0_3, %c0_4] : memref<1x512xf32, #tpu.memory_space<vmem>>, vector<1x512xf32>
    %4 = vector.broadcast %3 : vector<1x512xf32> to vector<400x512xf32>
    %5 = arith.addf %2, %4 : vector<400x512xf32>
    %cst_5 = arith.constant 0.000000e+00 : f32
    %6 = vector.broadcast %cst_5 : f32 to vector<400x512xf32>
    %7 = arith.maximumf %5, %6 : vector<400x512xf32>
    %8 = arith.truncf %7 : vector<400x512xf32> to vector<400x512xbf16>
    %c0_6 = arith.constant 0 : index
    %c0_7 = arith.constant 0 : index
    %9 = vector.load %arg4[%c0_6, %c0_7] : memref<512x128xbf16, #tpu.memory_space<vmem>>, vector<512x128xbf16>
    %cst_8 = arith.constant dense<0.000000e+00> : vector<400x128xf32>
    %10 = tpu.matmul %8, %9, %cst_8 {dimension_numbers = #tpu.dot_dimension_numbers<[1], [0], [0], [1], [0, 0, 1, 1], [], []>} : vector<400x512xbf16>, vector<512x128xbf16>, vector<400x128xf32> -> vector<400x128xf32>
    %c0_9 = arith.constant 0 : index
    %c0_10 = arith.constant 0 : index
    %11 = vector.load %arg5[%c0_9, %c0_10] : memref<1x128xf32, #tpu.memory_space<vmem>>, vector<1x128xf32>
    %12 = vector.broadcast %11 : vector<1x128xf32> to vector<400x128xf32>
    %13 = arith.addf %10, %12 : vector<400x128xf32>
    %cst_11 = arith.constant 0.000000e+00 : f32
    %14 = vector.broadcast %cst_11 : f32 to vector<400x128xf32>
    %15 = arith.maximumf %13, %14 : vector<400x128xf32>
    %16 = arith.truncf %15 : vector<400x128xf32> to vector<400x128xbf16>
    %c0_12 = arith.constant 0 : index
    %c0_13 = arith.constant 0 : index
    %17 = vector.load %arg6[%c0_12, %c0_13] : memref<400x128xbf16, #tpu.memory_space<vmem>>, vector<400x128xbf16>
    tpu.vector_store %arg6[%c0_12, %c0_13], %16 {strides = array<i32>} : memref<400x128xbf16, #tpu.memory_space<vmem>>, vector<400x128xbf16>,
    return
  }
  func.func @transform_0(%arg0: i32) -> (i32, i32) {
    %c0_i32 = arith.constant 0 : i32
    %c0_i32_0 = arith.constant 0 : i32
    return %arg0, %c0_i32 : i32, i32
  }
  func.func @transform_1(%arg0: i32) -> (i32, i32) {
    %c0_i32 = arith.constant 0 : i32
    %c0_i32_0 = arith.constant 0 : i32
    %c0_i32_1 = arith.constant 0 : i32
    return %c0_i32, %c0_i32_0 : i32, i32
  }
  func.func @transform_2(%arg0: i32) -> (i32, i32) {
    %c0_i32 = arith.constant 0 : i32
    %c0_i32_0 = arith.constant 0 : i32
    %c0_i32_1 = arith.constant 0 : i32
    return %c0_i32, %c0_i32_0 : i32, i32
  }
  func.func @transform_3(%arg0: i32) -> (i32, i32) {
    %c0_i32 = arith.constant 0 : i32
    %c0_i32_0 = arith.constant 0 : i32
    %c0_i32_1 = arith.constant 0 : i32
    return %c0_i32, %c0_i32_0 : i32, i32
  }
  func.func @transform_4(%arg0: i32) -> (i32, i32) {
    %c0_i32 = arith.constant 0 : i32
    %c0_i32_0 = arith.constant 0 : i32
    %c0_i32_1 = arith.constant 0 : i32
    return %c0_i32, %c0_i32_0 : i32, i32
  }
  func.func @transform_5(%arg0: i32) -> (i32, i32) {
    %c0_i32 = arith.constant 0 : i32
    %c0_i32_0 = arith.constant 0 : i32
    return %arg0, %c0_i32 : i32, i32
  }
}

module attributes {stable_mosaic.version = 11 : i64} {
  func.func @_ln_kernel(%arg0: i32, %arg1: memref<36x32xf32, #tpu.memory_space<vmem>>, %arg2: memref<1x32xf32, #tpu.memory_space<vmem>>, %arg3: memref<1x32xf32, #tpu.memory_space<vmem>>, %arg4: memref<36x32xf32, #tpu.memory_space<vmem>>) attributes {dimension_semantics = [#tpu.dimension_semantics<parallel>], iteration_bounds = array<i64: 1>, scalar_prefetch = 0 : i64, scratch_operands = 0 : i64, tpu.core_type = #tpu.core_type<tc>, window_params = [{transform_indices = @transform_0, window_bounds = array<i64: 36, 32>}, {pipeline_mode = #tpu.pipeline_mode<synchronous>, transform_indices = @transform_1, window_bounds = array<i64: 1, 32>}, {pipeline_mode = #tpu.pipeline_mode<synchronous>, transform_indices = @transform_2, window_bounds = array<i64: 1, 32>}, {transform_indices = @transform_3, window_bounds = array<i64: 36, 32>}]} {
    %c0 = arith.constant 0 : index
    %c0_0 = arith.constant 0 : index
    %0 = vector.load %arg1[%c0, %c0_0] : memref<36x32xf32, #tpu.memory_space<vmem>>, vector<36x32xf32>
    %cst = arith.constant dense<0.000000e+00> : vector<36xf32>
    %1 = vector.multi_reduction <add>, %0, %cst [1] : vector<36x32xf32> to vector<36xf32>
    %2 = vector.shape_cast %1 : vector<36xf32> to vector<36x1xf32>
    %cst_1 = arith.constant 3.200000e+01 : f32
    %3 = vector.broadcast %cst_1 : f32 to vector<36x1xf32>
    %4 = arith.divf %2, %3 : vector<36x1xf32>
    %5 = vector.broadcast %4 : vector<36x1xf32> to vector<36x32xf32>
    %6 = arith.subf %0, %5 : vector<36x32xf32>
    %7 = arith.mulf %6, %6 : vector<36x32xf32>
    %cst_2 = arith.constant dense<0.000000e+00> : vector<36xf32>
    %8 = vector.multi_reduction <add>, %7, %cst_2 [1] : vector<36x32xf32> to vector<36xf32>
    %9 = vector.shape_cast %8 : vector<36xf32> to vector<36x1xf32>
    %cst_3 = arith.constant 3.200000e+01 : f32
    %10 = vector.broadcast %cst_3 : f32 to vector<36x1xf32>
    %11 = arith.divf %9, %10 : vector<36x1xf32>
    %cst_4 = arith.constant 9.99999996E-13 : f32
    %12 = vector.broadcast %cst_4 : f32 to vector<36x1xf32>
    %13 = arith.addf %11, %12 : vector<36x1xf32>
    %14 = math.rsqrt %13 : vector<36x1xf32>
    %15 = vector.broadcast %14 : vector<36x1xf32> to vector<36x32xf32>
    %16 = arith.mulf %6, %15 : vector<36x32xf32>
    %c0_5 = arith.constant 0 : index
    %c0_6 = arith.constant 0 : index
    %17 = vector.load %arg2[%c0_5, %c0_6] : memref<1x32xf32, #tpu.memory_space<vmem>>, vector<1x32xf32>
    %18 = vector.broadcast %17 : vector<1x32xf32> to vector<36x32xf32>
    %19 = arith.mulf %16, %18 : vector<36x32xf32>
    %c0_7 = arith.constant 0 : index
    %c0_8 = arith.constant 0 : index
    %20 = vector.load %arg3[%c0_7, %c0_8] : memref<1x32xf32, #tpu.memory_space<vmem>>, vector<1x32xf32>
    %21 = vector.broadcast %20 : vector<1x32xf32> to vector<36x32xf32>
    %22 = arith.addf %19, %21 : vector<36x32xf32>
    %c0_9 = arith.constant 0 : index
    %c0_10 = arith.constant 0 : index
    %23 = vector.load %arg4[%c0_9, %c0_10] : memref<36x32xf32, #tpu.memory_space<vmem>>, vector<36x32xf32>
    tpu.vector_store %arg4[%c0_9, %c0_10], %22 {strides = array<i32>} : memref<36x32xf32, #tpu.memory_space<vmem>>, vector<36x32xf32>,
    return
  }
  func.func @transform_0(%arg0: i32) -> (i32, i32) {
    %c0_i32 = arith.constant 0 : i32
    %c0_i32_0 = arith.constant 0 : i32
    return %arg0, %c0_i32 : i32, i32
  }
  func.func @transform_1(%arg0: i32) -> (i32, i32) {
    %c0_i32 = arith.constant 0 : i32
    %c0_i32_0 = arith.constant 0 : i32
    %c0_i32_1 = arith.constant 0 : i32
    return %c0_i32, %c0_i32_0 : i32, i32
  }
  func.func @transform_2(%arg0: i32) -> (i32, i32) {
    %c0_i32 = arith.constant 0 : i32
    %c0_i32_0 = arith.constant 0 : i32
    %c0_i32_1 = arith.constant 0 : i32
    return %c0_i32, %c0_i32_0 : i32, i32
  }
  func.func @transform_3(%arg0: i32) -> (i32, i32) {
    %c0_i32 = arith.constant 0 : i32
    %c0_i32_0 = arith.constant 0 : i32
    return %arg0, %c0_i32 : i32, i32
  }
}

</mosaic_0001>

<bundles_post_ra>
// kernel: vln_embeddings_forward.2
= control target key start
LH: loop header
LB: loop body
LE: loop exit
PB: predicated region body
PF: predicated region fallthrough
CT: control target
= control target key end

     0   :  { %s20267_s1 = inlined_call_operand.vmem [shape: bf16[2048,512], index: 1, kind: input, shape index: {}]   ;;  %s20268_s0 = inlined_call_operand.vmem [shape: bf16[400,2048], index: 0, kind: input, shape index: {}]   ;;  %s20269_s3 = inlined_call_operand.vmem [shape: bf16[512,128], index: 3, kind: input, shape index: {}]   ;;  %s20270_s2 = inlined_call_operand.vmem [shape: f32[1,512], index: 2, kind: input, shape index: {}]   ;;  %s20271_s4 = inlined_call_operand.vmem [shape: f32[1,128], index: 4, kind: input, shape index: {}]   ;;  %s20272_s5 = inlined_call_operand.vmem [shape: bf16[400,128], index: 5, kind: output, shape index: {}]  }
   0x1   :  { %v14321_v0 = vld [vmem:[%s20267_s1 + $0x4] ss:$16 sps:$4 sm:$0xff]   ;;  %v14325_v2 = vld [vmem:[%s20267_s1] ss:$16 sps:$4 sm:$0xff]   ;;  %v22_v49 = vld [vmem:[%s20268_s0 + $0x8] sm:$0xff] }
   0x2   :  { %v14323_v1 = vld [vmem:[%s20267_s1 + $0x204] ss:$16 sps:$4 sm:$0xff]   ;;  %5515 = vmatprep.subr.bf16.mxu1 %v14321_v0  ;;  %v14326_v3 = vld [vmem:[%s20267_s1 + $0x200] ss:$16 sps:$4 sm:$0xff]   ;;  %v30_v50 = vld [vmem:[%s20268_s0 + $0x48] sm:$0xff] }
   0x3   :  { %5798 = vmatprep.subr.bf16.mxu0 %v14323_v1  ;;  %v14327_v4 = vld [vmem:[%s20267_s1 + $0x24] ss:$16 sps:$4 sm:$0xff]   ;;  %5516 = vmatpush1.bf16.msra.mxu1 %v14325_v2  ;;  %v14331_v6 = vld [vmem:[%s20267_s1 + $0x20] ss:$16 sps:$4 sm:$0xff]   ;;  %v15317_v55 = vcombine.high %v22_v49, %v30_v50 }
   0x4   :  { %5799 = vmatpush1.bf16.msra.mxu0 %v14326_v3  ;;  %v14329_v5 = vld [vmem:[%s20267_s1 + $0x224] ss:$16 sps:$4 sm:$0xff]   ;;  %5517 = vmatprep.subr.bf16.mxu1 %v14327_v4  ;;  %v14332_v7 = vld [vmem:[%s20267_s1 + $0x220] ss:$16 sps:$4 sm:$0xff]  }
   0x5   :  { %5800 = vmatprep.subr.bf16.mxu0 %v14329_v5  ;;  %v14333_v8 = vld [vmem:[%s20267_s1 + $0x44] ss:$16 sps:$4 sm:$0xff]   ;;  %v14337_v10 = vld [vmem:[%s20267_s1 + $0x40] ss:$16 sps:$4 sm:$0xff]   ;;  %5830 = vmatprep.mubr.bf16.mxu0 %v15317_v55 }
   0x6   :  { %v14335_v9 = vld [vmem:[%s20267_s1 + $0x244] ss:$16 sps:$4 sm:$0xff]   ;;  %v14338_v11 = vld [vmem:[%s20267_s1 + $0x240] ss:$16 sps:$4 sm:$0xff]  }
   0x7   :  { %5518 = vmatpush1.bf16.msra.mxu1 %v14331_v6  ;;  %v14339_v12 = vld [vmem:[%s20267_s1 + $0x64] ss:$16 sps:$4 sm:$0xff]   ;;  %v14343_v14 = vld [vmem:[%s20267_s1 + $0x60] ss:$16 sps:$4 sm:$0xff]   ;;  %v14419_v6 = vld [vmem:[%s20267_s1 + $0xc] ss:$16 sps:$4 sm:$0xff]  }
   0x8   :  { %5801 = vmatpush1.bf16.msra.mxu0 %v14332_v7  ;;  %5519 = vmatprep.subr.bf16.mxu1 %v14333_v8  ;;  %v14341_v13 = vld [vmem:[%s20267_s1 + $0x264] ss:$16 sps:$4 sm:$0xff]   ;;  %v14344_v15 = vld [vmem:[%s20267_s1 + $0x260] ss:$16 sps:$4 sm:$0xff]  }
   0x9   :  { %5802 = vmatprep.subr.bf16.mxu0 %v14335_v9  ;;  %v14345_v16 = vld [vmem:[%s20267_s1 + $0x84] ss:$16 sps:$4 sm:$0xff]   ;;  %v14349_v18 = vld [vmem:[%s20267_s1 + $0x80] ss:$16 sps:$4 sm:$0xff]   ;;  %v38_v9 = vld [vmem:[%s20268_s0 + $0x88] sm:$0xff] }
   0xa   :  { %v14347_v17 = vld [vmem:[%s20267_s1 + $0x284] ss:$16 sps:$4 sm:$0xff]   ;;  %v14350_v19 = vld [vmem:[%s20267_s1 + $0x280] ss:$16 sps:$4 sm:$0xff]  }
   0xb   :  { %5520 = vmatpush1.bf16.msra.mxu1 %v14337_v10  ;;  %v14351_v20 = vld [vmem:[%s20267_s1 + $0xa4] ss:$16 sps:$4 sm:$0xff]   ;;  %v14355_v22 = vld [vmem:[%s20267_s1 + $0xa0] ss:$16 sps:$4 sm:$0xff]   ;;  %v46_v10 = vld [vmem:[%s20268_s0 + $0xc8] sm:$0xff] }
   0xc   :  { %5803 = vmatpush1.bf16.msra.mxu0 %v14338_v11  ;;  %5521 = vmatprep.subr.bf16.mxu1 %v14339_v12  ;;  %v14353_v21 = vld [vmem:[%s20267_s1 + $0x2a4] ss:$16 sps:$4 sm:$0xff]   ;;  %v14356_v23 = vld [vmem:[%s20267_s1 + $0x2a0] ss:$16 sps:$4 sm:$0xff]   ;;  %v15380_v12 = vcombine.low %v22_v49, %v30_v50  ;;  %v14437_v49 = vld [vmem:[%s20267_s1 + $0xcc] ss:$16 sps:$4 sm:$0xff]  }
   0xd   :  { %5804 = vmatprep.subr.bf16.mxu0 %v14341_v13  ;;  %v14357_v24 = vld [vmem:[%s20267_s1 + $0xc4] ss:$16 sps:$4 sm:$0xff]   ;;  %v14361_v26 = vld [vmem:[%s20267_s1 + $0xc0] ss:$16 sps:$4 sm:$0xff]   ;;  %v14417_v13 = vld [vmem:[%s20267_s1 + $0x8] ss:$16 sps:$4 sm:$0xff]  }
   0xe   :  { %v14359_v25 = vld [vmem:[%s20267_s1 + $0x2c4] ss:$16 sps:$4 sm:$0xff]   ;;  %v14362_v27 = vld [vmem:[%s20267_s1 + $0x2c0] ss:$16 sps:$4 sm:$0xff]  }
   0xf   :  { %5522 = vmatpush1.bf16.msra.mxu1 %v14343_v14  ;;  %v14363_v28 = vld [vmem:[%s20267_s1 + $0xe4] ss:$16 sps:$4 sm:$0xff]   ;;  %v14367_v30 = vld [vmem:[%s20267_s1 + $0xe0] ss:$16 sps:$4 sm:$0xff]  }
  0x10   :  { %5805 = vmatpush1.bf16.msra.mxu0 %v14344_v15  ;;  %5523 = vmatprep.subr.bf16.mxu1 %v14345_v16  ;;  %v14365_v29 = vld [vmem:[%s20267_s1 + $0x2e4] ss:$16 sps:$4 sm:$0xff]   ;;  %v14368_v31 = vld [vmem:[%s20267_s1 + $0x2e0] ss:$16 sps:$4 sm:$0xff]   ;;  %v15387_v15 = vcombine.high %v38_v9, %v46_v10  ;;  %v14422_v16 = vld [vmem:[%s20267_s1 + $0x2c] ss:$16 sps:$4 sm:$0xff]  }
  0x11   :  { %5806 = vmatprep.subr.bf16.mxu0 %v14347_v17  ;;  %v14369_v32 = vld [vmem:[%s20267_s1 + $0x104] ss:$16 sps:$4 sm:$0xff]   ;;  %v14373_v34 = vld [vmem:[%s20267_s1 + $0x100] ss:$16 sps:$4 sm:$0xff]   ;;  %v14420_v17 = vld [vmem:[%s20267_s1 + $0x28] ss:$16 sps:$4 sm:$0xff]  }
  0x12   :  { %v14371_v33 = vld [vmem:[%s20267_s1 + $0x304] ss:$16 sps:$4 sm:$0xff]   ;;  %v14374_v35 = vld [vmem:[%s20267_s1 + $0x300] ss:$16 sps:$4 sm:$0xff]  }
  0x13   :  { %5524 = vmatpush1.bf16.msra.mxu1 %v14349_v18  ;;  %v14375_v36 = vld [vmem:[%s20267_s1 + $0x124] ss:$16 sps:$4 sm:$0xff]   ;;  %v14379_v38 = vld [vmem:[%s20267_s1 + $0x120] ss:$16 sps:$4 sm:$0xff]  }
  0x14   :  { %5807 = vmatpush1.bf16.msra.mxu0 %v14350_v19  ;;  %5525 = vmatprep.subr.bf16.mxu1 %v14351_v20  ;;  %v14377_v37 = vld [vmem:[%s20267_s1 + $0x324] ss:$16 sps:$4 sm:$0xff]   ;;  %v14380_v39 = vld [vmem:[%s20267_s1 + $0x320] ss:$16 sps:$4 sm:$0xff]   ;;  %v54_v20 = vld [vmem:[%s20268_s0 + $0x108] sm:$0xff] }
  0x15   :  { %5808 = vmatprep.subr.bf16.mxu0 %v14353_v21  ;;  %v14381_v40 = vld [vmem:[%s20267_s1 + $0x144] ss:$16 sps:$4 sm:$0xff]   ;;  %v14385_v42 = vld [vmem:[%s20267_s1 + $0x140] ss:$16 sps:$4 sm:$0xff]   ;;  %v62_v21 = vld [vmem:[%s20268_s0 + $0x148] sm:$0xff] }
  0x16   :  { %v14383_v41 = vld [vmem:[%s20267_s1 + $0x344] ss:$16 sps:$4 sm:$0xff]   ;;  %v14386_v43 = vld [vmem:[%s20267_s1 + $0x340] ss:$16 sps:$4 sm:$0xff]  }
  0x17   :  { %5526 = vmatpush1.bf16.msra.mxu1 %v14355_v22  ;;  %v14387_v44 = vld [vmem:[%s20267_s1 + $0x164] ss:$16 sps:$4 sm:$0xff]   ;;  %v14391_v46 = vld [vmem:[%s20267_s1 + $0x160] ss:$16 sps:$4 sm:$0xff]   ;;  %v14425_v22 = vld [vmem:[%s20267_s1 + $0x4c] ss:$16 sps:$4 sm:$0xff]  }
  0x18   :  { %5809 = vmatpush1.bf16.msra.mxu0 %v14356_v23  ;;  %5527 = vmatprep.subr.bf16.mxu1 %v14357_v24  ;;  %v14389_v45 = vld [vmem:[%s20267_s1 + $0x364] ss:$16 sps:$4 sm:$0xff]   ;;  %v14392_v51 = vld [vmem:[%s20267_s1 + $0x360] ss:$16 sps:$4 sm:$0xff]   ;;  %v15416_v24 = vcombine.low %v38_v9, %v46_v10  ;;  %v14446_v10 = vld [vmem:[%s20267_s1 + $0x12c] ss:$16 sps:$4 sm:$0xff]  }
  0x19   :  { %5810 = vmatprep.subr.bf16.mxu0 %v14359_v25  ;;  %v21_v47 = vld [vmem:[%s20268_s0] sm:$0xff] }
  0x1a   :  { %v29_v48 = vld [vmem:[%s20268_s0 + $0x40] sm:$0xff]  ;;  %20480 = vst [vmem:[#allocation2_spill] sm:$0xff] %v15416_v24 }
  0x1b   :  { %5528 = vmatpush1.bf16.msra.mxu1 %v14361_v26  ;;  %v15309_v52 = vcombine.high %v21_v47, %v29_v48  ;;  %v14393_v53 = vld [vmem:[%s20267_s1 + $0x184] ss:$16 sps:$4 sm:$0xff]   ;;  %v14397_v56 = vld [vmem:[%s20267_s1 + $0x180] ss:$16 sps:$4 sm:$0xff]   ;;  %v15378_v11 = vcombine.low %v21_v47, %v29_v48  ;;  %v15420_v26 = vcombine.high %v54_v20, %v62_v21  ;;  %v14432_v47 = vld [vmem:[%s20267_s1 + $0xa8] ss:$16 sps:$4 sm:$0xff]  }
  0x1c   :  { %5811 = vmatpush1.bf16.msra.mxu0 %v14362_v27  ;;  %5529 = vmatprep.subr.bf16.mxu1 %v14363_v28  ;;  %v14395_v54 = vld [vmem:[%s20267_s1 + $0x384] ss:$16 sps:$4 sm:$0xff]   ;;  %v14398_v57 = vld [vmem:[%s20267_s1 + $0x380] ss:$16 sps:$4 sm:$0xff]   ;;  %v14423_v27 = vld [vmem:[%s20267_s1 + $0x48] ss:$16 sps:$4 sm:$0xff]  }
  0x1d   :  { %5812 = vmatprep.subr.bf16.mxu0 %v14365_v29  ;;  %5547 = vmatprep.mubr.bf16.mxu1 %v15309_v52  ;;  %v14399_v58 = vld [vmem:[%s20267_s1 + $0x1a4] ss:$16 sps:$4 sm:$0xff]   ;;  %v14403_v60 = vld [vmem:[%s20267_s1 + $0x1a0] ss:$16 sps:$4 sm:$0xff]   ;;  %20481 = vst [vmem:[#allocation3_spill] sm:$0xff] %v15420_v26 }
  0x1e   :  { %v14401_v59 = vld [vmem:[%s20267_s1 + $0x3a4] ss:$16 sps:$4 sm:$0xff]   ;;  %v14404_v61 = vld [vmem:[%s20267_s1 + $0x3a0] ss:$16 sps:$4 sm:$0xff]   ;;  %v14428_v28 = vld [vmem:[%s20267_s1 + $0x6c] ss:$16 sps:$4 sm:$0xff]  }
  0x1f   :  { %5530 = vmatpush1.bf16.msra.mxu1 %v14367_v30  ;;  %v14405_v62 = vld [vmem:[%s20267_s1 + $0x1c4] ss:$16 sps:$4 sm:$0xff]   ;;  %v14409_v0 = vld [vmem:[%s20267_s1 + $0x1c0] ss:$16 sps:$4 sm:$0xff]  }
  0x20   :  { %5813 = vmatpush1.bf16.msra.mxu0 %v14368_v31  ;;  %5531 = vmatprep.subr.bf16.mxu1 %v14369_v32  ;;  %v14407_v63 = vld [vmem:[%s20267_s1 + $0x3c4] ss:$16 sps:$4 sm:$0xff]   ;;  %v14410_v1 = vld [vmem:[%s20267_s1 + $0x3c0] ss:$16 sps:$4 sm:$0xff]   ;;  %v70_v31 = vld [vmem:[%s20268_s0 + $0x188] sm:$0xff] }
  0x21   :  { %5814 = vmatprep.subr.bf16.mxu0 %v14371_v33  ;;  %v14411_v2 = vld [vmem:[%s20267_s1 + $0x1e4] ss:$16 sps:$4 sm:$0xff]   ;;  %v14415_v4 = vld [vmem:[%s20267_s1 + $0x1e0] ss:$16 sps:$4 sm:$0xff]   ;;  %v78_v32 = vld [vmem:[%s20268_s0 + $0x1c8] sm:$0xff] }
  0x22   :  { %v14413_v3 = vld [vmem:[%s20267_s1 + $0x3e4] ss:$16 sps:$4 sm:$0xff]   ;;  %v14416_v5 = vld [vmem:[%s20267_s1 + $0x3e0] ss:$16 sps:$4 sm:$0xff]   ;;  %v14426_v33 = vld [vmem:[%s20267_s1 + $0x68] ss:$16 sps:$4 sm:$0xff]  }
  0x23   :  { %5532 = vmatpush1.bf16.msra.mxu1 %v14373_v34  ;;  %v37_v7 = vld [vmem:[%s20268_s0 + $0x80] sm:$0xff]  ;;  %v14431_v34 = vld [vmem:[%s20267_s1 + $0x8c] ss:$16 sps:$4 sm:$0xff]  }
  0x24   :  { %5815 = vmatpush1.bf16.msra.mxu0 %v14374_v35  ;;  %5533 = vmatprep.subr.bf16.mxu1 %v14375_v36  ;;  %v45_v8 = vld [vmem:[%s20268_s0 + $0xc0] sm:$0xff]  ;;  %v15452_v36 = vcombine.low %v54_v20, %v62_v21  ;;  %v118_v20 = vld [vmem:[%s20268_s0 + $0x308] sm:$0xff] }
  0x25   :  { %5816 = vmatprep.subr.bf16.mxu0 %v14377_v37  ;;  %v15385_v14 = vcombine.high %v37_v7, %v45_v8  ;;  %v53_v18 = vld [vmem:[%s20268_s0 + $0x100] sm:$0xff]  ;;  %v15414_v23 = vcombine.low %v37_v7, %v45_v8  ;;  %v14441_v7 = vld [vmem:[%s20267_s1 + $0x108] ss:$16 sps:$4 sm:$0xff]  }
  0x26   :  { %v61_v19 = vld [vmem:[%s20268_s0 + $0x140] sm:$0xff]  ;;  %20482 = vst [vmem:[#allocation4_spill] sm:$0xff] %v15452_v36  ;;  %v126_v21 = vld [vmem:[%s20268_s0 + $0x348] sm:$0xff] }
  0x27   :  { %5534 = vmatpush1.bf16.msra.mxu1 %v14379_v38  ;;  %v15418_v25 = vcombine.high %v53_v18, %v61_v19  ;;  %v69_v29 = vld [vmem:[%s20268_s0 + $0x180] sm:$0xff]  ;;  %v15450_v35 = vcombine.low %v53_v18, %v61_v19  ;;  %v15456_v38 = vcombine.high %v70_v31, %v78_v32 }
  0x28   :  { %5817 = vmatpush1.bf16.msra.mxu0 %v14380_v39  ;;  %5535 = vmatprep.subr.bf16.mxu1 %v14381_v40  ;;  %v77_v30 = vld [vmem:[%s20268_s0 + $0x1c0] sm:$0xff]  ;;  %v14429_v39 = vld [vmem:[%s20267_s1 + $0x88] ss:$16 sps:$4 sm:$0xff]   ;;  %v14434_v40 = vld [vmem:[%s20267_s1 + $0xac] ss:$16 sps:$4 sm:$0xff]  }
  0x29   :  { %5818 = vmatprep.subr.bf16.mxu0 %v14383_v41  ;;  %v15454_v37 = vcombine.high %v69_v29, %v77_v30  ;;  %20483 = vst [vmem:[#allocation5_spill] sm:$0xff] %v15456_v38  ;;  %v14450_v41 = vld [vmem:[%s20267_s1 + $0x400] ss:$16 sps:$4 sm:$0xff]   ;;  %v14458_v48 = vld [vmem:[%s20267_s1 + $0x424] ss:$16 sps:$4 sm:$0xff]  }
  0x2a   :  { %v14456_v50 = vld [vmem:[%s20267_s1 + $0x420] ss:$16 sps:$4 sm:$0xff]   ;;  %v14473_v19 = vld [vmem:[%s20267_s1 + $0x4a4] ss:$16 sps:$4 sm:$0xff]  }
  0x2b   :  { %5536 = vmatpush1.bf16.msra.mxu1 %v14385_v42  ;;  %v14452_v42 = vld [vmem:[%s20267_s1 + $0x404] ss:$16 sps:$4 sm:$0xff]  }
  0x2c   :  { %5819 = vmatpush1.bf16.msra.mxu0 %v14386_v43  ;;  %5537 = vmatprep.subr.bf16.mxu1 %v14387_v44  ;;  %v85_v43 = vld [vmem:[%s20268_s0 + $0x200] sm:$0xff] }
  0x2d   :  { %5820 = vmatprep.subr.bf16.mxu0 %v14389_v45  ;;  %v93_v44 = vld [vmem:[%s20268_s0 + $0x240] sm:$0xff]  ;;  %v86_v45 = vld [vmem:[%s20268_s0 + $0x208] sm:$0xff] }
  0x2e   :  { %v125_v18 = vld [vmem:[%s20268_s0 + $0x340] sm:$0xff] }
  0x2f   :  { %5538 = vmatpush1.bf16.msra.mxu1 %v14391_v46  ;;  %v94_v46 = vld [vmem:[%s20268_s0 + $0x248] sm:$0xff] }
  0x30   :  { %5821 = vmatpush1.bf16.msra.mxu0 %v14392_v51  ;;  %5539 = vmatprep.subr.bf16.mxu1 %v14393_v53  ;;  %v15498_v51 = vcombine.low %v69_v29, %v77_v30  ;;  %v15500_v53 = vcombine.low %v70_v31, %v78_v32  ;;  %v14447_v31 = vld [vmem:[%s20267_s1 + $0x148] ss:$16 sps:$4 sm:$0xff]  }
  0x31   :  { %5822 = vmatprep.subr.bf16.mxu0 %v14395_v54  ;;  %v15502_v54 = vcombine.high %v85_v43, %v93_v44 }
  0x32   :  { %20484 = vst [vmem:[#allocation6_spill] sm:$0xff] %v15500_v53 }
  0x33   :  { %5540 = vmatpush1.bf16.msra.mxu1 %v14397_v56  ;;  %v15504_v56 = vcombine.high %v86_v45, %v94_v46 }
  0x34   :  { %5823 = vmatpush1.bf16.msra.mxu0 %v14398_v57  ;;  %5541 = vmatprep.subr.bf16.mxu1 %v14399_v58  ;;  %v14435_v57 = vld [vmem:[%s20267_s1 + $0xc8] ss:$16 sps:$4 sm:$0xff]   ;;  %v14461_v58 = vld [vmem:[%s20267_s1 + $0x444] ss:$16 sps:$4 sm:$0xff]  }
  0x35   :  { %5824 = vmatprep.subr.bf16.mxu0 %v14401_v59  ;;  %20485 = vst [vmem:[#allocation7_spill] sm:$0xff] %v15504_v56  ;;  %v14440_v59 = vld [vmem:[%s20267_s1 + $0xec] ss:$16 sps:$4 sm:$0xff]  }
  0x37   :  { %5542 = vmatpush1.bf16.msra.mxu1 %v14403_v60  ;;  %v14459_v60 = vld [vmem:[%s20267_s1 + $0x440] ss:$16 sps:$4 sm:$0xff]  }
  0x38   :  { %5825 = vmatpush1.bf16.msra.mxu0 %v14404_v61  ;;  %5543 = vmatprep.subr.bf16.mxu1 %v14405_v62  ;;  %v101_v61 = vld [vmem:[%s20268_s0 + $0x280] sm:$0xff] }
  0x39   :  { %5826 = vmatprep.subr.bf16.mxu0 %v14407_v63  ;;  %v109_v62 = vld [vmem:[%s20268_s0 + $0x2c0] sm:$0xff]  ;;  %v102_v63 = vld [vmem:[%s20268_s0 + $0x288] sm:$0xff] }
  0x3a   :  { %v15553_v8 = vcombine.high %v101_v61, %v109_v62  ;;  %v15594_v29 = vcombine.low %v101_v61, %v109_v62  ;;  %v14485_v61 = vld [vmem:[%s20267_s1 + $0x504] ss:$16 sps:$4 sm:$0xff]   ;;  %v14483_v62 = vld [vmem:[%s20267_s1 + $0x500] ss:$16 sps:$4 sm:$0xff]  }
  0x3b   :  { %5544 = vmatpush1.bf16.msra.mxu1 %v14409_v0  ;;  %v14464_v0 = vld [vmem:[%s20267_s1 + $0x464] ss:$16 sps:$4 sm:$0xff]  }
  0x3c   :  { %5827 = vmatpush1.bf16.msra.mxu0 %v14410_v1  ;;  %5545 = vmatprep.subr.bf16.mxu1 %v14411_v2  ;;  %v110_v1 = vld [vmem:[%s20268_s0 + $0x2c8] sm:$0xff] }
  0x3d   :  { %5828 = vmatprep.subr.bf16.mxu0 %v14413_v3  ;;  %v14438_v2 = vld [vmem:[%s20267_s1 + $0xe8] ss:$16 sps:$4 sm:$0xff]   ;;  %v14443_v3 = vld [vmem:[%s20267_s1 + $0x10c] ss:$16 sps:$4 sm:$0xff]   ;;  %v15555_v9 = vcombine.high %v102_v63, %v110_v1  ;;  %v15596_v30 = vcombine.low %v102_v63, %v110_v1  ;;  %v149_v63 = vld [vmem:[%s20268_s0 + $0x400] sm:$0xff] }
  0x3e   :  { %v150_v1 = vld [vmem:[%s20268_s0 + $0x408] sm:$0xff] }
  0x3f   :  { %5546 = vmatpush1.bf16.msra.mxu1 %v14415_v4  ;;  %v14462_v4 = vld [vmem:[%s20267_s1 + $0x460] ss:$16 sps:$4 sm:$0xff]   ;;  %20487 = vst [vmem:[#allocation9_spill] sm:$0xff] %v15555_v9  ;;  %20488 = vst [vmem:[#allocation10_spill] sm:$0xff] %v15596_v30 }
  0x40   :  { %5829 = vmatpush1.bf16.msra.mxu0 %v14416_v5  ;;  %7779 = vmatprep.subr.bf16.mxu1 %v14419_v6  ;;  %v15546_v5 = vcombine.low %v85_v43, %v93_v44  ;;  %v15548_v6 = vcombine.low %v86_v45, %v94_v46  ;;  %v14482_v43 = vld [vmem:[%s20267_s1 + $0x4e4] ss:$16 sps:$4 sm:$0xff]   ;;  %v134_v44 = vld [vmem:[%s20268_s0 + $0x388] sm:$0xff] }
  0x41   :  { %6081 = vmatprep.subr.bf16.mxu0 %v14452_v42  ;;  %v141_v42 = vld [vmem:[%s20268_s0 + $0x3c0] sm:$0xff]  ;;  %v142_v45 = vld [vmem:[%s20268_s0 + $0x3c8] sm:$0xff] }
  0x42   :  { %5548 = vmatmul.mubr.bf16.vlgmr.msra.gmra.mrb[0].mxu1 %v15378_v11  ;;  %20486 = vst [vmem:[#allocation8_spill] sm:$0xff] %v15548_v6  ;;  %v14453_v46 = vld [vmem:[%s20267_s1 + $0x168] ss:$16 sps:$4 sm:$0xff]  }
  0x43   :  { %5831 = vmatmul.mubr.bf16.vlgmr.msra.gmra.mrb[0].mxu0 %v15380_v12  ;;  %7780 = vmatpush1.bf16.msra.mxu1 %v14417_v13  ;;  %v14470_v13 = vld [vmem:[%s20267_s1 + $0x484] ss:$16 sps:$4 sm:$0xff]  }
  0x44   :  { %5557 = vmatprep.mubr.bf16.mxu1 %v15385_v14  ;;  %5840 = vmatprep.mubr.bf16.mxu0 %v15387_v15 }
  0x45   :  { %7781 = vmatprep.subr.bf16.mxu1 %v14422_v16  ;;  %6082 = vmatpush1.bf16.msra.mxu0 %v14450_v41  ;;  %v14468_v16 = vld [vmem:[%s20267_s1 + $0x480] ss:$16 sps:$4 sm:$0xff]  }
  0x46   :  { %6083 = vmatprep.subr.bf16.mxu0 %v14458_v48  ;;  %v133_v41 = vld [vmem:[%s20268_s0 + $0x380] sm:$0xff] }
  0x47   :  { %7782 = vmatpush1.bf16.msra.mxu1 %v14420_v17  ;;  %v117_v17 = vld [vmem:[%s20268_s0 + $0x300] sm:$0xff] }
  0x48   :  { %7783 = vmatprep.subr.bf16.mxu1 %v14425_v22  ;;  %v14444_v22 = vld [vmem:[%s20267_s1 + $0x128] ss:$16 sps:$4 sm:$0xff]   ;;  %v15601_v32 = vcombine.high %v117_v17, %v125_v18  ;;  %v14480_v48 = vld [vmem:[%s20267_s1 + $0x4e0] ss:$16 sps:$4 sm:$0xff]  }
  0x49   :  { %6084 = vmatpush1.bf16.msra.mxu0 %v14456_v50  ;;  %v15644_v50 = vcombine.low %v118_v20, %v126_v21 }
  0x4a   :  { %5558 = vmatmul.mubr.bf16.gmra.mrb[4].mxu1 %v15414_v23  ;;  %6085 = vmatprep.subr.bf16.mxu0 %v14461_v58  ;;  %v15649_v58 = vcombine.high %v133_v41, %v141_v42 }
  0x4b   :  { %5841 = vmatmul.mubr.bf16.gmra.mrb[4].mxu0 %v15416_v24  ;;  %5567 = vmatprep.mubr.bf16.mxu1 %v15418_v25  ;;  %20490 = vst [vmem:[#allocation12_spill] sm:$0xff] %v15644_v50  ;;  %v23_v24 = vld [vmem:[%s20268_s0 + $0x10] sm:$0xff] }
  0x4c   :  { %5850 = vmatprep.mubr.bf16.mxu0 %v15420_v26  ;;  %7784 = vmatpush1.bf16.msra.mxu1 %v14423_v27  ;;  %v14449_v27 = vld [vmem:[%s20267_s1 + $0x14c] ss:$16 sps:$4 sm:$0xff]  }
  0x4d   :  { %7785 = vmatprep.subr.bf16.mxu1 %v14428_v28  ;;  %6086 = vmatpush1.bf16.msra.mxu0 %v14459_v60  ;;  %v14471_v28 = vld [vmem:[%s20267_s1 + $0x4a0] ss:$16 sps:$4 sm:$0xff]   ;;  %v14479_v60 = vld [vmem:[%s20267_s1 + $0x1ac] ss:$16 sps:$4 sm:$0xff]  }
  0x4e   :  { %6087 = vmatprep.subr.bf16.mxu0 %v14464_v0  ;;  %v157_v0 = vld [vmem:[%s20268_s0 + $0x440] sm:$0xff] }
  0x50   :  { %7786 = vmatpush1.bf16.msra.mxu1 %v14426_v33  ;;  %v15603_v33 = vcombine.high %v118_v20, %v126_v21  ;;  %v14494_v20 = vld [vmem:[%s20267_s1 + $0x544] ss:$16 sps:$4 sm:$0xff]   ;;  %v14492_v21 = vld [vmem:[%s20267_s1 + $0x540] ss:$16 sps:$4 sm:$0xff]  }
  0x51   :  { %7787 = vmatprep.subr.bf16.mxu1 %v14431_v34  ;;  %6088 = vmatpush1.bf16.msra.mxu0 %v14462_v4  ;;  %v14455_v34 = vld [vmem:[%s20267_s1 + $0x16c] ss:$16 sps:$4 sm:$0xff]   ;;  %v14477_v4 = vld [vmem:[%s20267_s1 + $0x1a8] ss:$16 sps:$4 sm:$0xff]  }
  0x52   :  { %5568 = vmatmul.mubr.bf16.gmra.mrb[8].mxu1 %v15450_v35  ;;  %6089 = vmatprep.subr.bf16.mxu0 %v14470_v13  ;;  %20489 = vst [vmem:[#allocation11_spill] sm:$0xff] %v15603_v33  ;;  %v15690_v13 = vcombine.low %v133_v41, %v141_v42  ;;  %v14504_v41 = vld [vmem:[%s20267_s1 + $0x1e8] ss:$16 sps:$4 sm:$0xff]   ;;  %v15735_v42 = vcombine.low %v149_v63, %v157_v0 }
  0x53   :  { %5851 = vmatmul.mubr.bf16.gmra.mrb[8].mxu0 %v15452_v36  ;;  %5577 = vmatprep.mubr.bf16.mxu1 %v15454_v37  ;;  %v405_v36 = vld [vmem:[%s20268_s0 + $0xc00] sm:$0xff] }
  0x54   :  { %5860 = vmatprep.mubr.bf16.mxu0 %v15456_v38  ;;  %7788 = vmatpush1.bf16.msra.mxu1 %v14429_v39  ;;  %v14476_v39 = vld [vmem:[%s20267_s1 + $0x4c4] ss:$16 sps:$4 sm:$0xff]  }
  0x55   :  { %7789 = vmatprep.subr.bf16.mxu1 %v14434_v40  ;;  %6090 = vmatpush1.bf16.msra.mxu0 %v14468_v16  ;;  %v14474_v40 = vld [vmem:[%s20267_s1 + $0x4c0] ss:$16 sps:$4 sm:$0xff]   ;;  %v15692_v16 = vcombine.low %v134_v44, %v142_v45 }
  0x56   :  { %6091 = vmatprep.subr.bf16.mxu0 %v14473_v19 }
  0x57   :  { %20492 = vst [vmem:[#allocation14_spill] sm:$0xff] %v15692_v16 }
  0x58   :  { %7790 = vmatpush1.bf16.msra.mxu1 %v14432_v47  ;;  %v14467_v47 = vld [vmem:[%s20267_s1 + $0x18c] ss:$16 sps:$4 sm:$0xff]  }
  0x59   :  { %7791 = vmatprep.subr.bf16.mxu1 %v14437_v49  ;;  %6092 = vmatpush1.bf16.msra.mxu0 %v14471_v28  ;;  %v15642_v49 = vcombine.low %v117_v17, %v125_v18  ;;  %v14489_v17 = vld [vmem:[%s20267_s1 + $0x1c8] ss:$16 sps:$4 sm:$0xff]   ;;  %v15697_v18 = vcombine.high %v149_v63, %v157_v0  ;;  %v14497_v28 = vld [vmem:[%s20267_s1 + $0x564] ss:$16 sps:$4 sm:$0xff]   ;;  %v14501_v63 = vld [vmem:[%s20267_s1 + $0x5a0] ss:$16 sps:$4 sm:$0xff]  }
  0x5a   :  { %5578 = vmatmul.mubr.bf16.gmra.mrb[12].mxu1 %v15498_v51  ;;  %6093 = vmatprep.subr.bf16.mxu0 %v14476_v39  ;;  %v14506_v39 = vld [vmem:[%s20267_s1 + $0x1ec] ss:$16 sps:$4 sm:$0xff]  }
  0x5b   :  { %5861 = vmatmul.mubr.bf16.gmra.mrb[12].mxu0 %v15500_v53  ;;  %5587 = vmatprep.mubr.bf16.mxu1 %v15502_v54  ;;  %v389_v53 = vld [vmem:[%s20268_s0 + $0xb80] sm:$0xff] }
  0x5c   :  { %5870 = vmatprep.mubr.bf16.mxu0 %v15504_v56  ;;  %7792 = vmatpush1.bf16.msra.mxu1 %v14435_v57  ;;  %v14465_v57 = vld [vmem:[%s20267_s1 + $0x188] ss:$16 sps:$4 sm:$0xff]  }
  0x5d   :  { %7793 = vmatprep.subr.bf16.mxu1 %v14440_v59  ;;  %6094 = vmatpush1.bf16.msra.mxu0 %v14474_v40  ;;  %v15651_v59 = vcombine.high %v134_v44, %v142_v45  ;;  %v14495_v40 = vld [vmem:[%s20267_s1 + $0x560] ss:$16 sps:$4 sm:$0xff]  }
  0x5e   :  { %6095 = vmatprep.subr.bf16.mxu0 %v14482_v43 }
  0x5f   :  { %20491 = vst [vmem:[#allocation13_spill] sm:$0xff] %v15651_v59 }
  0x60   :  { %7794 = vmatpush1.bf16.msra.mxu1 %v14438_v2  ;;  %v158_v2 = vld [vmem:[%s20268_s0 + $0x448] sm:$0xff] }
  0x61   :  { %7795 = vmatprep.subr.bf16.mxu1 %v14443_v3  ;;  %6096 = vmatpush1.bf16.msra.mxu0 %v14480_v48  ;;  %v14488_v3 = vld [vmem:[%s20267_s1 + $0x524] ss:$16 sps:$4 sm:$0xff]   ;;  %v15699_v19 = vcombine.high %v150_v1, %v158_v2  ;;  %v15737_v43 = vcombine.low %v150_v1, %v158_v2 }
  0x62   :  { %5588 = vmatmul.mubr.bf16.gmra.mrb[16].mxu1 %v15546_v5  ;;  %6097 = vmatprep.subr.bf16.mxu0 %v14485_v61  ;;  %v181_v48 = vld [vmem:[%s20268_s0 + $0x500] sm:$0xff]  ;;  %v190_v61 = vld [vmem:[%s20268_s0 + $0x548] sm:$0xff] }
  0x63   :  { %5871 = vmatmul.mubr.bf16.gmra.mrb[16].mxu0 %v15548_v6  ;;  %5597 = vmatprep.mubr.bf16.mxu1 %v15553_v8  ;;  %20493 = vst [vmem:[#allocation15_spill] sm:$0xff] %v15699_v19  ;;  %20494 = vst [vmem:[#allocation16_spill] sm:$0xff] %v15737_v43  ;;  %v14509_v2 = vld [vmem:[%s20267_s1 + $0x5c4] ss:$16 sps:$4 sm:$0xff]  }
  0x64   :  { %5880 = vmatprep.mubr.bf16.mxu0 %v15555_v9  ;;  %7796 = vmatpush1.bf16.msra.mxu1 %v14441_v7  ;;  %v14486_v7 = vld [vmem:[%s20267_s1 + $0x520] ss:$16 sps:$4 sm:$0xff]  }
  0x65   :  { %7797 = vmatprep.subr.bf16.mxu1 %v14446_v10  ;;  %v14491_v10 = vld [vmem:[%s20267_s1 + $0x1cc] ss:$16 sps:$4 sm:$0xff]   ;;  %6098 = vmatpush1.bf16.msra.mxu0 %v14483_v62  ;;  %v14503_v62 = vld [vmem:[%s20267_s1 + $0x5a4] ss:$16 sps:$4 sm:$0xff]  }
  0x66   :  { %6099 = vmatprep.subr.bf16.mxu0 %v14488_v3  ;;  %v373_v6 = vld [vmem:[%s20268_s0 + $0xb00] sm:$0xff] }
  0x68   :  { %7798 = vmatpush1.bf16.msra.mxu1 %v14444_v22  ;;  %v165_v22 = vld [vmem:[%s20268_s0 + $0x480] sm:$0xff] }
  0x69   :  { %7799 = vmatprep.subr.bf16.mxu1 %v14449_v27  ;;  %6100 = vmatpush1.bf16.msra.mxu0 %v14486_v7  ;;  %v173_v27 = vld [vmem:[%s20268_s0 + $0x4c0] sm:$0xff] }
  0x6a   :  { %5598 = vmatmul.mubr.bf16.gmra.mrb[20].mxu1 %v15594_v29  ;;  %6101 = vmatprep.subr.bf16.mxu0 %v14494_v20  ;;  %v15739_v44 = vcombine.high %v165_v22, %v173_v27  ;;  %v15771_v0 = vcombine.low %v165_v22, %v173_v27  ;;  %v14507_v7 = vld [vmem:[%s20267_s1 + $0x5c0] ss:$16 sps:$4 sm:$0xff]   ;;  %v198_v20 = vld [vmem:[%s20268_s0 + $0x588] sm:$0xff] }
  0x6b   :  { %5881 = vmatmul.mubr.bf16.gmra.mrb[20].mxu0 %v15596_v30  ;;  %5607 = vmatprep.mubr.bf16.mxu1 %v15601_v32  ;;  %v14515_v22 = vld [vmem:[%s20267_s1 + $0x20c] ss:$16 sps:$4 sm:$0xff]   ;;  %v357_v30 = vld [vmem:[%s20268_s0 + $0xa80] sm:$0xff] }
  0x6c   :  { %5890 = vmatprep.mubr.bf16.mxu0 %v15603_v33  ;;  %7800 = vmatpush1.bf16.msra.mxu1 %v14447_v31  ;;  %v166_v31 = vld [vmem:[%s20268_s0 + $0x488] sm:$0xff] }
  0x6d   :  { %7801 = vmatprep.subr.bf16.mxu1 %v14455_v34  ;;  %v174_v34 = vld [vmem:[%s20268_s0 + $0x4c8] sm:$0xff]  ;;  %6102 = vmatpush1.bf16.msra.mxu0 %v14492_v21  ;;  %v14512_v21 = vld [vmem:[%s20267_s1 + $0x5e4] ss:$16 sps:$4 sm:$0xff]  }
  0x6e   :  { %6103 = vmatprep.subr.bf16.mxu0 %v14497_v28  ;;  %v15741_v45 = vcombine.high %v166_v31, %v174_v34  ;;  %v15773_v1 = vcombine.low %v166_v31, %v174_v34  ;;  %v206_v27 = vld [vmem:[%s20268_s0 + $0x5c8] sm:$0xff]  ;;  %v14510_v28 = vld [vmem:[%s20267_s1 + $0x5e0] ss:$16 sps:$4 sm:$0xff]  }
  0x70   :  { %7802 = vmatpush1.bf16.msra.mxu1 %v14453_v46  ;;  %20495 = vst [vmem:[#allocation17_spill] sm:$0xff] %v15741_v45  ;;  %v14500_v46 = vld [vmem:[%s20267_s1 + $0x584] ss:$16 sps:$4 sm:$0xff]   ;;  %20496 = vst [vmem:[#allocation18_spill] sm:$0xff] %v15773_v1 }
  0x71   :  { %7803 = vmatprep.subr.bf16.mxu1 %v14467_v47  ;;  %6104 = vmatpush1.bf16.msra.mxu0 %v14495_v40  ;;  %v14498_v47 = vld [vmem:[%s20267_s1 + $0x580] ss:$16 sps:$4 sm:$0xff]   ;;  %v15816_v40 = vcombine.high %v198_v20, %v206_v27 }
  0x72   :  { %5608 = vmatmul.mubr.bf16.gmra.mrb[24].mxu1 %v15642_v49  ;;  %6105 = vmatprep.subr.bf16.mxu0 %v14500_v46  ;;  %v221_v46 = vld [vmem:[%s20268_s0 + $0x640] sm:$0xff] }
  0x73   :  { %5891 = vmatmul.mubr.bf16.gmra.mrb[24].mxu0 %v15644_v50  ;;  %5617 = vmatprep.mubr.bf16.mxu1 %v15649_v58  ;;  %20499 = vst [vmem:[#allocation21_spill] sm:$0xff] %v15816_v40  ;;  %v341_v50 = vld [vmem:[%s20268_s0 + $0xa00] sm:$0xff] }
  0x74   :  { %5900 = vmatprep.mubr.bf16.mxu0 %v15651_v59  ;;  %7804 = vmatpush1.bf16.msra.mxu1 %v14465_v57  ;;  %v189_v57 = vld [vmem:[%s20268_s0 + $0x540] sm:$0xff] }
  0x75   :  { %7805 = vmatprep.subr.bf16.mxu1 %v14479_v60  ;;  %v182_v60 = vld [vmem:[%s20268_s0 + $0x508] sm:$0xff]  ;;  %6106 = vmatpush1.bf16.msra.mxu0 %v14498_v47  ;;  %v15778_v3 = vcombine.high %v181_v48, %v189_v57  ;;  %v15810_v31 = vcombine.low %v181_v48, %v189_v57 }
  0x76   :  { %6107 = vmatprep.subr.bf16.mxu0 %v14503_v62  ;;  %v15812_v34 = vcombine.low %v182_v60, %v190_v61  ;;  %v214_v47 = vld [vmem:[%s20268_s0 + $0x608] sm:$0xff] }
  0x77   :  { %v222_v48 = vld [vmem:[%s20268_s0 + $0x648] sm:$0xff] }
  0x78   :  { %7806 = vmatpush1.bf16.msra.mxu1 %v14477_v4  ;;  %v15780_v4 = vcombine.high %v182_v60, %v190_v61  ;;  %20498 = vst [vmem:[#allocation20_spill] sm:$0xff] %v15812_v34  ;;  %v15836_v60 = vcombine.low %v198_v20, %v206_v27  ;;  %v15840_v62 = vcombine.high %v214_v47, %v222_v48  ;;  %v245_v27 = vld [vmem:[%s20268_s0 + $0x700] sm:$0xff] }
  0x79   :  { %7807 = vmatprep.subr.bf16.mxu1 %v14491_v10  ;;  %6108 = vmatpush1.bf16.msra.mxu0 %v14501_v63  ;;  %v197_v10 = vld [vmem:[%s20268_s0 + $0x580] sm:$0xff]  ;;  %v15860_v20 = vcombine.low %v214_v47, %v222_v48 }
  0x7a   :  { %5618 = vmatmul.mubr.bf16.gmra.mrb[28].mxu1 %v15690_v13  ;;  %20497 = vst [vmem:[#allocation19_spill] sm:$0xff] %v15780_v4  ;;  %6109 = vmatprep.subr.bf16.mxu0 %v14509_v2  ;;  %20500 = vst [vmem:[#allocation22_spill] sm:$0xff] %v15836_v60  ;;  %v229_v63 = vld [vmem:[%s20268_s0 + $0x680] sm:$0xff] }
  0x7b   :  { %5901 = vmatmul.mubr.bf16.gmra.mrb[28].mxu0 %v15692_v16  ;;  %5627 = vmatprep.mubr.bf16.mxu1 %v15697_v18  ;;  %20501 = vst [vmem:[#allocation23_spill] sm:$0xff] %v15840_v62  ;;  %v237_v2 = vld [vmem:[%s20268_s0 + $0x6c0] sm:$0xff]  ;;  %20502 = vst [vmem:[#allocation24_spill] sm:$0xff] %v15860_v20 }
  0x7c   :  { %5910 = vmatprep.mubr.bf16.mxu0 %v15699_v19  ;;  %7808 = vmatpush1.bf16.msra.mxu1 %v14489_v17  ;;  %v205_v17 = vld [vmem:[%s20268_s0 + $0x5c0] sm:$0xff]  ;;  %v15882_v47 = vcombine.low %v229_v63, %v237_v2 }
  0x7d   :  { %7809 = vmatprep.subr.bf16.mxu1 %v14506_v39  ;;  %6110 = vmatpush1.bf16.msra.mxu0 %v14507_v7  ;;  %v15814_v39 = vcombine.high %v197_v10, %v205_v17  ;;  %v15834_v57 = vcombine.low %v197_v10, %v205_v17  ;;  %v230_v7 = vld [vmem:[%s20268_s0 + $0x688] sm:$0xff]  ;;  %v325_v16 = vld [vmem:[%s20268_s0 + $0x980] sm:$0xff] }
  0x7e   :  { %6111 = vmatprep.subr.bf16.mxu0 %v14512_v21  ;;  %v238_v10 = vld [vmem:[%s20268_s0 + $0x6c8] sm:$0xff]  ;;  %v15862_v21 = vcombine.high %v229_v63, %v237_v2 }
  0x7f   :  { %v15884_v48 = vcombine.low %v230_v7, %v238_v10  ;;  %v262_v63 = vld [vmem:[%s20268_s0 + $0x788] sm:$0xff] }
  0x80   :  { %7810 = vmatpush1.bf16.msra.mxu1 %v14504_v41  ;;  %v213_v41 = vld [vmem:[%s20268_s0 + $0x600] sm:$0xff]  ;;  %v270_v2 = vld [vmem:[%s20268_s0 + $0x7c8] sm:$0xff] }
  0x81   :  { %8062 = vmatprep.subr.bf16.mxu1 %v14515_v22  ;;  %6112 = vmatpush1.bf16.msra.mxu0 %v14510_v28  ;;  %v15838_v61 = vcombine.high %v213_v41, %v221_v46  ;;  %v15858_v17 = vcombine.low %v213_v41, %v221_v46  ;;  %v15864_v22 = vcombine.high %v230_v7, %v238_v10  ;;  %v253_v28 = vld [vmem:[%s20268_s0 + $0x740] sm:$0xff]  ;;  %v246_v41 = vld [vmem:[%s20268_s0 + $0x708] sm:$0xff] }
  0x82   :  { %5628 = vmatmul.mubr.bf16.gmra.mrb[32].mxu1 %v15735_v42  ;;  %v254_v46 = vld [vmem:[%s20268_s0 + $0x748] sm:$0xff]  ;;  %20504 = vst [vmem:[#allocation26_spill] sm:$0xff] %v15884_v48  ;;  %v15906_v7 = vcombine.low %v245_v27, %v253_v28 }
  0x83   :  { %5911 = vmatmul.mubr.bf16.gmra.mrb[32].mxu0 %v15737_v43  ;;  %5637 = vmatprep.mubr.bf16.mxu1 %v15739_v44  ;;  %20503 = vst [vmem:[#allocation25_spill] sm:$0xff] %v15864_v22  ;;  %v15908_v10 = vcombine.low %v246_v41, %v254_v46  ;;  %v309_v43 = vld [vmem:[%s20268_s0 + $0x900] sm:$0xff] }
  0x84   :  { %5920 = vmatprep.mubr.bf16.mxu0 %v15741_v45 }
  0x85   :  { %20506 = vst [vmem:[#allocation28_spill] sm:$0xff] %v15908_v10 }
  0x8a   :  { %5638 = vmatmul.mubr.bf16.gmra.mrb[36].mxu1 %v15771_v0 }
  0x8b   :  { %5921 = vmatmul.mubr.bf16.gmra.mrb[36].mxu0 %v15773_v1  ;;  %5647 = vmatprep.mubr.bf16.mxu1 %v15778_v3  ;;  %v293_v1 = vld [vmem:[%s20268_s0 + $0x880] sm:$0xff] }
  0x8c   :  { %5930 = vmatprep.mubr.bf16.mxu0 %v15780_v4 }
  0x92   :  { %5648 = vmatmul.mubr.bf16.gmra.mrb[40].mxu1 %v15810_v31 }
  0x93   :  { %5931 = vmatmul.mubr.bf16.gmra.mrb[40].mxu0 %v15812_v34  ;;  %5657 = vmatprep.mubr.bf16.mxu1 %v15814_v39  ;;  %v277_v34 = vld [vmem:[%s20268_s0 + $0x800] sm:$0xff] }
  0x94   :  { %5940 = vmatprep.mubr.bf16.mxu0 %v15816_v40  ;;  %v15912_v40 = vcombine.high %v262_v63, %v270_v2 }
  0x96   :  { %20507 = vst [vmem:[#allocation29_spill] sm:$0xff] %v15912_v40 }
  0x9a   :  { %5658 = vmatmul.mubr.bf16.gmra.mrb[44].mxu1 %v15834_v57 }
  0x9b   :  { %5941 = vmatmul.mubr.bf16.gmra.mrb[44].mxu0 %v15836_v60  ;;  %5667 = vmatprep.mubr.bf16.mxu1 %v15838_v61  ;;  %v261_v60 = vld [vmem:[%s20268_s0 + $0x780] sm:$0xff] }
  0x9c   :  { %5950 = vmatprep.mubr.bf16.mxu0 %v15840_v62  ;;  %v15888_v62 = vcombine.high %v246_v41, %v254_v46  ;;  %v15932_v46 = vcombine.low %v262_v63, %v270_v2 }
  0x9e   :  { %20505 = vst [vmem:[#allocation27_spill] sm:$0xff] %v15888_v62  ;;  %20508 = vst [vmem:[#allocation30_spill] sm:$0xff] %v15932_v46 }
  0xa2   :  { %5668 = vmatmul.mubr.bf16.gmra.mrb[48].mxu1 %v15858_v17 }
  0xa3   :  { %5951 = vmatmul.mubr.bf16.gmra.mrb[48].mxu0 %v15860_v20  ;;  %5677 = vmatprep.mubr.bf16.mxu1 %v15862_v21  ;;  %v15886_v20 = vcombine.high %v245_v27, %v253_v28  ;;  %v278_v27 = vld [vmem:[%s20268_s0 + $0x808] sm:$0xff] }
  0xa4   :  { %5960 = vmatprep.mubr.bf16.mxu0 %v15864_v22  ;;  %v269_v22 = vld [vmem:[%s20268_s0 + $0x7c0] sm:$0xff]  ;;  %v286_v28 = vld [vmem:[%s20268_s0 + $0x848] sm:$0xff] }
  0xa5   :  { %v15930_v41 = vcombine.low %v261_v60, %v269_v22  ;;  %v15936_v4 = vcombine.high %v278_v27, %v286_v28  ;;  %v15956_v2 = vcombine.low %v278_v27, %v286_v28 }
  0xa7   :  { %20509 = vst [vmem:[#allocation31_spill] sm:$0xff] %v15936_v4  ;;  %20510 = vst [vmem:[#allocation32_spill] sm:$0xff] %v15956_v2 }
  0xaa   :  { %5678 = vmatmul.mubr.bf16.gmra.mrb[52].mxu1 %v15882_v47 }
  0xab   :  { %5961 = vmatmul.mubr.bf16.gmra.mrb[52].mxu0 %v15884_v48  ;;  %5687 = vmatprep.mubr.bf16.mxu1 %v15886_v20  ;;  %v15910_v48 = vcombine.high %v261_v60, %v269_v22  ;;  %v294_v60 = vld [vmem:[%s20268_s0 + $0x888] sm:$0xff] }
  0xac   :  { %5970 = vmatprep.mubr.bf16.mxu0 %v15888_v62  ;;  %v285_v62 = vld [vmem:[%s20268_s0 + $0x840] sm:$0xff]  ;;  %v302_v22 = vld [vmem:[%s20268_s0 + $0x8c8] sm:$0xff] }
  0xad   :  { %v15954_v63 = vcombine.low %v277_v34, %v285_v62  ;;  %v15960_v45 = vcombine.high %v294_v60, %v302_v22  ;;  %v15980_v28 = vcombine.low %v294_v60, %v302_v22 }
  0xaf   :  { %20511 = vst [vmem:[#allocation33_spill] sm:$0xff] %v15960_v45  ;;  %20512 = vst [vmem:[#allocation34_spill] sm:$0xff] %v15980_v28 }
  0xb2   :  { %5688 = vmatmul.mubr.bf16.gmra.mrb[56].mxu1 %v15906_v7 }
  0xb3   :  { %5971 = vmatmul.mubr.bf16.gmra.mrb[56].mxu0 %v15908_v10  ;;  %5697 = vmatprep.mubr.bf16.mxu1 %v15910_v48  ;;  %v15934_v10 = vcombine.high %v277_v34, %v285_v62  ;;  %v310_v34 = vld [vmem:[%s20268_s0 + $0x908] sm:$0xff] }
  0xb4   :  { %5980 = vmatprep.mubr.bf16.mxu0 %v15912_v40  ;;  %v301_v40 = vld [vmem:[%s20268_s0 + $0x8c0] sm:$0xff]  ;;  %v318_v62 = vld [vmem:[%s20268_s0 + $0x948] sm:$0xff] }
  0xb5   :  { %v15978_v27 = vcombine.low %v293_v1, %v301_v40  ;;  %v15984_v19 = vcombine.high %v310_v34, %v318_v62  ;;  %v16004_v22 = vcombine.low %v310_v34, %v318_v62 }
  0xb7   :  { %20513 = vst [vmem:[#allocation35_spill] sm:$0xff] %v15984_v19  ;;  %20514 = vst [vmem:[#allocation36_spill] sm:$0xff] %v16004_v22 }
  0xba   :  { %5698 = vmatmul.mubr.bf16.gmra.mrb[60].mxu1 %v15930_v41 }
  0xbb   :  { %5981 = vmatmul.mubr.bf16.gmra.mrb[60].mxu0 %v15932_v46  ;;  %5707 = vmatprep.mubr.bf16.mxu1 %v15934_v10  ;;  %v15958_v46 = vcombine.high %v293_v1, %v301_v40  ;;  %v326_v1 = vld [vmem:[%s20268_s0 + $0x988] sm:$0xff] }
  0xbc   :  { %5990 = vmatprep.mubr.bf16.mxu0 %v15936_v4  ;;  %v317_v4 = vld [vmem:[%s20268_s0 + $0x940] sm:$0xff]  ;;  %v334_v40 = vld [vmem:[%s20268_s0 + $0x9c8] sm:$0xff] }
  0xbd   :  { %v16002_v60 = vcombine.low %v309_v43, %v317_v4  ;;  %v16008_v59 = vcombine.high %v326_v1, %v334_v40  ;;  %v16028_v62 = vcombine.low %v326_v1, %v334_v40 }
  0xbf   :  { %20515 = vst [vmem:[#allocation37_spill] sm:$0xff] %v16008_v59  ;;  %20516 = vst [vmem:[#allocation38_spill] sm:$0xff] %v16028_v62 }
  0xc2   :  { %5708 = vmatmul.mubr.bf16.gmra.mrb[64].mxu1 %v15954_v63 }
  0xc3   :  { %5991 = vmatmul.mubr.bf16.gmra.mrb[64].mxu0 %v15956_v2  ;;  %5717 = vmatprep.mubr.bf16.mxu1 %v15958_v46  ;;  %v15982_v2 = vcombine.high %v309_v43, %v317_v4  ;;  %v342_v43 = vld [vmem:[%s20268_s0 + $0xa08] sm:$0xff] }
  0xc4   :  { %6000 = vmatprep.mubr.bf16.mxu0 %v15960_v45  ;;  %v333_v45 = vld [vmem:[%s20268_s0 + $0x9c0] sm:$0xff]  ;;  %v350_v4 = vld [vmem:[%s20268_s0 + $0xa48] sm:$0xff] }
  0xc5   :  { %v16026_v34 = vcombine.low %v325_v16, %v333_v45  ;;  %v16032_v33 = vcombine.high %v342_v43, %v350_v4  ;;  %v16052_v40 = vcombine.low %v342_v43, %v350_v4 }
  0xc7   :  { %20517 = vst [vmem:[#allocation39_spill] sm:$0xff] %v16032_v33  ;;  %20518 = vst [vmem:[#allocation40_spill] sm:$0xff] %v16052_v40 }
  0xca   :  { %5718 = vmatmul.mubr.bf16.gmra.mrb[68].mxu1 %v15978_v27 }
  0xcb   :  { %6001 = vmatmul.mubr.bf16.gmra.mrb[68].mxu0 %v15980_v28  ;;  %5727 = vmatprep.mubr.bf16.mxu1 %v15982_v2  ;;  %v16006_v28 = vcombine.high %v325_v16, %v333_v45  ;;  %v358_v16 = vld [vmem:[%s20268_s0 + $0xa88] sm:$0xff] }
  0xcc   :  { %6010 = vmatprep.mubr.bf16.mxu0 %v15984_v19  ;;  %v349_v19 = vld [vmem:[%s20268_s0 + $0xa40] sm:$0xff]  ;;  %v366_v45 = vld [vmem:[%s20268_s0 + $0xac8] sm:$0xff] }
  0xcd   :  { %v16050_v1 = vcombine.low %v341_v50, %v349_v19  ;;  %v16056_v9 = vcombine.high %v358_v16, %v366_v45  ;;  %v16076_v4 = vcombine.low %v358_v16, %v366_v45 }
  0xcf   :  { %20519 = vst [vmem:[#allocation41_spill] sm:$0xff] %v16056_v9  ;;  %20520 = vst [vmem:[#allocation42_spill] sm:$0xff] %v16076_v4 }
  0xd2   :  { %5728 = vmatmul.mubr.bf16.gmra.mrb[72].mxu1 %v16002_v60 }
  0xd3   :  { %6011 = vmatmul.mubr.bf16.gmra.mrb[72].mxu0 %v16004_v22  ;;  %5737 = vmatprep.mubr.bf16.mxu1 %v16006_v28  ;;  %v16030_v22 = vcombine.high %v341_v50, %v349_v19  ;;  %v374_v50 = vld [vmem:[%s20268_s0 + $0xb08] sm:$0xff] }
  0xd4   :  { %6020 = vmatprep.mubr.bf16.mxu0 %v16008_v59  ;;  %v365_v59 = vld [vmem:[%s20268_s0 + $0xac0] sm:$0xff]  ;;  %v382_v19 = vld [vmem:[%s20268_s0 + $0xb48] sm:$0xff] }
  0xd5   :  { %v16074_v43 = vcombine.low %v357_v30, %v365_v59  ;;  %v16080_v56 = vcombine.high %v374_v50, %v382_v19  ;;  %v16100_v45 = vcombine.low %v374_v50, %v382_v19 }
  0xd7   :  { %20521 = vst [vmem:[#allocation43_spill] sm:$0xff] %v16080_v56  ;;  %20522 = vst [vmem:[#allocation44_spill] sm:$0xff] %v16100_v45 }
  0xda   :  { %5738 = vmatmul.mubr.bf16.gmra.mrb[76].mxu1 %v16026_v34 }
  0xdb   :  { %6021 = vmatmul.mubr.bf16.gmra.mrb[76].mxu0 %v16028_v62  ;;  %5747 = vmatprep.mubr.bf16.mxu1 %v16030_v22  ;;  %v16054_v62 = vcombine.high %v357_v30, %v365_v59  ;;  %v390_v30 = vld [vmem:[%s20268_s0 + $0xb88] sm:$0xff] }
  0xdc   :  { %6030 = vmatprep.mubr.bf16.mxu0 %v16032_v33  ;;  %v381_v33 = vld [vmem:[%s20268_s0 + $0xb40] sm:$0xff]  ;;  %v398_v59 = vld [vmem:[%s20268_s0 + $0xbc8] sm:$0xff] }
  0xdd   :  { %v16098_v16 = vcombine.low %v373_v6, %v381_v33  ;;  %v16104_v38 = vcombine.high %v390_v30, %v398_v59  ;;  %v16124_v19 = vcombine.low %v390_v30, %v398_v59  ;;  %v39_v59 = vld [vmem:[%s20268_s0 + $0x90] sm:$0xff] }
  0xdf   :  { %20523 = vst [vmem:[#allocation45_spill] sm:$0xff] %v16104_v38  ;;  %20524 = vst [vmem:[#allocation46_spill] sm:$0xff] %v16124_v19 }
  0xe2   :  { %5748 = vmatmul.mubr.bf16.gmra.mrb[80].mxu1 %v16050_v1 }
  0xe3   :  { %6031 = vmatmul.mubr.bf16.gmra.mrb[80].mxu0 %v16052_v40  ;;  %5757 = vmatprep.mubr.bf16.mxu1 %v16054_v62  ;;  %v16078_v40 = vcombine.high %v373_v6, %v381_v33  ;;  %v406_v6 = vld [vmem:[%s20268_s0 + $0xc08] sm:$0xff] }
  0xe4   :  { %6040 = vmatprep.mubr.bf16.mxu0 %v16056_v9  ;;  %v397_v9 = vld [vmem:[%s20268_s0 + $0xbc0] sm:$0xff]  ;;  %v414_v33 = vld [vmem:[%s20268_s0 + $0xc48] sm:$0xff] }
  0xe5   :  { %v16122_v50 = vcombine.low %v389_v53, %v397_v9  ;;  %v16128_v26 = vcombine.high %v406_v6, %v414_v33 }
  0xea   :  { %5758 = vmatmul.mubr.bf16.gmra.mrb[84].mxu1 %v16074_v43 }
  0xeb   :  { %6041 = vmatmul.mubr.bf16.gmra.mrb[84].mxu0 %v16076_v4  ;;  %5767 = vmatprep.mubr.bf16.mxu1 %v16078_v40  ;;  %v16102_v4 = vcombine.high %v389_v53, %v397_v9  ;;  %v16142_v9 = vcombine.low %v406_v6, %v414_v33  ;;  %v14518_v33 = vld [vmem:[%s20267_s1 + $0x22c] ss:$16 sps:$4 sm:$0xff]  }
  0xec   :  { %6050 = vmatprep.mubr.bf16.mxu0 %v16080_v56  ;;  %v413_v56 = vld [vmem:[%s20268_s0 + $0xc40] sm:$0xff] }
  0xed   :  { %v16140_v53 = vcombine.low %v405_v36, %v413_v56  ;;  %20525 = vst [vmem:[#allocation47_spill] sm:$0xff] %v16142_v9 }
  0xf2   :  { %5768 = vmatmul.mubr.bf16.gmra.mrb[88].mxu1 %v16098_v16 }
  0xf3   :  { %6051 = vmatmul.mubr.bf16.gmra.mrb[88].mxu0 %v16100_v45  ;;  %5777 = vmatprep.mubr.bf16.mxu1 %v16102_v4  ;;  %v16126_v45 = vcombine.high %v405_v36, %v413_v56  ;;  %v14513_v56 = vld [vmem:[%s20267_s1 + $0x208] ss:$16 sps:$4 sm:$0xff]  }
  0xf4   :  { %6060 = vmatprep.mubr.bf16.mxu0 %v16104_v38  ;;  %v31_v38 = vld [vmem:[%s20268_s0 + $0x50] sm:$0xff] }
  0xf5   :  { %v16144_v30 = vcombine.high %v23_v24, %v31_v38  ;;  %v16156_v36 = vcombine.low %v23_v24, %v31_v38  ;;  %v55_v24 = vld [vmem:[%s20268_s0 + $0x110] sm:$0xff] }
  0xf6   :  { %v63_v38 = vld [vmem:[%s20268_s0 + $0x150] sm:$0xff] }
  0xf7   :  { %20526 = vst [vmem:[#allocation48_spill] sm:$0xff] %v16144_v30  ;;  %20527 = vst [vmem:[#allocation49_spill] sm:$0xff] %v16156_v36 }
  0xfa   :  { %5778 = vmatmul.mubr.bf16.gmra.mrb[92].mxu1 %v16122_v50 }
  0xfb   :  { %6061 = vmatmul.mubr.bf16.gmra.mrb[92].mxu0 %v16124_v19  ;;  %5787 = vmatprep.mubr.bf16.mxu1 %v16126_v45  ;;  %v47_v19 = vld [vmem:[%s20268_s0 + $0xd0] sm:$0xff] }
  0xfc   :  { %6070 = vmatprep.mubr.bf16.mxu0 %v16128_v26  ;;  %v16161_v6 = vcombine.high %v39_v59, %v47_v19 }
  0xfe   :  { %20528 = vst [vmem:[#allocation50_spill] sm:$0xff] %v16161_v6 }
 0x102   :  { %5788 = vmatmul.mubr.bf16.gmra.mrb[96].mxu1 %v16140_v53 }
 0x103   :  { %6071 = vmatmul.mubr.bf16.gmra.mrb[96].mxu0 %v16142_v9  ;;  %7811 = vmatprep.mubr.bf16.mxu1 %v15309_v52  ;;  %v14516_v52 = vld [vmem:[%s20267_s1 + $0x228] ss:$16 sps:$4 sm:$0xff]  }
 0x104   :  { %6113 = vmatprep.mubr.bf16.mxu0 %v16144_v30  ;;  %v16224_v30 = vcombine.low %v55_v24, %v63_v38 }
 0x10a   :  { %7812 = vmatmul.mubr.bf16.vlgmr.msra.gmra.mrb[100].mxu1 %v15378_v11  ;;  %v14521_v11 = vld [vmem:[%s20267_s1 + $0x24c] ss:$16 sps:$4 sm:$0xff]  }
 0x10b   :  { %6114 = vmatmul.mubr.bf16.vlgmr.msra.gmra.mrb[0].mxu0 %v16156_v36  ;;  %8063 = vmatpush1.bf16.msra.mxu1 %v14513_v56  ;;  %v16182_v56 = vcombine.low %v39_v59, %v47_v19  ;;  %v14524_v36 = vld [vmem:[%s20267_s1 + $0x26c] ss:$16 sps:$4 sm:$0xff]   ;;  %v14546_v19 = vld [vmem:[%s20267_s1 + $0x600] ss:$16 sps:$4 sm:$0xff]  }
 0x10c   :  { %6123 = vmatprep.mubr.bf16.mxu0 %v16161_v6  ;;  %7821 = vmatprep.mubr.bf16.mxu1 %v15385_v14  ;;  %v16184_v6 = vcombine.high %v55_v24, %v63_v38  ;;  %v14519_v14 = vld [vmem:[%s20267_s1 + $0x248] ss:$16 sps:$4 sm:$0xff]   ;;  %v71_v59 = vld [vmem:[%s20268_s0 + $0x190] sm:$0xff]  ;;  %v14530_v24 = vld [vmem:[%s20267_s1 + $0x2ac] ss:$16 sps:$4 sm:$0xff]  }
 0x10d   :  { %8064 = vmatprep.subr.bf16.mxu1 %v14518_v33  ;;  %20529 = vst [vmem:[#allocation51_spill] sm:$0xff] %v16182_v56  ;;  %v14548_v33 = vld [vmem:[%s20267_s1 + $0x604] ss:$16 sps:$4 sm:$0xff]   ;;  %v14555_v38 = vld [vmem:[%s20267_s1 + $0x640] ss:$16 sps:$4 sm:$0xff]  }
 0x10e   :  { %20530 = vst [vmem:[#allocation52_spill] sm:$0xff] %v16184_v6  ;;  %6364 = vmatprep.subr.bf16.mxu0 %v14548_v33 }
 0x10f   :  { %8065 = vmatpush1.bf16.msra.mxu1 %v14516_v52  ;;  %v79_v52 = vld [vmem:[%s20268_s0 + $0x1d0] sm:$0xff]  ;;  %6365 = vmatpush1.bf16.msra.mxu0 %v14546_v19 }
 0x110   :  { %8066 = vmatprep.subr.bf16.mxu1 %v14521_v11  ;;  %v14522_v11 = vld [vmem:[%s20267_s1 + $0x268] ss:$16 sps:$4 sm:$0xff]   ;;  %v16228_v9 = vcombine.high %v71_v59, %v79_v52  ;;  %v14557_v19 = vld [vmem:[%s20267_s1 + $0x644] ss:$16 sps:$4 sm:$0xff]  }
 0x112   :  { %7822 = vmatmul.mubr.bf16.gmra.mrb[104].mxu1 %v15414_v23  ;;  %v14554_v23 = vld [vmem:[%s20267_s1 + $0x624] ss:$16 sps:$4 sm:$0xff]  }
 0x113   :  { %6124 = vmatmul.mubr.bf16.gmra.mrb[4].mxu0 %v16182_v56  ;;  %7831 = vmatprep.mubr.bf16.mxu1 %v15418_v25  ;;  %v14527_v25 = vld [vmem:[%s20267_s1 + $0x28c] ss:$16 sps:$4 sm:$0xff]  }
 0x114   :  { %6133 = vmatprep.mubr.bf16.mxu0 %v16184_v6  ;;  %8067 = vmatpush1.bf16.msra.mxu1 %v14519_v14  ;;  %v14552_v14 = vld [vmem:[%s20267_s1 + $0x620] ss:$16 sps:$4 sm:$0xff]  }
 0x115   :  { %v16214_v6 = vpop.f32.mrb[0].mxu1  ;;  %8068 = vmatprep.subr.bf16.mxu1 %v14524_v36  ;;  %6366 = vmatprep.subr.bf16.mxu0 %v14554_v23  ;;  %v14525_v36 = vld [vmem:[%s20267_s1 + $0x288] ss:$16 sps:$4 sm:$0xff]   ;;  %v95_v23 = vld [vmem:[%s20268_s0 + $0x250] sm:$0xff] }
 0x116   :  { %20531 = vst [vmem:[#allocation53_spill] sm:$0xff] %v16214_v6  ;;  %v16222_v56 = vpop.f32.mrb[1].mxu1  ;;  %6367 = vmatpush1.bf16.msra.mxu0 %v14552_v14 }
 0x117   :  { %20532 = vst [vmem:[#allocation54_spill] sm:$0xff] %v16222_v56  ;;  %v16226_v33 = vpop.f32.mrb[2].mxu1  ;;  %6368 = vmatprep.subr.bf16.mxu0 %v14557_v19 }
 0x118   :  { %20533 = vst [vmem:[#allocation55_spill] sm:$0xff] %v16226_v33  ;;  %v16230_v6 = vpop.f32.mrb[3].mxu1  ;;  %8069 = vmatpush1.bf16.msra.mxu1 %v14522_v11  ;;  %v87_v11 = vld [vmem:[%s20268_s0 + $0x210] sm:$0xff]  ;;  %v16270_v33 = vcombine.low %v71_v59, %v79_v52  ;;  %v14536_v59 = vld [vmem:[%s20267_s1 + $0x2ec] ss:$16 sps:$4 sm:$0xff]  }
 0x119   :  { %20534 = vst [vmem:[#allocation56_spill] sm:$0xff] %v16230_v6  ;;  %8070 = vmatprep.subr.bf16.mxu1 %v14527_v25  ;;  %v14528_v25 = vld [vmem:[%s20267_s1 + $0x2a8] ss:$16 sps:$4 sm:$0xff]   ;;  %v16274_v56 = vcombine.high %v87_v11, %v95_v23  ;;  %v14564_v52 = vld [vmem:[%s20267_s1 + $0x680] ss:$16 sps:$4 sm:$0xff]  }
 0x11a   :  { %7832 = vmatmul.mubr.bf16.gmra.mrb[108].mxu1 %v15450_v35  ;;  %v14560_v35 = vld [vmem:[%s20267_s1 + $0x664] ss:$16 sps:$4 sm:$0xff]   ;;  %6369 = vmatpush1.bf16.msra.mxu0 %v14555_v38 }
 0x11b   :  { %6134 = vmatmul.mubr.bf16.gmra.mrb[8].mxu0 %v16224_v30  ;;  %7841 = vmatprep.mubr.bf16.mxu1 %v15454_v37  ;;  %v14533_v37 = vld [vmem:[%s20267_s1 + $0x2cc] ss:$16 sps:$4 sm:$0xff]   ;;  %v14566_v38 = vld [vmem:[%s20267_s1 + $0x684] ss:$16 sps:$4 sm:$0xff]  }
 0x11c   :  { %6143 = vmatprep.mubr.bf16.mxu0 %v16228_v9  ;;  %8071 = vmatpush1.bf16.msra.mxu1 %v14525_v36  ;;  %v14558_v36 = vld [vmem:[%s20267_s1 + $0x660] ss:$16 sps:$4 sm:$0xff]  }
 0x11d   :  { %v16260_v14 = vpop.f32.mrb[4].mxu1  ;;  %8072 = vmatprep.subr.bf16.mxu1 %v14530_v24  ;;  %6370 = vmatprep.subr.bf16.mxu0 %v14560_v35  ;;  %v14531_v24 = vld [vmem:[%s20267_s1 + $0x2c8] ss:$16 sps:$4 sm:$0xff]   ;;  %v111_v35 = vld [vmem:[%s20268_s0 + $0x2d0] sm:$0xff] }
 0x11e   :  { %20535 = vst [vmem:[#allocation57_spill] sm:$0xff] %v16260_v14  ;;  %v16268_v6 = vpop.f32.mrb[5].mxu1  ;;  %6371 = vmatpush1.bf16.msra.mxu0 %v14558_v36 }
 0x11f   :  { %20536 = vst [vmem:[#allocation58_spill] sm:$0xff] %v16268_v6  ;;  %v16272_v19 = vpop.f32.mrb[6].mxu1  ;;  %6372 = vmatprep.subr.bf16.mxu0 %v14566_v38 }
 0x120   :  { %20537 = vst [vmem:[#allocation59_spill] sm:$0xff] %v16272_v19  ;;  %v16276_v14 = vpop.f32.mrb[7].mxu1  ;;  %8073 = vmatpush1.bf16.msra.mxu1 %v14528_v25  ;;  %v103_v25 = vld [vmem:[%s20268_s0 + $0x290] sm:$0xff]  ;;  %v16316_v19 = vcombine.low %v87_v11, %v95_v23  ;;  %v14542_v11 = vld [vmem:[%s20267_s1 + $0x32c] ss:$16 sps:$4 sm:$0xff]  }
 0x121   :  { %20538 = vst [vmem:[#allocation60_spill] sm:$0xff] %v16276_v14  ;;  %8074 = vmatprep.subr.bf16.mxu1 %v14533_v37  ;;  %v14534_v37 = vld [vmem:[%s20267_s1 + $0x2e8] ss:$16 sps:$4 sm:$0xff]   ;;  %v16320_v6 = vcombine.high %v103_v25, %v111_v35  ;;  %v14570_v23 = vld [vmem:[%s20267_s1 + $0x6c0] ss:$16 sps:$4 sm:$0xff]  }
 0x122   :  { %7842 = vmatmul.mubr.bf16.gmra.mrb[112].mxu1 %v15498_v51  ;;  %v14569_v51 = vld [vmem:[%s20267_s1 + $0x6a4] ss:$16 sps:$4 sm:$0xff]   ;;  %6373 = vmatpush1.bf16.msra.mxu0 %v14564_v52 }
 0x123   :  { %6144 = vmatmul.mubr.bf16.gmra.mrb[12].mxu0 %v16270_v33  ;;  %7851 = vmatprep.mubr.bf16.mxu1 %v15502_v54  ;;  %v14539_v54 = vld [vmem:[%s20267_s1 + $0x30c] ss:$16 sps:$4 sm:$0xff]   ;;  %v14572_v52 = vld [vmem:[%s20267_s1 + $0x6c4] ss:$16 sps:$4 sm:$0xff]  }
 0x124   :  { %6153 = vmatprep.mubr.bf16.mxu0 %v16274_v56  ;;  %8075 = vmatpush1.bf16.msra.mxu1 %v14531_v24  ;;  %v14567_v24 = vld [vmem:[%s20267_s1 + $0x6a0] ss:$16 sps:$4 sm:$0xff]  }
 0x125   :  { %v16306_v36 = vpop.f32.mrb[8].mxu1  ;;  %8076 = vmatprep.subr.bf16.mxu1 %v14536_v59  ;;  %6374 = vmatprep.subr.bf16.mxu0 %v14569_v51  ;;  %v14537_v59 = vld [vmem:[%s20267_s1 + $0x308] ss:$16 sps:$4 sm:$0xff]   ;;  %v127_v51 = vld [vmem:[%s20268_s0 + $0x350] sm:$0xff] }
 0x126   :  { %20539 = vst [vmem:[#allocation61_spill] sm:$0xff] %v16306_v36  ;;  %v16314_v14 = vpop.f32.mrb[9].mxu1  ;;  %6375 = vmatpush1.bf16.msra.mxu0 %v14567_v24 }
 0x127   :  { %20540 = vst [vmem:[#allocation62_spill] sm:$0xff] %v16314_v14  ;;  %v16318_v38 = vpop.f32.mrb[10].mxu1  ;;  %6376 = vmatprep.subr.bf16.mxu0 %v14572_v52 }
 0x128   :  { %20541 = vst [vmem:[#allocation63_spill] sm:$0xff] %v16318_v38  ;;  %v16322_v36 = vpop.f32.mrb[11].mxu1  ;;  %8077 = vmatpush1.bf16.msra.mxu1 %v14534_v37  ;;  %v119_v37 = vld [vmem:[%s20268_s0 + $0x310] sm:$0xff]  ;;  %v16362_v38 = vcombine.low %v103_v25, %v111_v35  ;;  %v14551_v25 = vld [vmem:[%s20267_s1 + $0x36c] ss:$16 sps:$4 sm:$0xff]  }
 0x129   :  { %20542 = vst [vmem:[#allocation64_spill] sm:$0xff] %v16322_v36  ;;  %8078 = vmatprep.subr.bf16.mxu1 %v14539_v54  ;;  %v14540_v54 = vld [vmem:[%s20267_s1 + $0x328] ss:$16 sps:$4 sm:$0xff]   ;;  %v16366_v14 = vcombine.high %v119_v37, %v127_v51  ;;  %v14579_v35 = vld [vmem:[%s20267_s1 + $0x700] ss:$16 sps:$4 sm:$0xff]  }
 0x12a   :  { %7852 = vmatmul.mubr.bf16.gmra.mrb[116].mxu1 %v15546_v5  ;;  %v14578_v5 = vld [vmem:[%s20267_s1 + $0x6e4] ss:$16 sps:$4 sm:$0xff]   ;;  %6377 = vmatpush1.bf16.msra.mxu0 %v14570_v23 }
 0x12b   :  { %6154 = vmatmul.mubr.bf16.gmra.mrb[16].mxu0 %v16316_v19  ;;  %7861 = vmatprep.mubr.bf16.mxu1 %v15553_v8  ;;  %v14545_v8 = vld [vmem:[%s20267_s1 + $0x34c] ss:$16 sps:$4 sm:$0xff]   ;;  %v14581_v23 = vld [vmem:[%s20267_s1 + $0x704] ss:$16 sps:$4 sm:$0xff]  }
 0x12c   :  { %6163 = vmatprep.mubr.bf16.mxu0 %v16320_v6  ;;  %8079 = vmatpush1.bf16.msra.mxu1 %v14537_v59  ;;  %v14576_v59 = vld [vmem:[%s20267_s1 + $0x6e0] ss:$16 sps:$4 sm:$0xff]  }
 0x12d   :  { %v16352_v24 = vpop.f32.mrb[12].mxu1  ;;  %8080 = vmatprep.subr.bf16.mxu1 %v14542_v11  ;;  %6378 = vmatprep.subr.bf16.mxu0 %v14578_v5  ;;  %v14543_v11 = vld [vmem:[%s20267_s1 + $0x348] ss:$16 sps:$4 sm:$0xff]   ;;  %v143_v5 = vld [vmem:[%s20268_s0 + $0x3d0] sm:$0xff] }
 0x12e   :  { %20543 = vst [vmem:[#allocation65_spill] sm:$0xff] %v16352_v24  ;;  %v16360_v36 = vpop.f32.mrb[13].mxu1  ;;  %6379 = vmatpush1.bf16.msra.mxu0 %v14576_v59 }
 0x12f   :  { %20544 = vst [vmem:[#allocation66_spill] sm:$0xff] %v16360_v36  ;;  %v16364_v52 = vpop.f32.mrb[14].mxu1  ;;  %6380 = vmatprep.subr.bf16.mxu0 %v14581_v23 }
 0x130   :  { %20545 = vst [vmem:[#allocation67_spill] sm:$0xff] %v16364_v52  ;;  %v16368_v24 = vpop.f32.mrb[15].mxu1  ;;  %8081 = vmatpush1.bf16.msra.mxu1 %v14540_v54  ;;  %v135_v54 = vld [vmem:[%s20268_s0 + $0x390] sm:$0xff]  ;;  %v16408_v52 = vcombine.low %v119_v37, %v127_v51  ;;  %v14575_v37 = vld [vmem:[%s20267_s1 + $0x3ac] ss:$16 sps:$4 sm:$0xff]  }
 0x131   :  { %20546 = vst [vmem:[#allocation68_spill] sm:$0xff] %v16368_v24  ;;  %8082 = vmatprep.subr.bf16.mxu1 %v14545_v8  ;;  %v14549_v8 = vld [vmem:[%s20267_s1 + $0x368] ss:$16 sps:$4 sm:$0xff]   ;;  %v16412_v36 = vcombine.high %v135_v54, %v143_v5  ;;  %v14588_v51 = vld [vmem:[%s20267_s1 + $0x740] ss:$16 sps:$4 sm:$0xff]  }
 0x132   :  { %7862 = vmatmul.mubr.bf16.gmra.mrb[120].mxu1 %v15594_v29  ;;  %v14584_v29 = vld [vmem:[%s20267_s1 + $0x724] ss:$16 sps:$4 sm:$0xff]   ;;  %6381 = vmatpush1.bf16.msra.mxu0 %v14579_v35 }
 0x133   :  { %6164 = vmatmul.mubr.bf16.gmra.mrb[20].mxu0 %v16362_v38  ;;  %7871 = vmatprep.mubr.bf16.mxu1 %v15601_v32  ;;  %v14563_v32 = vld [vmem:[%s20267_s1 + $0x38c] ss:$16 sps:$4 sm:$0xff]   ;;  %v14590_v35 = vld [vmem:[%s20267_s1 + $0x744] ss:$16 sps:$4 sm:$0xff]  }
 0x134   :  { %6173 = vmatprep.mubr.bf16.mxu0 %v16366_v14  ;;  %8083 = vmatpush1.bf16.msra.mxu1 %v14543_v11  ;;  %v14582_v11 = vld [vmem:[%s20267_s1 + $0x720] ss:$16 sps:$4 sm:$0xff]  }
 0x135   :  { %v16398_v59 = vpop.f32.mrb[16].mxu1  ;;  %8084 = vmatprep.subr.bf16.mxu1 %v14551_v25  ;;  %6382 = vmatprep.subr.bf16.mxu0 %v14584_v29  ;;  %v14561_v25 = vld [vmem:[%s20267_s1 + $0x388] ss:$16 sps:$4 sm:$0xff]   ;;  %v159_v29 = vld [vmem:[%s20268_s0 + $0x450] sm:$0xff] }
 0x136   :  { %20547 = vst [vmem:[#allocation69_spill] sm:$0xff] %v16398_v59  ;;  %v16406_v24 = vpop.f32.mrb[17].mxu1  ;;  %6383 = vmatpush1.bf16.msra.mxu0 %v14582_v11 }
 0x137   :  { %20548 = vst [vmem:[#allocation70_spill] sm:$0xff] %v16406_v24  ;;  %v16410_v23 = vpop.f32.mrb[18].mxu1  ;;  %6384 = vmatprep.subr.bf16.mxu0 %v14590_v35 }
 0x138   :  { %20549 = vst [vmem:[#allocation71_spill] sm:$0xff] %v16410_v23  ;;  %v16414_v59 = vpop.f32.mrb[19].mxu1  ;;  %8085 = vmatpush1.bf16.msra.mxu1 %v14549_v8  ;;  %v151_v8 = vld [vmem:[%s20268_s0 + $0x410] sm:$0xff]  ;;  %v16454_v23 = vcombine.low %v135_v54, %v143_v5 }
 0x139   :  { %20550 = vst [vmem:[#allocation72_spill] sm:$0xff] %v16414_v59  ;;  %8086 = vmatprep.subr.bf16.mxu1 %v14563_v32  ;;  %v14573_v32 = vld [vmem:[%s20267_s1 + $0x3a8] ss:$16 sps:$4 sm:$0xff]   ;;  %v16458_v24 = vcombine.high %v151_v8, %v159_v29  ;;  %v14594_v54 = vld [vmem:[%s20267_s1 + $0x780] ss:$16 sps:$4 sm:$0xff]  }
 0x13a   :  { %7872 = vmatmul.mubr.bf16.gmra.mrb[124].mxu1 %v15642_v49  ;;  %v14593_v49 = vld [vmem:[%s20267_s1 + $0x764] ss:$16 sps:$4 sm:$0xff]   ;;  %6385 = vmatpush1.bf16.msra.mxu0 %v14588_v51 }
 0x13b   :  { %6174 = vmatmul.mubr.bf16.gmra.mrb[24].mxu0 %v16408_v52  ;;  %7881 = vmatprep.mubr.bf16.mxu1 %v15649_v58  ;;  %v14587_v58 = vld [vmem:[%s20267_s1 + $0x3cc] ss:$16 sps:$4 sm:$0xff]   ;;  %v14596_v51 = vld [vmem:[%s20267_s1 + $0x784] ss:$16 sps:$4 sm:$0xff]  }
 0x13c   :  { %6183 = vmatprep.mubr.bf16.mxu0 %v16412_v36  ;;  %8087 = vmatpush1.bf16.msra.mxu1 %v14561_v25  ;;  %v14591_v25 = vld [vmem:[%s20267_s1 + $0x760] ss:$16 sps:$4 sm:$0xff]  }
 0x13d   :  { %v16444_v11 = vpop.f32.mrb[20].mxu1  ;;  %8088 = vmatprep.subr.bf16.mxu1 %v14575_v37  ;;  %6386 = vmatprep.subr.bf16.mxu0 %v14593_v49  ;;  %v14585_v37 = vld [vmem:[%s20267_s1 + $0x3c8] ss:$16 sps:$4 sm:$0xff]   ;;  %v167_v5 = vld [vmem:[%s20268_s0 + $0x490] sm:$0xff] }
 0x13e   :  { %20551 = vst [vmem:[#allocation73_spill] sm:$0xff] %v16444_v11  ;;  %v16452_v59 = vpop.f32.mrb[21].mxu1  ;;  %6387 = vmatpush1.bf16.msra.mxu0 %v14591_v25  ;;  %v14599_v49 = vld [vmem:[%s20267_s1 + $0x7a4] ss:$16 sps:$4 sm:$0xff]   ;;  %v16491_v25 = vcombine.low %v151_v8, %v159_v29  ;;  %v14603_v29 = vld [vmem:[%s20267_s1 + $0x7c0] ss:$16 sps:$4 sm:$0xff]  }
 0x13f   :  { %20552 = vst [vmem:[#allocation74_spill] sm:$0xff] %v16452_v59  ;;  %v16456_v35 = vpop.f32.mrb[22].mxu1  ;;  %6388 = vmatprep.subr.bf16.mxu0 %v14596_v51  ;;  %v14602_v51 = vld [vmem:[%s20267_s1 + $0x3ec] ss:$16 sps:$4 sm:$0xff]   ;;  %v14605_v8 = vld [vmem:[%s20267_s1 + $0x7c4] ss:$16 sps:$4 sm:$0xff]  }
 0x140   :  { %20553 = vst [vmem:[#allocation75_spill] sm:$0xff] %v16456_v35  ;;  %v16460_v11 = vpop.f32.mrb[23].mxu1  ;;  %8089 = vmatpush1.bf16.msra.mxu1 %v14573_v32  ;;  %v175_v32 = vld [vmem:[%s20268_s0 + $0x4d0] sm:$0xff] }
 0x141   :  { %20554 = vst [vmem:[#allocation76_spill] sm:$0xff] %v16460_v11  ;;  %8090 = vmatprep.subr.bf16.mxu1 %v14587_v58 }
 0x142   :  { %7882 = vmatmul.mubr.bf16.gmra.mrb[128].mxu1 %v15690_v13  ;;  %6389 = vmatpush1.bf16.msra.mxu0 %v14594_v54  ;;  %v14597_v13 = vld [vmem:[%s20267_s1 + $0x7a0] ss:$16 sps:$4 sm:$0xff]   ;;  %v14600_v54 = vld [vmem:[%s20267_s1 + $0x3e8] ss:$16 sps:$4 sm:$0xff]  }
 0x143   :  { %6184 = vmatmul.mubr.bf16.gmra.mrb[28].mxu0 %v16454_v23  ;;  %7891 = vmatprep.mubr.bf16.mxu1 %v15697_v18 }
 0x144   :  { %6193 = vmatprep.mubr.bf16.mxu0 %v16458_v24  ;;  %8091 = vmatpush1.bf16.msra.mxu1 %v14585_v37  ;;  %v16495_v37 = vcombine.high %v167_v5, %v175_v32 }
 0x145   :  { %v16484_v58 = vpop.f32.mrb[24].mxu1  ;;  %6390 = vmatprep.subr.bf16.mxu0 %v14599_v49  ;;  %8092 = vmatprep.subr.bf16.mxu1 %v14602_v51  ;;  %v183_v49 = vld [vmem:[%s20268_s0 + $0x510] sm:$0xff] }
 0x146   :  { %20555 = vst [vmem:[#allocation77_spill] sm:$0xff] %v16484_v58  ;;  %v16489_v18 = vpop.f32.mrb[25].mxu1  ;;  %6391 = vmatpush1.bf16.msra.mxu0 %v14597_v13  ;;  %v191_v13 = vld [vmem:[%s20268_s0 + $0x550] sm:$0xff] }
 0x147   :  { %20556 = vst [vmem:[#allocation78_spill] sm:$0xff] %v16489_v18  ;;  %v16493_v11 = vpop.f32.mrb[26].mxu1  ;;  %6392 = vmatprep.subr.bf16.mxu0 %v14605_v8  ;;  %v14608_v51 = vld [vmem:[%s20267_s1 + $0x7e4] ss:$16 sps:$4 sm:$0xff]   ;;  %v14648_v58 = vld [vmem:[%s20267_s1 + $0x820] ss:$16 sps:$4 sm:$0xff]  }
 0x148   :  { %20557 = vst [vmem:[#allocation79_spill] sm:$0xff] %v16493_v11  ;;  %v16500_v35 = vpop.f32.mrb[27].mxu1  ;;  %8093 = vmatpush1.bf16.msra.mxu1 %v14600_v54  ;;  %v16531_v11 = vcombine.low %v167_v5, %v175_v32  ;;  %v16535_v54 = vcombine.high %v183_v49, %v191_v13  ;;  %v199_v5 = vld [vmem:[%s20268_s0 + $0x590] sm:$0xff] }
 0x149   :  { %20558 = vst [vmem:[#allocation80_spill] sm:$0xff] %v16500_v35  ;;  %v207_v32 = vld [vmem:[%s20268_s0 + $0x5d0] sm:$0xff] }
 0x14a   :  { %7892 = vmatmul.mubr.bf16.gmra.mrb[132].mxu1 %v15735_v42  ;;  %6393 = vmatpush1.bf16.msra.mxu0 %v14603_v29  ;;  %v14606_v42 = vld [vmem:[%s20267_s1 + $0x7e0] ss:$16 sps:$4 sm:$0xff]   ;;  %v14611_v29 = vld [vmem:[%s20267_s1 + $0x40c] ss:$16 sps:$4 sm:$0xff]  }
 0x14b   :  { %6194 = vmatmul.mubr.bf16.gmra.mrb[32].mxu0 %v16491_v25  ;;  %7901 = vmatprep.mubr.bf16.mxu1 %v15739_v44 }
 0x14c   :  { %6203 = vmatprep.mubr.bf16.mxu0 %v16495_v37  ;;  %6394 = vmatprep.subr.bf16.mxu0 %v14608_v51 }
 0x14d   :  { %v16524_v35 = vpop.f32.mrb[28].mxu1  ;;  %8345 = vmatprep.subr.bf16.mxu1 %v14611_v29  ;;  %v215_v29 = vld [vmem:[%s20268_s0 + $0x610] sm:$0xff] }
 0x14e   :  { %20559 = vst [vmem:[#allocation81_spill] sm:$0xff] %v16524_v35  ;;  %v16529_v44 = vpop.f32.mrb[29].mxu1  ;;  %6395 = vmatpush1.bf16.msra.mxu0 %v14606_v42  ;;  %v16556_v42 = vcombine.low %v183_v49, %v191_v13  ;;  %v223_v49 = vld [vmem:[%s20268_s0 + $0x650] sm:$0xff]  ;;  %v14615_v35 = vld [vmem:[%s20267_s1 + $0x448] ss:$16 sps:$4 sm:$0xff]  }
 0x14f   :  { %20560 = vst [vmem:[#allocation82_spill] sm:$0xff] %v16529_v44  ;;  %v16533_v18 = vpop.f32.mrb[30].mxu1  ;;  %v14614_v44 = vld [vmem:[%s20267_s1 + $0x42c] ss:$16 sps:$4 sm:$0xff]  }
 0x150   :  { %20561 = vst [vmem:[#allocation83_spill] sm:$0xff] %v16533_v18  ;;  %v16537_v8 = vpop.f32.mrb[31].mxu1  ;;  %v16560_v18 = vcombine.high %v199_v5, %v207_v32 }
 0x151   :  { %20562 = vst [vmem:[#allocation84_spill] sm:$0xff] %v16537_v8 }
 0x152   :  { %7902 = vmatmul.mubr.bf16.gmra.mrb[136].mxu1 %v15771_v0 }
 0x153   :  { %6204 = vmatmul.mubr.bf16.gmra.mrb[36].mxu0 %v16531_v11  ;;  %7911 = vmatprep.mubr.bf16.mxu1 %v15778_v3 }
 0x154   :  { %6213 = vmatprep.mubr.bf16.mxu0 %v16535_v54 }
 0x155   :  { %v16552_v51 = vpop.f32.mrb[32].mxu1 }
 0x156   :  { %20563 = vst [vmem:[#allocation85_spill] sm:$0xff] %v16552_v51  ;;  %v16554_v0 = vpop.f32.mrb[33].mxu1 }
 0x157   :  { %20564 = vst [vmem:[#allocation86_spill] sm:$0xff] %v16554_v0  ;;  %v16558_v8 = vpop.f32.mrb[34].mxu1 }
 0x158   :  { %20565 = vst [vmem:[#allocation87_spill] sm:$0xff] %v16558_v8  ;;  %v16562_v3 = vpop.f32.mrb[35].mxu1 }
 0x159   :  { %20566 = vst [vmem:[#allocation88_spill] sm:$0xff] %v16562_v3  ;;  %v16578_v3 = vcombine.low %v199_v5, %v207_v32  ;;  %v239_v5 = vld [vmem:[%s20268_s0 + $0x6d0] sm:$0xff] }
 0x15a   :  { %7912 = vmatmul.mubr.bf16.gmra.mrb[140].mxu1 %v15810_v31  ;;  %v16582_v31 = vcombine.high %v215_v29, %v223_v49 }
 0x15b   :  { %6214 = vmatmul.mubr.bf16.gmra.mrb[40].mxu0 %v16556_v42  ;;  %7921 = vmatprep.mubr.bf16.mxu1 %v15814_v39  ;;  %v231_v39 = vld [vmem:[%s20268_s0 + $0x690] sm:$0xff] }
 0x15c   :  { %6223 = vmatprep.mubr.bf16.mxu0 %v16560_v18 }
 0x15d   :  { %v16574_v13 = vpop.f32.mrb[36].mxu1 }
 0x15e   :  { %20567 = vst [vmem:[#allocation89_spill] sm:$0xff] %v16574_v13  ;;  %v16576_v8 = vpop.f32.mrb[37].mxu1 }
 0x15f   :  { %20568 = vst [vmem:[#allocation90_spill] sm:$0xff] %v16576_v8  ;;  %v16580_v0 = vpop.f32.mrb[38].mxu1 }
 0x160   :  { %20569 = vst [vmem:[#allocation91_spill] sm:$0xff] %v16580_v0  ;;  %v16584_v51 = vpop.f32.mrb[39].mxu1 }
 0x161   :  { %20570 = vst [vmem:[#allocation92_spill] sm:$0xff] %v16584_v51  ;;  %v16600_v51 = vcombine.low %v215_v29, %v223_v49  ;;  %v255_v29 = vld [vmem:[%s20268_s0 + $0x750] sm:$0xff] }
 0x162   :  { %7922 = vmatmul.mubr.bf16.gmra.mrb[144].mxu1 %v15834_v57  ;;  %v16604_v57 = vcombine.high %v231_v39, %v239_v5 }
 0x163   :  { %6224 = vmatmul.mubr.bf16.gmra.mrb[44].mxu0 %v16578_v3  ;;  %7931 = vmatprep.mubr.bf16.mxu1 %v15838_v61  ;;  %v247_v61 = vld [vmem:[%s20268_s0 + $0x710] sm:$0xff] }
 0x164   :  { %6233 = vmatprep.mubr.bf16.mxu0 %v16582_v31 }
 0x165   :  { %v16596_v32 = vpop.f32.mrb[40].mxu1 }
 0x166   :  { %20571 = vst [vmem:[#allocation93_spill] sm:$0xff] %v16596_v32  ;;  %v16598_v0 = vpop.f32.mrb[41].mxu1 }
 0x167   :  { %20572 = vst [vmem:[#allocation94_spill] sm:$0xff] %v16598_v0  ;;  %v16602_v8 = vpop.f32.mrb[42].mxu1 }
 0x168   :  { %20573 = vst [vmem:[#allocation95_spill] sm:$0xff] %v16602_v8  ;;  %v16606_v13 = vpop.f32.mrb[43].mxu1 }
 0x169   :  { %20574 = vst [vmem:[#allocation96_spill] sm:$0xff] %v16606_v13  ;;  %v16622_v13 = vcombine.low %v231_v39, %v239_v5  ;;  %v271_v39 = vld [vmem:[%s20268_s0 + $0x7d0] sm:$0xff] }
 0x16a   :  { %7932 = vmatmul.mubr.bf16.gmra.mrb[148].mxu1 %v15858_v17  ;;  %v16626_v17 = vcombine.high %v247_v61, %v255_v29 }
 0x16b   :  { %6234 = vmatmul.mubr.bf16.gmra.mrb[48].mxu0 %v16600_v51  ;;  %7941 = vmatprep.mubr.bf16.mxu1 %v15862_v21  ;;  %v263_v21 = vld [vmem:[%s20268_s0 + $0x790] sm:$0xff] }
 0x16c   :  { %6243 = vmatprep.mubr.bf16.mxu0 %v16604_v57 }
 0x16d   :  { %v16618_v49 = vpop.f32.mrb[44].mxu1 }
 0x16e   :  { %20575 = vst [vmem:[#allocation97_spill] sm:$0xff] %v16618_v49  ;;  %v16620_v8 = vpop.f32.mrb[45].mxu1 }
 0x16f   :  { %20576 = vst [vmem:[#allocation98_spill] sm:$0xff] %v16620_v8  ;;  %v16624_v0 = vpop.f32.mrb[46].mxu1 }
 0x170   :  { %20577 = vst [vmem:[#allocation99_spill] sm:$0xff] %v16624_v0  ;;  %v16628_v32 = vpop.f32.mrb[47].mxu1 }
 0x171   :  { %20578 = vst [vmem:[#allocation100_spill] sm:$0xff] %v16628_v32  ;;  %v16644_v32 = vcombine.low %v247_v61, %v255_v29  ;;  %v287_v61 = vld [vmem:[%s20268_s0 + $0x850] sm:$0xff] }
 0x172   :  { %7942 = vmatmul.mubr.bf16.gmra.mrb[152].mxu1 %v15882_v47  ;;  %v16648_v47 = vcombine.high %v263_v21, %v271_v39 }
 0x173   :  { %6244 = vmatmul.mubr.bf16.gmra.mrb[52].mxu0 %v16622_v13  ;;  %7951 = vmatprep.mubr.bf16.mxu1 %v15886_v20  ;;  %v279_v20 = vld [vmem:[%s20268_s0 + $0x810] sm:$0xff] }
 0x174   :  { %6253 = vmatprep.mubr.bf16.mxu0 %v16626_v17 }
 0x175   :  { %v16640_v5 = vpop.f32.mrb[48].mxu1 }
 0x176   :  { %20579 = vst [vmem:[#allocation101_spill] sm:$0xff] %v16640_v5  ;;  %v16642_v0 = vpop.f32.mrb[49].mxu1 }
 0x177   :  { %20580 = vst [vmem:[#allocation102_spill] sm:$0xff] %v16642_v0  ;;  %v16646_v8 = vpop.f32.mrb[50].mxu1 }
 0x178   :  { %20581 = vst [vmem:[#allocation103_spill] sm:$0xff] %v16646_v8  ;;  %v16650_v49 = vpop.f32.mrb[51].mxu1 }
 0x179   :  { %20582 = vst [vmem:[#allocation104_spill] sm:$0xff] %v16650_v49  ;;  %v16666_v49 = vcombine.low %v263_v21, %v271_v39  ;;  %v303_v21 = vld [vmem:[%s20268_s0 + $0x8d0] sm:$0xff] }
 0x17a   :  { %7952 = vmatmul.mubr.bf16.gmra.mrb[156].mxu1 %v15906_v7  ;;  %v16670_v7 = vcombine.high %v279_v20, %v287_v61 }
 0x17b   :  { %6254 = vmatmul.mubr.bf16.gmra.mrb[56].mxu0 %v16644_v32  ;;  %7961 = vmatprep.mubr.bf16.mxu1 %v15910_v48  ;;  %v295_v48 = vld [vmem:[%s20268_s0 + $0x890] sm:$0xff] }
 0x17c   :  { %6263 = vmatprep.mubr.bf16.mxu0 %v16648_v47 }
 0x17d   :  { %v16662_v29 = vpop.f32.mrb[52].mxu1 }
 0x17e   :  { %20583 = vst [vmem:[#allocation105_spill] sm:$0xff] %v16662_v29  ;;  %v16664_v8 = vpop.f32.mrb[53].mxu1 }
 0x17f   :  { %20584 = vst [vmem:[#allocation106_spill] sm:$0xff] %v16664_v8  ;;  %v16668_v0 = vpop.f32.mrb[54].mxu1 }
 0x180   :  { %20585 = vst [vmem:[#allocation107_spill] sm:$0xff] %v16668_v0  ;;  %v16672_v5 = vpop.f32.mrb[55].mxu1 }
 0x181   :  { %20586 = vst [vmem:[#allocation108_spill] sm:$0xff] %v16672_v5  ;;  %v16688_v5 = vcombine.low %v279_v20, %v287_v61  ;;  %v319_v20 = vld [vmem:[%s20268_s0 + $0x950] sm:$0xff] }
 0x182   :  { %7962 = vmatmul.mubr.bf16.gmra.mrb[160].mxu1 %v15930_v41  ;;  %v16692_v41 = vcombine.high %v295_v48, %v303_v21 }
 0x183   :  { %6264 = vmatmul.mubr.bf16.gmra.mrb[60].mxu0 %v16666_v49  ;;  %7971 = vmatprep.mubr.bf16.mxu1 %v15934_v10  ;;  %v311_v10 = vld [vmem:[%s20268_s0 + $0x910] sm:$0xff] }
 0x184   :  { %6273 = vmatprep.mubr.bf16.mxu0 %v16670_v7 }
 0x185   :  { %v16684_v39 = vpop.f32.mrb[56].mxu1 }
 0x186   :  { %20587 = vst [vmem:[#allocation109_spill] sm:$0xff] %v16684_v39  ;;  %v16686_v0 = vpop.f32.mrb[57].mxu1 }
 0x187   :  { %20588 = vst [vmem:[#allocation110_spill] sm:$0xff] %v16686_v0  ;;  %v16690_v8 = vpop.f32.mrb[58].mxu1 }
 0x188   :  { %20589 = vst [vmem:[#allocation111_spill] sm:$0xff] %v16690_v8  ;;  %v16694_v29 = vpop.f32.mrb[59].mxu1 }
 0x189   :  { %20590 = vst [vmem:[#allocation112_spill] sm:$0xff] %v16694_v29  ;;  %v16710_v29 = vcombine.low %v295_v48, %v303_v21  ;;  %v335_v48 = vld [vmem:[%s20268_s0 + $0x9d0] sm:$0xff] }
 0x18a   :  { %7972 = vmatmul.mubr.bf16.gmra.mrb[164].mxu1 %v15954_v63  ;;  %v16714_v63 = vcombine.high %v311_v10, %v319_v20 }
 0x18b   :  { %6274 = vmatmul.mubr.bf16.gmra.mrb[64].mxu0 %v16688_v5  ;;  %7981 = vmatprep.mubr.bf16.mxu1 %v15958_v46  ;;  %v327_v46 = vld [vmem:[%s20268_s0 + $0x990] sm:$0xff] }
 0x18c   :  { %6283 = vmatprep.mubr.bf16.mxu0 %v16692_v41 }
 0x18d   :  { %v16706_v61 = vpop.f32.mrb[60].mxu1 }
 0x18e   :  { %20591 = vst [vmem:[#allocation113_spill] sm:$0xff] %v16706_v61  ;;  %v16708_v8 = vpop.f32.mrb[61].mxu1 }
 0x18f   :  { %20592 = vst [vmem:[#allocation114_spill] sm:$0xff] %v16708_v8  ;;  %v16712_v0 = vpop.f32.mrb[62].mxu1 }
 0x190   :  { %20593 = vst [vmem:[#allocation115_spill] sm:$0xff] %v16712_v0  ;;  %v16716_v39 = vpop.f32.mrb[63].mxu1 }
 0x191   :  { %20594 = vst [vmem:[#allocation116_spill] sm:$0xff] %v16716_v39  ;;  %v16732_v39 = vcombine.low %v311_v10, %v319_v20  ;;  %v351_v10 = vld [vmem:[%s20268_s0 + $0xa50] sm:$0xff] }
 0x192   :  { %7982 = vmatmul.mubr.bf16.gmra.mrb[168].mxu1 %v15978_v27  ;;  %v16736_v27 = vcombine.high %v327_v46, %v335_v48 }
 0x193   :  { %6284 = vmatmul.mubr.bf16.gmra.mrb[68].mxu0 %v16710_v29  ;;  %7991 = vmatprep.mubr.bf16.mxu1 %v15982_v2  ;;  %v343_v2 = vld [vmem:[%s20268_s0 + $0xa10] sm:$0xff] }
 0x194   :  { %6293 = vmatprep.mubr.bf16.mxu0 %v16714_v63 }
 0x195   :  { %v16728_v21 = vpop.f32.mrb[64].mxu1 }
 0x196   :  { %20595 = vst [vmem:[#allocation117_spill] sm:$0xff] %v16728_v21  ;;  %v16730_v0 = vpop.f32.mrb[65].mxu1 }
 0x197   :  { %20596 = vst [vmem:[#allocation118_spill] sm:$0xff] %v16730_v0  ;;  %v16734_v8 = vpop.f32.mrb[66].mxu1 }
 0x198   :  { %20597 = vst [vmem:[#allocation119_spill] sm:$0xff] %v16734_v8  ;;  %v16738_v61 = vpop.f32.mrb[67].mxu1 }
 0x199   :  { %20598 = vst [vmem:[#allocation120_spill] sm:$0xff] %v16738_v61  ;;  %v16754_v61 = vcombine.low %v327_v46, %v335_v48  ;;  %v367_v46 = vld [vmem:[%s20268_s0 + $0xad0] sm:$0xff] }
 0x19a   :  { %7992 = vmatmul.mubr.bf16.gmra.mrb[172].mxu1 %v16002_v60  ;;  %v16758_v60 = vcombine.high %v343_v2, %v351_v10 }
 0x19b   :  { %6294 = vmatmul.mubr.bf16.gmra.mrb[72].mxu0 %v16732_v39  ;;  %8001 = vmatprep.mubr.bf16.mxu1 %v16006_v28  ;;  %v359_v28 = vld [vmem:[%s20268_s0 + $0xa90] sm:$0xff] }
 0x19c   :  { %6303 = vmatprep.mubr.bf16.mxu0 %v16736_v27 }
 0x19d   :  { %v16750_v20 = vpop.f32.mrb[68].mxu1 }
 0x19e   :  { %20599 = vst [vmem:[#allocation121_spill] sm:$0xff] %v16750_v20  ;;  %v16752_v8 = vpop.f32.mrb[69].mxu1 }
 0x19f   :  { %20600 = vst [vmem:[#allocation122_spill] sm:$0xff] %v16752_v8  ;;  %v16756_v0 = vpop.f32.mrb[70].mxu1 }
 0x1a0   :  { %20601 = vst [vmem:[#allocation123_spill] sm:$0xff] %v16756_v0  ;;  %v16760_v21 = vpop.f32.mrb[71].mxu1 }
 0x1a1   :  { %20602 = vst [vmem:[#allocation124_spill] sm:$0xff] %v16760_v21  ;;  %v16776_v21 = vcombine.low %v343_v2, %v351_v10  ;;  %v383_v2 = vld [vmem:[%s20268_s0 + $0xb50] sm:$0xff] }
 0x1a2   :  { %8002 = vmatmul.mubr.bf16.gmra.mrb[176].mxu1 %v16026_v34  ;;  %v16780_v34 = vcombine.high %v359_v28, %v367_v46 }
 0x1a3   :  { %6304 = vmatmul.mubr.bf16.gmra.mrb[76].mxu0 %v16754_v61  ;;  %8011 = vmatprep.mubr.bf16.mxu1 %v16030_v22  ;;  %v375_v22 = vld [vmem:[%s20268_s0 + $0xb10] sm:$0xff] }
 0x1a4   :  { %6313 = vmatprep.mubr.bf16.mxu0 %v16758_v60 }
 0x1a5   :  { %v16772_v48 = vpop.f32.mrb[72].mxu1 }
 0x1a6   :  { %20603 = vst [vmem:[#allocation125_spill] sm:$0xff] %v16772_v48  ;;  %v16774_v0 = vpop.f32.mrb[73].mxu1 }
 0x1a7   :  { %20604 = vst [vmem:[#allocation126_spill] sm:$0xff] %v16774_v0  ;;  %v16778_v8 = vpop.f32.mrb[74].mxu1 }
 0x1a8   :  { %20605 = vst [vmem:[#allocation127_spill] sm:$0xff] %v16778_v8  ;;  %v16782_v20 = vpop.f32.mrb[75].mxu1 }
 0x1a9   :  { %20606 = vst [vmem:[#allocation128_spill] sm:$0xff] %v16782_v20  ;;  %v16798_v20 = vcombine.low %v359_v28, %v367_v46  ;;  %v399_v28 = vld [vmem:[%s20268_s0 + $0xbd0] sm:$0xff] }
 0x1aa   :  { %8012 = vmatmul.mubr.bf16.gmra.mrb[180].mxu1 %v16050_v1  ;;  %v16802_v1 = vcombine.high %v375_v22, %v383_v2 }
 0x1ab   :  { %6314 = vmatmul.mubr.bf16.gmra.mrb[80].mxu0 %v16776_v21  ;;  %8021 = vmatprep.mubr.bf16.mxu1 %v16054_v62  ;;  %v391_v62 = vld [vmem:[%s20268_s0 + $0xb90] sm:$0xff] }
 0x1ac   :  { %6323 = vmatprep.mubr.bf16.mxu0 %v16780_v34 }
 0x1ad   :  { %v16794_v10 = vpop.f32.mrb[76].mxu1 }
 0x1ae   :  { %20607 = vst [vmem:[#allocation129_spill] sm:$0xff] %v16794_v10  ;;  %v16796_v8 = vpop.f32.mrb[77].mxu1 }
 0x1af   :  { %20608 = vst [vmem:[#allocation130_spill] sm:$0xff] %v16796_v8  ;;  %v16800_v0 = vpop.f32.mrb[78].mxu1 }
 0x1b0   :  { %20609 = vst [vmem:[#allocation131_spill] sm:$0xff] %v16800_v0  ;;  %v16804_v48 = vpop.f32.mrb[79].mxu1 }
 0x1b1   :  { %20610 = vst [vmem:[#allocation132_spill] sm:$0xff] %v16804_v48  ;;  %v16820_v48 = vcombine.low %v375_v22, %v383_v2  ;;  %v415_v22 = vld [vmem:[%s20268_s0 + $0xc50] sm:$0xff] }
 0x1b2   :  { %8022 = vmatmul.mubr.bf16.gmra.mrb[184].mxu1 %v16074_v43  ;;  %v16824_v43 = vcombine.high %v391_v62, %v399_v28 }
 0x1b3   :  { %6324 = vmatmul.mubr.bf16.gmra.mrb[84].mxu0 %v16798_v20  ;;  %8031 = vmatprep.mubr.bf16.mxu1 %v16078_v40  ;;  %v407_v40 = vld [vmem:[%s20268_s0 + $0xc10] sm:$0xff] }
 0x1b4   :  { %6333 = vmatprep.mubr.bf16.mxu0 %v16802_v1 }
 0x1b5   :  { %v16816_v46 = vpop.f32.mrb[80].mxu1 }
 0x1b6   :  { %20611 = vst [vmem:[#allocation133_spill] sm:$0xff] %v16816_v46  ;;  %v16818_v0 = vpop.f32.mrb[81].mxu1 }
 0x1b7   :  { %20612 = vst [vmem:[#allocation134_spill] sm:$0xff] %v16818_v0  ;;  %v16822_v8 = vpop.f32.mrb[82].mxu1 }
 0x1b8   :  { %20613 = vst [vmem:[#allocation135_spill] sm:$0xff] %v16822_v8  ;;  %v16826_v10 = vpop.f32.mrb[83].mxu1 }
 0x1b9   :  { %20614 = vst [vmem:[#allocation136_spill] sm:$0xff] %v16826_v10  ;;  %v16842_v10 = vcombine.low %v391_v62, %v399_v28  ;;  %v32_v62 = vld [vmem:[%s20268_s0 + $0x58] sm:$0xff] }
 0x1ba   :  { %8032 = vmatmul.mubr.bf16.gmra.mrb[188].mxu1 %v16098_v16  ;;  %v16846_v16 = vcombine.high %v407_v40, %v415_v22 }
 0x1bb   :  { %6334 = vmatmul.mubr.bf16.gmra.mrb[88].mxu0 %v16820_v48  ;;  %8041 = vmatprep.mubr.bf16.mxu1 %v16102_v4  ;;  %v24_v4 = vld [vmem:[%s20268_s0 + $0x18] sm:$0xff] }
 0x1bc   :  { %6343 = vmatprep.mubr.bf16.mxu0 %v16824_v43 }
 0x1bd   :  { %v16838_v2 = vpop.f32.mrb[84].mxu1 }
 0x1be   :  { %20615 = vst [vmem:[#allocation137_spill] sm:$0xff] %v16838_v2  ;;  %v16840_v8 = vpop.f32.mrb[85].mxu1 }
 0x1bf   :  { %20616 = vst [vmem:[#allocation138_spill] sm:$0xff] %v16840_v8  ;;  %v16844_v0 = vpop.f32.mrb[86].mxu1 }
 0x1c0   :  { %20617 = vst [vmem:[#allocation139_spill] sm:$0xff] %v16844_v0  ;;  %v16848_v46 = vpop.f32.mrb[87].mxu1 }
 0x1c1   :  { %20618 = vst [vmem:[#allocation140_spill] sm:$0xff] %v16848_v46  ;;  %v16864_v46 = vcombine.low %v407_v40, %v415_v22  ;;  %v48_v40 = vld [vmem:[%s20268_s0 + $0xd8] sm:$0xff] }
 0x1c2   :  { %8042 = vmatmul.mubr.bf16.gmra.mrb[192].mxu1 %v16122_v50  ;;  %v16868_v50 = vcombine.high %v24_v4, %v32_v62 }
 0x1c3   :  { %6344 = vmatmul.mubr.bf16.gmra.mrb[92].mxu0 %v16842_v10  ;;  %8051 = vmatprep.mubr.bf16.mxu1 %v16126_v45  ;;  %v40_v45 = vld [vmem:[%s20268_s0 + $0x98] sm:$0xff] }
 0x1c4   :  { %6353 = vmatprep.mubr.bf16.mxu0 %v16846_v16 }
 0x1c5   :  { %v16860_v28 = vpop.f32.mrb[88].mxu1 }
 0x1c6   :  { %20619 = vst [vmem:[#allocation141_spill] sm:$0xff] %v16860_v28  ;;  %v16862_v0 = vpop.f32.mrb[89].mxu1 }
 0x1c7   :  { %20620 = vst [vmem:[#allocation142_spill] sm:$0xff] %v16862_v0  ;;  %v16866_v8 = vpop.f32.mrb[90].mxu1 }
 0x1c8   :  { %20621 = vst [vmem:[#allocation143_spill] sm:$0xff] %v16866_v8  ;;  %v16870_v2 = vpop.f32.mrb[91].mxu1 }
 0x1c9   :  { %20622 = vst [vmem:[#allocation144_spill] sm:$0xff] %v16870_v2  ;;  %v16886_v2 = vcombine.low %v24_v4, %v32_v62  ;;  %v14612_v4 = vld [vmem:[%s20267_s1 + $0x428] ss:$16 sps:$4 sm:$0xff]  }
 0x1ca   :  { %8052 = vmatmul.mubr.bf16.gmra.mrb[196].mxu1 %v16140_v53  ;;  %v16893_v53 = vcombine.high %v40_v45, %v48_v40  ;;  %v56_v62 = vld [vmem:[%s20268_s0 + $0x118] sm:$0xff] }
 0x1cb   :  { %6354 = vmatmul.mubr.bf16.gmra.mrb[96].mxu0 %v16864_v46  ;;  %8094 = vmatprep.mubr.bf16.mxu1 %v15317_v55  ;;  %v14609_v55 = vld [vmem:[%s20267_s1 + $0x408] ss:$16 sps:$4 sm:$0xff]  }
 0x1cc   :  { %6396 = vmatprep.mubr.bf16.mxu0 %v16868_v50 }
 0x1cd   :  { %v16882_v22 = vpop.f32.mrb[92].mxu1 }
 0x1ce   :  { %20623 = vst [vmem:[#allocation145_spill] sm:$0xff] %v16882_v22  ;;  %v16884_v8 = vpop.f32.mrb[93].mxu1 }
 0x1cf   :  { %20624 = vst [vmem:[#allocation146_spill] sm:$0xff] %v16884_v8  ;;  %v16888_v0 = vpop.f32.mrb[94].mxu1  ;;  %v16920_v8 = vcombine.low %v40_v45, %v48_v40  ;;  %v14620_v45 = vld [vmem:[%s20267_s1 + $0x46c] ss:$16 sps:$4 sm:$0xff]   ;;  %v14642_v40 = vld [vmem:[%s20267_s1 + $0x800] ss:$16 sps:$4 sm:$0xff]  }
 0x1d0   :  { %20625 = vst [vmem:[#allocation147_spill] sm:$0xff] %v16888_v0  ;;  %v16895_v28 = vpop.f32.mrb[95].mxu1 }
 0x1d1   :  { %20626 = vst [vmem:[#allocation148_spill] sm:$0xff] %v16895_v28  ;;  %v64_v28 = vld [vmem:[%s20268_s0 + $0x158] sm:$0xff] }
 0x1d2   :  { %8095 = vmatmul.mubr.bf16.vlgmr.msra.gmra.mrb[100].mxu1 %v15380_v12  ;;  %v14617_v12 = vld [vmem:[%s20267_s1 + $0x44c] ss:$16 sps:$4 sm:$0xff]   ;;  %v16962_v59 = vcombine.low %v56_v62, %v64_v28 }
 0x1d3   :  { %6397 = vmatmul.mubr.bf16.vlgmr.msra.gmra.mrb[0].mxu0 %v16886_v2  ;;  %8346 = vmatpush1.bf16.msra.mxu1 %v14609_v55 }
 0x1d4   :  { %6406 = vmatprep.mubr.bf16.mxu0 %v16893_v53  ;;  %8104 = vmatprep.mubr.bf16.mxu1 %v15387_v15 }
 0x1d5   :  { %8347 = vmatprep.subr.bf16.mxu1 %v14614_v44  ;;  %v16916_v55 = vpop.f32.mrb[96].mxu1  ;;  %v16924_v44 = vcombine.high %v56_v62, %v64_v28  ;;  %v14651_v28 = vld [vmem:[%s20267_s1 + $0x840] ss:$16 sps:$4 sm:$0xff]  }
 0x1d6   :  { %20627 = vst [vmem:[#allocation149_spill] sm:$0xff] %v16916_v55  ;;  %v16918_v0 = vpop.f32.mrb[97].mxu1  ;;  %v14644_v55 = vld [vmem:[%s20267_s1 + $0x804] ss:$16 sps:$4 sm:$0xff]  }
 0x1d7   :  { %20628 = vst [vmem:[#allocation150_spill] sm:$0xff] %v16918_v0  ;;  %v16922_v15 = vpop.f32.mrb[98].mxu1  ;;  %8348 = vmatpush1.bf16.msra.mxu1 %v14612_v4  ;;  %20630 = vst [vmem:[#allocation152_spill] sm:$0xff] %v16924_v44  ;;  %v20632_v4 = vld [vmem:[#allocation2_spill] sm:$0xff]  ;;  %v80_v0 = vld [vmem:[%s20268_s0 + $0x1d8] sm:$0xff]  ;;  %6647 = vmatprep.subr.bf16.mxu0 %v14644_v55 }
 0x1d8   :  { %20629 = vst [vmem:[#allocation151_spill] sm:$0xff] %v16922_v15  ;;  %v16926_v22 = vpop.f32.mrb[99].mxu1  ;;  %8349 = vmatprep.subr.bf16.mxu1 %v14617_v12  ;;  %v14650_v12 = vld [vmem:[%s20267_s1 + $0x824] ss:$16 sps:$4 sm:$0xff]   ;;  %v72_v15 = vld [vmem:[%s20268_s0 + $0x198] sm:$0xff]  ;;  %6648 = vmatpush1.bf16.msra.mxu0 %v14642_v40  ;;  %20634 = vst [vmem:[#allocation2_spill] sm:$0xff] %v16962_v59 }
 0x1d9   :  { %20631 = vst [vmem:[#allocation153_spill] sm:$0xff] %v16926_v22  ;;  %v20633_v22 = vld [vmem:[#allocation3_spill] sm:$0xff]  ;;  %6649 = vmatprep.subr.bf16.mxu0 %v14650_v12  ;;  %v14653_v55 = vld [vmem:[%s20267_s1 + $0x844] ss:$16 sps:$4 sm:$0xff]   ;;  %v20637_v12 = vld [vmem:[#allocation5_spill] sm:$0xff] }
 0x1da   :  { %8105 = vmatmul.mubr.bf16.gmra.mrb[104].mxu1 %v20632_v4  ;;  %v14618_v4 = vld [vmem:[%s20267_s1 + $0x468] ss:$16 sps:$4 sm:$0xff]   ;;  %v20636_v62 = vld [vmem:[#allocation4_spill] sm:$0xff] }
 0x1db   :  { %6407 = vmatmul.mubr.bf16.gmra.mrb[4].mxu0 %v16920_v8  ;;  %8114 = vmatprep.mubr.bf16.mxu1 %v20633_v22  ;;  %v14623_v22 = vld [vmem:[%s20267_s1 + $0x48c] ss:$16 sps:$4 sm:$0xff]   ;;  %v14656_v40 = vld [vmem:[%s20267_s1 + $0x864] ss:$16 sps:$4 sm:$0xff]  }
 0x1dc   :  { %6416 = vmatprep.mubr.bf16.mxu0 %v16924_v44  ;;  %8350 = vmatpush1.bf16.msra.mxu1 %v14615_v35  ;;  %v16964_v44 = vcombine.high %v72_v15, %v80_v0  ;;  %v14621_v35 = vld [vmem:[%s20267_s1 + $0x488] ss:$16 sps:$4 sm:$0xff]  }
 0x1dd   :  { %8351 = vmatprep.subr.bf16.mxu1 %v14620_v45  ;;  %v14626_v45 = vld [vmem:[%s20267_s1 + $0x4ac] ss:$16 sps:$4 sm:$0xff]   ;;  %6650 = vmatpush1.bf16.msra.mxu0 %v14648_v58 }
 0x1de   :  { %20635 = vst [vmem:[#allocation3_spill] sm:$0xff] %v16964_v44  ;;  %v88_v58 = vld [vmem:[%s20268_s0 + $0x218] sm:$0xff]  ;;  %6651 = vmatprep.subr.bf16.mxu0 %v14653_v55  ;;  %v14662_v55 = vld [vmem:[%s20267_s1 + $0x884] ss:$16 sps:$4 sm:$0xff]  }
 0x1e0   :  { %8352 = vmatpush1.bf16.msra.mxu1 %v14618_v4  ;;  %v96_v4 = vld [vmem:[%s20268_s0 + $0x258] sm:$0xff] }
 0x1e1   :  { %8353 = vmatprep.subr.bf16.mxu1 %v14623_v22  ;;  %v14624_v22 = vld [vmem:[%s20267_s1 + $0x4a8] ss:$16 sps:$4 sm:$0xff]   ;;  %6652 = vmatpush1.bf16.msra.mxu0 %v14651_v28  ;;  %v14665_v28 = vld [vmem:[%s20267_s1 + $0x8a4] ss:$16 sps:$4 sm:$0xff]  }
 0x1e2   :  { %8115 = vmatmul.mubr.bf16.gmra.mrb[108].mxu1 %v20636_v62  ;;  %v14629_v62 = vld [vmem:[%s20267_s1 + $0x4cc] ss:$16 sps:$4 sm:$0xff]   ;;  %6653 = vmatprep.subr.bf16.mxu0 %v14656_v40 }
 0x1e3   :  { %6417 = vmatmul.mubr.bf16.gmra.mrb[8].mxu0 %v16962_v59  ;;  %8124 = vmatprep.mubr.bf16.mxu1 %v20637_v12  ;;  %v14654_v12 = vld [vmem:[%s20267_s1 + $0x860] ss:$16 sps:$4 sm:$0xff]   ;;  %v17002_v59 = vcombine.high %v88_v58, %v96_v4  ;;  %v20641_v40 = vld [vmem:[#allocation7_spill] sm:$0xff] }
 0x1e4   :  { %6426 = vmatprep.mubr.bf16.mxu0 %v16964_v44  ;;  %8354 = vmatpush1.bf16.msra.mxu1 %v14621_v35  ;;  %v17000_v44 = vcombine.low %v72_v15, %v80_v0  ;;  %v14627_v35 = vld [vmem:[%s20267_s1 + $0x4c8] ss:$16 sps:$4 sm:$0xff]   ;;  %v14660_v0 = vld [vmem:[%s20267_s1 + $0x880] ss:$16 sps:$4 sm:$0xff]  }
 0x1e5   :  { %8355 = vmatprep.subr.bf16.mxu1 %v14626_v45  ;;  %20639 = vst [vmem:[#allocation5_spill] sm:$0xff] %v17002_v59  ;;  %v14632_v45 = vld [vmem:[%s20267_s1 + $0x4ec] ss:$16 sps:$4 sm:$0xff]   ;;  %6654 = vmatpush1.bf16.msra.mxu0 %v14654_v12  ;;  %v20640_v15 = vld [vmem:[#allocation6_spill] sm:$0xff]  ;;  %v14630_v12 = vld [vmem:[%s20267_s1 + $0x4e8] ss:$16 sps:$4 sm:$0xff]  }
 0x1e6   :  { %20638 = vst [vmem:[#allocation4_spill] sm:$0xff] %v17000_v44  ;;  %6655 = vmatprep.subr.bf16.mxu0 %v14662_v55  ;;  %v14668_v55 = vld [vmem:[%s20267_s1 + $0x8c4] ss:$16 sps:$4 sm:$0xff]  }
 0x1e8   :  { %8356 = vmatpush1.bf16.msra.mxu1 %v14624_v22  ;;  %v104_v22 = vld [vmem:[%s20268_s0 + $0x298] sm:$0xff] }
 0x1e9   :  { %8357 = vmatprep.subr.bf16.mxu1 %v14629_v62  ;;  %v112_v62 = vld [vmem:[%s20268_s0 + $0x2d8] sm:$0xff]  ;;  %6656 = vmatpush1.bf16.msra.mxu0 %v14660_v0 }
 0x1ea   :  { %8125 = vmatmul.mubr.bf16.gmra.mrb[112].mxu1 %v20640_v15  ;;  %v14635_v15 = vld [vmem:[%s20267_s1 + $0x50c] ss:$16 sps:$4 sm:$0xff]   ;;  %6657 = vmatprep.subr.bf16.mxu0 %v14665_v28  ;;  %v14674_v28 = vld [vmem:[%s20267_s1 + $0x8e4] ss:$16 sps:$4 sm:$0xff]  }
 0x1eb   :  { %6427 = vmatmul.mubr.bf16.gmra.mrb[12].mxu0 %v17000_v44  ;;  %8134 = vmatprep.mubr.bf16.mxu1 %v20641_v40  ;;  %v14663_v40 = vld [vmem:[%s20267_s1 + $0x8a0] ss:$16 sps:$4 sm:$0xff]   ;;  %v17040_v44 = vcombine.high %v104_v22, %v112_v62  ;;  %v20645_v0 = vld [vmem:[#allocation9_spill] sm:$0xff] }
 0x1ec   :  { %6436 = vmatprep.mubr.bf16.mxu0 %v17002_v59  ;;  %8358 = vmatpush1.bf16.msra.mxu1 %v14627_v35  ;;  %v17038_v59 = vcombine.low %v88_v58, %v96_v4  ;;  %v14633_v35 = vld [vmem:[%s20267_s1 + $0x508] ss:$16 sps:$4 sm:$0xff]   ;;  %v14666_v58 = vld [vmem:[%s20267_s1 + $0x8c0] ss:$16 sps:$4 sm:$0xff]  }
 0x1ed   :  { %8359 = vmatprep.subr.bf16.mxu1 %v14632_v45  ;;  %20643 = vst [vmem:[#allocation7_spill] sm:$0xff] %v17040_v44  ;;  %v14638_v45 = vld [vmem:[%s20267_s1 + $0x52c] ss:$16 sps:$4 sm:$0xff]   ;;  %6658 = vmatpush1.bf16.msra.mxu0 %v14663_v40  ;;  %v20644_v4 = vld [vmem:[#allocation8_spill] sm:$0xff]  ;;  %v14636_v40 = vld [vmem:[%s20267_s1 + $0x528] ss:$16 sps:$4 sm:$0xff]  }
 0x1ee   :  { %20642 = vst [vmem:[#allocation6_spill] sm:$0xff] %v17038_v59  ;;  %6659 = vmatprep.subr.bf16.mxu0 %v14668_v55  ;;  %v14677_v55 = vld [vmem:[%s20267_s1 + $0x904] ss:$16 sps:$4 sm:$0xff]  }
 0x1f0   :  { %8360 = vmatpush1.bf16.msra.mxu1 %v14630_v12  ;;  %v120_v12 = vld [vmem:[%s20268_s0 + $0x318] sm:$0xff] }
 0x1f1   :  { %8361 = vmatprep.subr.bf16.mxu1 %v14635_v15  ;;  %v128_v15 = vld [vmem:[%s20268_s0 + $0x358] sm:$0xff]  ;;  %6660 = vmatpush1.bf16.msra.mxu0 %v14666_v58  ;;  %v14680_v58 = vld [vmem:[%s20267_s1 + $0x924] ss:$16 sps:$4 sm:$0xff]  }
 0x1f2   :  { %8135 = vmatmul.mubr.bf16.gmra.mrb[116].mxu1 %v20644_v4  ;;  %v14641_v4 = vld [vmem:[%s20267_s1 + $0x54c] ss:$16 sps:$4 sm:$0xff]   ;;  %6661 = vmatprep.subr.bf16.mxu0 %v14674_v28 }
 0x1f3   :  { %6437 = vmatmul.mubr.bf16.gmra.mrb[16].mxu0 %v17038_v59  ;;  %8144 = vmatprep.mubr.bf16.mxu1 %v20645_v0  ;;  %v14672_v0 = vld [vmem:[%s20267_s1 + $0x8e0] ss:$16 sps:$4 sm:$0xff]   ;;  %v17078_v59 = vcombine.high %v120_v12, %v128_v15  ;;  %v20649_v28 = vld [vmem:[#allocation11_spill] sm:$0xff] }
 0x1f4   :  { %6446 = vmatprep.mubr.bf16.mxu0 %v17040_v44  ;;  %8362 = vmatpush1.bf16.msra.mxu1 %v14633_v35  ;;  %v17076_v44 = vcombine.low %v104_v22, %v112_v62  ;;  %v14639_v35 = vld [vmem:[%s20267_s1 + $0x548] ss:$16 sps:$4 sm:$0xff]   ;;  %v14675_v22 = vld [vmem:[%s20267_s1 + $0x900] ss:$16 sps:$4 sm:$0xff]  }
 0x1f5   :  { %8363 = vmatprep.subr.bf16.mxu1 %v14638_v45  ;;  %20647 = vst [vmem:[#allocation9_spill] sm:$0xff] %v17078_v59  ;;  %v14647_v45 = vld [vmem:[%s20267_s1 + $0x56c] ss:$16 sps:$4 sm:$0xff]   ;;  %6662 = vmatpush1.bf16.msra.mxu0 %v14672_v0  ;;  %v20648_v62 = vld [vmem:[#allocation10_spill] sm:$0xff]  ;;  %v14645_v0 = vld [vmem:[%s20267_s1 + $0x568] ss:$16 sps:$4 sm:$0xff]  }
 0x1f6   :  { %20646 = vst [vmem:[#allocation8_spill] sm:$0xff] %v17076_v44  ;;  %6663 = vmatprep.subr.bf16.mxu0 %v14677_v55  ;;  %v14686_v55 = vld [vmem:[%s20267_s1 + $0x944] ss:$16 sps:$4 sm:$0xff]  }
 0x1f8   :  { %8364 = vmatpush1.bf16.msra.mxu1 %v14636_v40  ;;  %v136_v40 = vld [vmem:[%s20268_s0 + $0x398] sm:$0xff] }
 0x1f9   :  { %8365 = vmatprep.subr.bf16.mxu1 %v14641_v4  ;;  %v144_v4 = vld [vmem:[%s20268_s0 + $0x3d8] sm:$0xff]  ;;  %6664 = vmatpush1.bf16.msra.mxu0 %v14675_v22  ;;  %v14689_v22 = vld [vmem:[%s20267_s1 + $0x964] ss:$16 sps:$4 sm:$0xff]  }
 0x1fa   :  { %8145 = vmatmul.mubr.bf16.gmra.mrb[120].mxu1 %v20648_v62  ;;  %v14659_v62 = vld [vmem:[%s20267_s1 + $0x58c] ss:$16 sps:$4 sm:$0xff]   ;;  %6665 = vmatprep.subr.bf16.mxu0 %v14680_v58 }
 0x1fb   :  { %6447 = vmatmul.mubr.bf16.gmra.mrb[20].mxu0 %v17076_v44  ;;  %8154 = vmatprep.mubr.bf16.mxu1 %v20649_v28  ;;  %v14678_v28 = vld [vmem:[%s20267_s1 + $0x920] ss:$16 sps:$4 sm:$0xff]   ;;  %v17116_v44 = vcombine.high %v136_v40, %v144_v4  ;;  %v20653_v58 = vld [vmem:[#allocation13_spill] sm:$0xff] }
 0x1fc   :  { %6456 = vmatprep.mubr.bf16.mxu0 %v17078_v59  ;;  %8366 = vmatpush1.bf16.msra.mxu1 %v14639_v35  ;;  %v17114_v59 = vcombine.low %v120_v12, %v128_v15  ;;  %v14657_v35 = vld [vmem:[%s20267_s1 + $0x588] ss:$16 sps:$4 sm:$0xff]   ;;  %v14684_v12 = vld [vmem:[%s20267_s1 + $0x940] ss:$16 sps:$4 sm:$0xff]  }
 0x1fd   :  { %8367 = vmatprep.subr.bf16.mxu1 %v14647_v45  ;;  %20651 = vst [vmem:[#allocation11_spill] sm:$0xff] %v17116_v44  ;;  %v14671_v45 = vld [vmem:[%s20267_s1 + $0x5ac] ss:$16 sps:$4 sm:$0xff]   ;;  %6666 = vmatpush1.bf16.msra.mxu0 %v14678_v28  ;;  %v20652_v15 = vld [vmem:[#allocation12_spill] sm:$0xff]  ;;  %v14669_v28 = vld [vmem:[%s20267_s1 + $0x5a8] ss:$16 sps:$4 sm:$0xff]  }
 0x1fe   :  { %20650 = vst [vmem:[#allocation10_spill] sm:$0xff] %v17114_v59  ;;  %6667 = vmatprep.subr.bf16.mxu0 %v14686_v55  ;;  %v14692_v55 = vld [vmem:[%s20267_s1 + $0x984] ss:$16 sps:$4 sm:$0xff]  }
 0x200   :  { %8368 = vmatpush1.bf16.msra.mxu1 %v14645_v0  ;;  %v152_v0 = vld [vmem:[%s20268_s0 + $0x418] sm:$0xff] }
 0x201   :  { %8369 = vmatprep.subr.bf16.mxu1 %v14659_v62  ;;  %v160_v62 = vld [vmem:[%s20268_s0 + $0x458] sm:$0xff]  ;;  %6668 = vmatpush1.bf16.msra.mxu0 %v14684_v12  ;;  %v20656_v12 = vld [vmem:[#allocation15_spill] sm:$0xff] }
 0x202   :  { %8155 = vmatmul.mubr.bf16.gmra.mrb[124].mxu1 %v20652_v15  ;;  %v14683_v15 = vld [vmem:[%s20267_s1 + $0x5cc] ss:$16 sps:$4 sm:$0xff]   ;;  %6669 = vmatprep.subr.bf16.mxu0 %v14689_v22 }
 0x203   :  { %6457 = vmatmul.mubr.bf16.gmra.mrb[24].mxu0 %v17114_v59  ;;  %8164 = vmatprep.mubr.bf16.mxu1 %v20653_v58  ;;  %v14687_v58 = vld [vmem:[%s20267_s1 + $0x960] ss:$16 sps:$4 sm:$0xff]   ;;  %v17154_v59 = vcombine.high %v152_v0, %v160_v62  ;;  %v14698_v22 = vld [vmem:[%s20267_s1 + $0x5ec] ss:$16 sps:$4 sm:$0xff]  }
 0x204   :  { %6466 = vmatprep.mubr.bf16.mxu0 %v17116_v44  ;;  %8370 = vmatpush1.bf16.msra.mxu1 %v14657_v35  ;;  %v17152_v44 = vcombine.low %v136_v40, %v144_v4  ;;  %v14681_v35 = vld [vmem:[%s20267_s1 + $0x5c8] ss:$16 sps:$4 sm:$0xff]   ;;  %v20655_v40 = vld [vmem:[#allocation14_spill] sm:$0xff] }
 0x205   :  { %8371 = vmatprep.subr.bf16.mxu1 %v14671_v45  ;;  %20654 = vst [vmem:[#allocation12_spill] sm:$0xff] %v17154_v59  ;;  %6670 = vmatpush1.bf16.msra.mxu0 %v14687_v58  ;;  %v14690_v45 = vld [vmem:[%s20267_s1 + $0x980] ss:$16 sps:$4 sm:$0xff]   ;;  %v14695_v4 = vld [vmem:[%s20267_s1 + $0x9a4] ss:$16 sps:$4 sm:$0xff]  }
 0x206   :  { %6671 = vmatprep.subr.bf16.mxu0 %v14692_v55  ;;  %v14696_v58 = vld [vmem:[%s20267_s1 + $0x5e8] ss:$16 sps:$4 sm:$0xff]   ;;  %v14699_v55 = vld [vmem:[%s20267_s1 + $0x9c0] ss:$16 sps:$4 sm:$0xff]  }
 0x208   :  { %8372 = vmatpush1.bf16.msra.mxu1 %v14669_v28  ;;  %v168_v28 = vld [vmem:[%s20268_s0 + $0x498] sm:$0xff] }
 0x209   :  { %8373 = vmatprep.subr.bf16.mxu1 %v14683_v15  ;;  %v176_v15 = vld [vmem:[%s20268_s0 + $0x4d8] sm:$0xff]  ;;  %6672 = vmatpush1.bf16.msra.mxu0 %v14690_v45  ;;  %v20659_v45 = vld [vmem:[#allocation16_spill] sm:$0xff] }
 0x20a   :  { %8165 = vmatmul.mubr.bf16.gmra.mrb[128].mxu1 %v20655_v40  ;;  %v14693_v40 = vld [vmem:[%s20267_s1 + $0x9a0] ss:$16 sps:$4 sm:$0xff]   ;;  %6673 = vmatprep.subr.bf16.mxu0 %v14695_v4  ;;  %v184_v4 = vld [vmem:[%s20268_s0 + $0x518] sm:$0xff] }
 0x20b   :  { %6467 = vmatmul.mubr.bf16.gmra.mrb[28].mxu0 %v17152_v44  ;;  %8174 = vmatprep.mubr.bf16.mxu1 %v20656_v12  ;;  %v17187_v12 = vcombine.low %v152_v0, %v160_v62  ;;  %v14704_v0 = vld [vmem:[%s20267_s1 + $0x9e4] ss:$16 sps:$4 sm:$0xff]   ;;  %v20660_v62 = vld [vmem:[#allocation17_spill] sm:$0xff] }
 0x20c   :  { %6476 = vmatprep.mubr.bf16.mxu0 %v17154_v59  ;;  %8374 = vmatpush1.bf16.msra.mxu1 %v14681_v35  ;;  %v17189_v59 = vcombine.high %v168_v28, %v176_v15  ;;  %v14701_v35 = vld [vmem:[%s20267_s1 + $0x9c4] ss:$16 sps:$4 sm:$0xff]  }
 0x20d   :  { %8375 = vmatprep.subr.bf16.mxu1 %v14698_v22  ;;  %20657 = vst [vmem:[#allocation13_spill] sm:$0xff] %v17187_v12  ;;  %6674 = vmatpush1.bf16.msra.mxu0 %v14693_v40  ;;  %v192_v22 = vld [vmem:[%s20268_s0 + $0x558] sm:$0xff]  ;;  %v17213_v40 = vcombine.low %v168_v28, %v176_v15 }
 0x20e   :  { %20658 = vst [vmem:[#allocation14_spill] sm:$0xff] %v17189_v59  ;;  %6675 = vmatprep.subr.bf16.mxu0 %v14701_v35  ;;  %v20664_v35 = vld [vmem:[#allocation19_spill] sm:$0xff]  ;;  %v200_v28 = vld [vmem:[%s20268_s0 + $0x598] sm:$0xff] }
 0x20f   :  { %20661 = vst [vmem:[#allocation15_spill] sm:$0xff] %v17213_v40  ;;  %v208_v15 = vld [vmem:[%s20268_s0 + $0x5d8] sm:$0xff] }
 0x210   :  { %8376 = vmatpush1.bf16.msra.mxu1 %v14696_v58  ;;  %v14702_v58 = vld [vmem:[%s20267_s1 + $0x9e0] ss:$16 sps:$4 sm:$0xff]  }
 0x211   :  { %6676 = vmatpush1.bf16.msra.mxu0 %v14699_v55  ;;  %v17230_v55 = vcombine.low %v184_v4, %v192_v22 }
 0x212   :  { %8175 = vmatmul.mubr.bf16.gmra.mrb[132].mxu1 %v20659_v45  ;;  %6677 = vmatprep.subr.bf16.mxu0 %v14704_v0  ;;  %v17215_v45 = vcombine.high %v184_v4, %v192_v22  ;;  %v17232_v0 = vcombine.high %v200_v28, %v208_v15  ;;  %v17244_v4 = vcombine.low %v200_v28, %v208_v15 }
 0x213   :  { %6477 = vmatmul.mubr.bf16.gmra.mrb[32].mxu0 %v17187_v12  ;;  %8184 = vmatprep.mubr.bf16.mxu1 %v20660_v62  ;;  %v20663_v62 = vld [vmem:[#allocation18_spill] sm:$0xff]  ;;  %20665 = vst [vmem:[#allocation17_spill] sm:$0xff] %v17230_v55 }
 0x214   :  { %6486 = vmatprep.mubr.bf16.mxu0 %v17189_v59  ;;  %20662 = vst [vmem:[#allocation16_spill] sm:$0xff] %v17215_v45  ;;  %v14707_v59 = vld [vmem:[%s20267_s1 + $0x60c] ss:$16 sps:$4 sm:$0xff]   ;;  %20666 = vst [vmem:[#allocation18_spill] sm:$0xff] %v17232_v0 }
 0x215   :  { %6678 = vmatpush1.bf16.msra.mxu0 %v14702_v58  ;;  %8628 = vmatprep.subr.bf16.mxu1 %v14707_v59  ;;  %v20667_v58 = vld [vmem:[#allocation20_spill] sm:$0xff]  ;;  %v224_v59 = vld [vmem:[%s20268_s0 + $0x658] sm:$0xff]  ;;  %20669 = vst [vmem:[#allocation19_spill] sm:$0xff] %v17244_v4 }
 0x21a   :  { %8185 = vmatmul.mubr.bf16.gmra.mrb[136].mxu1 %v20663_v62  ;;  %v20668_v62 = vld [vmem:[#allocation21_spill] sm:$0xff] }
 0x21b   :  { %6487 = vmatmul.mubr.bf16.gmra.mrb[36].mxu0 %v17213_v40  ;;  %8194 = vmatprep.mubr.bf16.mxu1 %v20664_v35  ;;  %v216_v35 = vld [vmem:[%s20268_s0 + $0x618] sm:$0xff]  ;;  %v81_v40 = vld [vmem:[%s20268_s0 + $0x1e0] sm:$0xff] }
 0x21c   :  { %6496 = vmatprep.mubr.bf16.mxu0 %v17215_v45  ;;  %v17246_v22 = vcombine.high %v216_v35, %v224_v59  ;;  %v17258_v28 = vcombine.low %v216_v35, %v224_v59  ;;  %v73_v45 = vld [vmem:[%s20268_s0 + $0x1a0] sm:$0xff] }
 0x21d   :  { %v17506_v12 = vcombine.high %v73_v45, %v81_v40 }
 0x21e   :  { %20670 = vst [vmem:[#allocation20_spill] sm:$0xff] %v17246_v22  ;;  %20673 = vst [vmem:[#allocation21_spill] sm:$0xff] %v17258_v28 }
 0x222   :  { %8195 = vmatmul.mubr.bf16.gmra.mrb[140].mxu1 %v20667_v58  ;;  %v20672_v58 = vld [vmem:[#allocation23_spill] sm:$0xff] }
 0x223   :  { %6497 = vmatmul.mubr.bf16.gmra.mrb[40].mxu0 %v17230_v55  ;;  %8204 = vmatprep.mubr.bf16.mxu1 %v20668_v62  ;;  %v20671_v55 = vld [vmem:[#allocation22_spill] sm:$0xff]  ;;  %v232_v62 = vld [vmem:[%s20268_s0 + $0x698] sm:$0xff] }
 0x224   :  { %6506 = vmatprep.mubr.bf16.mxu0 %v17232_v0  ;;  %v240_v0 = vld [vmem:[%s20268_s0 + $0x6d8] sm:$0xff] }
 0x225   :  { %v17260_v15 = vcombine.high %v232_v62, %v240_v0  ;;  %v17272_v35 = vcombine.low %v232_v62, %v240_v0 }
 0x227   :  { %20674 = vst [vmem:[#allocation22_spill] sm:$0xff] %v17260_v15  ;;  %20677 = vst [vmem:[#allocation23_spill] sm:$0xff] %v17272_v35 }
 0x22a   :  { %8205 = vmatmul.mubr.bf16.gmra.mrb[144].mxu1 %v20671_v55  ;;  %v20676_v55 = vld [vmem:[#allocation25_spill] sm:$0xff] }
 0x22b   :  { %6507 = vmatmul.mubr.bf16.gmra.mrb[44].mxu0 %v17244_v4  ;;  %8214 = vmatprep.mubr.bf16.mxu1 %v20672_v58  ;;  %v20675_v4 = vld [vmem:[#allocation24_spill] sm:$0xff]  ;;  %v248_v58 = vld [vmem:[%s20268_s0 + $0x718] sm:$0xff] }
 0x22c   :  { %6516 = vmatprep.mubr.bf16.mxu0 %v17246_v22  ;;  %v256_v22 = vld [vmem:[%s20268_s0 + $0x758] sm:$0xff] }
 0x22d   :  { %v17274_v59 = vcombine.high %v248_v58, %v256_v22  ;;  %v17286_v0 = vcombine.low %v248_v58, %v256_v22 }
 0x22f   :  { %20678 = vst [vmem:[#allocation24_spill] sm:$0xff] %v17274_v59  ;;  %20681 = vst [vmem:[#allocation25_spill] sm:$0xff] %v17286_v0 }
 0x232   :  { %8215 = vmatmul.mubr.bf16.gmra.mrb[148].mxu1 %v20675_v4  ;;  %v20680_v4 = vld [vmem:[#allocation27_spill] sm:$0xff] }
 0x233   :  { %6517 = vmatmul.mubr.bf16.gmra.mrb[48].mxu0 %v17258_v28  ;;  %8224 = vmatprep.mubr.bf16.mxu1 %v20676_v55  ;;  %v20679_v28 = vld [vmem:[#allocation26_spill] sm:$0xff]  ;;  %v264_v55 = vld [vmem:[%s20268_s0 + $0x798] sm:$0xff] }
 0x234   :  { %6526 = vmatprep.mubr.bf16.mxu0 %v17260_v15  ;;  %v272_v15 = vld [vmem:[%s20268_s0 + $0x7d8] sm:$0xff] }
 0x235   :  { %v17288_v62 = vcombine.high %v264_v55, %v272_v15  ;;  %v17300_v22 = vcombine.low %v264_v55, %v272_v15 }
 0x237   :  { %20682 = vst [vmem:[#allocation26_spill] sm:$0xff] %v17288_v62  ;;  %20685 = vst [vmem:[#allocation27_spill] sm:$0xff] %v17300_v22 }
 0x23a   :  { %8225 = vmatmul.mubr.bf16.gmra.mrb[152].mxu1 %v20679_v28  ;;  %v20684_v28 = vld [vmem:[#allocation29_spill] sm:$0xff] }
 0x23b   :  { %6527 = vmatmul.mubr.bf16.gmra.mrb[52].mxu0 %v17272_v35  ;;  %8234 = vmatprep.mubr.bf16.mxu1 %v20680_v4  ;;  %v20683_v35 = vld [vmem:[#allocation28_spill] sm:$0xff]  ;;  %v280_v4 = vld [vmem:[%s20268_s0 + $0x818] sm:$0xff] }
 0x23c   :  { %6536 = vmatprep.mubr.bf16.mxu0 %v17274_v59  ;;  %v288_v59 = vld [vmem:[%s20268_s0 + $0x858] sm:$0xff] }
 0x23d   :  { %v17302_v58 = vcombine.high %v280_v4, %v288_v59  ;;  %v17314_v15 = vcombine.low %v280_v4, %v288_v59 }
 0x23f   :  { %20686 = vst [vmem:[#allocation28_spill] sm:$0xff] %v17302_v58  ;;  %20689 = vst [vmem:[#allocation29_spill] sm:$0xff] %v17314_v15 }
 0x242   :  { %8235 = vmatmul.mubr.bf16.gmra.mrb[156].mxu1 %v20683_v35  ;;  %v20688_v35 = vld [vmem:[#allocation31_spill] sm:$0xff] }
 0x243   :  { %6537 = vmatmul.mubr.bf16.gmra.mrb[56].mxu0 %v17286_v0  ;;  %8244 = vmatprep.mubr.bf16.mxu1 %v20684_v28  ;;  %v20687_v0 = vld [vmem:[#allocation30_spill] sm:$0xff]  ;;  %v296_v28 = vld [vmem:[%s20268_s0 + $0x898] sm:$0xff] }
 0x244   :  { %6546 = vmatprep.mubr.bf16.mxu0 %v17288_v62  ;;  %v304_v62 = vld [vmem:[%s20268_s0 + $0x8d8] sm:$0xff] }
 0x245   :  { %v17316_v55 = vcombine.high %v296_v28, %v304_v62  ;;  %v17328_v59 = vcombine.low %v296_v28, %v304_v62 }
 0x247   :  { %20690 = vst [vmem:[#allocation30_spill] sm:$0xff] %v17316_v55  ;;  %20693 = vst [vmem:[#allocation31_spill] sm:$0xff] %v17328_v59 }
 0x24a   :  { %8245 = vmatmul.mubr.bf16.gmra.mrb[160].mxu1 %v20687_v0  ;;  %v20692_v0 = vld [vmem:[#allocation33_spill] sm:$0xff] }
 0x24b   :  { %6547 = vmatmul.mubr.bf16.gmra.mrb[60].mxu0 %v17300_v22  ;;  %8254 = vmatprep.mubr.bf16.mxu1 %v20688_v35  ;;  %v20691_v22 = vld [vmem:[#allocation32_spill] sm:$0xff]  ;;  %v312_v35 = vld [vmem:[%s20268_s0 + $0x918] sm:$0xff] }
 0x24c   :  { %6556 = vmatprep.mubr.bf16.mxu0 %v17302_v58  ;;  %v320_v58 = vld [vmem:[%s20268_s0 + $0x958] sm:$0xff] }
 0x24d   :  { %v17330_v4 = vcombine.high %v312_v35, %v320_v58  ;;  %v17342_v62 = vcombine.low %v312_v35, %v320_v58 }
 0x24f   :  { %20694 = vst [vmem:[#allocation32_spill] sm:$0xff] %v17330_v4  ;;  %20697 = vst [vmem:[#allocation33_spill] sm:$0xff] %v17342_v62 }
 0x252   :  { %8255 = vmatmul.mubr.bf16.gmra.mrb[164].mxu1 %v20691_v22  ;;  %v20696_v22 = vld [vmem:[#allocation35_spill] sm:$0xff] }
 0x253   :  { %6557 = vmatmul.mubr.bf16.gmra.mrb[64].mxu0 %v17314_v15  ;;  %8264 = vmatprep.mubr.bf16.mxu1 %v20692_v0  ;;  %v20695_v15 = vld [vmem:[#allocation34_spill] sm:$0xff]  ;;  %v328_v0 = vld [vmem:[%s20268_s0 + $0x998] sm:$0xff] }
 0x254   :  { %6566 = vmatprep.mubr.bf16.mxu0 %v17316_v55  ;;  %v336_v55 = vld [vmem:[%s20268_s0 + $0x9d8] sm:$0xff] }
 0x255   :  { %v17344_v28 = vcombine.high %v328_v0, %v336_v55  ;;  %v17356_v58 = vcombine.low %v328_v0, %v336_v55 }
 0x257   :  { %20698 = vst [vmem:[#allocation34_spill] sm:$0xff] %v17344_v28  ;;  %20701 = vst [vmem:[#allocation35_spill] sm:$0xff] %v17356_v58 }
 0x25a   :  { %8265 = vmatmul.mubr.bf16.gmra.mrb[168].mxu1 %v20695_v15  ;;  %v20700_v15 = vld [vmem:[#allocation37_spill] sm:$0xff] }
 0x25b   :  { %6567 = vmatmul.mubr.bf16.gmra.mrb[68].mxu0 %v17328_v59  ;;  %8274 = vmatprep.mubr.bf16.mxu1 %v20696_v22  ;;  %v20699_v59 = vld [vmem:[#allocation36_spill] sm:$0xff]  ;;  %v344_v22 = vld [vmem:[%s20268_s0 + $0xa18] sm:$0xff] }
 0x25c   :  { %6576 = vmatprep.mubr.bf16.mxu0 %v17330_v4  ;;  %v352_v4 = vld [vmem:[%s20268_s0 + $0xa58] sm:$0xff] }
 0x25d   :  { %v17358_v35 = vcombine.high %v344_v22, %v352_v4  ;;  %v17370_v55 = vcombine.low %v344_v22, %v352_v4 }
 0x25f   :  { %20702 = vst [vmem:[#allocation36_spill] sm:$0xff] %v17358_v35  ;;  %20705 = vst [vmem:[#allocation37_spill] sm:$0xff] %v17370_v55 }
 0x262   :  { %8275 = vmatmul.mubr.bf16.gmra.mrb[172].mxu1 %v20699_v59  ;;  %v20704_v59 = vld [vmem:[#allocation39_spill] sm:$0xff] }
 0x263   :  { %6577 = vmatmul.mubr.bf16.gmra.mrb[72].mxu0 %v17342_v62  ;;  %8284 = vmatprep.mubr.bf16.mxu1 %v20700_v15  ;;  %v20703_v62 = vld [vmem:[#allocation38_spill] sm:$0xff]  ;;  %v360_v15 = vld [vmem:[%s20268_s0 + $0xa98] sm:$0xff] }
 0x264   :  { %6586 = vmatprep.mubr.bf16.mxu0 %v17344_v28  ;;  %v368_v28 = vld [vmem:[%s20268_s0 + $0xad8] sm:$0xff] }
 0x265   :  { %v17372_v0 = vcombine.high %v360_v15, %v368_v28  ;;  %v17384_v4 = vcombine.low %v360_v15, %v368_v28 }
 0x267   :  { %20706 = vst [vmem:[#allocation38_spill] sm:$0xff] %v17372_v0  ;;  %20709 = vst [vmem:[#allocation39_spill] sm:$0xff] %v17384_v4 }
 0x26a   :  { %8285 = vmatmul.mubr.bf16.gmra.mrb[176].mxu1 %v20703_v62  ;;  %v20708_v62 = vld [vmem:[#allocation41_spill] sm:$0xff] }
 0x26b   :  { %6587 = vmatmul.mubr.bf16.gmra.mrb[76].mxu0 %v17356_v58  ;;  %8294 = vmatprep.mubr.bf16.mxu1 %v20704_v59  ;;  %v20707_v58 = vld [vmem:[#allocation40_spill] sm:$0xff]  ;;  %v376_v59 = vld [vmem:[%s20268_s0 + $0xb18] sm:$0xff] }
 0x26c   :  { %6596 = vmatprep.mubr.bf16.mxu0 %v17358_v35  ;;  %v384_v35 = vld [vmem:[%s20268_s0 + $0xb58] sm:$0xff] }
 0x26d   :  { %v17386_v22 = vcombine.high %v376_v59, %v384_v35  ;;  %v17398_v28 = vcombine.low %v376_v59, %v384_v35 }
 0x26f   :  { %20710 = vst [vmem:[#allocation40_spill] sm:$0xff] %v17386_v22  ;;  %20713 = vst [vmem:[#allocation41_spill] sm:$0xff] %v17398_v28 }
 0x272   :  { %8295 = vmatmul.mubr.bf16.gmra.mrb[180].mxu1 %v20707_v58  ;;  %v20712_v58 = vld [vmem:[#allocation43_spill] sm:$0xff] }
 0x273   :  { %6597 = vmatmul.mubr.bf16.gmra.mrb[80].mxu0 %v17370_v55  ;;  %8304 = vmatprep.mubr.bf16.mxu1 %v20708_v62  ;;  %v20711_v55 = vld [vmem:[#allocation42_spill] sm:$0xff]  ;;  %v392_v62 = vld [vmem:[%s20268_s0 + $0xb98] sm:$0xff] }
 0x274   :  { %6606 = vmatprep.mubr.bf16.mxu0 %v17372_v0  ;;  %v400_v0 = vld [vmem:[%s20268_s0 + $0xbd8] sm:$0xff] }
 0x275   :  { %v17400_v15 = vcombine.high %v392_v62, %v400_v0  ;;  %v17412_v35 = vcombine.low %v392_v62, %v400_v0 }
 0x277   :  { %20714 = vst [vmem:[#allocation42_spill] sm:$0xff] %v17400_v15  ;;  %20717 = vst [vmem:[#allocation43_spill] sm:$0xff] %v17412_v35 }
 0x27a   :  { %8305 = vmatmul.mubr.bf16.gmra.mrb[184].mxu1 %v20711_v55  ;;  %v20716_v55 = vld [vmem:[#allocation45_spill] sm:$0xff] }
 0x27b   :  { %6607 = vmatmul.mubr.bf16.gmra.mrb[84].mxu0 %v17384_v4  ;;  %8314 = vmatprep.mubr.bf16.mxu1 %v20712_v58  ;;  %v20715_v4 = vld [vmem:[#allocation44_spill] sm:$0xff]  ;;  %v408_v58 = vld [vmem:[%s20268_s0 + $0xc18] sm:$0xff] }
 0x27c   :  { %6616 = vmatprep.mubr.bf16.mxu0 %v17386_v22  ;;  %v416_v22 = vld [vmem:[%s20268_s0 + $0xc58] sm:$0xff] }
 0x27d   :  { %v17414_v59 = vcombine.high %v408_v58, %v416_v22  ;;  %v17426_v0 = vcombine.low %v408_v58, %v416_v22  ;;  %v14705_v58 = vld [vmem:[%s20267_s1 + $0x608] ss:$16 sps:$4 sm:$0xff]  }
 0x27f   :  { %20718 = vst [vmem:[#allocation44_spill] sm:$0xff] %v17414_v59  ;;  %20720 = vst [vmem:[#allocation45_spill] sm:$0xff] %v17426_v0 }
 0x282   :  { %8315 = vmatmul.mubr.bf16.gmra.mrb[188].mxu1 %v20715_v4  ;;  %v25_v4 = vld [vmem:[%s20268_s0 + $0x20] sm:$0xff] }
 0x283   :  { %6617 = vmatmul.mubr.bf16.gmra.mrb[88].mxu0 %v17398_v28  ;;  %8324 = vmatprep.mubr.bf16.mxu1 %v20716_v55  ;;  %v20719_v28 = vld [vmem:[#allocation46_spill] sm:$0xff] }
 0x284   :  { %6626 = vmatprep.mubr.bf16.mxu0 %v17400_v15  ;;  %v33_v55 = vld [vmem:[%s20268_s0 + $0x60] sm:$0xff]  ;;  %v14716_v15 = vld [vmem:[%s20267_s1 + $0x66c] ss:$16 sps:$4 sm:$0xff]  }
 0x285   :  { %v17428_v62 = vcombine.high %v25_v4, %v33_v55  ;;  %v17440_v22 = vcombine.low %v25_v4, %v33_v55  ;;  %v14708_v4 = vld [vmem:[%s20267_s1 + $0x628] ss:$16 sps:$4 sm:$0xff]   ;;  %v20727_v55 = vld [vmem:[#allocation50_spill] sm:$0xff] }
 0x287   :  { %20721 = vst [vmem:[#allocation46_spill] sm:$0xff] %v17428_v62 }
 0x28a   :  { %8325 = vmatmul.mubr.bf16.gmra.mrb[192].mxu1 %v20719_v28  ;;  %v20723_v28 = vld [vmem:[#allocation48_spill] sm:$0xff] }
 0x28b   :  { %6627 = vmatmul.mubr.bf16.gmra.mrb[92].mxu0 %v17412_v35  ;;  %8334 = vmatprep.mubr.bf16.mxu1 %v16128_v26  ;;  %v20722_v35 = vld [vmem:[#allocation47_spill] sm:$0xff]  ;;  %v41_v26 = vld [vmem:[%s20268_s0 + $0xa0] sm:$0xff] }
 0x28c   :  { %6636 = vmatprep.mubr.bf16.mxu0 %v17414_v59  ;;  %v49_v59 = vld [vmem:[%s20268_s0 + $0xe0] sm:$0xff]  ;;  %20724 = vst [vmem:[#allocation47_spill] sm:$0xff] %v17440_v22 }
 0x292   :  { %8335 = vmatmul.mubr.bf16.gmra.mrb[196].mxu1 %v20722_v35  ;;  %v14710_v35 = vld [vmem:[%s20267_s1 + $0x62c] ss:$16 sps:$4 sm:$0xff]  }
 0x293   :  { %6637 = vmatmul.mubr.bf16.gmra.mrb[96].mxu0 %v17426_v0  ;;  %8377 = vmatprep.mubr.bf16.mxu1 %v20723_v28  ;;  %v17445_v0 = vcombine.high %v41_v26, %v49_v59  ;;  %v20726_v28 = vld [vmem:[#allocation49_spill] sm:$0xff] }
 0x294   :  { %6679 = vmatprep.mubr.bf16.mxu0 %v17428_v62  ;;  %v57_v62 = vld [vmem:[%s20268_s0 + $0x120] sm:$0xff] }
 0x295   :  { %20725 = vst [vmem:[#allocation48_spill] sm:$0xff] %v17445_v0 }
 0x29a   :  { %8378 = vmatmul.mubr.bf16.vlgmr.msra.gmra.mrb[100].mxu1 %v20726_v28  ;;  %v17466_v28 = vcombine.low %v41_v26, %v49_v59  ;;  %v14738_v59 = vld [vmem:[%s20267_s1 + $0xa00] ss:$16 sps:$4 sm:$0xff]   ;;  %v20730_v26 = vld [vmem:[#allocation51_spill] sm:$0xff] }
 0x29b   :  { %6680 = vmatmul.mubr.bf16.vlgmr.msra.gmra.mrb[0].mxu0 %v17440_v22  ;;  %8629 = vmatpush1.bf16.msra.mxu1 %v14705_v58  ;;  %v65_v22 = vld [vmem:[%s20268_s0 + $0x160] sm:$0xff]  ;;  %v14713_v58 = vld [vmem:[%s20267_s1 + $0x64c] ss:$16 sps:$4 sm:$0xff]  }
 0x29c   :  { %6689 = vmatprep.mubr.bf16.mxu0 %v17445_v0  ;;  %8387 = vmatprep.mubr.bf16.mxu1 %v20727_v55  ;;  %20728 = vst [vmem:[#allocation49_spill] sm:$0xff] %v17466_v28  ;;  %v17468_v0 = vcombine.high %v57_v62, %v65_v22  ;;  %v14740_v55 = vld [vmem:[%s20267_s1 + $0xa04] ss:$16 sps:$4 sm:$0xff]  }
 0x29d   :  { %8630 = vmatprep.subr.bf16.mxu1 %v14710_v35  ;;  %v14711_v35 = vld [vmem:[%s20267_s1 + $0x648] ss:$16 sps:$4 sm:$0xff]   ;;  %6930 = vmatprep.subr.bf16.mxu0 %v14740_v55  ;;  %v14722_v55 = vld [vmem:[%s20267_s1 + $0x6ac] ss:$16 sps:$4 sm:$0xff]  }
 0x29e   :  { %20729 = vst [vmem:[#allocation50_spill] sm:$0xff] %v17468_v0  ;;  %6931 = vmatpush1.bf16.msra.mxu0 %v14738_v59  ;;  %v97_v59 = vld [vmem:[%s20268_s0 + $0x260] sm:$0xff] }
 0x29f   :  { %8631 = vmatpush1.bf16.msra.mxu1 %v14708_v4  ;;  %v20731_v4 = vld [vmem:[#allocation52_spill] sm:$0xff] }
 0x2a0   :  { %8632 = vmatprep.subr.bf16.mxu1 %v14713_v58  ;;  %v14746_v58 = vld [vmem:[%s20267_s1 + $0xa24] ss:$16 sps:$4 sm:$0xff]  }
 0x2a1   :  { %6932 = vmatprep.subr.bf16.mxu0 %v14746_v58  ;;  %v14725_v58 = vld [vmem:[%s20267_s1 + $0x6cc] ss:$16 sps:$4 sm:$0xff]  }
 0x2a2   :  { %8388 = vmatmul.mubr.bf16.gmra.mrb[104].mxu1 %v20730_v26  ;;  %v14714_v26 = vld [vmem:[%s20267_s1 + $0x668] ss:$16 sps:$4 sm:$0xff]  }
 0x2a3   :  { %6690 = vmatmul.mubr.bf16.gmra.mrb[4].mxu0 %v17466_v28  ;;  %8397 = vmatprep.mubr.bf16.mxu1 %v20731_v4  ;;  %v14719_v4 = vld [vmem:[%s20267_s1 + $0x68c] ss:$16 sps:$4 sm:$0xff]   ;;  %v17504_v28 = vcombine.low %v57_v62, %v65_v22  ;;  %v14747_v62 = vld [vmem:[%s20267_s1 + $0xa40] ss:$16 sps:$4 sm:$0xff]   ;;  %v14752_v22 = vld [vmem:[%s20267_s1 + $0xa64] ss:$16 sps:$4 sm:$0xff]  }
 0x2a4   :  { %6699 = vmatprep.mubr.bf16.mxu0 %v17468_v0  ;;  %8633 = vmatpush1.bf16.msra.mxu1 %v14711_v35  ;;  %v14744_v0 = vld [vmem:[%s20267_s1 + $0xa20] ss:$16 sps:$4 sm:$0xff]   ;;  %v14717_v35 = vld [vmem:[%s20267_s1 + $0x688] ss:$16 sps:$4 sm:$0xff]  }
 0x2a5   :  { %8634 = vmatprep.subr.bf16.mxu1 %v14716_v15  ;;  %v14749_v15 = vld [vmem:[%s20267_s1 + $0xa44] ss:$16 sps:$4 sm:$0xff]   ;;  %6933 = vmatpush1.bf16.msra.mxu0 %v14744_v0 }
 0x2a6   :  { %v89_v0 = vld [vmem:[%s20268_s0 + $0x220] sm:$0xff]  ;;  %6934 = vmatprep.subr.bf16.mxu0 %v14749_v15 }
 0x2a7   :  { %v14758_v15 = vld [vmem:[%s20267_s1 + $0xa84] ss:$16 sps:$4 sm:$0xff]  }
 0x2a8   :  { %8635 = vmatpush1.bf16.msra.mxu1 %v14714_v26  ;;  %v17542_v26 = vcombine.low %v73_v45, %v81_v40  ;;  %v14756_v40 = vld [vmem:[%s20267_s1 + $0xa80] ss:$16 sps:$4 sm:$0xff]   ;;  %v14761_v45 = vld [vmem:[%s20267_s1 + $0xaa4] ss:$16 sps:$4 sm:$0xff]  }
 0x2a9   :  { %8636 = vmatprep.subr.bf16.mxu1 %v14719_v4  ;;  %6935 = vmatpush1.bf16.msra.mxu0 %v14747_v62  ;;  %v17544_v4 = vcombine.high %v89_v0, %v97_v59  ;;  %v105_v62 = vld [vmem:[%s20268_s0 + $0x2a0] sm:$0xff] }
 0x2aa   :  { %8398 = vmatmul.mubr.bf16.gmra.mrb[108].mxu1 %v16224_v30  ;;  %v14720_v30 = vld [vmem:[%s20267_s1 + $0x6a8] ss:$16 sps:$4 sm:$0xff]   ;;  %6936 = vmatprep.subr.bf16.mxu0 %v14752_v22  ;;  %v113_v22 = vld [vmem:[%s20268_s0 + $0x2e0] sm:$0xff] }
 0x2ab   :  { %6700 = vmatmul.mubr.bf16.gmra.mrb[8].mxu0 %v17504_v28  ;;  %8407 = vmatprep.mubr.bf16.mxu1 %v16228_v9  ;;  %v14750_v9 = vld [vmem:[%s20267_s1 + $0xa60] ss:$16 sps:$4 sm:$0xff]  }
 0x2ac   :  { %6709 = vmatprep.mubr.bf16.mxu0 %v17506_v12  ;;  %8637 = vmatpush1.bf16.msra.mxu1 %v14717_v35  ;;  %v14723_v35 = vld [vmem:[%s20267_s1 + $0x6c8] ss:$16 sps:$4 sm:$0xff]  }
 0x2ad   :  { %8638 = vmatprep.subr.bf16.mxu1 %v14722_v55  ;;  %v14728_v55 = vld [vmem:[%s20267_s1 + $0x6ec] ss:$16 sps:$4 sm:$0xff]   ;;  %6937 = vmatpush1.bf16.msra.mxu0 %v14750_v9  ;;  %v17582_v9 = vcombine.high %v105_v62, %v113_v22 }
 0x2ae   :  { %6938 = vmatprep.subr.bf16.mxu0 %v14758_v15  ;;  %v14764_v15 = vld [vmem:[%s20267_s1 + $0xac4] ss:$16 sps:$4 sm:$0xff]  }
 0x2b0   :  { %8639 = vmatpush1.bf16.msra.mxu1 %v14720_v30  ;;  %v14731_v30 = vld [vmem:[%s20267_s1 + $0x70c] ss:$16 sps:$4 sm:$0xff]  }
 0x2b1   :  { %8640 = vmatprep.subr.bf16.mxu1 %v14725_v58  ;;  %6939 = vmatpush1.bf16.msra.mxu0 %v14756_v40  ;;  %v17580_v58 = vcombine.low %v89_v0, %v97_v59  ;;  %v14762_v0 = vld [vmem:[%s20267_s1 + $0xac0] ss:$16 sps:$4 sm:$0xff]   ;;  %v14770_v59 = vld [vmem:[%s20267_s1 + $0xae4] ss:$16 sps:$4 sm:$0xff]  }
 0x2b2   :  { %8408 = vmatmul.mubr.bf16.gmra.mrb[112].mxu1 %v16270_v33  ;;  %v14726_v33 = vld [vmem:[%s20267_s1 + $0x6e8] ss:$16 sps:$4 sm:$0xff]   ;;  %6940 = vmatprep.subr.bf16.mxu0 %v14761_v45  ;;  %v121_v40 = vld [vmem:[%s20268_s0 + $0x320] sm:$0xff] }
 0x2b3   :  { %6710 = vmatmul.mubr.bf16.gmra.mrb[12].mxu0 %v17542_v26  ;;  %8417 = vmatprep.mubr.bf16.mxu1 %v16274_v56  ;;  %v14759_v56 = vld [vmem:[%s20267_s1 + $0xaa0] ss:$16 sps:$4 sm:$0xff]  }
 0x2b4   :  { %6719 = vmatprep.mubr.bf16.mxu0 %v17544_v4  ;;  %8641 = vmatpush1.bf16.msra.mxu1 %v14723_v35  ;;  %v14729_v35 = vld [vmem:[%s20267_s1 + $0x708] ss:$16 sps:$4 sm:$0xff]   ;;  %v129_v45 = vld [vmem:[%s20268_s0 + $0x360] sm:$0xff] }
 0x2b5   :  { %8642 = vmatprep.subr.bf16.mxu1 %v14728_v55  ;;  %v14734_v55 = vld [vmem:[%s20267_s1 + $0x72c] ss:$16 sps:$4 sm:$0xff]   ;;  %6941 = vmatpush1.bf16.msra.mxu0 %v14759_v56  ;;  %v17620_v56 = vcombine.high %v121_v40, %v129_v45 }
 0x2b6   :  { %6942 = vmatprep.subr.bf16.mxu0 %v14764_v15  ;;  %v14773_v15 = vld [vmem:[%s20267_s1 + $0xb04] ss:$16 sps:$4 sm:$0xff]  }
 0x2b8   :  { %8643 = vmatpush1.bf16.msra.mxu1 %v14726_v33  ;;  %v14768_v33 = vld [vmem:[%s20267_s1 + $0xae0] ss:$16 sps:$4 sm:$0xff]  }
 0x2b9   :  { %8644 = vmatprep.subr.bf16.mxu1 %v14731_v30  ;;  %6943 = vmatpush1.bf16.msra.mxu0 %v14762_v0  ;;  %v17618_v30 = vcombine.low %v105_v62, %v113_v22  ;;  %v14771_v62 = vld [vmem:[%s20267_s1 + $0xb00] ss:$16 sps:$4 sm:$0xff]   ;;  %v14776_v22 = vld [vmem:[%s20267_s1 + $0xb24] ss:$16 sps:$4 sm:$0xff]  }
 0x2ba   :  { %8418 = vmatmul.mubr.bf16.gmra.mrb[116].mxu1 %v16316_v19  ;;  %v14732_v19 = vld [vmem:[%s20267_s1 + $0x728] ss:$16 sps:$4 sm:$0xff]   ;;  %6944 = vmatprep.subr.bf16.mxu0 %v14770_v59  ;;  %v137_v0 = vld [vmem:[%s20268_s0 + $0x3a0] sm:$0xff] }
 0x2bb   :  { %6720 = vmatmul.mubr.bf16.gmra.mrb[16].mxu0 %v17580_v58  ;;  %8427 = vmatprep.mubr.bf16.mxu1 %v16320_v6  ;;  %v14737_v6 = vld [vmem:[%s20267_s1 + $0x74c] ss:$16 sps:$4 sm:$0xff]   ;;  %v145_v59 = vld [vmem:[%s20268_s0 + $0x3e0] sm:$0xff] }
 0x2bc   :  { %6729 = vmatprep.mubr.bf16.mxu0 %v17582_v9  ;;  %8645 = vmatpush1.bf16.msra.mxu1 %v14729_v35  ;;  %v14735_v35 = vld [vmem:[%s20267_s1 + $0x748] ss:$16 sps:$4 sm:$0xff]  }
 0x2bd   :  { %8646 = vmatprep.subr.bf16.mxu1 %v14734_v55  ;;  %v14743_v55 = vld [vmem:[%s20267_s1 + $0x76c] ss:$16 sps:$4 sm:$0xff]   ;;  %6945 = vmatpush1.bf16.msra.mxu0 %v14768_v33  ;;  %v17658_v33 = vcombine.high %v137_v0, %v145_v59 }
 0x2be   :  { %6946 = vmatprep.subr.bf16.mxu0 %v14773_v15  ;;  %v14782_v15 = vld [vmem:[%s20267_s1 + $0xb44] ss:$16 sps:$4 sm:$0xff]  }
 0x2c0   :  { %8647 = vmatpush1.bf16.msra.mxu1 %v14732_v19  ;;  %v14755_v19 = vld [vmem:[%s20267_s1 + $0x78c] ss:$16 sps:$4 sm:$0xff]  }
 0x2c1   :  { %8648 = vmatprep.subr.bf16.mxu1 %v14737_v6  ;;  %6947 = vmatpush1.bf16.msra.mxu0 %v14771_v62  ;;  %v17656_v6 = vcombine.low %v121_v40, %v129_v45  ;;  %v14780_v40 = vld [vmem:[%s20267_s1 + $0xb40] ss:$16 sps:$4 sm:$0xff]   ;;  %v14785_v45 = vld [vmem:[%s20267_s1 + $0xb64] ss:$16 sps:$4 sm:$0xff]  }
 0x2c2   :  { %8428 = vmatmul.mubr.bf16.gmra.mrb[120].mxu1 %v16362_v38  ;;  %v14741_v38 = vld [vmem:[%s20267_s1 + $0x768] ss:$16 sps:$4 sm:$0xff]   ;;  %6948 = vmatprep.subr.bf16.mxu0 %v14776_v22  ;;  %v153_v62 = vld [vmem:[%s20268_s0 + $0x420] sm:$0xff] }
 0x2c3   :  { %6730 = vmatmul.mubr.bf16.gmra.mrb[20].mxu0 %v17618_v30  ;;  %8437 = vmatprep.mubr.bf16.mxu1 %v16366_v14  ;;  %v14774_v14 = vld [vmem:[%s20267_s1 + $0xb20] ss:$16 sps:$4 sm:$0xff]  }
 0x2c4   :  { %6739 = vmatprep.mubr.bf16.mxu0 %v17620_v56  ;;  %8649 = vmatpush1.bf16.msra.mxu1 %v14735_v35  ;;  %v14753_v35 = vld [vmem:[%s20267_s1 + $0x788] ss:$16 sps:$4 sm:$0xff]   ;;  %v161_v22 = vld [vmem:[%s20268_s0 + $0x460] sm:$0xff] }
 0x2c5   :  { %8650 = vmatprep.subr.bf16.mxu1 %v14743_v55  ;;  %v14767_v55 = vld [vmem:[%s20267_s1 + $0x7ac] ss:$16 sps:$4 sm:$0xff]   ;;  %6949 = vmatpush1.bf16.msra.mxu0 %v14774_v14  ;;  %v17696_v14 = vcombine.high %v153_v62, %v161_v22 }
 0x2c6   :  { %6950 = vmatprep.subr.bf16.mxu0 %v14782_v15  ;;  %v14788_v15 = vld [vmem:[%s20267_s1 + $0xb84] ss:$16 sps:$4 sm:$0xff]  }
 0x2c8   :  { %8651 = vmatpush1.bf16.msra.mxu1 %v14741_v38  ;;  %v14779_v38 = vld [vmem:[%s20267_s1 + $0x7cc] ss:$16 sps:$4 sm:$0xff]  }
 0x2c9   :  { %8652 = vmatprep.subr.bf16.mxu1 %v14755_v19  ;;  %6951 = vmatpush1.bf16.msra.mxu0 %v14780_v40  ;;  %v17694_v19 = vcombine.low %v137_v0, %v145_v59  ;;  %v14791_v0 = vld [vmem:[%s20267_s1 + $0xba4] ss:$16 sps:$4 sm:$0xff]   ;;  %v14794_v59 = vld [vmem:[%s20267_s1 + $0x7ec] ss:$16 sps:$4 sm:$0xff]  }
 0x2ca   :  { %8438 = vmatmul.mubr.bf16.gmra.mrb[124].mxu1 %v16408_v52  ;;  %v14765_v52 = vld [vmem:[%s20267_s1 + $0x7a8] ss:$16 sps:$4 sm:$0xff]   ;;  %6952 = vmatprep.subr.bf16.mxu0 %v14785_v45  ;;  %v169_v40 = vld [vmem:[%s20268_s0 + $0x4a0] sm:$0xff] }
 0x2cb   :  { %6740 = vmatmul.mubr.bf16.gmra.mrb[24].mxu0 %v17656_v6  ;;  %8447 = vmatprep.mubr.bf16.mxu1 %v16412_v36  ;;  %v14783_v36 = vld [vmem:[%s20267_s1 + $0xb60] ss:$16 sps:$4 sm:$0xff]   ;;  %v14792_v45 = vld [vmem:[%s20267_s1 + $0x7e8] ss:$16 sps:$4 sm:$0xff]  }
 0x2cc   :  { %6749 = vmatprep.mubr.bf16.mxu0 %v17658_v33  ;;  %8653 = vmatpush1.bf16.msra.mxu1 %v14753_v35  ;;  %v14777_v35 = vld [vmem:[%s20267_s1 + $0x7c8] ss:$16 sps:$4 sm:$0xff]  }
 0x2cd   :  { %8654 = vmatprep.subr.bf16.mxu1 %v14767_v55  ;;  %6953 = vmatpush1.bf16.msra.mxu0 %v14783_v36  ;;  %v14786_v55 = vld [vmem:[%s20267_s1 + $0xb80] ss:$16 sps:$4 sm:$0xff]   ;;  %v14797_v36 = vld [vmem:[%s20267_s1 + $0xbc4] ss:$16 sps:$4 sm:$0xff]  }
 0x2ce   :  { %6954 = vmatprep.subr.bf16.mxu0 %v14788_v15  ;;  %v193_v15 = vld [vmem:[%s20268_s0 + $0x560] sm:$0xff] }
 0x2d0   :  { %8655 = vmatpush1.bf16.msra.mxu1 %v14765_v52  ;;  %v17729_v52 = vcombine.low %v153_v62, %v161_v22  ;;  %v14800_v62 = vld [vmem:[%s20267_s1 + $0xbe4] ss:$16 sps:$4 sm:$0xff]  }
 0x2d1   :  { %8656 = vmatprep.subr.bf16.mxu1 %v14779_v38  ;;  %6955 = vmatpush1.bf16.msra.mxu0 %v14786_v55  ;;  %v185_v22 = vld [vmem:[%s20268_s0 + $0x520] sm:$0xff] }
 0x2d2   :  { %8448 = vmatmul.mubr.bf16.gmra.mrb[128].mxu1 %v16454_v23  ;;  %v177_v23 = vld [vmem:[%s20268_s0 + $0x4e0] sm:$0xff]  ;;  %6956 = vmatprep.subr.bf16.mxu0 %v14791_v0  ;;  %v17757_v0 = vcombine.high %v185_v22, %v193_v15 }
 0x2d3   :  { %6750 = vmatmul.mubr.bf16.gmra.mrb[28].mxu0 %v17694_v19  ;;  %8457 = vmatprep.mubr.bf16.mxu1 %v16458_v24  ;;  %v14789_v24 = vld [vmem:[%s20267_s1 + $0xba0] ss:$16 sps:$4 sm:$0xff]   ;;  %v17731_v38 = vcombine.high %v169_v40, %v177_v23  ;;  %v17755_v55 = vcombine.low %v169_v40, %v177_v23  ;;  %v17772_v23 = vcombine.low %v185_v22, %v193_v15 }
 0x2d4   :  { %6759 = vmatprep.mubr.bf16.mxu0 %v17696_v14  ;;  %8657 = vmatpush1.bf16.msra.mxu1 %v14777_v35  ;;  %v14795_v35 = vld [vmem:[%s20267_s1 + $0xbc0] ss:$16 sps:$4 sm:$0xff]  }
 0x2d5   :  { %8658 = vmatprep.subr.bf16.mxu1 %v14794_v59  ;;  %6957 = vmatpush1.bf16.msra.mxu0 %v14789_v24  ;;  %v201_v59 = vld [vmem:[%s20268_s0 + $0x5a0] sm:$0xff] }
 0x2d6   :  { %6958 = vmatprep.subr.bf16.mxu0 %v14797_v36  ;;  %v209_v40 = vld [vmem:[%s20268_s0 + $0x5e0] sm:$0xff] }
 0x2d7   :  { %v17786_v24 = vcombine.low %v201_v59, %v209_v40 }
 0x2d8   :  { %8659 = vmatpush1.bf16.msra.mxu1 %v14792_v45  ;;  %v225_v45 = vld [vmem:[%s20268_s0 + $0x660] sm:$0xff] }
 0x2d9   :  { %6959 = vmatpush1.bf16.msra.mxu0 %v14795_v35 }
 0x2da   :  { %8458 = vmatmul.mubr.bf16.gmra.mrb[132].mxu1 %v16491_v25  ;;  %v14798_v25 = vld [vmem:[%s20267_s1 + $0xbe0] ss:$16 sps:$4 sm:$0xff]   ;;  %6960 = vmatprep.subr.bf16.mxu0 %v14800_v62 }
 0x2db   :  { %6760 = vmatmul.mubr.bf16.gmra.mrb[32].mxu0 %v17729_v52  ;;  %8467 = vmatprep.mubr.bf16.mxu1 %v16495_v37  ;;  %v14803_v37 = vld [vmem:[%s20267_s1 + $0x80c] ss:$16 sps:$4 sm:$0xff]  }
 0x2dc   :  { %6769 = vmatprep.mubr.bf16.mxu0 %v17731_v38  ;;  %8911 = vmatprep.subr.bf16.mxu1 %v14803_v37 }
 0x2dd   :  { %6961 = vmatpush1.bf16.msra.mxu0 %v14798_v25 }
 0x2e2   :  { %8468 = vmatmul.mubr.bf16.gmra.mrb[136].mxu1 %v16531_v11  ;;  %v17774_v11 = vcombine.high %v201_v59, %v209_v40 }
 0x2e3   :  { %6770 = vmatmul.mubr.bf16.gmra.mrb[36].mxu0 %v17755_v55  ;;  %8477 = vmatprep.mubr.bf16.mxu1 %v16535_v54  ;;  %v217_v54 = vld [vmem:[%s20268_s0 + $0x620] sm:$0xff] }
 0x2e4   :  { %6779 = vmatprep.mubr.bf16.mxu0 %v17757_v0  ;;  %v17788_v36 = vcombine.high %v217_v54, %v225_v45  ;;  %v17800_v35 = vcombine.low %v217_v54, %v225_v45 }
 0x2ea   :  { %8478 = vmatmul.mubr.bf16.gmra.mrb[140].mxu1 %v16556_v42  ;;  %v241_v42 = vld [vmem:[%s20268_s0 + $0x6e0] sm:$0xff] }
 0x2eb   :  { %6780 = vmatmul.mubr.bf16.gmra.mrb[40].mxu0 %v17772_v23  ;;  %8487 = vmatprep.mubr.bf16.mxu1 %v16560_v18  ;;  %v233_v18 = vld [vmem:[%s20268_s0 + $0x6a0] sm:$0xff] }
 0x2ec   :  { %6789 = vmatprep.mubr.bf16.mxu0 %v17774_v11  ;;  %v17802_v62 = vcombine.high %v233_v18, %v241_v42  ;;  %v17814_v22 = vcombine.low %v233_v18, %v241_v42 }
 0x2f2   :  { %8488 = vmatmul.mubr.bf16.gmra.mrb[144].mxu1 %v16578_v3  ;;  %v249_v3 = vld [vmem:[%s20268_s0 + $0x720] sm:$0xff] }
 0x2f3   :  { %6790 = vmatmul.mubr.bf16.gmra.mrb[44].mxu0 %v17786_v24  ;;  %8497 = vmatprep.mubr.bf16.mxu1 %v16582_v31  ;;  %v257_v31 = vld [vmem:[%s20268_s0 + $0x760] sm:$0xff] }
 0x2f4   :  { %6799 = vmatprep.mubr.bf16.mxu0 %v17788_v36  ;;  %v17816_v15 = vcombine.high %v249_v3, %v257_v31  ;;  %v17828_v25 = vcombine.low %v249_v3, %v257_v31 }
 0x2fa   :  { %8498 = vmatmul.mubr.bf16.gmra.mrb[148].mxu1 %v16600_v51  ;;  %v265_v51 = vld [vmem:[%s20268_s0 + $0x7a0] sm:$0xff] }
 0x2fb   :  { %6800 = vmatmul.mubr.bf16.gmra.mrb[48].mxu0 %v17800_v35  ;;  %8507 = vmatprep.mubr.bf16.mxu1 %v16604_v57  ;;  %v273_v57 = vld [vmem:[%s20268_s0 + $0x7e0] sm:$0xff] }
 0x2fc   :  { %6809 = vmatprep.mubr.bf16.mxu0 %v17802_v62  ;;  %v17830_v37 = vcombine.high %v265_v51, %v273_v57  ;;  %v17842_v59 = vcombine.low %v265_v51, %v273_v57 }
 0x302   :  { %8508 = vmatmul.mubr.bf16.gmra.mrb[152].mxu1 %v16622_v13  ;;  %v281_v13 = vld [vmem:[%s20268_s0 + $0x820] sm:$0xff] }
 0x303   :  { %6810 = vmatmul.mubr.bf16.gmra.mrb[52].mxu0 %v17814_v22  ;;  %8517 = vmatprep.mubr.bf16.mxu1 %v16626_v17  ;;  %v289_v17 = vld [vmem:[%s20268_s0 + $0x860] sm:$0xff] }
 0x304   :  { %6819 = vmatprep.mubr.bf16.mxu0 %v17816_v15  ;;  %v17844_v40 = vcombine.high %v281_v13, %v289_v17  ;;  %v17856_v54 = vcombine.low %v281_v13, %v289_v17 }
 0x30a   :  { %8518 = vmatmul.mubr.bf16.gmra.mrb[156].mxu1 %v16644_v32  ;;  %v297_v32 = vld [vmem:[%s20268_s0 + $0x8a0] sm:$0xff] }
 0x30b   :  { %6820 = vmatmul.mubr.bf16.gmra.mrb[56].mxu0 %v17828_v25  ;;  %8527 = vmatprep.mubr.bf16.mxu1 %v16648_v47  ;;  %v305_v47 = vld [vmem:[%s20268_s0 + $0x8e0] sm:$0xff] }
 0x30c   :  { %6829 = vmatprep.mubr.bf16.mxu0 %v17830_v37  ;;  %v17858_v45 = vcombine.high %v297_v32, %v305_v47  ;;  %v17870_v18 = vcombine.low %v297_v32, %v305_v47 }
 0x312   :  { %8528 = vmatmul.mubr.bf16.gmra.mrb[160].mxu1 %v16666_v49  ;;  %v313_v49 = vld [vmem:[%s20268_s0 + $0x920] sm:$0xff] }
 0x313   :  { %6830 = vmatmul.mubr.bf16.gmra.mrb[60].mxu0 %v17842_v59  ;;  %8537 = vmatprep.mubr.bf16.mxu1 %v16670_v7  ;;  %v321_v7 = vld [vmem:[%s20268_s0 + $0x960] sm:$0xff] }
 0x314   :  { %6839 = vmatprep.mubr.bf16.mxu0 %v17844_v40  ;;  %v17872_v42 = vcombine.high %v313_v49, %v321_v7  ;;  %v17884_v3 = vcombine.low %v313_v49, %v321_v7 }
 0x31a   :  { %8538 = vmatmul.mubr.bf16.gmra.mrb[164].mxu1 %v16688_v5  ;;  %v329_v5 = vld [vmem:[%s20268_s0 + $0x9a0] sm:$0xff] }
 0x31b   :  { %6840 = vmatmul.mubr.bf16.gmra.mrb[64].mxu0 %v17856_v54  ;;  %8547 = vmatprep.mubr.bf16.mxu1 %v16692_v41  ;;  %v337_v41 = vld [vmem:[%s20268_s0 + $0x9e0] sm:$0xff] }
 0x31c   :  { %6849 = vmatprep.mubr.bf16.mxu0 %v17858_v45  ;;  %v17886_v31 = vcombine.high %v329_v5, %v337_v41  ;;  %v17898_v51 = vcombine.low %v329_v5, %v337_v41 }
 0x322   :  { %8548 = vmatmul.mubr.bf16.gmra.mrb[168].mxu1 %v16710_v29  ;;  %v345_v29 = vld [vmem:[%s20268_s0 + $0xa20] sm:$0xff] }
 0x323   :  { %6850 = vmatmul.mubr.bf16.gmra.mrb[68].mxu0 %v17870_v18  ;;  %8557 = vmatprep.mubr.bf16.mxu1 %v16714_v63  ;;  %v353_v63 = vld [vmem:[%s20268_s0 + $0xa60] sm:$0xff] }
 0x324   :  { %6859 = vmatprep.mubr.bf16.mxu0 %v17872_v42  ;;  %v17900_v57 = vcombine.high %v345_v29, %v353_v63  ;;  %v17912_v13 = vcombine.low %v345_v29, %v353_v63 }
 0x32a   :  { %8558 = vmatmul.mubr.bf16.gmra.mrb[172].mxu1 %v16732_v39  ;;  %v361_v39 = vld [vmem:[%s20268_s0 + $0xaa0] sm:$0xff] }
 0x32b   :  { %6860 = vmatmul.mubr.bf16.gmra.mrb[72].mxu0 %v17884_v3  ;;  %8567 = vmatprep.mubr.bf16.mxu1 %v16736_v27  ;;  %v369_v27 = vld [vmem:[%s20268_s0 + $0xae0] sm:$0xff] }
 0x32c   :  { %6869 = vmatprep.mubr.bf16.mxu0 %v17886_v31  ;;  %v17914_v17 = vcombine.high %v361_v39, %v369_v27  ;;  %v17926_v32 = vcombine.low %v361_v39, %v369_v27  ;;  %v14801_v27 = vld [vmem:[%s20267_s1 + $0x808] ss:$16 sps:$4 sm:$0xff]  }
 0x332   :  { %8568 = vmatmul.mubr.bf16.gmra.mrb[176].mxu1 %v16754_v61  ;;  %v377_v61 = vld [vmem:[%s20268_s0 + $0xb20] sm:$0xff] }
 0x333   :  { %6870 = vmatmul.mubr.bf16.gmra.mrb[76].mxu0 %v17898_v51  ;;  %8577 = vmatprep.mubr.bf16.mxu1 %v16758_v60  ;;  %v385_v60 = vld [vmem:[%s20268_s0 + $0xb60] sm:$0xff] }
 0x334   :  { %6879 = vmatprep.mubr.bf16.mxu0 %v17900_v57  ;;  %v17928_v47 = vcombine.high %v377_v61, %v385_v60  ;;  %v17940_v49 = vcombine.low %v377_v61, %v385_v60  ;;  %v58_v60 = vld [vmem:[%s20268_s0 + $0x128] sm:$0xff] }
 0x33a   :  { %8578 = vmatmul.mubr.bf16.gmra.mrb[180].mxu1 %v16776_v21  ;;  %v393_v21 = vld [vmem:[%s20268_s0 + $0xba0] sm:$0xff] }
 0x33b   :  { %6880 = vmatmul.mubr.bf16.gmra.mrb[80].mxu0 %v17912_v13  ;;  %8587 = vmatprep.mubr.bf16.mxu1 %v16780_v34  ;;  %v401_v34 = vld [vmem:[%s20268_s0 + $0xbe0] sm:$0xff] }
 0x33c   :  { %6889 = vmatprep.mubr.bf16.mxu0 %v17914_v17  ;;  %v17942_v7 = vcombine.high %v393_v21, %v401_v34  ;;  %v17954_v5 = vcombine.low %v393_v21, %v401_v34  ;;  %v66_v21 = vld [vmem:[%s20268_s0 + $0x168] sm:$0xff] }
 0x342   :  { %8588 = vmatmul.mubr.bf16.gmra.mrb[184].mxu1 %v16798_v20  ;;  %v409_v20 = vld [vmem:[%s20268_s0 + $0xc20] sm:$0xff] }
 0x343   :  { %6890 = vmatmul.mubr.bf16.gmra.mrb[84].mxu0 %v17926_v32  ;;  %8597 = vmatprep.mubr.bf16.mxu1 %v16802_v1  ;;  %v417_v1 = vld [vmem:[%s20268_s0 + $0xc60] sm:$0xff] }
 0x344   :  { %6899 = vmatprep.mubr.bf16.mxu0 %v17928_v47  ;;  %v17956_v41 = vcombine.high %v409_v20, %v417_v1  ;;  %v17968_v29 = vcombine.low %v409_v20, %v417_v1  ;;  %v18010_v20 = vcombine.high %v58_v60, %v66_v21  ;;  %v14836_v1 = vld [vmem:[%s20267_s1 + $0xc04] ss:$16 sps:$4 sm:$0xff]  }
 0x345   :  { %7213 = vmatprep.subr.bf16.mxu0 %v14836_v1  ;;  %v14845_v1 = vld [vmem:[%s20267_s1 + $0xc44] ss:$16 sps:$4 sm:$0xff]  }
 0x346   :  { %20732 = vst [vmem:[#allocation51_spill] sm:$0xff] %v18010_v20 }
 0x34a   :  { %8598 = vmatmul.mubr.bf16.gmra.mrb[188].mxu1 %v16820_v48  ;;  %v26_v48 = vld [vmem:[%s20268_s0 + $0x28] sm:$0xff] }
 0x34b   :  { %6900 = vmatmul.mubr.bf16.gmra.mrb[88].mxu0 %v17940_v49  ;;  %8607 = vmatprep.mubr.bf16.mxu1 %v16824_v43  ;;  %v34_v43 = vld [vmem:[%s20268_s0 + $0x68] sm:$0xff] }
 0x34c   :  { %6909 = vmatprep.mubr.bf16.mxu0 %v17942_v7  ;;  %v17970_v63 = vcombine.high %v26_v48, %v34_v43  ;;  %v17982_v39 = vcombine.low %v26_v48, %v34_v43  ;;  %v14812_v48 = vld [vmem:[%s20267_s1 + $0x86c] ss:$16 sps:$4 sm:$0xff]   ;;  %v14834_v43 = vld [vmem:[%s20267_s1 + $0xc00] ss:$16 sps:$4 sm:$0xff]  }
 0x352   :  { %8608 = vmatmul.mubr.bf16.gmra.mrb[192].mxu1 %v16842_v10  ;;  %v42_v10 = vld [vmem:[%s20268_s0 + $0xa8] sm:$0xff] }
 0x353   :  { %6910 = vmatmul.mubr.bf16.gmra.mrb[92].mxu0 %v17954_v5  ;;  %8617 = vmatprep.mubr.bf16.mxu1 %v16846_v16  ;;  %v50_v16 = vld [vmem:[%s20268_s0 + $0xe8] sm:$0xff] }
 0x354   :  { %6919 = vmatprep.mubr.bf16.mxu0 %v17956_v41  ;;  %v17987_v61 = vcombine.high %v42_v10, %v50_v16  ;;  %v18008_v34 = vcombine.low %v42_v10, %v50_v16  ;;  %v20733_v10 = vld [vmem:[#allocation152_spill] sm:$0xff] }
 0x355   :  { %v14842_v16 = vld [vmem:[%s20267_s1 + $0xc24] ss:$16 sps:$4 sm:$0xff]  }
 0x35a   :  { %8618 = vmatmul.mubr.bf16.gmra.mrb[196].mxu1 %v16864_v46  ;;  %v14806_v46 = vld [vmem:[%s20267_s1 + $0x82c] ss:$16 sps:$4 sm:$0xff]  }
 0x35b   :  { %6920 = vmatmul.mubr.bf16.gmra.mrb[96].mxu0 %v17968_v29  ;;  %8660 = vmatprep.mubr.bf16.mxu1 %v16868_v50  ;;  %v14804_v50 = vld [vmem:[%s20267_s1 + $0x828] ss:$16 sps:$4 sm:$0xff]  }
 0x35c   :  { %6962 = vmatprep.mubr.bf16.mxu0 %v17970_v63 }
 0x362   :  { %8661 = vmatmul.mubr.bf16.vlgmr.msra.gmra.mrb[100].mxu1 %v16886_v2  ;;  %v14809_v2 = vld [vmem:[%s20267_s1 + $0x84c] ss:$16 sps:$4 sm:$0xff]  }
 0x363   :  { %6963 = vmatmul.mubr.bf16.vlgmr.msra.gmra.mrb[0].mxu0 %v17982_v39  ;;  %8912 = vmatpush1.bf16.msra.mxu1 %v14801_v27  ;;  %v74_v27 = vld [vmem:[%s20268_s0 + $0x1a8] sm:$0xff] }
 0x364   :  { %6972 = vmatprep.mubr.bf16.mxu0 %v17987_v61  ;;  %8670 = vmatprep.mubr.bf16.mxu1 %v16893_v53  ;;  %v14807_v53 = vld [vmem:[%s20267_s1 + $0x848] ss:$16 sps:$4 sm:$0xff]  }
 0x365   :  { %8913 = vmatprep.subr.bf16.mxu1 %v14806_v46  ;;  %v82_v46 = vld [vmem:[%s20268_s0 + $0x1e8] sm:$0xff]  ;;  %7214 = vmatpush1.bf16.msra.mxu0 %v14834_v43  ;;  %v14848_v43 = vld [vmem:[%s20267_s1 + $0xc64] ss:$16 sps:$4 sm:$0xff]  }
 0x366   :  { %7215 = vmatprep.subr.bf16.mxu0 %v14842_v16  ;;  %v20737_v16 = vld [vmem:[#allocation3_spill] sm:$0xff] }
 0x367   :  { %8914 = vmatpush1.bf16.msra.mxu1 %v14804_v50  ;;  %v14815_v50 = vld [vmem:[%s20267_s1 + $0x88c] ss:$16 sps:$4 sm:$0xff]  }
 0x368   :  { %8915 = vmatprep.subr.bf16.mxu1 %v14809_v2  ;;  %v14840_v2 = vld [vmem:[%s20267_s1 + $0xc20] ss:$16 sps:$4 sm:$0xff]  }
 0x369   :  { %7216 = vmatpush1.bf16.msra.mxu0 %v14840_v2  ;;  %v14816_v2 = vld [vmem:[%s20267_s1 + $0x8a8] ss:$16 sps:$4 sm:$0xff]  }
 0x36a   :  { %8671 = vmatmul.mubr.bf16.gmra.mrb[104].mxu1 %v16920_v8  ;;  %v14810_v8 = vld [vmem:[%s20267_s1 + $0x868] ss:$16 sps:$4 sm:$0xff]   ;;  %7217 = vmatprep.subr.bf16.mxu0 %v14845_v1  ;;  %v14854_v1 = vld [vmem:[%s20267_s1 + $0xc84] ss:$16 sps:$4 sm:$0xff]  }
 0x36b   :  { %6973 = vmatmul.mubr.bf16.gmra.mrb[4].mxu0 %v18008_v34  ;;  %8680 = vmatprep.mubr.bf16.mxu1 %v20733_v10  ;;  %v18046_v10 = vcombine.low %v58_v60, %v66_v21  ;;  %v14843_v60 = vld [vmem:[%s20267_s1 + $0xc40] ss:$16 sps:$4 sm:$0xff]  }
 0x36c   :  { %6982 = vmatprep.mubr.bf16.mxu0 %v18010_v20  ;;  %8916 = vmatpush1.bf16.msra.mxu1 %v14807_v53  ;;  %v18048_v20 = vcombine.high %v74_v27, %v82_v46  ;;  %v14813_v53 = vld [vmem:[%s20267_s1 + $0x888] ss:$16 sps:$4 sm:$0xff]   ;;  %v20736_v21 = vld [vmem:[#allocation2_spill] sm:$0xff] }
 0x36d   :  { %8917 = vmatprep.subr.bf16.mxu1 %v14812_v48  ;;  %20734 = vst [vmem:[#allocation52_spill] sm:$0xff] %v18046_v10  ;;  %v14818_v48 = vld [vmem:[%s20267_s1 + $0x8ac] ss:$16 sps:$4 sm:$0xff]   ;;  %7218 = vmatpush1.bf16.msra.mxu0 %v14843_v60  ;;  %v14857_v60 = vld [vmem:[%s20267_s1 + $0xca4] ss:$16 sps:$4 sm:$0xff]  }
 0x36e   :  { %20735 = vst [vmem:[#allocation152_spill] sm:$0xff] %v18048_v20  ;;  %7219 = vmatprep.subr.bf16.mxu0 %v14848_v43  ;;  %v20741_v43 = vld [vmem:[#allocation5_spill] sm:$0xff] }
 0x370   :  { %8918 = vmatpush1.bf16.msra.mxu1 %v14810_v8  ;;  %v90_v8 = vld [vmem:[%s20268_s0 + $0x228] sm:$0xff] }
 0x371   :  { %8919 = vmatprep.subr.bf16.mxu1 %v14815_v50  ;;  %v98_v50 = vld [vmem:[%s20268_s0 + $0x268] sm:$0xff] }
 0x372   :  { %8681 = vmatmul.mubr.bf16.gmra.mrb[108].mxu1 %v20736_v21  ;;  %v14821_v21 = vld [vmem:[%s20267_s1 + $0x8cc] ss:$16 sps:$4 sm:$0xff]  }
 0x373   :  { %6983 = vmatmul.mubr.bf16.gmra.mrb[8].mxu0 %v18046_v10  ;;  %8690 = vmatprep.mubr.bf16.mxu1 %v20737_v16  ;;  %v14846_v16 = vld [vmem:[%s20267_s1 + $0xc60] ss:$16 sps:$4 sm:$0xff]   ;;  %v18086_v10 = vcombine.high %v90_v8, %v98_v50 }
 0x374   :  { %6992 = vmatprep.mubr.bf16.mxu0 %v18048_v20  ;;  %8920 = vmatpush1.bf16.msra.mxu1 %v14813_v53  ;;  %v18084_v20 = vcombine.low %v74_v27, %v82_v46  ;;  %v14819_v53 = vld [vmem:[%s20267_s1 + $0x8c8] ss:$16 sps:$4 sm:$0xff]   ;;  %v14852_v27 = vld [vmem:[%s20267_s1 + $0xc80] ss:$16 sps:$4 sm:$0xff]  }
 0x375   :  { %8921 = vmatprep.subr.bf16.mxu1 %v14818_v48  ;;  %20739 = vst [vmem:[#allocation3_spill] sm:$0xff] %v18086_v10  ;;  %v14824_v48 = vld [vmem:[%s20267_s1 + $0x8ec] ss:$16 sps:$4 sm:$0xff]   ;;  %7220 = vmatpush1.bf16.msra.mxu0 %v14846_v16  ;;  %v20740_v46 = vld [vmem:[#allocation4_spill] sm:$0xff]  ;;  %v14822_v16 = vld [vmem:[%s20267_s1 + $0x8e8] ss:$16 sps:$4 sm:$0xff]  }
 0x376   :  { %20738 = vst [vmem:[#allocation2_spill] sm:$0xff] %v18084_v20  ;;  %7221 = vmatprep.subr.bf16.mxu0 %v14854_v1  ;;  %v14860_v1 = vld [vmem:[%s20267_s1 + $0xcc4] ss:$16 sps:$4 sm:$0xff]  }
 0x378   :  { %8922 = vmatpush1.bf16.msra.mxu1 %v14816_v2  ;;  %v106_v2 = vld [vmem:[%s20268_s0 + $0x2a8] sm:$0xff] }
 0x379   :  { %8923 = vmatprep.subr.bf16.mxu1 %v14821_v21  ;;  %v114_v21 = vld [vmem:[%s20268_s0 + $0x2e8] sm:$0xff]  ;;  %7222 = vmatpush1.bf16.msra.mxu0 %v14852_v27 }
 0x37a   :  { %8691 = vmatmul.mubr.bf16.gmra.mrb[112].mxu1 %v20740_v46  ;;  %v14827_v46 = vld [vmem:[%s20267_s1 + $0x90c] ss:$16 sps:$4 sm:$0xff]   ;;  %7223 = vmatprep.subr.bf16.mxu0 %v14857_v60  ;;  %v14866_v60 = vld [vmem:[%s20267_s1 + $0xce4] ss:$16 sps:$4 sm:$0xff]  }
 0x37b   :  { %6993 = vmatmul.mubr.bf16.gmra.mrb[12].mxu0 %v18084_v20  ;;  %8700 = vmatprep.mubr.bf16.mxu1 %v20741_v43  ;;  %v14855_v43 = vld [vmem:[%s20267_s1 + $0xca0] ss:$16 sps:$4 sm:$0xff]   ;;  %v18124_v20 = vcombine.high %v106_v2, %v114_v21  ;;  %v20745_v27 = vld [vmem:[#allocation7_spill] sm:$0xff] }
 0x37c   :  { %7002 = vmatprep.mubr.bf16.mxu0 %v18086_v10  ;;  %8924 = vmatpush1.bf16.msra.mxu1 %v14819_v53  ;;  %v18122_v10 = vcombine.low %v90_v8, %v98_v50  ;;  %v14825_v53 = vld [vmem:[%s20267_s1 + $0x908] ss:$16 sps:$4 sm:$0xff]   ;;  %v14858_v8 = vld [vmem:[%s20267_s1 + $0xcc0] ss:$16 sps:$4 sm:$0xff]  }
 0x37d   :  { %8925 = vmatprep.subr.bf16.mxu1 %v14824_v48  ;;  %20743 = vst [vmem:[#allocation5_spill] sm:$0xff] %v18124_v20  ;;  %v14830_v48 = vld [vmem:[%s20267_s1 + $0x92c] ss:$16 sps:$4 sm:$0xff]   ;;  %7224 = vmatpush1.bf16.msra.mxu0 %v14855_v43  ;;  %v20744_v50 = vld [vmem:[#allocation6_spill] sm:$0xff]  ;;  %v14828_v43 = vld [vmem:[%s20267_s1 + $0x928] ss:$16 sps:$4 sm:$0xff]  }
 0x37e   :  { %20742 = vst [vmem:[#allocation4_spill] sm:$0xff] %v18122_v10  ;;  %7225 = vmatprep.subr.bf16.mxu0 %v14860_v1  ;;  %v14869_v1 = vld [vmem:[%s20267_s1 + $0xd04] ss:$16 sps:$4 sm:$0xff]  }
 0x380   :  { %8926 = vmatpush1.bf16.msra.mxu1 %v14822_v16  ;;  %v122_v16 = vld [vmem:[%s20268_s0 + $0x328] sm:$0xff] }
 0x381   :  { %8927 = vmatprep.subr.bf16.mxu1 %v14827_v46  ;;  %v130_v46 = vld [vmem:[%s20268_s0 + $0x368] sm:$0xff]  ;;  %7226 = vmatpush1.bf16.msra.mxu0 %v14858_v8  ;;  %v14872_v8 = vld [vmem:[%s20267_s1 + $0xd24] ss:$16 sps:$4 sm:$0xff]  }
 0x382   :  { %8701 = vmatmul.mubr.bf16.gmra.mrb[116].mxu1 %v20744_v50  ;;  %v14833_v50 = vld [vmem:[%s20267_s1 + $0x94c] ss:$16 sps:$4 sm:$0xff]   ;;  %7227 = vmatprep.subr.bf16.mxu0 %v14866_v60 }
 0x383   :  { %7003 = vmatmul.mubr.bf16.gmra.mrb[16].mxu0 %v18122_v10  ;;  %8710 = vmatprep.mubr.bf16.mxu1 %v20745_v27  ;;  %v14864_v27 = vld [vmem:[%s20267_s1 + $0xce0] ss:$16 sps:$4 sm:$0xff]   ;;  %v18162_v10 = vcombine.high %v122_v16, %v130_v46  ;;  %v20749_v60 = vld [vmem:[#allocation9_spill] sm:$0xff] }
 0x384   :  { %7012 = vmatprep.mubr.bf16.mxu0 %v18124_v20  ;;  %8928 = vmatpush1.bf16.msra.mxu1 %v14825_v53  ;;  %v18160_v20 = vcombine.low %v106_v2, %v114_v21  ;;  %v14831_v53 = vld [vmem:[%s20267_s1 + $0x948] ss:$16 sps:$4 sm:$0xff]   ;;  %v14867_v2 = vld [vmem:[%s20267_s1 + $0xd00] ss:$16 sps:$4 sm:$0xff]  }
 0x385   :  { %8929 = vmatprep.subr.bf16.mxu1 %v14830_v48  ;;  %20747 = vst [vmem:[#allocation7_spill] sm:$0xff] %v18162_v10  ;;  %v14839_v48 = vld [vmem:[%s20267_s1 + $0x96c] ss:$16 sps:$4 sm:$0xff]   ;;  %7228 = vmatpush1.bf16.msra.mxu0 %v14864_v27  ;;  %v20748_v21 = vld [vmem:[#allocation8_spill] sm:$0xff]  ;;  %v14837_v27 = vld [vmem:[%s20267_s1 + $0x968] ss:$16 sps:$4 sm:$0xff]  }
 0x386   :  { %20746 = vst [vmem:[#allocation6_spill] sm:$0xff] %v18160_v20  ;;  %7229 = vmatprep.subr.bf16.mxu0 %v14869_v1  ;;  %v14878_v1 = vld [vmem:[%s20267_s1 + $0xd44] ss:$16 sps:$4 sm:$0xff]  }
 0x388   :  { %8930 = vmatpush1.bf16.msra.mxu1 %v14828_v43  ;;  %v138_v43 = vld [vmem:[%s20268_s0 + $0x3a8] sm:$0xff] }
 0x389   :  { %8931 = vmatprep.subr.bf16.mxu1 %v14833_v50  ;;  %v146_v50 = vld [vmem:[%s20268_s0 + $0x3e8] sm:$0xff]  ;;  %7230 = vmatpush1.bf16.msra.mxu0 %v14867_v2  ;;  %v14881_v2 = vld [vmem:[%s20267_s1 + $0xd64] ss:$16 sps:$4 sm:$0xff]  }
 0x38a   :  { %8711 = vmatmul.mubr.bf16.gmra.mrb[120].mxu1 %v20748_v21  ;;  %v14851_v21 = vld [vmem:[%s20267_s1 + $0x98c] ss:$16 sps:$4 sm:$0xff]   ;;  %7231 = vmatprep.subr.bf16.mxu0 %v14872_v8 }
 0x38b   :  { %7013 = vmatmul.mubr.bf16.gmra.mrb[20].mxu0 %v18160_v20  ;;  %8720 = vmatprep.mubr.bf16.mxu1 %v20749_v60  ;;  %v14870_v60 = vld [vmem:[%s20267_s1 + $0xd20] ss:$16 sps:$4 sm:$0xff]   ;;  %v18200_v20 = vcombine.high %v138_v43, %v146_v50  ;;  %v20753_v8 = vld [vmem:[#allocation11_spill] sm:$0xff] }
 0x38c   :  { %7022 = vmatprep.mubr.bf16.mxu0 %v18162_v10  ;;  %8932 = vmatpush1.bf16.msra.mxu1 %v14831_v53  ;;  %v18198_v10 = vcombine.low %v122_v16, %v130_v46  ;;  %v14849_v53 = vld [vmem:[%s20267_s1 + $0x988] ss:$16 sps:$4 sm:$0xff]   ;;  %v14876_v16 = vld [vmem:[%s20267_s1 + $0xd40] ss:$16 sps:$4 sm:$0xff]  }
 0x38d   :  { %8933 = vmatprep.subr.bf16.mxu1 %v14839_v48  ;;  %20751 = vst [vmem:[#allocation9_spill] sm:$0xff] %v18200_v20  ;;  %v14863_v48 = vld [vmem:[%s20267_s1 + $0x9ac] ss:$16 sps:$4 sm:$0xff]   ;;  %7232 = vmatpush1.bf16.msra.mxu0 %v14870_v60  ;;  %v20752_v46 = vld [vmem:[#allocation10_spill] sm:$0xff]  ;;  %v14861_v60 = vld [vmem:[%s20267_s1 + $0x9a8] ss:$16 sps:$4 sm:$0xff]  }
 0x38e   :  { %20750 = vst [vmem:[#allocation8_spill] sm:$0xff] %v18198_v10  ;;  %7233 = vmatprep.subr.bf16.mxu0 %v14878_v1  ;;  %v14884_v1 = vld [vmem:[%s20267_s1 + $0xd84] ss:$16 sps:$4 sm:$0xff]  }
 0x390   :  { %8934 = vmatpush1.bf16.msra.mxu1 %v14837_v27  ;;  %v154_v27 = vld [vmem:[%s20268_s0 + $0x428] sm:$0xff] }
 0x391   :  { %8935 = vmatprep.subr.bf16.mxu1 %v14851_v21  ;;  %v162_v21 = vld [vmem:[%s20268_s0 + $0x468] sm:$0xff]  ;;  %7234 = vmatpush1.bf16.msra.mxu0 %v14876_v16 }
 0x392   :  { %8721 = vmatmul.mubr.bf16.gmra.mrb[124].mxu1 %v20752_v46  ;;  %v14875_v46 = vld [vmem:[%s20267_s1 + $0x9cc] ss:$16 sps:$4 sm:$0xff]   ;;  %7235 = vmatprep.subr.bf16.mxu0 %v14881_v2 }
 0x393   :  { %7023 = vmatmul.mubr.bf16.gmra.mrb[24].mxu0 %v18198_v10  ;;  %8730 = vmatprep.mubr.bf16.mxu1 %v20753_v8  ;;  %v14879_v8 = vld [vmem:[%s20267_s1 + $0xd60] ss:$16 sps:$4 sm:$0xff]   ;;  %v18238_v10 = vcombine.high %v154_v27, %v162_v21  ;;  %v14890_v16 = vld [vmem:[%s20267_s1 + $0x9ec] ss:$16 sps:$4 sm:$0xff]  }
 0x394   :  { %7032 = vmatprep.mubr.bf16.mxu0 %v18200_v20  ;;  %8936 = vmatpush1.bf16.msra.mxu1 %v14849_v53  ;;  %v18236_v20 = vcombine.low %v138_v43, %v146_v50  ;;  %v14873_v53 = vld [vmem:[%s20267_s1 + $0x9c8] ss:$16 sps:$4 sm:$0xff]   ;;  %v14887_v43 = vld [vmem:[%s20267_s1 + $0xda4] ss:$16 sps:$4 sm:$0xff]  }
 0x395   :  { %8937 = vmatprep.subr.bf16.mxu1 %v14863_v48  ;;  %20754 = vst [vmem:[#allocation10_spill] sm:$0xff] %v18238_v10  ;;  %7236 = vmatpush1.bf16.msra.mxu0 %v14879_v8  ;;  %v14882_v48 = vld [vmem:[%s20267_s1 + $0xd80] ss:$16 sps:$4 sm:$0xff]   ;;  %v170_v2 = vld [vmem:[%s20268_s0 + $0x4a8] sm:$0xff]  ;;  %v18271_v8 = vcombine.low %v154_v27, %v162_v21  ;;  %v14896_v27 = vld [vmem:[%s20267_s1 + $0xde4] ss:$16 sps:$4 sm:$0xff]  }
 0x396   :  { %v20755_v50 = vld [vmem:[#allocation12_spill] sm:$0xff]  ;;  %7237 = vmatprep.subr.bf16.mxu0 %v14884_v1  ;;  %v20759_v21 = vld [vmem:[#allocation14_spill] sm:$0xff] }
 0x397   :  { %20756 = vst [vmem:[#allocation11_spill] sm:$0xff] %v18271_v8  ;;  %v14891_v1 = vld [vmem:[%s20267_s1 + $0xdc0] ss:$16 sps:$4 sm:$0xff]  }
 0x398   :  { %8938 = vmatpush1.bf16.msra.mxu1 %v14861_v60  ;;  %v14888_v60 = vld [vmem:[%s20267_s1 + $0x9e8] ss:$16 sps:$4 sm:$0xff]  }
 0x399   :  { %8939 = vmatprep.subr.bf16.mxu1 %v14875_v46  ;;  %7238 = vmatpush1.bf16.msra.mxu0 %v14882_v48  ;;  %v14885_v46 = vld [vmem:[%s20267_s1 + $0xda0] ss:$16 sps:$4 sm:$0xff]   ;;  %v20758_v48 = vld [vmem:[#allocation13_spill] sm:$0xff] }
 0x39a   :  { %8731 = vmatmul.mubr.bf16.gmra.mrb[128].mxu1 %v17152_v44  ;;  %v178_v44 = vld [vmem:[%s20268_s0 + $0x4e8] sm:$0xff]  ;;  %7239 = vmatprep.subr.bf16.mxu0 %v14887_v43 }
 0x39b   :  { %7033 = vmatmul.mubr.bf16.gmra.mrb[28].mxu0 %v18236_v20  ;;  %8740 = vmatprep.mubr.bf16.mxu1 %v20755_v50  ;;  %v18273_v50 = vcombine.high %v170_v2, %v178_v44  ;;  %v186_v43 = vld [vmem:[%s20268_s0 + $0x528] sm:$0xff] }
 0x39c   :  { %7042 = vmatprep.mubr.bf16.mxu0 %v18238_v10  ;;  %8940 = vmatpush1.bf16.msra.mxu1 %v14873_v53  ;;  %v14893_v53 = vld [vmem:[%s20267_s1 + $0xdc4] ss:$16 sps:$4 sm:$0xff]  }
 0x39d   :  { %8941 = vmatprep.subr.bf16.mxu1 %v14890_v16  ;;  %20757 = vst [vmem:[#allocation12_spill] sm:$0xff] %v18273_v50  ;;  %7240 = vmatpush1.bf16.msra.mxu0 %v14885_v46  ;;  %v194_v16 = vld [vmem:[%s20268_s0 + $0x568] sm:$0xff]  ;;  %v18297_v46 = vcombine.low %v170_v2, %v178_v44 }
 0x39e   :  { %7241 = vmatprep.subr.bf16.mxu0 %v14893_v53  ;;  %v20763_v53 = vld [vmem:[#allocation16_spill] sm:$0xff]  ;;  %v202_v2 = vld [vmem:[%s20268_s0 + $0x5a8] sm:$0xff] }
 0x39f   :  { %20760 = vst [vmem:[#allocation13_spill] sm:$0xff] %v18297_v46  ;;  %v210_v44 = vld [vmem:[%s20268_s0 + $0x5e8] sm:$0xff] }
 0x3a0   :  { %8942 = vmatpush1.bf16.msra.mxu1 %v14888_v60  ;;  %v14894_v60 = vld [vmem:[%s20267_s1 + $0xde0] ss:$16 sps:$4 sm:$0xff]  }
 0x3a1   :  { %7242 = vmatpush1.bf16.msra.mxu0 %v14891_v1  ;;  %v18314_v1 = vcombine.low %v186_v43, %v194_v16 }
 0x3a2   :  { %8741 = vmatmul.mubr.bf16.gmra.mrb[132].mxu1 %v20758_v48  ;;  %7243 = vmatprep.subr.bf16.mxu0 %v14896_v27  ;;  %v18299_v48 = vcombine.high %v186_v43, %v194_v16  ;;  %v18316_v27 = vcombine.high %v202_v2, %v210_v44  ;;  %v18328_v43 = vcombine.low %v202_v2, %v210_v44 }
 0x3a3   :  { %7043 = vmatmul.mubr.bf16.gmra.mrb[32].mxu0 %v18271_v8  ;;  %8750 = vmatprep.mubr.bf16.mxu1 %v20759_v21  ;;  %v20762_v21 = vld [vmem:[#allocation15_spill] sm:$0xff]  ;;  %v83_v8 = vld [vmem:[%s20268_s0 + $0x1f0] sm:$0xff] }
 0x3a4   :  { %7052 = vmatprep.mubr.bf16.mxu0 %v18273_v50  ;;  %20761 = vst [vmem:[#allocation14_spill] sm:$0xff] %v18299_v48  ;;  %v14899_v50 = vld [vmem:[%s20267_s1 + $0xa0c] ss:$16 sps:$4 sm:$0xff]   ;;  %20764 = vst [vmem:[#allocation15_spill] sm:$0xff] %v18314_v1 }
 0x3a5   :  { %7244 = vmatpush1.bf16.msra.mxu0 %v14894_v60  ;;  %9194 = vmatprep.subr.bf16.mxu1 %v14899_v50  ;;  %20765 = vst [vmem:[#allocation16_spill] sm:$0xff] %v18316_v27  ;;  %v20766_v60 = vld [vmem:[#allocation17_spill] sm:$0xff]  ;;  %v226_v50 = vld [vmem:[%s20268_s0 + $0x668] sm:$0xff] }
 0x3a6   :  { %20768 = vst [vmem:[#allocation17_spill] sm:$0xff] %v18328_v43 }
 0x3aa   :  { %8751 = vmatmul.mubr.bf16.gmra.mrb[136].mxu1 %v20762_v21  ;;  %v20767_v21 = vld [vmem:[#allocation18_spill] sm:$0xff] }
 0x3ab   :  { %7053 = vmatmul.mubr.bf16.gmra.mrb[36].mxu0 %v18297_v46  ;;  %8760 = vmatprep.mubr.bf16.mxu1 %v20763_v53  ;;  %v218_v53 = vld [vmem:[%s20268_s0 + $0x628] sm:$0xff]  ;;  %v75_v46 = vld [vmem:[%s20268_s0 + $0x1b0] sm:$0xff] }
 0x3ac   :  { %7062 = vmatprep.mubr.bf16.mxu0 %v18299_v48  ;;  %v18330_v16 = vcombine.high %v218_v53, %v226_v50  ;;  %v18342_v2 = vcombine.low %v218_v53, %v226_v50  ;;  %v14908_v48 = vld [vmem:[%s20267_s1 + $0xa6c] ss:$16 sps:$4 sm:$0xff]   ;;  %v18590_v10 = vcombine.high %v75_v46, %v83_v8 }
 0x3ae   :  { %20769 = vst [vmem:[#allocation18_spill] sm:$0xff] %v18330_v16 }
 0x3b2   :  { %8761 = vmatmul.mubr.bf16.gmra.mrb[140].mxu1 %v20766_v60  ;;  %v20771_v60 = vld [vmem:[#allocation20_spill] sm:$0xff] }
 0x3b3   :  { %7063 = vmatmul.mubr.bf16.gmra.mrb[40].mxu0 %v18314_v1  ;;  %8770 = vmatprep.mubr.bf16.mxu1 %v20767_v21  ;;  %v20770_v1 = vld [vmem:[#allocation19_spill] sm:$0xff] }
 0x3b4   :  { %7072 = vmatprep.mubr.bf16.mxu0 %v18316_v27  ;;  %v234_v21 = vld [vmem:[%s20268_s0 + $0x6a8] sm:$0xff]  ;;  %20772 = vst [vmem:[#allocation19_spill] sm:$0xff] %v18342_v2 }
 0x3b5   :  { %v242_v27 = vld [vmem:[%s20268_s0 + $0x6e8] sm:$0xff] }
 0x3b6   :  { %v18344_v44 = vcombine.high %v234_v21, %v242_v27  ;;  %v18356_v53 = vcombine.low %v234_v21, %v242_v27 }
 0x3b8   :  { %20773 = vst [vmem:[#allocation20_spill] sm:$0xff] %v18344_v44 }
 0x3ba   :  { %8771 = vmatmul.mubr.bf16.gmra.mrb[144].mxu1 %v20770_v1  ;;  %v20775_v1 = vld [vmem:[#allocation22_spill] sm:$0xff] }
 0x3bb   :  { %7073 = vmatmul.mubr.bf16.gmra.mrb[44].mxu0 %v18328_v43  ;;  %8780 = vmatprep.mubr.bf16.mxu1 %v20771_v60  ;;  %v20774_v43 = vld [vmem:[#allocation21_spill] sm:$0xff]  ;;  %v250_v60 = vld [vmem:[%s20268_s0 + $0x728] sm:$0xff] }
 0x3bc   :  { %7082 = vmatprep.mubr.bf16.mxu0 %v18330_v16  ;;  %v258_v16 = vld [vmem:[%s20268_s0 + $0x768] sm:$0xff]  ;;  %20776 = vst [vmem:[#allocation21_spill] sm:$0xff] %v18356_v53 }
 0x3bd   :  { %v18358_v50 = vcombine.high %v250_v60, %v258_v16  ;;  %v18370_v27 = vcombine.low %v250_v60, %v258_v16 }
 0x3bf   :  { %20777 = vst [vmem:[#allocation22_spill] sm:$0xff] %v18358_v50 }
 0x3c2   :  { %8781 = vmatmul.mubr.bf16.gmra.mrb[148].mxu1 %v20774_v43  ;;  %v20779_v43 = vld [vmem:[#allocation24_spill] sm:$0xff] }
 0x3c3   :  { %7083 = vmatmul.mubr.bf16.gmra.mrb[48].mxu0 %v18342_v2  ;;  %8790 = vmatprep.mubr.bf16.mxu1 %v20775_v1  ;;  %v20778_v2 = vld [vmem:[#allocation23_spill] sm:$0xff] }
 0x3c4   :  { %7092 = vmatprep.mubr.bf16.mxu0 %v18344_v44  ;;  %v266_v1 = vld [vmem:[%s20268_s0 + $0x7a8] sm:$0xff]  ;;  %20780 = vst [vmem:[#allocation23_spill] sm:$0xff] %v18370_v27 }
 0x3c5   :  { %v274_v44 = vld [vmem:[%s20268_s0 + $0x7e8] sm:$0xff] }
 0x3c6   :  { %v18372_v21 = vcombine.high %v266_v1, %v274_v44  ;;  %v18384_v16 = vcombine.low %v266_v1, %v274_v44 }
 0x3c8   :  { %20781 = vst [vmem:[#allocation24_spill] sm:$0xff] %v18372_v21 }
 0x3ca   :  { %8791 = vmatmul.mubr.bf16.gmra.mrb[152].mxu1 %v20778_v2  ;;  %v20783_v2 = vld [vmem:[#allocation26_spill] sm:$0xff] }
 0x3cb   :  { %7093 = vmatmul.mubr.bf16.gmra.mrb[52].mxu0 %v18356_v53  ;;  %8800 = vmatprep.mubr.bf16.mxu1 %v20779_v43  ;;  %v20782_v53 = vld [vmem:[#allocation25_spill] sm:$0xff]  ;;  %v282_v43 = vld [vmem:[%s20268_s0 + $0x828] sm:$0xff] }
 0x3cc   :  { %7102 = vmatprep.mubr.bf16.mxu0 %v18358_v50  ;;  %v290_v50 = vld [vmem:[%s20268_s0 + $0x868] sm:$0xff]  ;;  %20784 = vst [vmem:[#allocation25_spill] sm:$0xff] %v18384_v16 }
 0x3cd   :  { %v18386_v60 = vcombine.high %v282_v43, %v290_v50  ;;  %v18398_v44 = vcombine.low %v282_v43, %v290_v50 }
 0x3cf   :  { %20785 = vst [vmem:[#allocation26_spill] sm:$0xff] %v18386_v60 }
 0x3d2   :  { %8801 = vmatmul.mubr.bf16.gmra.mrb[156].mxu1 %v20782_v53  ;;  %v20787_v53 = vld [vmem:[#allocation28_spill] sm:$0xff] }
 0x3d3   :  { %7103 = vmatmul.mubr.bf16.gmra.mrb[56].mxu0 %v18370_v27  ;;  %8810 = vmatprep.mubr.bf16.mxu1 %v20783_v2  ;;  %v20786_v27 = vld [vmem:[#allocation27_spill] sm:$0xff] }
 0x3d4   :  { %7112 = vmatprep.mubr.bf16.mxu0 %v18372_v21  ;;  %v298_v2 = vld [vmem:[%s20268_s0 + $0x8a8] sm:$0xff]  ;;  %20788 = vst [vmem:[#allocation27_spill] sm:$0xff] %v18398_v44 }
 0x3d5   :  { %v306_v21 = vld [vmem:[%s20268_s0 + $0x8e8] sm:$0xff] }
 0x3d6   :  { %v18400_v1 = vcombine.high %v298_v2, %v306_v21  ;;  %v18412_v50 = vcombine.low %v298_v2, %v306_v21 }
 0x3d8   :  { %20789 = vst [vmem:[#allocation28_spill] sm:$0xff] %v18400_v1 }
 0x3da   :  { %8811 = vmatmul.mubr.bf16.gmra.mrb[160].mxu1 %v20786_v27  ;;  %v20791_v27 = vld [vmem:[#allocation30_spill] sm:$0xff] }
 0x3db   :  { %7113 = vmatmul.mubr.bf16.gmra.mrb[60].mxu0 %v18384_v16  ;;  %8820 = vmatprep.mubr.bf16.mxu1 %v20787_v53  ;;  %v20790_v16 = vld [vmem:[#allocation29_spill] sm:$0xff]  ;;  %v314_v53 = vld [vmem:[%s20268_s0 + $0x928] sm:$0xff] }
 0x3dc   :  { %7122 = vmatprep.mubr.bf16.mxu0 %v18386_v60  ;;  %v322_v60 = vld [vmem:[%s20268_s0 + $0x968] sm:$0xff]  ;;  %20792 = vst [vmem:[#allocation29_spill] sm:$0xff] %v18412_v50 }
 0x3dd   :  { %v18414_v43 = vcombine.high %v314_v53, %v322_v60  ;;  %v18426_v21 = vcombine.low %v314_v53, %v322_v60 }
 0x3df   :  { %20793 = vst [vmem:[#allocation30_spill] sm:$0xff] %v18414_v43 }
 0x3e2   :  { %8821 = vmatmul.mubr.bf16.gmra.mrb[164].mxu1 %v20790_v16  ;;  %v20795_v16 = vld [vmem:[#allocation32_spill] sm:$0xff] }
 0x3e3   :  { %7123 = vmatmul.mubr.bf16.gmra.mrb[64].mxu0 %v18398_v44  ;;  %8830 = vmatprep.mubr.bf16.mxu1 %v20791_v27  ;;  %v20794_v44 = vld [vmem:[#allocation31_spill] sm:$0xff] }
 0x3e4   :  { %7132 = vmatprep.mubr.bf16.mxu0 %v18400_v1  ;;  %v330_v27 = vld [vmem:[%s20268_s0 + $0x9a8] sm:$0xff]  ;;  %20796 = vst [vmem:[#allocation31_spill] sm:$0xff] %v18426_v21 }
 0x3e5   :  { %v338_v1 = vld [vmem:[%s20268_s0 + $0x9e8] sm:$0xff] }
 0x3e6   :  { %v18428_v2 = vcombine.high %v330_v27, %v338_v1  ;;  %v18440_v60 = vcombine.low %v330_v27, %v338_v1 }
 0x3e8   :  { %20797 = vst [vmem:[#allocation32_spill] sm:$0xff] %v18428_v2 }
 0x3ea   :  { %8831 = vmatmul.mubr.bf16.gmra.mrb[168].mxu1 %v20794_v44  ;;  %v20799_v44 = vld [vmem:[#allocation34_spill] sm:$0xff] }
 0x3eb   :  { %7133 = vmatmul.mubr.bf16.gmra.mrb[68].mxu0 %v18412_v50  ;;  %8840 = vmatprep.mubr.bf16.mxu1 %v20795_v16  ;;  %v20798_v50 = vld [vmem:[#allocation33_spill] sm:$0xff]  ;;  %v346_v16 = vld [vmem:[%s20268_s0 + $0xa28] sm:$0xff] }
 0x3ec   :  { %7142 = vmatprep.mubr.bf16.mxu0 %v18414_v43  ;;  %v354_v43 = vld [vmem:[%s20268_s0 + $0xa68] sm:$0xff]  ;;  %20800 = vst [vmem:[#allocation33_spill] sm:$0xff] %v18440_v60 }
 0x3ed   :  { %v18442_v53 = vcombine.high %v346_v16, %v354_v43  ;;  %v18454_v1 = vcombine.low %v346_v16, %v354_v43 }
 0x3ef   :  { %20801 = vst [vmem:[#allocation34_spill] sm:$0xff] %v18442_v53 }
 0x3f2   :  { %8841 = vmatmul.mubr.bf16.gmra.mrb[172].mxu1 %v20798_v50  ;;  %v20803_v50 = vld [vmem:[#allocation36_spill] sm:$0xff] }
 0x3f3   :  { %7143 = vmatmul.mubr.bf16.gmra.mrb[72].mxu0 %v18426_v21  ;;  %8850 = vmatprep.mubr.bf16.mxu1 %v20799_v44  ;;  %v20802_v21 = vld [vmem:[#allocation35_spill] sm:$0xff] }
 0x3f4   :  { %7152 = vmatprep.mubr.bf16.mxu0 %v18428_v2  ;;  %v362_v44 = vld [vmem:[%s20268_s0 + $0xaa8] sm:$0xff]  ;;  %20804 = vst [vmem:[#allocation35_spill] sm:$0xff] %v18454_v1 }
 0x3f5   :  { %v370_v2 = vld [vmem:[%s20268_s0 + $0xae8] sm:$0xff] }
 0x3f6   :  { %v18456_v27 = vcombine.high %v362_v44, %v370_v2  ;;  %v18468_v43 = vcombine.low %v362_v44, %v370_v2 }
 0x3f8   :  { %20805 = vst [vmem:[#allocation36_spill] sm:$0xff] %v18456_v27 }
 0x3fa   :  { %8851 = vmatmul.mubr.bf16.gmra.mrb[176].mxu1 %v20802_v21  ;;  %v20807_v21 = vld [vmem:[#allocation38_spill] sm:$0xff] }
 0x3fb   :  { %7153 = vmatmul.mubr.bf16.gmra.mrb[76].mxu0 %v18440_v60  ;;  %8860 = vmatprep.mubr.bf16.mxu1 %v20803_v50  ;;  %v20806_v60 = vld [vmem:[#allocation37_spill] sm:$0xff]  ;;  %v378_v50 = vld [vmem:[%s20268_s0 + $0xb28] sm:$0xff] }
 0x3fc   :  { %7162 = vmatprep.mubr.bf16.mxu0 %v18442_v53  ;;  %v386_v53 = vld [vmem:[%s20268_s0 + $0xb68] sm:$0xff]  ;;  %20808 = vst [vmem:[#allocation37_spill] sm:$0xff] %v18468_v43 }
 0x3fd   :  { %v18470_v16 = vcombine.high %v378_v50, %v386_v53  ;;  %v18482_v2 = vcombine.low %v378_v50, %v386_v53 }
 0x3ff   :  { %20809 = vst [vmem:[#allocation38_spill] sm:$0xff] %v18470_v16 }
 0x402   :  { %8861 = vmatmul.mubr.bf16.gmra.mrb[180].mxu1 %v20806_v60  ;;  %v20811_v60 = vld [vmem:[#allocation40_spill] sm:$0xff] }
 0x403   :  { %7163 = vmatmul.mubr.bf16.gmra.mrb[80].mxu0 %v18454_v1  ;;  %8870 = vmatprep.mubr.bf16.mxu1 %v20807_v21  ;;  %v20810_v1 = vld [vmem:[#allocation39_spill] sm:$0xff] }
 0x404   :  { %7172 = vmatprep.mubr.bf16.mxu0 %v18456_v27  ;;  %v394_v21 = vld [vmem:[%s20268_s0 + $0xba8] sm:$0xff]  ;;  %20812 = vst [vmem:[#allocation39_spill] sm:$0xff] %v18482_v2 }
 0x405   :  { %v402_v27 = vld [vmem:[%s20268_s0 + $0xbe8] sm:$0xff] }
 0x406   :  { %v18484_v44 = vcombine.high %v394_v21, %v402_v27  ;;  %v18496_v53 = vcombine.low %v394_v21, %v402_v27 }
 0x408   :  { %20813 = vst [vmem:[#allocation40_spill] sm:$0xff] %v18484_v44 }
 0x40a   :  { %8871 = vmatmul.mubr.bf16.gmra.mrb[184].mxu1 %v20810_v1  ;;  %v20815_v1 = vld [vmem:[#allocation42_spill] sm:$0xff] }
 0x40b   :  { %7173 = vmatmul.mubr.bf16.gmra.mrb[84].mxu0 %v18468_v43  ;;  %8880 = vmatprep.mubr.bf16.mxu1 %v20811_v60  ;;  %v20814_v43 = vld [vmem:[#allocation41_spill] sm:$0xff]  ;;  %v410_v60 = vld [vmem:[%s20268_s0 + $0xc28] sm:$0xff] }
 0x40c   :  { %7182 = vmatprep.mubr.bf16.mxu0 %v18470_v16  ;;  %v418_v16 = vld [vmem:[%s20268_s0 + $0xc68] sm:$0xff]  ;;  %20816 = vst [vmem:[#allocation41_spill] sm:$0xff] %v18496_v53 }
 0x40d   :  { %v18498_v50 = vcombine.high %v410_v60, %v418_v16  ;;  %v18510_v27 = vcombine.low %v410_v60, %v418_v16  ;;  %v14897_v60 = vld [vmem:[%s20267_s1 + $0xa08] ss:$16 sps:$4 sm:$0xff]  }
 0x40f   :  { %20817 = vst [vmem:[#allocation42_spill] sm:$0xff] %v18498_v50 }
 0x412   :  { %8881 = vmatmul.mubr.bf16.gmra.mrb[188].mxu1 %v20814_v43  ;;  %v20819_v43 = vld [vmem:[#allocation44_spill] sm:$0xff] }
 0x413   :  { %7183 = vmatmul.mubr.bf16.gmra.mrb[88].mxu0 %v18482_v2  ;;  %8890 = vmatprep.mubr.bf16.mxu1 %v20815_v1  ;;  %v20818_v2 = vld [vmem:[#allocation43_spill] sm:$0xff]  ;;  %v27_v1 = vld [vmem:[%s20268_s0 + $0x30] sm:$0xff] }
 0x414   :  { %7192 = vmatprep.mubr.bf16.mxu0 %v18484_v44  ;;  %v35_v44 = vld [vmem:[%s20268_s0 + $0x70] sm:$0xff]  ;;  %20820 = vst [vmem:[#allocation43_spill] sm:$0xff] %v18510_v27 }
 0x415   :  { %v18512_v21 = vcombine.high %v27_v1, %v35_v44  ;;  %v18524_v16 = vcombine.low %v27_v1, %v35_v44  ;;  %v14900_v44 = vld [vmem:[%s20267_s1 + $0xa28] ss:$16 sps:$4 sm:$0xff]   ;;  %v20827_v1 = vld [vmem:[#allocation48_spill] sm:$0xff] }
 0x417   :  { %20821 = vst [vmem:[#allocation44_spill] sm:$0xff] %v18512_v21 }
 0x41a   :  { %8891 = vmatmul.mubr.bf16.gmra.mrb[192].mxu1 %v20818_v2  ;;  %v20823_v2 = vld [vmem:[#allocation46_spill] sm:$0xff] }
 0x41b   :  { %7193 = vmatmul.mubr.bf16.gmra.mrb[92].mxu0 %v18496_v53  ;;  %8900 = vmatprep.mubr.bf16.mxu1 %v20819_v43  ;;  %v20822_v53 = vld [vmem:[#allocation45_spill] sm:$0xff]  ;;  %v43_v43 = vld [vmem:[%s20268_s0 + $0xb0] sm:$0xff] }
 0x41c   :  { %7202 = vmatprep.mubr.bf16.mxu0 %v18498_v50  ;;  %v51_v50 = vld [vmem:[%s20268_s0 + $0xf0] sm:$0xff]  ;;  %20824 = vst [vmem:[#allocation45_spill] sm:$0xff] %v18524_v16 }
 0x422   :  { %8901 = vmatmul.mubr.bf16.gmra.mrb[196].mxu1 %v20822_v53  ;;  %v14902_v53 = vld [vmem:[%s20267_s1 + $0xa2c] ss:$16 sps:$4 sm:$0xff]  }
 0x423   :  { %7203 = vmatmul.mubr.bf16.gmra.mrb[96].mxu0 %v18510_v27  ;;  %8943 = vmatprep.mubr.bf16.mxu1 %v20823_v2  ;;  %v18529_v27 = vcombine.high %v43_v43, %v51_v50  ;;  %v20826_v2 = vld [vmem:[#allocation47_spill] sm:$0xff] }
 0x424   :  { %7245 = vmatprep.mubr.bf16.mxu0 %v18512_v21  ;;  %v59_v21 = vld [vmem:[%s20268_s0 + $0x130] sm:$0xff] }
 0x425   :  { %20825 = vst [vmem:[#allocation46_spill] sm:$0xff] %v18529_v27 }
 0x42a   :  { %8944 = vmatmul.mubr.bf16.vlgmr.msra.gmra.mrb[100].mxu1 %v20826_v2  ;;  %v18550_v2 = vcombine.low %v43_v43, %v51_v50  ;;  %v14930_v50 = vld [vmem:[%s20267_s1 + $0xe00] ss:$16 sps:$4 sm:$0xff]   ;;  %v20830_v43 = vld [vmem:[#allocation49_spill] sm:$0xff] }
 0x42b   :  { %7246 = vmatmul.mubr.bf16.vlgmr.msra.gmra.mrb[0].mxu0 %v18524_v16  ;;  %9195 = vmatpush1.bf16.msra.mxu1 %v14897_v60  ;;  %v67_v16 = vld [vmem:[%s20268_s0 + $0x170] sm:$0xff]  ;;  %v14905_v60 = vld [vmem:[%s20267_s1 + $0xa4c] ss:$16 sps:$4 sm:$0xff]  }
 0x42c   :  { %7255 = vmatprep.mubr.bf16.mxu0 %v18529_v27  ;;  %8953 = vmatprep.mubr.bf16.mxu1 %v20827_v1  ;;  %20828 = vst [vmem:[#allocation47_spill] sm:$0xff] %v18550_v2  ;;  %v18552_v27 = vcombine.high %v59_v21, %v67_v16  ;;  %v14932_v1 = vld [vmem:[%s20267_s1 + $0xe04] ss:$16 sps:$4 sm:$0xff]  }
 0x42d   :  { %9196 = vmatprep.subr.bf16.mxu1 %v14902_v53  ;;  %v14903_v53 = vld [vmem:[%s20267_s1 + $0xa48] ss:$16 sps:$4 sm:$0xff]   ;;  %7496 = vmatprep.subr.bf16.mxu0 %v14932_v1  ;;  %v14914_v1 = vld [vmem:[%s20267_s1 + $0xaac] ss:$16 sps:$4 sm:$0xff]  }
 0x42e   :  { %20829 = vst [vmem:[#allocation48_spill] sm:$0xff] %v18552_v27  ;;  %7497 = vmatpush1.bf16.msra.mxu0 %v14930_v50  ;;  %v99_v50 = vld [vmem:[%s20268_s0 + $0x270] sm:$0xff] }
 0x42f   :  { %9197 = vmatpush1.bf16.msra.mxu1 %v14900_v44  ;;  %v20831_v44 = vld [vmem:[#allocation50_spill] sm:$0xff] }
 0x430   :  { %9198 = vmatprep.subr.bf16.mxu1 %v14905_v60  ;;  %v14938_v60 = vld [vmem:[%s20267_s1 + $0xe24] ss:$16 sps:$4 sm:$0xff]  }
 0x431   :  { %7498 = vmatprep.subr.bf16.mxu0 %v14938_v60  ;;  %v14917_v60 = vld [vmem:[%s20267_s1 + $0xacc] ss:$16 sps:$4 sm:$0xff]  }
 0x432   :  { %8954 = vmatmul.mubr.bf16.gmra.mrb[104].mxu1 %v20830_v43  ;;  %v14906_v43 = vld [vmem:[%s20267_s1 + $0xa68] ss:$16 sps:$4 sm:$0xff]  }
 0x433   :  { %7256 = vmatmul.mubr.bf16.gmra.mrb[4].mxu0 %v18550_v2  ;;  %8963 = vmatprep.mubr.bf16.mxu1 %v20831_v44  ;;  %v14911_v44 = vld [vmem:[%s20267_s1 + $0xa8c] ss:$16 sps:$4 sm:$0xff]   ;;  %v18588_v2 = vcombine.low %v59_v21, %v67_v16  ;;  %v14939_v21 = vld [vmem:[%s20267_s1 + $0xe40] ss:$16 sps:$4 sm:$0xff]   ;;  %v14944_v16 = vld [vmem:[%s20267_s1 + $0xe64] ss:$16 sps:$4 sm:$0xff]  }
 0x434   :  { %7265 = vmatprep.mubr.bf16.mxu0 %v18552_v27  ;;  %9199 = vmatpush1.bf16.msra.mxu1 %v14903_v53  ;;  %v14936_v27 = vld [vmem:[%s20267_s1 + $0xe20] ss:$16 sps:$4 sm:$0xff]   ;;  %v14909_v53 = vld [vmem:[%s20267_s1 + $0xa88] ss:$16 sps:$4 sm:$0xff]  }
 0x435   :  { %9200 = vmatprep.subr.bf16.mxu1 %v14908_v48  ;;  %v14941_v48 = vld [vmem:[%s20267_s1 + $0xe44] ss:$16 sps:$4 sm:$0xff]   ;;  %7499 = vmatpush1.bf16.msra.mxu0 %v14936_v27 }
 0x436   :  { %v91_v27 = vld [vmem:[%s20268_s0 + $0x230] sm:$0xff]  ;;  %7500 = vmatprep.subr.bf16.mxu0 %v14941_v48 }
 0x437   :  { %v14950_v48 = vld [vmem:[%s20267_s1 + $0xe84] ss:$16 sps:$4 sm:$0xff]  }
 0x438   :  { %9201 = vmatpush1.bf16.msra.mxu1 %v14906_v43  ;;  %v18626_v43 = vcombine.low %v75_v46, %v83_v8  ;;  %v14948_v8 = vld [vmem:[%s20267_s1 + $0xe80] ss:$16 sps:$4 sm:$0xff]   ;;  %v14953_v46 = vld [vmem:[%s20267_s1 + $0xea4] ss:$16 sps:$4 sm:$0xff]  }
 0x439   :  { %9202 = vmatprep.subr.bf16.mxu1 %v14911_v44  ;;  %7501 = vmatpush1.bf16.msra.mxu0 %v14939_v21  ;;  %v18628_v44 = vcombine.high %v91_v27, %v99_v50  ;;  %v107_v21 = vld [vmem:[%s20268_s0 + $0x2b0] sm:$0xff] }
 0x43a   :  { %8964 = vmatmul.mubr.bf16.gmra.mrb[108].mxu1 %v17504_v28  ;;  %v14912_v28 = vld [vmem:[%s20267_s1 + $0xaa8] ss:$16 sps:$4 sm:$0xff]   ;;  %7502 = vmatprep.subr.bf16.mxu0 %v14944_v16  ;;  %v115_v16 = vld [vmem:[%s20268_s0 + $0x2f0] sm:$0xff] }
 0x43b   :  { %7266 = vmatmul.mubr.bf16.gmra.mrb[8].mxu0 %v18588_v2  ;;  %8973 = vmatprep.mubr.bf16.mxu1 %v17506_v12  ;;  %v14942_v12 = vld [vmem:[%s20267_s1 + $0xe60] ss:$16 sps:$4 sm:$0xff]  }
 0x43c   :  { %7275 = vmatprep.mubr.bf16.mxu0 %v18590_v10  ;;  %9203 = vmatpush1.bf16.msra.mxu1 %v14909_v53  ;;  %v14915_v53 = vld [vmem:[%s20267_s1 + $0xac8] ss:$16 sps:$4 sm:$0xff]  }
 0x43d   :  { %9204 = vmatprep.subr.bf16.mxu1 %v14914_v1  ;;  %v14920_v1 = vld [vmem:[%s20267_s1 + $0xaec] ss:$16 sps:$4 sm:$0xff]   ;;  %7503 = vmatpush1.bf16.msra.mxu0 %v14942_v12  ;;  %v18666_v12 = vcombine.high %v107_v21, %v115_v16 }
 0x43e   :  { %7504 = vmatprep.subr.bf16.mxu0 %v14950_v48  ;;  %v14956_v48 = vld [vmem:[%s20267_s1 + $0xec4] ss:$16 sps:$4 sm:$0xff]  }
 0x440   :  { %9205 = vmatpush1.bf16.msra.mxu1 %v14912_v28  ;;  %v14923_v28 = vld [vmem:[%s20267_s1 + $0xb0c] ss:$16 sps:$4 sm:$0xff]  }
 0x441   :  { %9206 = vmatprep.subr.bf16.mxu1 %v14917_v60  ;;  %7505 = vmatpush1.bf16.msra.mxu0 %v14948_v8  ;;  %v18664_v60 = vcombine.low %v91_v27, %v99_v50  ;;  %v14954_v27 = vld [vmem:[%s20267_s1 + $0xec0] ss:$16 sps:$4 sm:$0xff]   ;;  %v14962_v50 = vld [vmem:[%s20267_s1 + $0xee4] ss:$16 sps:$4 sm:$0xff]  }
 0x442   :  { %8974 = vmatmul.mubr.bf16.gmra.mrb[112].mxu1 %v17542_v26  ;;  %v14918_v26 = vld [vmem:[%s20267_s1 + $0xae8] ss:$16 sps:$4 sm:$0xff]   ;;  %7506 = vmatprep.subr.bf16.mxu0 %v14953_v46  ;;  %v123_v8 = vld [vmem:[%s20268_s0 + $0x330] sm:$0xff] }
 0x443   :  { %7276 = vmatmul.mubr.bf16.gmra.mrb[12].mxu0 %v18626_v43  ;;  %8983 = vmatprep.mubr.bf16.mxu1 %v17544_v4  ;;  %v14951_v4 = vld [vmem:[%s20267_s1 + $0xea0] ss:$16 sps:$4 sm:$0xff]  }
 0x444   :  { %7285 = vmatprep.mubr.bf16.mxu0 %v18628_v44  ;;  %9207 = vmatpush1.bf16.msra.mxu1 %v14915_v53  ;;  %v14921_v53 = vld [vmem:[%s20267_s1 + $0xb08] ss:$16 sps:$4 sm:$0xff]   ;;  %v131_v46 = vld [vmem:[%s20268_s0 + $0x370] sm:$0xff] }
 0x445   :  { %9208 = vmatprep.subr.bf16.mxu1 %v14920_v1  ;;  %v14926_v1 = vld [vmem:[%s20267_s1 + $0xb2c] ss:$16 sps:$4 sm:$0xff]   ;;  %7507 = vmatpush1.bf16.msra.mxu0 %v14951_v4  ;;  %v18704_v4 = vcombine.high %v123_v8, %v131_v46 }
 0x446   :  { %7508 = vmatprep.subr.bf16.mxu0 %v14956_v48  ;;  %v14965_v48 = vld [vmem:[%s20267_s1 + $0xf04] ss:$16 sps:$4 sm:$0xff]  }
 0x448   :  { %9209 = vmatpush1.bf16.msra.mxu1 %v14918_v26  ;;  %v14960_v26 = vld [vmem:[%s20267_s1 + $0xee0] ss:$16 sps:$4 sm:$0xff]  }
 0x449   :  { %9210 = vmatprep.subr.bf16.mxu1 %v14923_v28  ;;  %7509 = vmatpush1.bf16.msra.mxu0 %v14954_v27  ;;  %v18702_v28 = vcombine.low %v107_v21, %v115_v16  ;;  %v14963_v21 = vld [vmem:[%s20267_s1 + $0xf00] ss:$16 sps:$4 sm:$0xff]   ;;  %v14968_v16 = vld [vmem:[%s20267_s1 + $0xf24] ss:$16 sps:$4 sm:$0xff]  }
 0x44a   :  { %8984 = vmatmul.mubr.bf16.gmra.mrb[116].mxu1 %v17580_v58  ;;  %v14924_v58 = vld [vmem:[%s20267_s1 + $0xb28] ss:$16 sps:$4 sm:$0xff]   ;;  %7510 = vmatprep.subr.bf16.mxu0 %v14962_v50  ;;  %v139_v27 = vld [vmem:[%s20268_s0 + $0x3b0] sm:$0xff] }
 0x44b   :  { %7286 = vmatmul.mubr.bf16.gmra.mrb[16].mxu0 %v18664_v60  ;;  %8993 = vmatprep.mubr.bf16.mxu1 %v17582_v9  ;;  %v14929_v9 = vld [vmem:[%s20267_s1 + $0xb4c] ss:$16 sps:$4 sm:$0xff]   ;;  %v147_v50 = vld [vmem:[%s20268_s0 + $0x3f0] sm:$0xff] }
 0x44c   :  { %7295 = vmatprep.mubr.bf16.mxu0 %v18666_v12  ;;  %9211 = vmatpush1.bf16.msra.mxu1 %v14921_v53  ;;  %v14927_v53 = vld [vmem:[%s20267_s1 + $0xb48] ss:$16 sps:$4 sm:$0xff]  }
 0x44d   :  { %9212 = vmatprep.subr.bf16.mxu1 %v14926_v1  ;;  %v14935_v1 = vld [vmem:[%s20267_s1 + $0xb6c] ss:$16 sps:$4 sm:$0xff]   ;;  %7511 = vmatpush1.bf16.msra.mxu0 %v14960_v26  ;;  %v18742_v26 = vcombine.high %v139_v27, %v147_v50 }
 0x44e   :  { %7512 = vmatprep.subr.bf16.mxu0 %v14965_v48  ;;  %v14974_v48 = vld [vmem:[%s20267_s1 + $0xf44] ss:$16 sps:$4 sm:$0xff]  }
 0x450   :  { %9213 = vmatpush1.bf16.msra.mxu1 %v14924_v58  ;;  %v14947_v58 = vld [vmem:[%s20267_s1 + $0xb8c] ss:$16 sps:$4 sm:$0xff]  }
 0x451   :  { %9214 = vmatprep.subr.bf16.mxu1 %v14929_v9  ;;  %7513 = vmatpush1.bf16.msra.mxu0 %v14963_v21  ;;  %v18740_v9 = vcombine.low %v123_v8, %v131_v46  ;;  %v14972_v8 = vld [vmem:[%s20267_s1 + $0xf40] ss:$16 sps:$4 sm:$0xff]   ;;  %v14977_v46 = vld [vmem:[%s20267_s1 + $0xf64] ss:$16 sps:$4 sm:$0xff]  }
 0x452   :  { %8994 = vmatmul.mubr.bf16.gmra.mrb[120].mxu1 %v17618_v30  ;;  %v14933_v30 = vld [vmem:[%s20267_s1 + $0xb68] ss:$16 sps:$4 sm:$0xff]   ;;  %7514 = vmatprep.subr.bf16.mxu0 %v14968_v16  ;;  %v155_v21 = vld [vmem:[%s20268_s0 + $0x430] sm:$0xff] }
 0x453   :  { %7296 = vmatmul.mubr.bf16.gmra.mrb[20].mxu0 %v18702_v28  ;;  %9003 = vmatprep.mubr.bf16.mxu1 %v17620_v56  ;;  %v14966_v56 = vld [vmem:[%s20267_s1 + $0xf20] ss:$16 sps:$4 sm:$0xff]  }
 0x454   :  { %7305 = vmatprep.mubr.bf16.mxu0 %v18704_v4  ;;  %9215 = vmatpush1.bf16.msra.mxu1 %v14927_v53  ;;  %v14945_v53 = vld [vmem:[%s20267_s1 + $0xb88] ss:$16 sps:$4 sm:$0xff]   ;;  %v163_v16 = vld [vmem:[%s20268_s0 + $0x470] sm:$0xff] }
 0x455   :  { %9216 = vmatprep.subr.bf16.mxu1 %v14935_v1  ;;  %v14959_v1 = vld [vmem:[%s20267_s1 + $0xbac] ss:$16 sps:$4 sm:$0xff]   ;;  %7515 = vmatpush1.bf16.msra.mxu0 %v14966_v56  ;;  %v18780_v56 = vcombine.high %v155_v21, %v163_v16 }
 0x456   :  { %7516 = vmatprep.subr.bf16.mxu0 %v14974_v48  ;;  %v14980_v48 = vld [vmem:[%s20267_s1 + $0xf84] ss:$16 sps:$4 sm:$0xff]  }
 0x458   :  { %9217 = vmatpush1.bf16.msra.mxu1 %v14933_v30  ;;  %v14971_v30 = vld [vmem:[%s20267_s1 + $0xbcc] ss:$16 sps:$4 sm:$0xff]  }
 0x459   :  { %9218 = vmatprep.subr.bf16.mxu1 %v14947_v58  ;;  %7517 = vmatpush1.bf16.msra.mxu0 %v14972_v8  ;;  %v18778_v58 = vcombine.low %v139_v27, %v147_v50  ;;  %v14983_v27 = vld [vmem:[%s20267_s1 + $0xfa4] ss:$16 sps:$4 sm:$0xff]   ;;  %v14986_v50 = vld [vmem:[%s20267_s1 + $0xbec] ss:$16 sps:$4 sm:$0xff]  }
 0x45a   :  { %9004 = vmatmul.mubr.bf16.gmra.mrb[124].mxu1 %v17656_v6  ;;  %v14957_v6 = vld [vmem:[%s20267_s1 + $0xba8] ss:$16 sps:$4 sm:$0xff]   ;;  %7518 = vmatprep.subr.bf16.mxu0 %v14977_v46  ;;  %v171_v8 = vld [vmem:[%s20268_s0 + $0x4b0] sm:$0xff] }
 0x45b   :  { %7306 = vmatmul.mubr.bf16.gmra.mrb[24].mxu0 %v18740_v9  ;;  %9013 = vmatprep.mubr.bf16.mxu1 %v17658_v33  ;;  %v14975_v33 = vld [vmem:[%s20267_s1 + $0xf60] ss:$16 sps:$4 sm:$0xff]   ;;  %v14984_v46 = vld [vmem:[%s20267_s1 + $0xbe8] ss:$16 sps:$4 sm:$0xff]  }
 0x45c   :  { %7315 = vmatprep.mubr.bf16.mxu0 %v18742_v26  ;;  %9219 = vmatpush1.bf16.msra.mxu1 %v14945_v53  ;;  %v14969_v53 = vld [vmem:[%s20267_s1 + $0xbc8] ss:$16 sps:$4 sm:$0xff]  }
 0x45d   :  { %9220 = vmatprep.subr.bf16.mxu1 %v14959_v1  ;;  %7519 = vmatpush1.bf16.msra.mxu0 %v14975_v33  ;;  %v14978_v1 = vld [vmem:[%s20267_s1 + $0xf80] ss:$16 sps:$4 sm:$0xff]   ;;  %v14989_v33 = vld [vmem:[%s20267_s1 + $0xfc4] ss:$16 sps:$4 sm:$0xff]  }
 0x45e   :  { %7520 = vmatprep.subr.bf16.mxu0 %v14980_v48  ;;  %v195_v48 = vld [vmem:[%s20268_s0 + $0x570] sm:$0xff] }
 0x460   :  { %9221 = vmatpush1.bf16.msra.mxu1 %v14957_v6  ;;  %v18813_v6 = vcombine.low %v155_v21, %v163_v16  ;;  %v14992_v21 = vld [vmem:[%s20267_s1 + $0xfe4] ss:$16 sps:$4 sm:$0xff]  }
 0x461   :  { %9222 = vmatprep.subr.bf16.mxu1 %v14971_v30  ;;  %7521 = vmatpush1.bf16.msra.mxu0 %v14978_v1  ;;  %v187_v16 = vld [vmem:[%s20268_s0 + $0x530] sm:$0xff] }
 0x462   :  { %9014 = vmatmul.mubr.bf16.gmra.mrb[128].mxu1 %v17694_v19  ;;  %v179_v19 = vld [vmem:[%s20268_s0 + $0x4f0] sm:$0xff]  ;;  %7522 = vmatprep.subr.bf16.mxu0 %v14983_v27  ;;  %v18841_v27 = vcombine.high %v187_v16, %v195_v48 }
 0x463   :  { %7316 = vmatmul.mubr.bf16.gmra.mrb[28].mxu0 %v18778_v58  ;;  %9023 = vmatprep.mubr.bf16.mxu1 %v17696_v14  ;;  %v14981_v14 = vld [vmem:[%s20267_s1 + $0xfa0] ss:$16 sps:$4 sm:$0xff]   ;;  %v18815_v30 = vcombine.high %v171_v8, %v179_v19  ;;  %v18839_v1 = vcombine.low %v171_v8, %v179_v19  ;;  %v18856_v19 = vcombine.low %v187_v16, %v195_v48 }
 0x464   :  { %7325 = vmatprep.mubr.bf16.mxu0 %v18780_v56  ;;  %9223 = vmatpush1.bf16.msra.mxu1 %v14969_v53  ;;  %v14987_v53 = vld [vmem:[%s20267_s1 + $0xfc0] ss:$16 sps:$4 sm:$0xff]  }
 0x465   :  { %9224 = vmatprep.subr.bf16.mxu1 %v14986_v50  ;;  %7523 = vmatpush1.bf16.msra.mxu0 %v14981_v14  ;;  %v203_v50 = vld [vmem:[%s20268_s0 + $0x5b0] sm:$0xff] }
 0x466   :  { %7524 = vmatprep.subr.bf16.mxu0 %v14989_v33  ;;  %v211_v8 = vld [vmem:[%s20268_s0 + $0x5f0] sm:$0xff] }
 0x467   :  { %v18870_v14 = vcombine.low %v203_v50, %v211_v8 }
 0x468   :  { %9225 = vmatpush1.bf16.msra.mxu1 %v14984_v46  ;;  %v227_v46 = vld [vmem:[%s20268_s0 + $0x670] sm:$0xff] }
 0x469   :  { %7525 = vmatpush1.bf16.msra.mxu0 %v14987_v53 }
 0x46a   :  { %9024 = vmatmul.mubr.bf16.gmra.mrb[132].mxu1 %v17729_v52  ;;  %v14990_v52 = vld [vmem:[%s20267_s1 + $0xfe0] ss:$16 sps:$4 sm:$0xff]   ;;  %7526 = vmatprep.subr.bf16.mxu0 %v14992_v21 }
 0x46b   :  { %7326 = vmatmul.mubr.bf16.gmra.mrb[32].mxu0 %v18813_v6  ;;  %9033 = vmatprep.mubr.bf16.mxu1 %v17731_v38  ;;  %v14995_v38 = vld [vmem:[%s20267_s1 + $0xc0c] ss:$16 sps:$4 sm:$0xff]  }
 0x46c   :  { %7335 = vmatprep.mubr.bf16.mxu0 %v18815_v30  ;;  %9477 = vmatprep.subr.bf16.mxu1 %v14995_v38 }
 0x46d   :  { %7527 = vmatpush1.bf16.msra.mxu0 %v14990_v52 }
 0x472   :  { %9034 = vmatmul.mubr.bf16.gmra.mrb[136].mxu1 %v17755_v55  ;;  %v18858_v55 = vcombine.high %v203_v50, %v211_v8 }
 0x473   :  { %7336 = vmatmul.mubr.bf16.gmra.mrb[36].mxu0 %v18839_v1  ;;  %9043 = vmatprep.mubr.bf16.mxu1 %v17757_v0  ;;  %v219_v0 = vld [vmem:[%s20268_s0 + $0x630] sm:$0xff] }
 0x474   :  { %7345 = vmatprep.mubr.bf16.mxu0 %v18841_v27  ;;  %v18872_v33 = vcombine.high %v219_v0, %v227_v46  ;;  %v18884_v53 = vcombine.low %v219_v0, %v227_v46 }
 0x47a   :  { %9044 = vmatmul.mubr.bf16.gmra.mrb[140].mxu1 %v17772_v23  ;;  %v235_v23 = vld [vmem:[%s20268_s0 + $0x6b0] sm:$0xff] }
 0x47b   :  { %7346 = vmatmul.mubr.bf16.gmra.mrb[40].mxu0 %v18856_v19  ;;  %9053 = vmatprep.mubr.bf16.mxu1 %v17774_v11  ;;  %v243_v11 = vld [vmem:[%s20268_s0 + $0x6f0] sm:$0xff] }
 0x47c   :  { %7355 = vmatprep.mubr.bf16.mxu0 %v18858_v55  ;;  %v18886_v21 = vcombine.high %v235_v23, %v243_v11  ;;  %v18898_v16 = vcombine.low %v235_v23, %v243_v11 }
 0x482   :  { %9054 = vmatmul.mubr.bf16.gmra.mrb[144].mxu1 %v17786_v24  ;;  %v251_v24 = vld [vmem:[%s20268_s0 + $0x730] sm:$0xff] }
 0x483   :  { %7356 = vmatmul.mubr.bf16.gmra.mrb[44].mxu0 %v18870_v14  ;;  %9063 = vmatprep.mubr.bf16.mxu1 %v17788_v36  ;;  %v259_v36 = vld [vmem:[%s20268_s0 + $0x770] sm:$0xff] }
 0x484   :  { %7365 = vmatprep.mubr.bf16.mxu0 %v18872_v33  ;;  %v18900_v48 = vcombine.high %v251_v24, %v259_v36  ;;  %v18912_v52 = vcombine.low %v251_v24, %v259_v36 }
 0x48a   :  { %9064 = vmatmul.mubr.bf16.gmra.mrb[148].mxu1 %v17800_v35  ;;  %v267_v35 = vld [vmem:[%s20268_s0 + $0x7b0] sm:$0xff] }
 0x48b   :  { %7366 = vmatmul.mubr.bf16.gmra.mrb[48].mxu0 %v18884_v53  ;;  %9073 = vmatprep.mubr.bf16.mxu1 %v17802_v62  ;;  %v275_v62 = vld [vmem:[%s20268_s0 + $0x7f0] sm:$0xff] }
 0x48c   :  { %7375 = vmatprep.mubr.bf16.mxu0 %v18886_v21  ;;  %v18914_v38 = vcombine.high %v267_v35, %v275_v62  ;;  %v18926_v50 = vcombine.low %v267_v35, %v275_v62 }
 0x492   :  { %9074 = vmatmul.mubr.bf16.gmra.mrb[152].mxu1 %v17814_v22  ;;  %v283_v22 = vld [vmem:[%s20268_s0 + $0x830] sm:$0xff] }
 0x493   :  { %7376 = vmatmul.mubr.bf16.gmra.mrb[52].mxu0 %v18898_v16  ;;  %9083 = vmatprep.mubr.bf16.mxu1 %v17816_v15  ;;  %v291_v15 = vld [vmem:[%s20268_s0 + $0x870] sm:$0xff] }
 0x494   :  { %7385 = vmatprep.mubr.bf16.mxu0 %v18900_v48  ;;  %v18928_v8 = vcombine.high %v283_v22, %v291_v15  ;;  %v18940_v0 = vcombine.low %v283_v22, %v291_v15 }
 0x49a   :  { %9084 = vmatmul.mubr.bf16.gmra.mrb[156].mxu1 %v17828_v25  ;;  %v299_v25 = vld [vmem:[%s20268_s0 + $0x8b0] sm:$0xff] }
 0x49b   :  { %7386 = vmatmul.mubr.bf16.gmra.mrb[56].mxu0 %v18912_v52  ;;  %9093 = vmatprep.mubr.bf16.mxu1 %v17830_v37  ;;  %v307_v37 = vld [vmem:[%s20268_s0 + $0x8f0] sm:$0xff] }
 0x49c   :  { %7395 = vmatprep.mubr.bf16.mxu0 %v18914_v38  ;;  %v18942_v46 = vcombine.high %v299_v25, %v307_v37  ;;  %v18954_v23 = vcombine.low %v299_v25, %v307_v37 }
 0x4a2   :  { %9094 = vmatmul.mubr.bf16.gmra.mrb[160].mxu1 %v17842_v59  ;;  %v315_v59 = vld [vmem:[%s20268_s0 + $0x930] sm:$0xff] }
 0x4a3   :  { %7396 = vmatmul.mubr.bf16.gmra.mrb[60].mxu0 %v18926_v50  ;;  %9103 = vmatprep.mubr.bf16.mxu1 %v17844_v40  ;;  %v323_v40 = vld [vmem:[%s20268_s0 + $0x970] sm:$0xff] }
 0x4a4   :  { %7405 = vmatprep.mubr.bf16.mxu0 %v18928_v8  ;;  %v18956_v11 = vcombine.high %v315_v59, %v323_v40  ;;  %v18968_v24 = vcombine.low %v315_v59, %v323_v40 }
 0x4aa   :  { %9104 = vmatmul.mubr.bf16.gmra.mrb[164].mxu1 %v17856_v54  ;;  %v331_v54 = vld [vmem:[%s20268_s0 + $0x9b0] sm:$0xff] }
 0x4ab   :  { %7406 = vmatmul.mubr.bf16.gmra.mrb[64].mxu0 %v18940_v0  ;;  %9113 = vmatprep.mubr.bf16.mxu1 %v17858_v45  ;;  %v339_v45 = vld [vmem:[%s20268_s0 + $0x9f0] sm:$0xff] }
 0x4ac   :  { %7415 = vmatprep.mubr.bf16.mxu0 %v18942_v46  ;;  %v18970_v36 = vcombine.high %v331_v54, %v339_v45  ;;  %v18982_v35 = vcombine.low %v331_v54, %v339_v45 }
 0x4b2   :  { %9114 = vmatmul.mubr.bf16.gmra.mrb[168].mxu1 %v17870_v18  ;;  %v347_v18 = vld [vmem:[%s20268_s0 + $0xa30] sm:$0xff] }
 0x4b3   :  { %7416 = vmatmul.mubr.bf16.gmra.mrb[68].mxu0 %v18954_v23  ;;  %9123 = vmatprep.mubr.bf16.mxu1 %v17872_v42  ;;  %v355_v42 = vld [vmem:[%s20268_s0 + $0xa70] sm:$0xff] }
 0x4b4   :  { %7425 = vmatprep.mubr.bf16.mxu0 %v18956_v11  ;;  %v18984_v62 = vcombine.high %v347_v18, %v355_v42  ;;  %v18996_v22 = vcombine.low %v347_v18, %v355_v42 }
 0x4ba   :  { %9124 = vmatmul.mubr.bf16.gmra.mrb[172].mxu1 %v17884_v3  ;;  %v363_v3 = vld [vmem:[%s20268_s0 + $0xab0] sm:$0xff] }
 0x4bb   :  { %7426 = vmatmul.mubr.bf16.gmra.mrb[72].mxu0 %v18968_v24  ;;  %9133 = vmatprep.mubr.bf16.mxu1 %v17886_v31  ;;  %v371_v31 = vld [vmem:[%s20268_s0 + $0xaf0] sm:$0xff] }
 0x4bc   :  { %7435 = vmatprep.mubr.bf16.mxu0 %v18970_v36  ;;  %v18998_v15 = vcombine.high %v363_v3, %v371_v31  ;;  %v19010_v25 = vcombine.low %v363_v3, %v371_v31  ;;  %v14993_v31 = vld [vmem:[%s20267_s1 + $0xc08] ss:$16 sps:$4 sm:$0xff]  }
 0x4c2   :  { %9134 = vmatmul.mubr.bf16.gmra.mrb[176].mxu1 %v17898_v51  ;;  %v379_v51 = vld [vmem:[%s20268_s0 + $0xb30] sm:$0xff] }
 0x4c3   :  { %7436 = vmatmul.mubr.bf16.gmra.mrb[76].mxu0 %v18982_v35  ;;  %9143 = vmatprep.mubr.bf16.mxu1 %v17900_v57  ;;  %v387_v57 = vld [vmem:[%s20268_s0 + $0xb70] sm:$0xff] }
 0x4c4   :  { %7445 = vmatprep.mubr.bf16.mxu0 %v18984_v62  ;;  %v19012_v37 = vcombine.high %v379_v51, %v387_v57  ;;  %v19024_v59 = vcombine.low %v379_v51, %v387_v57  ;;  %v60_v57 = vld [vmem:[%s20268_s0 + $0x138] sm:$0xff] }
 0x4ca   :  { %9144 = vmatmul.mubr.bf16.gmra.mrb[180].mxu1 %v17912_v13  ;;  %v395_v13 = vld [vmem:[%s20268_s0 + $0xbb0] sm:$0xff] }
 0x4cb   :  { %7446 = vmatmul.mubr.bf16.gmra.mrb[80].mxu0 %v18996_v22  ;;  %9153 = vmatprep.mubr.bf16.mxu1 %v17914_v17  ;;  %v403_v17 = vld [vmem:[%s20268_s0 + $0xbf0] sm:$0xff] }
 0x4cc   :  { %7455 = vmatprep.mubr.bf16.mxu0 %v18998_v15  ;;  %v19026_v40 = vcombine.high %v395_v13, %v403_v17  ;;  %v19038_v54 = vcombine.low %v395_v13, %v403_v17  ;;  %v68_v13 = vld [vmem:[%s20268_s0 + $0x178] sm:$0xff] }
 0x4d2   :  { %9154 = vmatmul.mubr.bf16.gmra.mrb[184].mxu1 %v17926_v32  ;;  %v411_v32 = vld [vmem:[%s20268_s0 + $0xc30] sm:$0xff] }
 0x4d3   :  { %7456 = vmatmul.mubr.bf16.gmra.mrb[84].mxu0 %v19010_v25  ;;  %9163 = vmatprep.mubr.bf16.mxu1 %v17928_v47  ;;  %v419_v47 = vld [vmem:[%s20268_s0 + $0xc70] sm:$0xff] }
 0x4d4   :  { %7465 = vmatprep.mubr.bf16.mxu0 %v19012_v37  ;;  %v19040_v45 = vcombine.high %v411_v32, %v419_v47  ;;  %v19052_v18 = vcombine.low %v411_v32, %v419_v47  ;;  %v19094_v32 = vcombine.high %v60_v57, %v68_v13  ;;  %v15004_v47 = vld [vmem:[%s20267_s1 + $0xc6c] ss:$16 sps:$4 sm:$0xff]  }
 0x4d6   :  { %20832 = vst [vmem:[#allocation49_spill] sm:$0xff] %v19040_v45  ;;  %20833 = vst [vmem:[#allocation50_spill] sm:$0xff] %v19052_v18 }
 0x4d7   :  { %20838 = vst [vmem:[#allocation158_spill] sm:$0xff] %v19094_v32 }
 0x4da   :  { %9164 = vmatmul.mubr.bf16.gmra.mrb[188].mxu1 %v17940_v49  ;;  %v28_v49 = vld [vmem:[%s20268_s0 + $0x38] sm:$0xff] }
 0x4db   :  { %7466 = vmatmul.mubr.bf16.gmra.mrb[88].mxu0 %v19024_v59  ;;  %9173 = vmatprep.mubr.bf16.mxu1 %v17942_v7  ;;  %v36_v7 = vld [vmem:[%s20268_s0 + $0x78] sm:$0xff] }
 0x4dc   :  { %7475 = vmatprep.mubr.bf16.mxu0 %v19026_v40  ;;  %v19054_v42 = vcombine.high %v28_v49, %v36_v7  ;;  %v19066_v3 = vcombine.low %v28_v49, %v36_v7  ;;  %v20839_v49 = vld [vmem:[#allocation51_spill] sm:$0xff]  ;;  %v76_v7 = vld [vmem:[%s20268_s0 + $0x1b8] sm:$0xff] }
 0x4de   :  { %20834 = vst [vmem:[#allocation154_spill] sm:$0xff] %v19054_v42  ;;  %20835 = vst [vmem:[#allocation155_spill] sm:$0xff] %v19066_v3 }
 0x4e2   :  { %9174 = vmatmul.mubr.bf16.gmra.mrb[192].mxu1 %v17954_v5  ;;  %v44_v5 = vld [vmem:[%s20268_s0 + $0xb8] sm:$0xff] }
 0x4e3   :  { %7476 = vmatmul.mubr.bf16.gmra.mrb[92].mxu0 %v19038_v54  ;;  %9183 = vmatprep.mubr.bf16.mxu1 %v17956_v41  ;;  %v52_v41 = vld [vmem:[%s20268_s0 + $0xf8] sm:$0xff] }
 0x4e4   :  { %7485 = vmatprep.mubr.bf16.mxu0 %v19040_v45  ;;  %v19071_v51 = vcombine.high %v44_v5, %v52_v41  ;;  %v19092_v17 = vcombine.low %v44_v5, %v52_v41  ;;  %v84_v5 = vld [vmem:[%s20268_s0 + $0x1f8] sm:$0xff] }
 0x4e5   :  { %v15002_v41 = vld [vmem:[%s20267_s1 + $0xc68] ss:$16 sps:$4 sm:$0xff]  }
 0x4e6   :  { %20836 = vst [vmem:[#allocation156_spill] sm:$0xff] %v19071_v51  ;;  %20837 = vst [vmem:[#allocation157_spill] sm:$0xff] %v19092_v17 }
 0x4ea   :  { %9184 = vmatmul.mubr.bf16.gmra.mrb[196].mxu1 %v17968_v29  ;;  %v14998_v29 = vld [vmem:[%s20267_s1 + $0xc2c] ss:$16 sps:$4 sm:$0xff]  }
 0x4eb   :  { %7486 = vmatmul.mubr.bf16.gmra.mrb[96].mxu0 %v19052_v18  ;;  %9226 = vmatprep.mubr.bf16.mxu1 %v17970_v63  ;;  %v14996_v63 = vld [vmem:[%s20267_s1 + $0xc28] ss:$16 sps:$4 sm:$0xff]  }
 0x4ec   :  { %7528 = vmatprep.mubr.bf16.mxu0 %v19054_v42 }
 0x4f2   :  { %9227 = vmatmul.mubr.bf16.vlgmr.msra.gmra.mrb[100].mxu1 %v17982_v39  ;;  %v15001_v39 = vld [vmem:[%s20267_s1 + $0xc4c] ss:$16 sps:$4 sm:$0xff]  }
 0x4f3   :  { %7529 = vmatmul.mubr.bf16.vlgmr.msra.gmra.mrb[0].mxu0 %v19066_v3  ;;  %9478 = vmatpush1.bf16.msra.mxu1 %v14993_v31  ;;  %v19118_v31 = vcombine.low %v60_v57, %v68_v13  ;;  %v20843_v57 = vld [vmem:[#allocation152_spill] sm:$0xff]  ;;  %v92_v13 = vld [vmem:[%s20268_s0 + $0x238] sm:$0xff] }
 0x4f4   :  { %7538 = vmatprep.mubr.bf16.mxu0 %v19071_v51  ;;  %9236 = vmatprep.mubr.bf16.mxu1 %v17987_v61  ;;  %v14999_v61 = vld [vmem:[%s20267_s1 + $0xc48] ss:$16 sps:$4 sm:$0xff]  }
 0x4f5   :  { %9479 = vmatprep.subr.bf16.mxu1 %v14998_v29  ;;  %20840 = vst [vmem:[#allocation51_spill] sm:$0xff] %v19118_v31  ;;  %v19120_v29 = vcombine.high %v76_v7, %v84_v5 }
 0x4f7   :  { %9480 = vmatpush1.bf16.msra.mxu1 %v14996_v63  ;;  %20841 = vst [vmem:[#allocation159_spill] sm:$0xff] %v19120_v29  ;;  %v15005_v63 = vld [vmem:[%s20267_s1 + $0xc88] ss:$16 sps:$4 sm:$0xff]  }
 0x4f8   :  { %9481 = vmatprep.subr.bf16.mxu1 %v15001_v39  ;;  %v15010_v39 = vld [vmem:[%s20267_s1 + $0xcac] ss:$16 sps:$4 sm:$0xff]  }
 0x4fa   :  { %9237 = vmatmul.mubr.bf16.gmra.mrb[104].mxu1 %v18008_v34  ;;  %v15007_v34 = vld [vmem:[%s20267_s1 + $0xc8c] ss:$16 sps:$4 sm:$0xff]  }
 0x4fb   :  { %7539 = vmatmul.mubr.bf16.gmra.mrb[4].mxu0 %v19092_v17  ;;  %9246 = vmatprep.mubr.bf16.mxu1 %v20839_v49  ;;  %v15008_v49 = vld [vmem:[%s20267_s1 + $0xca8] ss:$16 sps:$4 sm:$0xff]   ;;  %v15028_v17 = vld [vmem:[%s20267_s1 + $0xd6c] ss:$16 sps:$4 sm:$0xff]  }
 0x4fc   :  { %7548 = vmatprep.mubr.bf16.mxu0 %v19094_v32  ;;  %9482 = vmatpush1.bf16.msra.mxu1 %v14999_v61  ;;  %v20842_v61 = vld [vmem:[#allocation52_spill] sm:$0xff] }
 0x4fd   :  { %9483 = vmatprep.subr.bf16.mxu1 %v15004_v47  ;;  %v100_v47 = vld [vmem:[%s20268_s0 + $0x278] sm:$0xff] }
 0x500   :  { %9484 = vmatpush1.bf16.msra.mxu1 %v15002_v41  ;;  %v15013_v41 = vld [vmem:[%s20267_s1 + $0xccc] ss:$16 sps:$4 sm:$0xff]  }
 0x501   :  { %9485 = vmatprep.subr.bf16.mxu1 %v15007_v34  ;;  %v19144_v34 = vcombine.low %v76_v7, %v84_v5  ;;  %v108_v7 = vld [vmem:[%s20268_s0 + $0x2b8] sm:$0xff]  ;;  %v20847_v5 = vld [vmem:[#allocation3_spill] sm:$0xff] }
 0x502   :  { %9247 = vmatmul.mubr.bf16.gmra.mrb[108].mxu1 %v20842_v61  ;;  %v19146_v61 = vcombine.high %v92_v13, %v100_v47 }
 0x503   :  { %7549 = vmatmul.mubr.bf16.gmra.mrb[8].mxu0 %v19118_v31  ;;  %9256 = vmatprep.mubr.bf16.mxu1 %v20843_v57  ;;  %20844 = vst [vmem:[#allocation52_spill] sm:$0xff] %v19144_v34  ;;  %v15011_v57 = vld [vmem:[%s20267_s1 + $0xcc8] ss:$16 sps:$4 sm:$0xff]  }
 0x504   :  { %7558 = vmatprep.mubr.bf16.mxu0 %v19120_v29  ;;  %9486 = vmatpush1.bf16.msra.mxu1 %v15005_v63  ;;  %20845 = vst [vmem:[#allocation152_spill] sm:$0xff] %v19146_v61  ;;  %v15016_v63 = vld [vmem:[%s20267_s1 + $0xcec] ss:$16 sps:$4 sm:$0xff]   ;;  %v15017_v29 = vld [vmem:[%s20267_s1 + $0xd08] ss:$16 sps:$4 sm:$0xff]  }
 0x505   :  { %9487 = vmatprep.subr.bf16.mxu1 %v15010_v39  ;;  %v20846_v39 = vld [vmem:[#allocation2_spill] sm:$0xff] }
 0x508   :  { %9488 = vmatpush1.bf16.msra.mxu1 %v15008_v49  ;;  %v116_v49 = vld [vmem:[%s20268_s0 + $0x2f8] sm:$0xff] }
 0x509   :  { %9489 = vmatprep.subr.bf16.mxu1 %v15013_v41  ;;  %v15014_v41 = vld [vmem:[%s20267_s1 + $0xce8] ss:$16 sps:$4 sm:$0xff]   ;;  %v19179_v31 = vcombine.high %v108_v7, %v116_v49 }
 0x50a   :  { %9257 = vmatmul.mubr.bf16.gmra.mrb[112].mxu1 %v20846_v39  ;;  %v15019_v39 = vld [vmem:[%s20267_s1 + $0xd0c] ss:$16 sps:$4 sm:$0xff]  }
 0x50b   :  { %7559 = vmatmul.mubr.bf16.gmra.mrb[12].mxu0 %v19144_v34  ;;  %9266 = vmatprep.mubr.bf16.mxu1 %v20847_v5  ;;  %v20428_v34 = vmov 0   ;;  %v15032_v5 = vld [vmem:[%s20269_s3] sm:$0xff]   ;;  %20849 = vst [vmem:[#allocation3_spill] sm:$0xff] %v19179_v31 }
 0x50c   :  { %7568 = vmatprep.mubr.bf16.mxu0 %v19146_v61  ;;  %9490 = vmatpush1.bf16.msra.mxu1 %v15011_v57  ;;  %v19174_v61 = vcombine.low %v92_v13, %v100_v47  ;;  %v15022_v57 = vld [vmem:[%s20267_s1 + $0xd2c] ss:$16 sps:$4 sm:$0xff]  }
 0x50d   :  { %10606 = vmatprep.subr.bf16.mxu0 %v20428_v34  ;;  %9491 = vmatprep.subr.bf16.mxu1 %v15016_v63  ;;  %v20850_v63 = vld [vmem:[#allocation4_spill] sm:$0xff]  ;;  %v124_v13 = vld [vmem:[%s20268_s0 + $0x338] sm:$0xff] }
 0x50e   :  { %20848 = vst [vmem:[#allocation2_spill] sm:$0xff] %v19174_v61  ;;  %10607 = vmatpush1.bf16.msra.mxu0 %v15032_v5  ;;  %v132_v47 = vld [vmem:[%s20268_s0 + $0x378] sm:$0xff]  ;;  %v15036_v5 = vld [vmem:[%s20269_s3 + $0x8] sm:$0xff]  }
 0x50f   :  { %10608 = vmatprep.subr.bf16.mxu0 %v20428_v34  ;;  %v15037_v34 = vld [vmem:[%s20269_s3 + $0x10] sm:$0xff]   ;;  %v19213_v32 = vcombine.high %v124_v13, %v132_v47 }
 0x510   :  { %9492 = vmatpush1.bf16.msra.mxu1 %v15014_v41  ;;  %v20851_v41 = vld [vmem:[#allocation5_spill] sm:$0xff] }
 0x511   :  { %9493 = vmatprep.subr.bf16.mxu1 %v15019_v39  ;;  %v15020_v39 = vld [vmem:[%s20267_s1 + $0xd28] ss:$16 sps:$4 sm:$0xff]   ;;  %20854 = vst [vmem:[#allocation5_spill] sm:$0xff] %v19213_v32 }
 0x512   :  { %9267 = vmatmul.mubr.bf16.gmra.mrb[116].mxu1 %v20850_v63  ;;  %v15025_v63 = vld [vmem:[%s20267_s1 + $0xd4c] ss:$16 sps:$4 sm:$0xff]   ;;  %10609 = vmatpush1.bf16.msra.mxu0 %v15036_v5  ;;  %v15026_v5 = vld [vmem:[%s20267_s1 + $0xd68] ss:$16 sps:$4 sm:$0xff]  }
 0x513   :  { %7569 = vmatmul.mubr.bf16.gmra.mrb[16].mxu0 %v19174_v61  ;;  %9276 = vmatprep.mubr.bf16.mxu1 %v20851_v41  ;;  %v20852_v61 = vmov 0   ;;  %v15023_v41 = vld [vmem:[%s20267_s1 + $0xd48] ss:$16 sps:$4 sm:$0xff]  }
 0x514   :  { %7578 = vmatprep.mubr.bf16.mxu0 %v19179_v31  ;;  %9494 = vmatpush1.bf16.msra.mxu1 %v15017_v29  ;;  %v19208_v31 = vcombine.low %v108_v7, %v116_v49  ;;  %v20855_v29 = vld [vmem:[#allocation6_spill] sm:$0xff]  ;;  %v140_v7 = vld [vmem:[%s20268_s0 + $0x3b8] sm:$0xff] }
 0x515   :  { %9495 = vmatprep.subr.bf16.mxu1 %v15022_v57  ;;  %10610 = vmatprep.subr.bf16.mxu0 %v20852_v61  ;;  %v148_v49 = vld [vmem:[%s20268_s0 + $0x3f8] sm:$0xff] }
 0x516   :  { %20853 = vst [vmem:[#allocation4_spill] sm:$0xff] %v19208_v31  ;;  %10611 = vmatpush1.bf16.msra.mxu0 %v15037_v34  ;;  %v15038_v57 = vld [vmem:[%s20269_s3 + $0x18] sm:$0xff]   ;;  %v20856_v34 = vld [vmem:[#allocation7_spill] sm:$0xff] }
 0x517   :  { %10612 = vmatprep.subr.bf16.mxu0 %v20852_v61 }
 0x518   :  { %9496 = vmatpush1.bf16.msra.mxu1 %v15020_v39  ;;  %v15031_v39 = vld [vmem:[%s20267_s1 + $0xd8c] ss:$16 sps:$4 sm:$0xff]  }
 0x519   :  { %9497 = vmatprep.subr.bf16.mxu1 %v15025_v63  ;;  %v15042_v63 = vld [vmem:[%s20269_s3 + $0x20] sm:$0xff]  }
 0x51a   :  { %9277 = vmatmul.mubr.bf16.gmra.mrb[120].mxu1 %v20855_v29  ;;  %10613 = vmatpush1.bf16.msra.mxu0 %v15038_v57  ;;  %v19242_v29 = vcombine.low %v124_v13, %v132_v47  ;;  %v156_v13 = vld [vmem:[%s20268_s0 + $0x438] sm:$0xff]  ;;  %v15043_v57 = vld [vmem:[%s20269_s3 + $0x28] sm:$0xff]  }
 0x51b   :  { %7579 = vmatmul.mubr.bf16.gmra.mrb[20].mxu0 %v19208_v31  ;;  %9286 = vmatprep.mubr.bf16.mxu1 %v20856_v34  ;;  %v15029_v34 = vld [vmem:[%s20267_s1 + $0xd88] ss:$16 sps:$4 sm:$0xff]   ;;  %v15035_v31 = vld [vmem:[%s20267_s1 + $0xdac] ss:$16 sps:$4 sm:$0xff]  }
 0x51c   :  { %7588 = vmatprep.mubr.bf16.mxu0 %v19213_v32  ;;  %9498 = vmatpush1.bf16.msra.mxu1 %v15023_v41  ;;  %20857 = vst [vmem:[#allocation6_spill] sm:$0xff] %v19242_v29  ;;  %v19247_v32 = vcombine.high %v140_v7, %v148_v49  ;;  %v164_v47 = vld [vmem:[%s20268_s0 + $0x478] sm:$0xff] }
 0x51d   :  { %9499 = vmatprep.subr.bf16.mxu1 %v15028_v17  ;;  %10614 = vmatprep.subr.bf16.mxu0 %v20852_v61  ;;  %v20859_v17 = vld [vmem:[#allocation8_spill] sm:$0xff]  ;;  %v15033_v41 = vld [vmem:[%s20267_s1 + $0xda8] ss:$16 sps:$4 sm:$0xff]  }
 0x51e   :  { %20858 = vst [vmem:[#allocation7_spill] sm:$0xff] %v19247_v32  ;;  %10615 = vmatpush1.bf16.msra.mxu0 %v15042_v63  ;;  %v15044_v63 = vld [vmem:[%s20269_s3 + $0x30] sm:$0xff]  }
 0x51f   :  { %10616 = vmatprep.subr.bf16.mxu0 %v20852_v61 }
 0x520   :  { %9500 = vmatpush1.bf16.msra.mxu1 %v15026_v5  ;;  %v20860_v5 = vld [vmem:[#allocation9_spill] sm:$0xff] }
 0x521   :  { %9501 = vmatprep.subr.bf16.mxu1 %v15031_v39  ;;  %v15041_v39 = vld [vmem:[%s20267_s1 + $0xdcc] ss:$16 sps:$4 sm:$0xff]  }
 0x522   :  { %9287 = vmatmul.mubr.bf16.gmra.mrb[124].mxu1 %v20859_v17  ;;  %10617 = vmatpush1.bf16.msra.mxu0 %v15043_v57  ;;  %v19276_v17 = vcombine.low %v140_v7, %v148_v49  ;;  %v15048_v7 = vld [vmem:[%s20267_s1 + $0xdec] ss:$16 sps:$4 sm:$0xff]   ;;  %v20863_v49 = vld [vmem:[#allocation10_spill] sm:$0xff] }
 0x523   :  { %7589 = vmatmul.mubr.bf16.gmra.mrb[24].mxu0 %v19242_v29  ;;  %9296 = vmatprep.mubr.bf16.mxu1 %v20860_v5  ;;  %v19278_v29 = vcombine.high %v156_v13, %v164_v47  ;;  %v15039_v5 = vld [vmem:[%s20267_s1 + $0xdc8] ss:$16 sps:$4 sm:$0xff]   ;;  %v15049_v57 = vld [vmem:[%s20269_s3 + $0x40] sm:$0xff]  }
 0x524   :  { %7598 = vmatprep.mubr.bf16.mxu0 %v19247_v32  ;;  %9502 = vmatpush1.bf16.msra.mxu1 %v15029_v34  ;;  %20861 = vst [vmem:[#allocation8_spill] sm:$0xff] %v19276_v17  ;;  %v172_v34 = vld [vmem:[%s20268_s0 + $0x4b8] sm:$0xff]  ;;  %v20939_v32 = vld [vmem:[#allocation56_spill] sm:$0xff] }
 0x525   :  { %9503 = vmatprep.subr.bf16.mxu1 %v15035_v31  ;;  %10618 = vmatprep.subr.bf16.mxu0 %v20852_v61  ;;  %20862 = vst [vmem:[#allocation9_spill] sm:$0xff] %v19278_v29  ;;  %v15045_v31 = vld [vmem:[%s20269_s3 + $0x38] sm:$0xff]  }
 0x526   :  { %10619 = vmatpush1.bf16.msra.mxu0 %v15044_v63 }
 0x527   :  { %10620 = vmatprep.subr.bf16.mxu0 %v20852_v61 }
 0x528   :  { %9504 = vmatpush1.bf16.msra.mxu1 %v15033_v41  ;;  %v15046_v41 = vld [vmem:[%s20267_s1 + $0xde8] ss:$16 sps:$4 sm:$0xff]  }
 0x529   :  { %9505 = vmatprep.subr.bf16.mxu1 %v15041_v39  ;;  %v19307_v39 = vcombine.low %v156_v13, %v164_v47  ;;  %v188_v13 = vld [vmem:[%s20268_s0 + $0x538] sm:$0xff] }
 0x52a   :  { %9297 = vmatmul.mubr.bf16.gmra.mrb[128].mxu1 %v18236_v20  ;;  %v180_v20 = vld [vmem:[%s20268_s0 + $0x4f8] sm:$0xff]  ;;  %10621 = vmatpush1.bf16.msra.mxu0 %v15045_v31  ;;  %v15050_v31 = vld [vmem:[%s20269_s3 + $0x48] sm:$0xff]  }
 0x52b   :  { %7599 = vmatmul.mubr.bf16.gmra.mrb[28].mxu0 %v19276_v17  ;;  %9306 = vmatprep.mubr.bf16.mxu1 %v20863_v49  ;;  %20864 = vst [vmem:[#allocation10_spill] sm:$0xff] %v19307_v39  ;;  %v19309_v63 = vcombine.high %v172_v34, %v180_v20  ;;  %v196_v47 = vld [vmem:[%s20268_s0 + $0x578] sm:$0xff]  ;;  %v15051_v49 = vld [vmem:[%s20269_s3 + $0x50] sm:$0xff]  }
 0x52c   :  { %7608 = vmatprep.mubr.bf16.mxu0 %v19278_v29  ;;  %9506 = vmatpush1.bf16.msra.mxu1 %v15039_v5  ;;  %v20866_v5 = vld [vmem:[#allocation11_spill] sm:$0xff] }
 0x52d   :  { %9507 = vmatprep.subr.bf16.mxu1 %v15048_v7  ;;  %10622 = vmatprep.subr.bf16.mxu0 %v20852_v61  ;;  %20865 = vst [vmem:[#allocation160_spill] sm:$0xff] %v19309_v63  ;;  %v20867_v7 = vld [vmem:[#allocation12_spill] sm:$0xff] }
 0x52e   :  { %10623 = vmatpush1.bf16.msra.mxu0 %v15049_v57  ;;  %v19331_v57 = vcombine.high %v188_v13, %v196_v47 }
 0x52f   :  { %10624 = vmatprep.subr.bf16.mxu0 %v20852_v61 }
 0x530   :  { %9508 = vmatpush1.bf16.msra.mxu1 %v15046_v41  ;;  %v19329_v41 = vcombine.low %v172_v34, %v180_v20  ;;  %20869 = vst [vmem:[#allocation12_spill] sm:$0xff] %v19331_v57  ;;  %v15055_v34 = vld [vmem:[%s20269_s3 + $0x58] sm:$0xff]  }
 0x531   :  { %v204_v20 = vld [vmem:[%s20268_s0 + $0x5b8] sm:$0xff] }
 0x532   :  { %9307 = vmatmul.mubr.bf16.gmra.mrb[132].mxu1 %v20866_v5  ;;  %10625 = vmatpush1.bf16.msra.mxu0 %v15050_v31  ;;  %20868 = vst [vmem:[#allocation11_spill] sm:$0xff] %v19329_v41  ;;  %v20870_v5 = vld [vmem:[#allocation13_spill] sm:$0xff] }
 0x533   :  { %7609 = vmatmul.mubr.bf16.gmra.mrb[32].mxu0 %v19307_v39  ;;  %9316 = vmatprep.mubr.bf16.mxu1 %v20867_v7  ;;  %v15054_v31 = vld [vmem:[%s20267_s1 + $0xe0c] ss:$16 sps:$4 sm:$0xff]   ;;  %v20871_v7 = vld [vmem:[#allocation14_spill] sm:$0xff]  ;;  %v20935_v39 = vld [vmem:[#allocation48_spill] sm:$0xff] }
 0x534   :  { %7618 = vmatprep.mubr.bf16.mxu0 %v19309_v63  ;;  %10626 = vmatprep.subr.bf16.mxu0 %v20852_v61  ;;  %v20875_v63 = vld [vmem:[#allocation16_spill] sm:$0xff] }
 0x535   :  { %9760 = vmatprep.subr.bf16.mxu1 %v15054_v31  ;;  %v15057_v31 = vld [vmem:[%s20269_s3 + $0x68] sm:$0xff]  }
 0x536   :  { %10627 = vmatpush1.bf16.msra.mxu0 %v15051_v49  ;;  %v212_v49 = vld [vmem:[%s20268_s0 + $0x5f8] sm:$0xff] }
 0x537   :  { %10628 = vmatprep.subr.bf16.mxu0 %v20852_v61 }
 0x53a   :  { %9317 = vmatmul.mubr.bf16.gmra.mrb[136].mxu1 %v20870_v5  ;;  %10629 = vmatpush1.bf16.msra.mxu0 %v15055_v34  ;;  %v15056_v5 = vld [vmem:[%s20269_s3 + $0x60] sm:$0xff]   ;;  %v15061_v34 = vld [vmem:[%s20269_s3 + $0x70] sm:$0xff]  }
 0x53b   :  { %7619 = vmatmul.mubr.bf16.gmra.mrb[36].mxu0 %v19329_v41  ;;  %9326 = vmatprep.mubr.bf16.mxu1 %v20871_v7  ;;  %v19356_v7 = vcombine.high %v204_v20, %v212_v49  ;;  %v20874_v41 = vld [vmem:[#allocation15_spill] sm:$0xff] }
 0x53c   :  { %7628 = vmatprep.mubr.bf16.mxu0 %v19331_v57  ;;  %v19353_v57 = vcombine.low %v188_v13, %v196_v47  ;;  %10630 = vmatprep.subr.bf16.mxu0 %v20852_v61  ;;  %v220_v13 = vld [vmem:[%s20268_s0 + $0x638] sm:$0xff] }
 0x53d   :  { %20873 = vst [vmem:[#allocation14_spill] sm:$0xff] %v19356_v7  ;;  %v228_v47 = vld [vmem:[%s20268_s0 + $0x678] sm:$0xff] }
 0x53e   :  { %20872 = vst [vmem:[#allocation13_spill] sm:$0xff] %v19353_v57  ;;  %10631 = vmatpush1.bf16.msra.mxu0 %v15056_v5  ;;  %v20878_v5 = vld [vmem:[#allocation17_spill] sm:$0xff] }
 0x53f   :  { %10632 = vmatprep.subr.bf16.mxu0 %v20852_v61 }
 0x542   :  { %9327 = vmatmul.mubr.bf16.gmra.mrb[140].mxu1 %v20874_v41  ;;  %10633 = vmatpush1.bf16.msra.mxu0 %v15057_v31  ;;  %v19372_v41 = vcombine.low %v204_v20, %v212_v49  ;;  %v15062_v20 = vld [vmem:[%s20269_s3 + $0x78] sm:$0xff]  }
 0x543   :  { %7629 = vmatmul.mubr.bf16.gmra.mrb[40].mxu0 %v19353_v57  ;;  %9336 = vmatprep.mubr.bf16.mxu1 %v20875_v63  ;;  %v19375_v63 = vcombine.high %v220_v13, %v228_v47  ;;  %v236_v49 = vld [vmem:[%s20268_s0 + $0x6b8] sm:$0xff]  ;;  %v20930_v57 = vld [vmem:[#allocation44_spill] sm:$0xff] }
 0x544   :  { %7638 = vmatprep.mubr.bf16.mxu0 %v19356_v7  ;;  %20876 = vst [vmem:[#allocation15_spill] sm:$0xff] %v19372_v41  ;;  %10634 = vmatprep.subr.bf16.mxu0 %v20852_v61  ;;  %v20879_v7 = vld [vmem:[#allocation18_spill] sm:$0xff]  ;;  %v244_v31 = vld [vmem:[%s20268_s0 + $0x6f8] sm:$0xff] }
 0x545   :  { %20877 = vst [vmem:[#allocation16_spill] sm:$0xff] %v19375_v63 }
 0x546   :  { %10635 = vmatpush1.bf16.msra.mxu0 %v15061_v34  ;;  %v19394_v34 = vcombine.low %v220_v13, %v228_v47  ;;  %v260_v13 = vld [vmem:[%s20268_s0 + $0x778] sm:$0xff]  ;;  %v19409_v47 = vcombine.low %v236_v49, %v244_v31 }
 0x547   :  { %10636 = vmatprep.subr.bf16.mxu0 %v20852_v61 }
 0x548   :  { %20880 = vst [vmem:[#allocation17_spill] sm:$0xff] %v19394_v34 }
 0x54a   :  { %9337 = vmatmul.mubr.bf16.gmra.mrb[144].mxu1 %v20878_v5  ;;  %10637 = vmatpush1.bf16.msra.mxu0 %v15062_v20  ;;  %v20882_v5 = vld [vmem:[#allocation19_spill] sm:$0xff] }
 0x54b   :  { %7639 = vmatmul.mubr.bf16.gmra.mrb[44].mxu0 %v19372_v41  ;;  %9346 = vmatprep.mubr.bf16.mxu1 %v20879_v7  ;;  %v19397_v7 = vcombine.high %v236_v49, %v244_v31  ;;  %v252_v41 = vld [vmem:[%s20268_s0 + $0x738] sm:$0xff]  ;;  %20884 = vst [vmem:[#allocation19_spill] sm:$0xff] %v19409_v47 }
 0x54c   :  { %7648 = vmatprep.mubr.bf16.mxu0 %v19375_v63  ;;  %10839 = vmatprep.subr.bf16.mxu0 %v20852_v61  ;;  %v20883_v63 = vld [vmem:[#allocation20_spill] sm:$0xff]  ;;  %v19411_v20 = vcombine.high %v252_v41, %v260_v13  ;;  %v19423_v49 = vcombine.low %v252_v41, %v260_v13 }
 0x54d   :  { %20881 = vst [vmem:[#allocation18_spill] sm:$0xff] %v19397_v7 }
 0x54e   :  { %20885 = vst [vmem:[#allocation20_spill] sm:$0xff] %v19411_v20 }
 0x552   :  { %9347 = vmatmul.mubr.bf16.gmra.mrb[148].mxu1 %v20882_v5  ;;  %v20887_v5 = vld [vmem:[#allocation22_spill] sm:$0xff] }
 0x553   :  { %7649 = vmatmul.mubr.bf16.gmra.mrb[48].mxu0 %v19394_v34  ;;  %9356 = vmatprep.mubr.bf16.mxu1 %v20883_v63  ;;  %v20886_v34 = vld [vmem:[#allocation21_spill] sm:$0xff] }
 0x554   :  { %7658 = vmatprep.mubr.bf16.mxu0 %v19397_v7  ;;  %v268_v63 = vld [vmem:[%s20268_s0 + $0x7b8] sm:$0xff]  ;;  %20888 = vst [vmem:[#allocation21_spill] sm:$0xff] %v19423_v49 }
 0x555   :  { %v276_v7 = vld [vmem:[%s20268_s0 + $0x7f8] sm:$0xff] }
 0x556   :  { %v19425_v31 = vcombine.high %v268_v63, %v276_v7  ;;  %v19437_v41 = vcombine.low %v268_v63, %v276_v7 }
 0x558   :  { %20889 = vst [vmem:[#allocation22_spill] sm:$0xff] %v19425_v31 }
 0x55a   :  { %9357 = vmatmul.mubr.bf16.gmra.mrb[152].mxu1 %v20886_v34  ;;  %v20891_v34 = vld [vmem:[#allocation24_spill] sm:$0xff] }
 0x55b   :  { %7659 = vmatmul.mubr.bf16.gmra.mrb[52].mxu0 %v19409_v47  ;;  %9366 = vmatprep.mubr.bf16.mxu1 %v20887_v5  ;;  %v20890_v47 = vld [vmem:[#allocation23_spill] sm:$0xff]  ;;  %v284_v5 = vld [vmem:[%s20268_s0 + $0x838] sm:$0xff] }
 0x55c   :  { %7668 = vmatprep.mubr.bf16.mxu0 %v19411_v20  ;;  %v292_v20 = vld [vmem:[%s20268_s0 + $0x878] sm:$0xff]  ;;  %20892 = vst [vmem:[#allocation23_spill] sm:$0xff] %v19437_v41 }
 0x55d   :  { %v19439_v13 = vcombine.high %v284_v5, %v292_v20  ;;  %v19451_v7 = vcombine.low %v284_v5, %v292_v20 }
 0x55f   :  { %20893 = vst [vmem:[#allocation24_spill] sm:$0xff] %v19439_v13 }
 0x562   :  { %9367 = vmatmul.mubr.bf16.gmra.mrb[156].mxu1 %v20890_v47  ;;  %v20895_v47 = vld [vmem:[#allocation26_spill] sm:$0xff] }
 0x563   :  { %7669 = vmatmul.mubr.bf16.gmra.mrb[56].mxu0 %v19423_v49  ;;  %9376 = vmatprep.mubr.bf16.mxu1 %v20891_v34  ;;  %v20894_v49 = vld [vmem:[#allocation25_spill] sm:$0xff] }
 0x564   :  { %7678 = vmatprep.mubr.bf16.mxu0 %v19425_v31  ;;  %v300_v34 = vld [vmem:[%s20268_s0 + $0x8b8] sm:$0xff]  ;;  %20896 = vst [vmem:[#allocation25_spill] sm:$0xff] %v19451_v7 }
 0x565   :  { %v308_v31 = vld [vmem:[%s20268_s0 + $0x8f8] sm:$0xff] }
 0x566   :  { %v19453_v63 = vcombine.high %v300_v34, %v308_v31  ;;  %v19465_v20 = vcombine.low %v300_v34, %v308_v31 }
 0x568   :  { %20897 = vst [vmem:[#allocation26_spill] sm:$0xff] %v19453_v63 }
 0x56a   :  { %9377 = vmatmul.mubr.bf16.gmra.mrb[160].mxu1 %v20894_v49  ;;  %v20899_v49 = vld [vmem:[#allocation28_spill] sm:$0xff] }
 0x56b   :  { %7679 = vmatmul.mubr.bf16.gmra.mrb[60].mxu0 %v19437_v41  ;;  %9386 = vmatprep.mubr.bf16.mxu1 %v20895_v47  ;;  %v20898_v41 = vld [vmem:[#allocation27_spill] sm:$0xff]  ;;  %v316_v47 = vld [vmem:[%s20268_s0 + $0x938] sm:$0xff] }
 0x56c   :  { %7688 = vmatprep.mubr.bf16.mxu0 %v19439_v13  ;;  %v324_v13 = vld [vmem:[%s20268_s0 + $0x978] sm:$0xff]  ;;  %20900 = vst [vmem:[#allocation27_spill] sm:$0xff] %v19465_v20 }
 0x56d   :  { %v19467_v5 = vcombine.high %v316_v47, %v324_v13  ;;  %v19479_v31 = vcombine.low %v316_v47, %v324_v13 }
 0x56f   :  { %20901 = vst [vmem:[#allocation28_spill] sm:$0xff] %v19467_v5 }
 0x572   :  { %9387 = vmatmul.mubr.bf16.gmra.mrb[164].mxu1 %v20898_v41  ;;  %v20903_v41 = vld [vmem:[#allocation30_spill] sm:$0xff] }
 0x573   :  { %7689 = vmatmul.mubr.bf16.gmra.mrb[64].mxu0 %v19451_v7  ;;  %9396 = vmatprep.mubr.bf16.mxu1 %v20899_v49  ;;  %v20902_v7 = vld [vmem:[#allocation29_spill] sm:$0xff] }
 0x574   :  { %7698 = vmatprep.mubr.bf16.mxu0 %v19453_v63  ;;  %v332_v49 = vld [vmem:[%s20268_s0 + $0x9b8] sm:$0xff]  ;;  %20904 = vst [vmem:[#allocation29_spill] sm:$0xff] %v19479_v31 }
 0x575   :  { %v340_v63 = vld [vmem:[%s20268_s0 + $0x9f8] sm:$0xff] }
 0x576   :  { %v19481_v34 = vcombine.high %v332_v49, %v340_v63  ;;  %v19493_v13 = vcombine.low %v332_v49, %v340_v63 }
 0x578   :  { %20905 = vst [vmem:[#allocation30_spill] sm:$0xff] %v19481_v34 }
 0x57a   :  { %9397 = vmatmul.mubr.bf16.gmra.mrb[168].mxu1 %v20902_v7  ;;  %v20907_v7 = vld [vmem:[#allocation32_spill] sm:$0xff] }
 0x57b   :  { %7699 = vmatmul.mubr.bf16.gmra.mrb[68].mxu0 %v19465_v20  ;;  %9406 = vmatprep.mubr.bf16.mxu1 %v20903_v41  ;;  %v20906_v20 = vld [vmem:[#allocation31_spill] sm:$0xff]  ;;  %v348_v41 = vld [vmem:[%s20268_s0 + $0xa38] sm:$0xff] }
 0x57c   :  { %7708 = vmatprep.mubr.bf16.mxu0 %v19467_v5  ;;  %v356_v5 = vld [vmem:[%s20268_s0 + $0xa78] sm:$0xff]  ;;  %20908 = vst [vmem:[#allocation31_spill] sm:$0xff] %v19493_v13 }
 0x57d   :  { %v19495_v47 = vcombine.high %v348_v41, %v356_v5  ;;  %v19507_v63 = vcombine.low %v348_v41, %v356_v5 }
 0x57f   :  { %20909 = vst [vmem:[#allocation32_spill] sm:$0xff] %v19495_v47 }
 0x582   :  { %9407 = vmatmul.mubr.bf16.gmra.mrb[172].mxu1 %v20906_v20  ;;  %v20911_v20 = vld [vmem:[#allocation34_spill] sm:$0xff] }
 0x583   :  { %7709 = vmatmul.mubr.bf16.gmra.mrb[72].mxu0 %v19479_v31  ;;  %9416 = vmatprep.mubr.bf16.mxu1 %v20907_v7  ;;  %v20910_v31 = vld [vmem:[#allocation33_spill] sm:$0xff] }
 0x584   :  { %7718 = vmatprep.mubr.bf16.mxu0 %v19481_v34  ;;  %v364_v7 = vld [vmem:[%s20268_s0 + $0xab8] sm:$0xff]  ;;  %20912 = vst [vmem:[#allocation33_spill] sm:$0xff] %v19507_v63 }
 0x585   :  { %v372_v34 = vld [vmem:[%s20268_s0 + $0xaf8] sm:$0xff] }
 0x586   :  { %v19509_v49 = vcombine.high %v364_v7, %v372_v34  ;;  %v19521_v5 = vcombine.low %v364_v7, %v372_v34 }
 0x588   :  { %20913 = vst [vmem:[#allocation34_spill] sm:$0xff] %v19509_v49 }
 0x58a   :  { %9417 = vmatmul.mubr.bf16.gmra.mrb[176].mxu1 %v20910_v31  ;;  %v20915_v31 = vld [vmem:[#allocation36_spill] sm:$0xff] }
 0x58b   :  { %7719 = vmatmul.mubr.bf16.gmra.mrb[76].mxu0 %v19493_v13  ;;  %9426 = vmatprep.mubr.bf16.mxu1 %v20911_v20  ;;  %v20914_v13 = vld [vmem:[#allocation35_spill] sm:$0xff]  ;;  %v380_v20 = vld [vmem:[%s20268_s0 + $0xb38] sm:$0xff] }
 0x58c   :  { %7728 = vmatprep.mubr.bf16.mxu0 %v19495_v47  ;;  %v388_v47 = vld [vmem:[%s20268_s0 + $0xb78] sm:$0xff]  ;;  %20916 = vst [vmem:[#allocation35_spill] sm:$0xff] %v19521_v5 }
 0x58d   :  { %v19523_v41 = vcombine.high %v380_v20, %v388_v47  ;;  %v19535_v34 = vcombine.low %v380_v20, %v388_v47 }
 0x58f   :  { %20917 = vst [vmem:[#allocation36_spill] sm:$0xff] %v19523_v41 }
 0x592   :  { %9427 = vmatmul.mubr.bf16.gmra.mrb[180].mxu1 %v20914_v13  ;;  %v20919_v13 = vld [vmem:[#allocation38_spill] sm:$0xff] }
 0x593   :  { %7729 = vmatmul.mubr.bf16.gmra.mrb[80].mxu0 %v19507_v63  ;;  %9436 = vmatprep.mubr.bf16.mxu1 %v20915_v31  ;;  %v20918_v63 = vld [vmem:[#allocation37_spill] sm:$0xff] }
 0x594   :  { %7738 = vmatprep.mubr.bf16.mxu0 %v19509_v49  ;;  %v396_v31 = vld [vmem:[%s20268_s0 + $0xbb8] sm:$0xff]  ;;  %20920 = vst [vmem:[#allocation37_spill] sm:$0xff] %v19535_v34 }
 0x595   :  { %v404_v49 = vld [vmem:[%s20268_s0 + $0xbf8] sm:$0xff] }
 0x596   :  { %v19537_v7 = vcombine.high %v396_v31, %v404_v49  ;;  %v19549_v47 = vcombine.low %v396_v31, %v404_v49  ;;  %v935_v49 = vlaneseq  ;;  %v15052_v31 = vld [vmem:[%s20267_s1 + $0xe08] ss:$16 sps:$4 sm:$0xff]  }
 0x598   :  { %20921 = vst [vmem:[#allocation38_spill] sm:$0xff] %v19537_v7 }
 0x59a   :  { %9437 = vmatmul.mubr.bf16.gmra.mrb[184].mxu1 %v20918_v63  ;;  %v20923_v63 = vld [vmem:[#allocation40_spill] sm:$0xff] }
 0x59b   :  { %7739 = vmatmul.mubr.bf16.gmra.mrb[84].mxu0 %v19521_v5  ;;  %9446 = vmatprep.mubr.bf16.mxu1 %v20919_v13  ;;  %v20922_v5 = vld [vmem:[#allocation39_spill] sm:$0xff]  ;;  %v412_v13 = vld [vmem:[%s20268_s0 + $0xc38] sm:$0xff] }
 0x59c   :  { %7748 = vmatprep.mubr.bf16.mxu0 %v19523_v41  ;;  %v420_v41 = vld [vmem:[%s20268_s0 + $0xc78] sm:$0xff]  ;;  %20924 = vst [vmem:[#allocation39_spill] sm:$0xff] %v19549_v47 }
 0x59d   :  { %v19551_v20 = vcombine.high %v412_v13, %v420_v41 }
 0x59f   :  { %20925 = vst [vmem:[#allocation40_spill] sm:$0xff] %v19551_v20 }
 0x5a2   :  { %9447 = vmatmul.mubr.bf16.gmra.mrb[188].mxu1 %v20922_v5  ;;  %v20927_v5 = vld [vmem:[#allocation42_spill] sm:$0xff] }
 0x5a3   :  { %7749 = vmatmul.mubr.bf16.gmra.mrb[88].mxu0 %v19535_v34  ;;  %9456 = vmatprep.mubr.bf16.mxu1 %v20923_v63  ;;  %v20926_v34 = vld [vmem:[#allocation41_spill] sm:$0xff]  ;;  %v19557_v63 = vcombine.low %v412_v13, %v420_v41  ;;  %v20933_v41 = vld [vmem:[#allocation46_spill] sm:$0xff] }
 0x5a4   :  { %7758 = vmatprep.mubr.bf16.mxu0 %v19537_v7  ;;  %v20929_v7 = vld [vmem:[#allocation43_spill] sm:$0xff] }
 0x5a5   :  { %20928 = vst [vmem:[#allocation41_spill] sm:$0xff] %v19557_v63  ;;  %v15065_v13 = vld [vmem:[%s20267_s1 + $0xe4c] ss:$16 sps:$4 sm:$0xff]  }
 0x5aa   :  { %9457 = vmatmul.mubr.bf16.gmra.mrb[192].mxu1 %v20926_v34  ;;  %v15060_v34 = vld [vmem:[%s20267_s1 + $0xe2c] ss:$16 sps:$4 sm:$0xff]  }
 0x5ab   :  { %7759 = vmatmul.mubr.bf16.gmra.mrb[92].mxu0 %v19549_v47  ;;  %9466 = vmatprep.mubr.bf16.mxu1 %v20927_v5  ;;  %v19565_v47 = vshrl.u32 %v935_v49, 7  ;;  %v20932_v5 = vld [vmem:[#allocation45_spill] sm:$0xff]  ;;  %v933_v49 = vld [vmem:[%s20270_s2] sm:$0xf] }
 0x5ac   :  { %7768 = vmatprep.mubr.bf16.mxu0 %v19551_v20  ;;  %v20934_v20 = vld [vmem:[#allocation47_spill] sm:$0xff] }
 0x5ad   :  { %20931 = vst [vmem:[#allocation42_spill] sm:$0xff] %v19565_v47 }
 0x5b2   :  { %9467 = vmatmul.mubr.bf16.gmra.mrb[196].mxu1 %v20929_v7  ;;  %v937_v7 = vsub.s32 0, %v19565_v47 }
 0x5b3   :  { %7769 = vmatmul.mubr.bf16.gmra.mrb[96].mxu0 %v19557_v63  ;;  %9509 = vmatprep.mubr.bf16.mxu1 %v20930_v57  ;;  %v15058_v57 = vld [vmem:[%s20267_s1 + $0xe28] ss:$16 sps:$4 sm:$0xff]  }
 0x5ba   :  { %9510 = vmatmul.mubr.bf16.vlgmr.msra.gmra.mrb[100].mxu1 %v20932_v5  ;;  %v941_v5 = vsub.s32 1, %v19565_v47  ;;  %v20936_v47 = vld [vmem:[#allocation53_spill] sm:$0xff] }
 0x5bb   :  { %9761 = vmatpush1.bf16.msra.mxu1 %v15052_v31  ;;  %9519 = vmatprep.mubr.bf16.mxu1 %v20933_v41  ;;  %v15063_v31 = vld [vmem:[%s20267_s1 + $0xe48] ss:$16 sps:$4 sm:$0xff]   ;;  %v19586_v41 = vrot.slane %v933_v49, %v937_v7 }
 0x5bc   :  { %9762 = vmatprep.subr.bf16.mxu1 %v15060_v34  ;;  %v15068_v34 = vld [vmem:[%s20267_s1 + $0xe6c] ss:$16 sps:$4 sm:$0xff]   ;;  %v19591_v63 = vrot.slane %v933_v49, %v941_v5  ;;  %v20937_v49 = vld [vmem:[#allocation54_spill] sm:$0xff] }
 0x5bd   :  { %v5550_v7 = vadd.f32 %v20936_v47, %v19586_v41  ;;  %v15069_v47 = vld [vmem:[%s20267_s1 + $0xe88] ss:$16 sps:$4 sm:$0xff]  }
 0x5be   :  { %v5552_v5 = vadd.f32 %v20937_v49, %v19591_v63  ;;  %v5556_v51 = vadd.f32 %v20939_v32, %v19591_v63  ;;  %v15074_v49 = vld [vmem:[%s20267_s1 + $0xeac] ss:$16 sps:$4 sm:$0xff]  }
 0x5bf   :  { %9763 = vmatpush1.bf16.msra.mxu1 %v15058_v57  ;;  %v15066_v57 = vld [vmem:[%s20267_s1 + $0xe68] ss:$16 sps:$4 sm:$0xff]  }
 0x5c0   :  { %9764 = vmatprep.subr.bf16.mxu1 %v15065_v13  ;;  %v15071_v13 = vld [vmem:[%s20267_s1 + $0xe8c] ss:$16 sps:$4 sm:$0xff]  }
 0x5c2   :  { %9520 = vmatmul.mubr.bf16.gmra.mrb[104].mxu1 %v20934_v20  ;;  %v20938_v20 = vld [vmem:[#allocation55_spill] sm:$0xff] }
 0x5c3   :  { %9529 = vmatprep.mubr.bf16.mxu1 %v20935_v39  ;;  %9765 = vmatpush1.bf16.msra.mxu1 %v15063_v31  ;;  %v5554_v39 = vadd.f32 %v20938_v20, %v19586_v41 }
 0x5c4   :  { %9766 = vmatprep.subr.bf16.mxu1 %v15068_v34 }
 0x5c6   :  { %v7530_v29 = vpop.f32.mrb[0].mxu0 }
 0x5c7   :  { %v12571_v31 = vadd.f32 %v7530_v29, %v5550_v7  ;;  %v7532_v17 = vpop.f32.mrb[1].mxu0  ;;  %9767 = vmatpush1.bf16.msra.mxu1 %v15066_v57  ;;  %v20940_v57 = vld [vmem:[#allocation57_spill] sm:$0xff] }
 0x5c8   :  { %v12573_v3 = vadd.f32 %v7532_v17, %v5552_v5  ;;  %v7534_v42 = vpop.f32.mrb[2].mxu0  ;;  %9768 = vmatprep.subr.bf16.mxu1 %v15071_v13  ;;  %v5560_v13 = vadd.f32 %v20940_v57, %v19586_v41 }
 0x5c9   :  { %v12575_v34 = vadd.f32 %v7534_v42, %v5554_v39  ;;  %v7536_v18 = vpop.f32.mrb[3].mxu0  ;;  %v10043_v29 = vmax.f32 %v12571_v31, 0.0  ;;  %v15072_v42 = vld [vmem:[%s20267_s1 + $0xea8] ss:$16 sps:$4 sm:$0xff]  }
 0x5ca   :  { %v12577_v20 = vadd.f32 %v7536_v18, %v5556_v51  ;;  %9530 = vmatmul.mubr.bf16.gmra.mrb[108].mxu1 %v18588_v2  ;;  %v10044_v32 = vmax.f32 %v12573_v3, 0.0  ;;  %v15077_v18 = vld [vmem:[%s20267_s1 + $0xecc] ss:$16 sps:$4 sm:$0xff]   ;;  %v20941_v2 = vld [vmem:[#allocation58_spill] sm:$0xff] }
 0x5cb   :  { %v10047_v7 = vmax.f32 %v12575_v34, 0.0  ;;  %9539 = vmatprep.mubr.bf16.mxu1 %v18590_v10  ;;  %9769 = vmatpush1.bf16.msra.mxu1 %v15069_v47  ;;  %v5562_v3 = vadd.f32 %v20941_v2, %v19591_v63  ;;  %v20942_v10 = vld [vmem:[#allocation59_spill] sm:$0xff] }
 0x5cc   :  { %v10048_v17 = vmax.f32 %v12577_v20, 0.0  ;;  %9770 = vmatprep.subr.bf16.mxu1 %v15074_v49  ;;  %v5564_v31 = vadd.f32 %v20942_v10, %v19586_v41  ;;  %v20943_v20 = vld [vmem:[#allocation60_spill] sm:$0xff]  ;;  %v15075_v49 = vld [vmem:[%s20267_s1 + $0xec8] ss:$16 sps:$4 sm:$0xff]  }
 0x5cd   :  { %v10243_v5 = vpack.c.bf16 %v10047_v7, %v10043_v29  ;;  %v5566_v45 = vadd.f32 %v20943_v20, %v19591_v63 }
 0x5ce   :  { %v10244_v51 = vpack.c.bf16 %v10048_v17, %v10044_v32  ;;  %v7540_v39 = vpop.f32.mrb[4].mxu0  ;;  %v15080_v32 = vld [vmem:[%s20267_s1 + $0xeec] ss:$16 sps:$4 sm:$0xff]  }
 0x5cf   :  { %v12579_v47 = vadd.f32 %v7540_v39, %v5560_v13  ;;  %v7542_v34 = vpop.f32.mrb[5].mxu0  ;;  %9771 = vmatpush1.bf16.msra.mxu1 %v15072_v42  ;;  %v15078_v42 = vld [vmem:[%s20267_s1 + $0xee8] ss:$16 sps:$4 sm:$0xff]  }
 0x5d0   :  { %v12581_v57 = vadd.f32 %v7542_v34, %v5562_v3  ;;  %v7544_v29 = vpop.f32.mrb[6].mxu0  ;;  %10638 = vmatprep.mubr.bf16.mxu0 %v10244_v51  ;;  %9772 = vmatprep.subr.bf16.mxu1 %v15077_v18 }
 0x5d1   :  { %v12583_v7 = vadd.f32 %v7544_v29, %v5564_v31  ;;  %v7546_v2 = vpop.f32.mrb[7].mxu0  ;;  %10639 = vmatmul.mubr.bf16.vlgmr.msra.gmra.mrb[100].mxu0 %v10243_v5  ;;  %v10051_v13 = vmax.f32 %v12579_v47, 0.0  ;;  %v20944_v5 = vld [vmem:[#allocation61_spill] sm:$0xff] }
 0x5d2   :  { %v12585_v17 = vadd.f32 %v7546_v2, %v5566_v45  ;;  %9540 = vmatmul.mubr.bf16.gmra.mrb[112].mxu1 %v18626_v43  ;;  %v10052_v3 = vmax.f32 %v12581_v57, 0.0  ;;  %v5570_v18 = vadd.f32 %v20944_v5, %v19586_v41  ;;  %v15083_v45 = vld [vmem:[%s20267_s1 + $0xf0c] ss:$16 sps:$4 sm:$0xff]   ;;  %v20945_v43 = vld [vmem:[#allocation62_spill] sm:$0xff] }
 0x5d3   :  { %v10055_v39 = vmax.f32 %v12583_v7, 0.0  ;;  %9549 = vmatprep.mubr.bf16.mxu1 %v18628_v44  ;;  %9773 = vmatpush1.bf16.msra.mxu1 %v15075_v49  ;;  %v5572_v31 = vadd.f32 %v20945_v43, %v19591_v63  ;;  %v20946_v44 = vld [vmem:[#allocation63_spill] sm:$0xff]  ;;  %v20947_v49 = vld [vmem:[#allocation64_spill] sm:$0xff] }
 0x5d4   :  { %v10056_v51 = vmax.f32 %v12585_v17, 0.0  ;;  %9774 = vmatprep.subr.bf16.mxu1 %v15080_v32  ;;  %v5574_v20 = vadd.f32 %v20946_v44, %v19586_v41  ;;  %v5576_v7 = vadd.f32 %v20947_v49, %v19591_v63  ;;  %v15081_v32 = vld [vmem:[%s20267_s1 + $0xf08] ss:$16 sps:$4 sm:$0xff]  }
 0x5d5   :  { %v10247_v10 = vpack.c.bf16 %v10055_v39, %v10051_v13 }
 0x5d6   :  { %v10248_v47 = vpack.c.bf16 %v10056_v51, %v10052_v3  ;;  %v7550_v34 = vpop.f32.mrb[8].mxu0  ;;  %v15086_v3 = vld [vmem:[%s20267_s1 + $0xf2c] ss:$16 sps:$4 sm:$0xff]  }
 0x5d7   :  { %v12587_v57 = vadd.f32 %v7550_v34, %v5570_v18  ;;  %v7552_v29 = vpop.f32.mrb[9].mxu0  ;;  %9775 = vmatpush1.bf16.msra.mxu1 %v15078_v42  ;;  %v15084_v42 = vld [vmem:[%s20267_s1 + $0xf28] ss:$16 sps:$4 sm:$0xff]   ;;  %v15089_v34 = vld [vmem:[%s20267_s1 + $0xf4c] ss:$16 sps:$4 sm:$0xff]  }
 0x5d8   :  { %v12589_v2 = vadd.f32 %v7552_v29, %v5572_v31  ;;  %v7554_v17 = vpop.f32.mrb[10].mxu0  ;;  %10646 = vmatprep.mubr.bf16.mxu0 %v10248_v47  ;;  %9776 = vmatprep.subr.bf16.mxu1 %v15083_v45 }
 0x5d9   :  { %v12591_v13 = vadd.f32 %v7554_v17, %v5574_v20  ;;  %v7556_v39 = vpop.f32.mrb[11].mxu0  ;;  %10647 = vmatmul.mubr.bf16.gmra.mrb[104].mxu0 %v10247_v10  ;;  %v10059_v5 = vmax.f32 %v12587_v57, 0.0  ;;  %v20948_v10 = vld [vmem:[#allocation65_spill] sm:$0xff] }
 0x5da   :  { %v12593_v51 = vadd.f32 %v7556_v39, %v5576_v7  ;;  %9550 = vmatmul.mubr.bf16.gmra.mrb[116].mxu1 %v18664_v60  ;;  %v10060_v43 = vmax.f32 %v12589_v2, 0.0  ;;  %v5580_v45 = vadd.f32 %v20948_v10, %v19586_v41  ;;  %v20949_v60 = vld [vmem:[#allocation66_spill] sm:$0xff]  ;;  %v20951_v2 = vld [vmem:[#allocation68_spill] sm:$0xff]  ;;  %v15087_v39 = vld [vmem:[%s20267_s1 + $0xf48] ss:$16 sps:$4 sm:$0xff]  }
 0x5db   :  { %v10063_v18 = vmax.f32 %v12591_v13, 0.0  ;;  %9559 = vmatprep.mubr.bf16.mxu1 %v18666_v12  ;;  %9777 = vmatpush1.bf16.msra.mxu1 %v15081_v32  ;;  %v5582_v44 = vadd.f32 %v20949_v60, %v19591_v63  ;;  %v20950_v12 = vld [vmem:[#allocation67_spill] sm:$0xff]  ;;  %v5586_v17 = vadd.f32 %v20951_v2, %v19591_v63  ;;  %v20955_v2 = vld [vmem:[#allocation72_spill] sm:$0xff] }
 0x5dc   :  { %v10064_v31 = vmax.f32 %v12593_v51, 0.0  ;;  %9778 = vmatprep.subr.bf16.mxu1 %v15086_v3  ;;  %v5584_v29 = vadd.f32 %v20950_v12, %v19586_v41 }
 0x5dd   :  { %v10251_v47 = vpack.c.bf16 %v10063_v18, %v10059_v5  ;;  %v15092_v5 = vld [vmem:[%s20267_s1 + $0xf6c] ss:$16 sps:$4 sm:$0xff]  }
 0x5de   :  { %v10252_v20 = vpack.c.bf16 %v10064_v31, %v10060_v43  ;;  %v7560_v57 = vpop.f32.mrb[12].mxu0 }
 0x5df   :  { %v12595_v49 = vadd.f32 %v7560_v57, %v5580_v45  ;;  %v7562_v7 = vpop.f32.mrb[13].mxu0  ;;  %9779 = vmatpush1.bf16.msra.mxu1 %v15084_v42  ;;  %v15090_v42 = vld [vmem:[%s20267_s1 + $0xf68] ss:$16 sps:$4 sm:$0xff]  }
 0x5e0   :  { %v12597_v32 = vadd.f32 %v7562_v7, %v5582_v44  ;;  %v7564_v13 = vpop.f32.mrb[14].mxu0  ;;  %10654 = vmatprep.mubr.bf16.mxu0 %v10252_v20  ;;  %9780 = vmatprep.subr.bf16.mxu1 %v15089_v34  ;;  %v15095_v44 = vld [vmem:[%s20267_s1 + $0xf8c] ss:$16 sps:$4 sm:$0xff]  }
 0x5e1   :  { %v12599_v3 = vadd.f32 %v7564_v13, %v5584_v29  ;;  %v7566_v51 = vpop.f32.mrb[15].mxu0  ;;  %10655 = vmatmul.mubr.bf16.gmra.mrb[108].mxu0 %v10251_v47  ;;  %v10067_v43 = vmax.f32 %v12595_v49, 0.0  ;;  %v20952_v47 = vld [vmem:[#allocation69_spill] sm:$0xff] }
 0x5e2   :  { %v12601_v18 = vadd.f32 %v7566_v51, %v5586_v17  ;;  %9560 = vmatmul.mubr.bf16.gmra.mrb[120].mxu1 %v18702_v28  ;;  %v10068_v10 = vmax.f32 %v12597_v32, 0.0  ;;  %v5590_v34 = vadd.f32 %v20952_v47, %v19586_v41  ;;  %v20953_v28 = vld [vmem:[#allocation70_spill] sm:$0xff]  ;;  %v5596_v17 = vadd.f32 %v20955_v2, %v19591_v63  ;;  %v20956_v47 = vld [vmem:[#allocation73_spill] sm:$0xff] }
 0x5e3   :  { %v10071_v31 = vmax.f32 %v12599_v3, 0.0  ;;  %9569 = vmatprep.mubr.bf16.mxu1 %v18704_v4  ;;  %9781 = vmatpush1.bf16.msra.mxu1 %v15087_v39  ;;  %v5592_v20 = vadd.f32 %v20953_v28, %v19591_v63  ;;  %v20954_v4 = vld [vmem:[#allocation71_spill] sm:$0xff] }
 0x5e4   :  { %v10072_v45 = vmax.f32 %v12601_v18, 0.0  ;;  %9782 = vmatprep.subr.bf16.mxu1 %v15092_v5  ;;  %v5594_v29 = vadd.f32 %v20954_v4, %v19586_v41  ;;  %v15093_v39 = vld [vmem:[%s20267_s1 + $0xf88] ss:$16 sps:$4 sm:$0xff]   ;;  %v15098_v5 = vld [vmem:[%s20267_s1 + $0xfac] ss:$16 sps:$4 sm:$0xff]  }
 0x5e5   :  { %v10255_v60 = vpack.c.bf16 %v10071_v31, %v10067_v43 }
 0x5e6   :  { %v10256_v57 = vpack.c.bf16 %v10072_v45, %v10068_v10  ;;  %v7570_v12 = vpop.f32.mrb[16].mxu0 }
 0x5e7   :  { %v12603_v49 = vadd.f32 %v7570_v12, %v5590_v34  ;;  %v7572_v7 = vpop.f32.mrb[17].mxu0  ;;  %9783 = vmatpush1.bf16.msra.mxu1 %v15090_v42  ;;  %v15096_v42 = vld [vmem:[%s20267_s1 + $0xfa8] ss:$16 sps:$4 sm:$0xff]   ;;  %v5600_v34 = vadd.f32 %v20956_v47, %v19586_v41 }
 0x5e8   :  { %v12605_v32 = vadd.f32 %v7572_v7, %v5592_v20  ;;  %v7574_v13 = vpop.f32.mrb[18].mxu0  ;;  %10662 = vmatprep.mubr.bf16.mxu0 %v10256_v57  ;;  %9784 = vmatprep.subr.bf16.mxu1 %v15095_v44  ;;  %v20957_v44 = vld [vmem:[#allocation74_spill] sm:$0xff] }
 0x5e9   :  { %v12607_v3 = vadd.f32 %v7574_v13, %v5594_v29  ;;  %v7576_v51 = vpop.f32.mrb[19].mxu0  ;;  %10663 = vmatmul.mubr.bf16.gmra.mrb[112].mxu0 %v10255_v60  ;;  %v10075_v43 = vmax.f32 %v12603_v49, 0.0  ;;  %v5602_v28 = vadd.f32 %v20957_v44, %v19591_v63  ;;  %v20959_v49 = vld [vmem:[#allocation76_spill] sm:$0xff]  ;;  %v20962_v44 = vld [vmem:[#allocation79_spill] sm:$0xff] }
 0x5ea   :  { %v12609_v18 = vadd.f32 %v7576_v51, %v5596_v17  ;;  %9570 = vmatmul.mubr.bf16.gmra.mrb[124].mxu1 %v18740_v9  ;;  %v10076_v10 = vmax.f32 %v12605_v32, 0.0  ;;  %v15101_v9 = vld [vmem:[%s20267_s1 + $0xfcc] ss:$16 sps:$4 sm:$0xff]   ;;  %v5606_v7 = vadd.f32 %v20959_v49, %v19591_v63  ;;  %v15099_v32 = vld [vmem:[%s20267_s1 + $0xfc8] ss:$16 sps:$4 sm:$0xff]  }
 0x5eb   :  { %v10079_v31 = vmax.f32 %v12607_v3, 0.0  ;;  %9579 = vmatprep.mubr.bf16.mxu1 %v18742_v26  ;;  %9785 = vmatpush1.bf16.msra.mxu1 %v15093_v39  ;;  %v20958_v26 = vld [vmem:[#allocation75_spill] sm:$0xff] }
 0x5ec   :  { %v10080_v45 = vmax.f32 %v12609_v18, 0.0  ;;  %9786 = vmatprep.subr.bf16.mxu1 %v15098_v5  ;;  %v5604_v12 = vadd.f32 %v20958_v26, %v19586_v41  ;;  %v15102_v49 = vld [vmem:[%s20267_s1 + $0xfe8] ss:$16 sps:$4 sm:$0xff]  }
 0x5ed   :  { %v10259_v60 = vpack.c.bf16 %v10079_v31, %v10075_v43  ;;  %v20960_v31 = vld [vmem:[#allocation77_spill] sm:$0xff] }
 0x5ee   :  { %v10260_v20 = vpack.c.bf16 %v10080_v45, %v10076_v10  ;;  %v7580_v57 = vpop.f32.mrb[20].mxu0  ;;  %v5610_v10 = vadd.f32 %v20960_v31, %v19586_v41 }
 0x5ef   :  { %v12611_v4 = vadd.f32 %v7580_v57, %v5600_v34  ;;  %v7582_v29 = vpop.f32.mrb[21].mxu0  ;;  %9787 = vmatpush1.bf16.msra.mxu1 %v15096_v42  ;;  %v20961_v42 = vld [vmem:[#allocation78_spill] sm:$0xff] }
 0x5f0   :  { %v12613_v2 = vadd.f32 %v7582_v29, %v5602_v28  ;;  %v7584_v17 = vpop.f32.mrb[22].mxu0  ;;  %10670 = vmatprep.mubr.bf16.mxu0 %v10260_v20  ;;  %9788 = vmatprep.subr.bf16.mxu1 %v15101_v9  ;;  %v5612_v47 = vadd.f32 %v20961_v42, %v19591_v63  ;;  %v5614_v28 = vadd.f32 %v20962_v44, %v19586_v41 }
 0x5f1   :  { %v12615_v13 = vadd.f32 %v7584_v17, %v5604_v12  ;;  %v7586_v39 = vpop.f32.mrb[23].mxu0  ;;  %10671 = vmatmul.mubr.bf16.gmra.mrb[116].mxu0 %v10259_v60  ;;  %v10083_v51 = vmax.f32 %v12611_v4, 0.0 }
 0x5f2   :  { %v12617_v3 = vadd.f32 %v7586_v39, %v5606_v7  ;;  %9580 = vmatmul.mubr.bf16.gmra.mrb[128].mxu1 %v18778_v58  ;;  %v10084_v18 = vmax.f32 %v12613_v2, 0.0  ;;  %v20963_v58 = vld [vmem:[#allocation80_spill] sm:$0xff]  ;;  %v15104_v7 = vld [vmem:[%s20267_s1 + $0xfec] ss:$16 sps:$4 sm:$0xff]  }
 0x5f3   :  { %v10087_v5 = vmax.f32 %v12615_v13, 0.0  ;;  %9589 = vmatprep.mubr.bf16.mxu1 %v18780_v56  ;;  %9789 = vmatpush1.bf16.msra.mxu1 %v15099_v32  ;;  %v5616_v9 = vadd.f32 %v20963_v58, %v19591_v63  ;;  %v20964_v39 = vld [vmem:[#allocation81_spill] sm:$0xff] }
 0x5f4   :  { %v10088_v43 = vmax.f32 %v12617_v3, 0.0  ;;  %9790 = vmatprep.subr.bf16.mxu1 %v15104_v7  ;;  %v5620_v3 = vadd.f32 %v20964_v39, %v19586_v41 }
 0x5f5   :  { %v10263_v45 = vpack.c.bf16 %v10087_v5, %v10083_v51  ;;  %v20965_v5 = vld [vmem:[#allocation82_spill] sm:$0xff] }
 0x5f6   :  { %v10264_v34 = vpack.c.bf16 %v10088_v43, %v10084_v18  ;;  %v7590_v60 = vpop.f32.mrb[24].mxu0  ;;  %v5622_v18 = vadd.f32 %v20965_v5, %v19591_v63 }
 0x5f7   :  { %v12619_v20 = vadd.f32 %v7590_v60, %v5610_v10  ;;  %v7592_v57 = vpop.f32.mrb[25].mxu0  ;;  %9791 = vmatpush1.bf16.msra.mxu1 %v15102_v49  ;;  %v20966_v10 = vld [vmem:[#allocation83_spill] sm:$0xff] }
 0x5f8   :  { %v12621_v26 = vadd.f32 %v7592_v57, %v5612_v47  ;;  %v7594_v56 = vpop.f32.mrb[26].mxu0  ;;  %10678 = vmatprep.mubr.bf16.mxu0 %v10264_v34  ;;  %v20967_v47 = vld [vmem:[#allocation84_spill] sm:$0xff] }
 0x5f9   :  { %v12623_v12 = vadd.f32 %v7594_v56, %v5614_v28  ;;  %v7596_v4 = vpop.f32.mrb[27].mxu0  ;;  %10679 = vmatmul.mubr.bf16.gmra.mrb[120].mxu0 %v10263_v45  ;;  %v10091_v2 = vmax.f32 %v12619_v20, 0.0  ;;  %v5624_v45 = vadd.f32 %v20966_v10, %v19586_v41  ;;  %v5626_v34 = vadd.f32 %v20967_v47, %v19591_v63  ;;  %v20968_v56 = vld [vmem:[#allocation85_spill] sm:$0xff] }
 0x5fa   :  { %v12625_v29 = vadd.f32 %v7596_v4, %v5616_v9  ;;  %9590 = vmatmul.mubr.bf16.gmra.mrb[132].mxu1 %v18813_v6  ;;  %v10092_v32 = vmax.f32 %v12621_v26, 0.0 }
 0x5fb   :  { %v10095_v17 = vmax.f32 %v12623_v12, 0.0  ;;  %9599 = vmatprep.mubr.bf16.mxu1 %v18815_v30  ;;  %v5630_v12 = vadd.f32 %v20968_v56, %v19586_v41 }
 0x5fc   :  { %v10096_v13 = vmax.f32 %v12625_v29, 0.0  ;;  %v20969_v29 = vld [vmem:[#allocation86_spill] sm:$0xff] }
 0x5fd   :  { %v10267_v51 = vpack.c.bf16 %v10095_v17, %v10091_v2  ;;  %v5632_v49 = vadd.f32 %v20969_v29, %v19591_v63  ;;  %v20970_v17 = vld [vmem:[#allocation87_spill] sm:$0xff] }
 0x5fe   :  { %v10268_v43 = vpack.c.bf16 %v10096_v13, %v10092_v32  ;;  %v7600_v31 = vpop.f32.mrb[28].mxu0  ;;  %v5634_v32 = vadd.f32 %v20970_v17, %v19586_v41 }
 0x5ff   :  { %v12627_v42 = vadd.f32 %v7600_v31, %v5620_v3  ;;  %v7602_v6 = vpop.f32.mrb[29].mxu0 }
 0x600   :  { %v12629_v30 = vadd.f32 %v7602_v6, %v5622_v18  ;;  %v7604_v60 = vpop.f32.mrb[30].mxu0  ;;  %10686 = vmatprep.mubr.bf16.mxu0 %v10268_v43  ;;  %v20972_v6 = vld [vmem:[#allocation89_spill] sm:$0xff] }
 0x601   :  { %v12631_v44 = vadd.f32 %v7604_v60, %v5624_v45  ;;  %v7606_v28 = vpop.f32.mrb[31].mxu0  ;;  %10687 = vmatmul.mubr.bf16.gmra.mrb[124].mxu0 %v10267_v51  ;;  %v10099_v57 = vmax.f32 %v12627_v42, 0.0  ;;  %v5640_v47 = vadd.f32 %v20972_v6, %v19586_v41 }
 0x602   :  { %v12633_v20 = vadd.f32 %v7606_v28, %v5626_v34  ;;  %9600 = vmatmul.mubr.bf16.gmra.mrb[136].mxu1 %v18839_v1  ;;  %v10100_v9 = vmax.f32 %v12629_v30, 0.0  ;;  %v20971_v1 = vld [vmem:[#allocation88_spill] sm:$0xff]  ;;  %v20973_v30 = vld [vmem:[#allocation90_spill] sm:$0xff] }
 0x603   :  { %v10103_v58 = vmax.f32 %v12631_v44, 0.0  ;;  %9609 = vmatprep.mubr.bf16.mxu1 %v18841_v27  ;;  %v5636_v3 = vadd.f32 %v20971_v1, %v19591_v63  ;;  %v5642_v60 = vadd.f32 %v20973_v30, %v19591_v63 }
 0x604   :  { %v10104_v26 = vmax.f32 %v12633_v20, 0.0  ;;  %v20974_v20 = vld [vmem:[#allocation91_spill] sm:$0xff] }
 0x605   :  { %v10271_v4 = vpack.c.bf16 %v10103_v58, %v10099_v57  ;;  %v5644_v57 = vadd.f32 %v20974_v20, %v19586_v41  ;;  %v20980_v20 = vld [vmem:[#allocation97_spill] sm:$0xff] }
 0x606   :  { %v10272_v7 = vpack.c.bf16 %v10104_v26, %v10100_v9  ;;  %v7610_v2 = vpop.f32.mrb[32].mxu0 }
 0x607   :  { %v12635_v13 = vadd.f32 %v7610_v2, %v5630_v12  ;;  %v7612_v39 = vpop.f32.mrb[33].mxu0 }
 0x608   :  { %v12637_v51 = vadd.f32 %v7612_v39, %v5632_v49  ;;  %v7614_v5 = vpop.f32.mrb[34].mxu0  ;;  %10694 = vmatprep.mubr.bf16.mxu0 %v10272_v7 }
 0x609   :  { %v12639_v27 = vadd.f32 %v7614_v5, %v5634_v32  ;;  %v7616_v18 = vpop.f32.mrb[35].mxu0  ;;  %10695 = vmatmul.mubr.bf16.gmra.mrb[128].mxu0 %v10271_v4  ;;  %v10107_v31 = vmax.f32 %v12635_v13, 0.0  ;;  %v15105_v32 = vld [vmem:[%s20269_s3 + $0x80] sm:$0xff]   ;;  %v20976_v13 = vld [vmem:[#allocation93_spill] sm:$0xff] }
 0x60a   :  { %v12641_v43 = vadd.f32 %v7616_v18, %v5636_v3  ;;  %9610 = vmatmul.mubr.bf16.gmra.mrb[140].mxu1 %v18856_v19  ;;  %v10108_v45 = vmax.f32 %v12637_v51, 0.0  ;;  %v20975_v19 = vld [vmem:[#allocation92_spill] sm:$0xff]  ;;  %v5650_v39 = vadd.f32 %v20976_v13, %v19586_v41  ;;  %v20977_v3 = vld [vmem:[#allocation94_spill] sm:$0xff]  ;;  %10840 = vmatpush1.bf16.msra.mxu0 %v15105_v32 }
 0x60b   :  { %v10111_v10 = vmax.f32 %v12639_v27, 0.0  ;;  %9619 = vmatprep.mubr.bf16.mxu1 %v18858_v55  ;;  %v5646_v26 = vadd.f32 %v20975_v19, %v19591_v63  ;;  %v5652_v51 = vadd.f32 %v20977_v3, %v19591_v63  ;;  %10841 = vmatprep.subr.bf16.mxu0 %v20852_v61 }
 0x60c   :  { %v10112_v42 = vmax.f32 %v12641_v43, 0.0 }
 0x60d   :  { %v10275_v34 = vpack.c.bf16 %v10111_v10, %v10107_v31 }
 0x60e   :  { %v10276_v44 = vpack.c.bf16 %v10112_v42, %v10108_v45  ;;  %v7620_v28 = vpop.f32.mrb[36].mxu0 }
 0x60f   :  { %v12643_v58 = vadd.f32 %v7620_v28, %v5640_v47  ;;  %v7622_v9 = vpop.f32.mrb[37].mxu0 }
 0x610   :  { %v12645_v56 = vadd.f32 %v7622_v9, %v5642_v60  ;;  %v7624_v12 = vpop.f32.mrb[38].mxu0  ;;  %10702 = vmatprep.mubr.bf16.mxu0 %v10276_v44  ;;  %v20981_v9 = vld [vmem:[#allocation98_spill] sm:$0xff] }
 0x611   :  { %v12647_v55 = vadd.f32 %v7624_v12, %v5644_v57  ;;  %v7626_v4 = vpop.f32.mrb[39].mxu0  ;;  %10703 = vmatmul.mubr.bf16.gmra.mrb[132].mxu0 %v10275_v34  ;;  %v10115_v49 = vmax.f32 %v12643_v58, 0.0  ;;  %v5660_v57 = vadd.f32 %v20980_v20, %v19586_v41  ;;  %v5662_v19 = vadd.f32 %v20981_v9, %v19591_v63  ;;  %v20982_v12 = vld [vmem:[#allocation99_spill] sm:$0xff]  ;;  %v20988_v9 = vld [vmem:[#allocation105_spill] sm:$0xff] }
 0x612   :  { %v12649_v29 = vadd.f32 %v7626_v4, %v5646_v26  ;;  %9620 = vmatmul.mubr.bf16.gmra.mrb[144].mxu1 %v18870_v14  ;;  %v10116_v2 = vmax.f32 %v12645_v56, 0.0  ;;  %v20978_v14 = vld [vmem:[#allocation95_spill] sm:$0xff] }
 0x613   :  { %v10119_v7 = vmax.f32 %v12647_v55, 0.0  ;;  %9629 = vmatprep.mubr.bf16.mxu1 %v18872_v33  ;;  %v5654_v18 = vadd.f32 %v20978_v14, %v19586_v41  ;;  %v20979_v33 = vld [vmem:[#allocation96_spill] sm:$0xff]  ;;  %v5664_v55 = vadd.f32 %v20982_v12, %v19586_v41 }
 0x614   :  { %v10120_v17 = vmax.f32 %v12649_v29, 0.0  ;;  %v5656_v10 = vadd.f32 %v20979_v33, %v19591_v63 }
 0x615   :  { %v10279_v1 = vpack.c.bf16 %v10119_v7, %v10115_v49 }
 0x616   :  { %v10280_v5 = vpack.c.bf16 %v10120_v17, %v10116_v2  ;;  %v7630_v27 = vpop.f32.mrb[40].mxu0 }
 0x617   :  { %v12651_v43 = vadd.f32 %v7630_v27, %v5650_v39  ;;  %v7632_v31 = vpop.f32.mrb[41].mxu0 }
 0x618   :  { %v12653_v45 = vadd.f32 %v7632_v31, %v5652_v51  ;;  %v7634_v42 = vpop.f32.mrb[42].mxu0  ;;  %10710 = vmatprep.mubr.bf16.mxu0 %v10280_v5  ;;  %v20984_v5 = vld [vmem:[#allocation101_spill] sm:$0xff] }
 0x619   :  { %v12655_v6 = vadd.f32 %v7634_v42, %v5654_v18  ;;  %v7636_v47 = vpop.f32.mrb[43].mxu0  ;;  %10711 = vmatmul.mubr.bf16.gmra.mrb[136].mxu0 %v10279_v1  ;;  %v10123_v30 = vmax.f32 %v12651_v43, 0.0  ;;  %v15106_v1 = vld [vmem:[%s20269_s3 + $0x88] sm:$0xff]   ;;  %v5670_v27 = vadd.f32 %v20984_v5, %v19586_v41  ;;  %v20985_v18 = vld [vmem:[#allocation102_spill] sm:$0xff] }
 0x61a   :  { %v12657_v34 = vadd.f32 %v7636_v47, %v5656_v10  ;;  %9630 = vmatmul.mubr.bf16.gmra.mrb[148].mxu1 %v18884_v53  ;;  %v10124_v44 = vmax.f32 %v12653_v45, 0.0  ;;  %v20983_v53 = vld [vmem:[#allocation100_spill] sm:$0xff]  ;;  %10842 = vmatpush1.bf16.msra.mxu0 %v15106_v1  ;;  %v5672_v43 = vadd.f32 %v20985_v18, %v19591_v63 }
 0x61b   :  { %v10127_v60 = vmax.f32 %v12655_v6, 0.0  ;;  %9639 = vmatprep.mubr.bf16.mxu1 %v18886_v21  ;;  %v5666_v49 = vadd.f32 %v20983_v53, %v19591_v63  ;;  %10843 = vmatprep.subr.bf16.mxu0 %v20852_v61  ;;  %v20987_v6 = vld [vmem:[#allocation104_spill] sm:$0xff] }
 0x61c   :  { %v10128_v28 = vmax.f32 %v12657_v34, 0.0 }
 0x61d   :  { %v10283_v58 = vpack.c.bf16 %v10127_v60, %v10123_v30 }
 0x61e   :  { %v10284_v26 = vpack.c.bf16 %v10128_v28, %v10124_v44  ;;  %v7640_v56 = vpop.f32.mrb[44].mxu0 }
 0x61f   :  { %v12659_v4 = vadd.f32 %v7640_v56, %v5660_v57  ;;  %v7642_v29 = vpop.f32.mrb[45].mxu0  ;;  %v20989_v56 = vld [vmem:[#allocation106_spill] sm:$0xff] }
 0x620   :  { %v12661_v7 = vadd.f32 %v7642_v29, %v5662_v19  ;;  %v7644_v2 = vpop.f32.mrb[46].mxu0  ;;  %10718 = vmatprep.mubr.bf16.mxu0 %v10284_v26  ;;  %v5680_v19 = vadd.f32 %v20988_v9, %v19586_v41  ;;  %v5682_v12 = vadd.f32 %v20989_v56, %v19591_v63  ;;  %v20990_v29 = vld [vmem:[#allocation107_spill] sm:$0xff]  ;;  %v20996_v9 = vld [vmem:[#allocation113_spill] sm:$0xff]  ;;  %v20997_v56 = vld [vmem:[#allocation114_spill] sm:$0xff] }
 0x621   :  { %v12663_v21 = vadd.f32 %v7644_v2, %v5664_v55  ;;  %v7646_v17 = vpop.f32.mrb[47].mxu0  ;;  %10719 = vmatmul.mubr.bf16.gmra.mrb[140].mxu0 %v10283_v58  ;;  %v10131_v13 = vmax.f32 %v12659_v4, 0.0  ;;  %v5684_v53 = vadd.f32 %v20990_v29, %v19586_v41 }
 0x622   :  { %v12665_v32 = vadd.f32 %v7646_v17, %v5666_v49  ;;  %9640 = vmatmul.mubr.bf16.gmra.mrb[152].mxu1 %v18898_v16  ;;  %v10132_v3 = vmax.f32 %v12661_v7, 0.0  ;;  %v20986_v16 = vld [vmem:[#allocation103_spill] sm:$0xff] }
 0x623   :  { %v10135_v39 = vmax.f32 %v12663_v21, 0.0  ;;  %9649 = vmatprep.mubr.bf16.mxu1 %v18900_v48  ;;  %v5674_v10 = vadd.f32 %v20986_v16, %v19586_v41  ;;  %v5676_v48 = vadd.f32 %v20987_v6, %v19591_v63  ;;  %v20995_v6 = vld [vmem:[#allocation112_spill] sm:$0xff] }
 0x624   :  { %v10136_v51 = vmax.f32 %v12665_v32, 0.0 }
 0x625   :  { %v10287_v14 = vpack.c.bf16 %v10135_v39, %v10131_v13 }
 0x626   :  { %v10288_v31 = vpack.c.bf16 %v10136_v51, %v10132_v3  ;;  %v7650_v33 = vpop.f32.mrb[48].mxu0  ;;  %v15107_v3 = vld [vmem:[%s20269_s3 + $0x90] sm:$0xff]  }
 0x627   :  { %v12667_v45 = vadd.f32 %v7650_v33, %v5670_v27  ;;  %v7652_v42 = vpop.f32.mrb[49].mxu0  ;;  %v20992_v27 = vld [vmem:[#allocation109_spill] sm:$0xff]  ;;  %10844 = vmatpush1.bf16.msra.mxu0 %v15107_v3 }
 0x628   :  { %v12669_v47 = vadd.f32 %v7652_v42, %v5672_v43  ;;  %v7654_v34 = vpop.f32.mrb[50].mxu0  ;;  %10726 = vmatprep.mubr.bf16.mxu0 %v10288_v31  ;;  %v20993_v43 = vld [vmem:[#allocation110_spill] sm:$0xff]  ;;  %10845 = vmatprep.subr.bf16.mxu0 %v20852_v61  ;;  %v21000_v3 = vld [vmem:[#allocation117_spill] sm:$0xff] }
 0x629   :  { %v12671_v30 = vadd.f32 %v7654_v34, %v5674_v10  ;;  %v7656_v60 = vpop.f32.mrb[51].mxu0  ;;  %10727 = vmatmul.mubr.bf16.gmra.mrb[144].mxu0 %v10287_v14  ;;  %v10139_v28 = vmax.f32 %v12667_v45, 0.0  ;;  %v5690_v14 = vadd.f32 %v20992_v27, %v19586_v41  ;;  %v5692_v31 = vadd.f32 %v20993_v43, %v19591_v63  ;;  %v21001_v27 = vld [vmem:[#allocation118_spill] sm:$0xff] }
 0x62a   :  { %v12673_v44 = vadd.f32 %v7656_v60, %v5676_v48  ;;  %9650 = vmatmul.mubr.bf16.gmra.mrb[156].mxu1 %v18912_v52  ;;  %v10140_v57 = vmax.f32 %v12669_v47, 0.0  ;;  %v20991_v52 = vld [vmem:[#allocation108_spill] sm:$0xff] }
 0x62b   :  { %v10143_v20 = vmax.f32 %v12671_v30, 0.0  ;;  %9659 = vmatprep.mubr.bf16.mxu1 %v18914_v38  ;;  %v5686_v2 = vadd.f32 %v20991_v52, %v19591_v63 }
 0x62c   :  { %v10144_v58 = vmax.f32 %v12673_v44, 0.0 }
 0x62d   :  { %v10291_v26 = vpack.c.bf16 %v10143_v20, %v10139_v28  ;;  %v15108_v20 = vld [vmem:[%s20269_s3 + $0x98] sm:$0xff]  }
 0x62e   :  { %v10292_v55 = vpack.c.bf16 %v10144_v58, %v10140_v57  ;;  %v7660_v4 = vpop.f32.mrb[52].mxu0  ;;  %10846 = vmatpush1.bf16.msra.mxu0 %v15108_v20 }
 0x62f   :  { %v12675_v49 = vadd.f32 %v7660_v4, %v5680_v19  ;;  %v7662_v7 = vpop.f32.mrb[53].mxu0  ;;  %v5700_v19 = vadd.f32 %v20996_v9, %v19586_v41  ;;  %10847 = vmatprep.subr.bf16.mxu0 %v20852_v61 }
 0x630   :  { %v12677_v21 = vadd.f32 %v7662_v7, %v5682_v12  ;;  %v7664_v17 = vpop.f32.mrb[54].mxu0  ;;  %10734 = vmatprep.mubr.bf16.mxu0 %v10292_v55  ;;  %v5702_v12 = vadd.f32 %v20997_v56, %v19591_v63  ;;  %v20999_v7 = vld [vmem:[#allocation116_spill] sm:$0xff] }
 0x631   :  { %v12679_v38 = vadd.f32 %v7664_v17, %v5684_v53  ;;  %v7666_v32 = vpop.f32.mrb[55].mxu0  ;;  %10735 = vmatmul.mubr.bf16.gmra.mrb[148].mxu0 %v10291_v26  ;;  %v10147_v39 = vmax.f32 %v12675_v49, 0.0 }
 0x632   :  { %v12681_v13 = vadd.f32 %v7666_v32, %v5686_v2  ;;  %9660 = vmatmul.mubr.bf16.gmra.mrb[160].mxu1 %v18926_v50  ;;  %v10148_v51 = vmax.f32 %v12677_v21, 0.0  ;;  %v20994_v50 = vld [vmem:[#allocation111_spill] sm:$0xff] }
 0x633   :  { %v10151_v1 = vmax.f32 %v12679_v38, 0.0  ;;  %9669 = vmatprep.mubr.bf16.mxu1 %v18928_v8  ;;  %v5694_v10 = vadd.f32 %v20994_v50, %v19586_v41  ;;  %v5696_v8 = vadd.f32 %v20995_v6, %v19591_v63 }
 0x634   :  { %v10152_v5 = vmax.f32 %v12681_v13, 0.0 }
 0x635   :  { %v10295_v18 = vpack.c.bf16 %v10151_v1, %v10147_v39 }
 0x636   :  { %v10296_v33 = vpack.c.bf16 %v10152_v5, %v10148_v51  ;;  %v7670_v16 = vpop.f32.mrb[56].mxu0  ;;  %v5710_v51 = vadd.f32 %v21000_v3, %v19586_v41 }
 0x637   :  { %v12683_v45 = vadd.f32 %v7670_v16, %v5690_v14  ;;  %v7672_v42 = vpop.f32.mrb[57].mxu0  ;;  %v5712_v14 = vadd.f32 %v21001_v27, %v19591_v63 }
 0x638   :  { %v12685_v48 = vadd.f32 %v7672_v42, %v5692_v31  ;;  %v7674_v47 = vpop.f32.mrb[58].mxu0  ;;  %10742 = vmatprep.mubr.bf16.mxu0 %v10296_v33  ;;  %v21002_v31 = vld [vmem:[#allocation119_spill] sm:$0xff] }
 0x639   :  { %v12687_v34 = vadd.f32 %v7674_v47, %v5694_v10  ;;  %v7676_v30 = vpop.f32.mrb[59].mxu0  ;;  %10743 = vmatmul.mubr.bf16.gmra.mrb[152].mxu0 %v10295_v18  ;;  %v10155_v44 = vmax.f32 %v12683_v45, 0.0  ;;  %v5714_v33 = vadd.f32 %v21002_v31, %v19586_v41 }
 0x63a   :  { %v12689_v60 = vadd.f32 %v7676_v30, %v5696_v8  ;;  %9670 = vmatmul.mubr.bf16.gmra.mrb[164].mxu1 %v18940_v0  ;;  %v10156_v57 = vmax.f32 %v12685_v48, 0.0  ;;  %v20998_v0 = vld [vmem:[#allocation115_spill] sm:$0xff] }
 0x63b   :  { %v10159_v28 = vmax.f32 %v12687_v34, 0.0  ;;  %9679 = vmatprep.mubr.bf16.mxu1 %v18942_v46  ;;  %v5704_v29 = vadd.f32 %v20998_v0, %v19586_v41  ;;  %v5706_v46 = vadd.f32 %v20999_v7, %v19591_v63  ;;  %v15109_v34 = vld [vmem:[%s20269_s3 + $0xa0] sm:$0xff]  }
 0x63c   :  { %v10160_v58 = vmax.f32 %v12689_v60, 0.0  ;;  %10848 = vmatpush1.bf16.msra.mxu0 %v15109_v34 }
 0x63d   :  { %v10299_v26 = vpack.c.bf16 %v10159_v28, %v10155_v44  ;;  %v21004_v44 = vld [vmem:[#allocation121_spill] sm:$0xff]  ;;  %10849 = vmatprep.subr.bf16.mxu0 %v20852_v61 }
 0x63e   :  { %v10300_v55 = vpack.c.bf16 %v10160_v58, %v10156_v57  ;;  %v7680_v4 = vpop.f32.mrb[60].mxu0  ;;  %v5720_v28 = vadd.f32 %v21004_v44, %v19586_v41  ;;  %v21005_v57 = vld [vmem:[#allocation122_spill] sm:$0xff] }
 0x63f   :  { %v12691_v53 = vadd.f32 %v7680_v4, %v5700_v19  ;;  %v7682_v49 = vpop.f32.mrb[61].mxu0  ;;  %v5722_v58 = vadd.f32 %v21005_v57, %v19591_v63 }
 0x640   :  { %v12693_v52 = vadd.f32 %v7682_v49, %v5702_v12  ;;  %v7684_v2 = vpop.f32.mrb[62].mxu0  ;;  %10750 = vmatprep.mubr.bf16.mxu0 %v10300_v55  ;;  %v21007_v55 = vld [vmem:[#allocation124_spill] sm:$0xff] }
 0x641   :  { %v12695_v21 = vadd.f32 %v7684_v2, %v5704_v29  ;;  %v7686_v17 = vpop.f32.mrb[63].mxu0  ;;  %10751 = vmatmul.mubr.bf16.gmra.mrb[156].mxu0 %v10299_v26  ;;  %v10163_v32 = vmax.f32 %v12691_v53, 0.0 }
 0x642   :  { %v12697_v38 = vadd.f32 %v7686_v17, %v5706_v46  ;;  %9680 = vmatmul.mubr.bf16.gmra.mrb[168].mxu1 %v18954_v23  ;;  %v10164_v39 = vmax.f32 %v12693_v52, 0.0  ;;  %v21003_v23 = vld [vmem:[#allocation120_spill] sm:$0xff]  ;;  %v15110_v52 = vld [vmem:[%s20269_s3 + $0xa8] sm:$0xff]   ;;  %v21008_v17 = vld [vmem:[#allocation125_spill] sm:$0xff] }
 0x643   :  { %v10167_v13 = vmax.f32 %v12695_v21, 0.0  ;;  %9689 = vmatprep.mubr.bf16.mxu1 %v18956_v11  ;;  %v5716_v10 = vadd.f32 %v21003_v23, %v19591_v63  ;;  %10850 = vmatpush1.bf16.msra.mxu0 %v15110_v52 }
 0x644   :  { %v10168_v1 = vmax.f32 %v12697_v38, 0.0  ;;  %v5730_v38 = vadd.f32 %v21008_v17, %v19586_v41  ;;  %10851 = vmatprep.subr.bf16.mxu0 %v20852_v61 }
 0x645   :  { %v10303_v5 = vpack.c.bf16 %v10167_v13, %v10163_v32  ;;  %v21009_v13 = vld [vmem:[#allocation126_spill] sm:$0xff] }
 0x646   :  { %v10304_v18 = vpack.c.bf16 %v10168_v1, %v10164_v39  ;;  %v7690_v43 = vpop.f32.mrb[64].mxu0  ;;  %v5732_v39 = vadd.f32 %v21009_v13, %v19591_v63 }
 0x647   :  { %v12699_v16 = vadd.f32 %v7690_v43, %v5710_v51  ;;  %v7692_v50 = vpop.f32.mrb[65].mxu0 }
 0x648   :  { %v12701_v45 = vadd.f32 %v7692_v50, %v5712_v14  ;;  %v7694_v42 = vpop.f32.mrb[66].mxu0  ;;  %10758 = vmatprep.mubr.bf16.mxu0 %v10304_v18  ;;  %v21011_v14 = vld [vmem:[#allocation128_spill] sm:$0xff] }
 0x649   :  { %v12703_v11 = vadd.f32 %v7694_v42, %v5714_v33  ;;  %v7696_v6 = vpop.f32.mrb[67].mxu0  ;;  %10759 = vmatmul.mubr.bf16.gmra.mrb[160].mxu0 %v10303_v5  ;;  %v10171_v48 = vmax.f32 %v12699_v16, 0.0  ;;  %v21012_v42 = vld [vmem:[#allocation129_spill] sm:$0xff] }
 0x64a   :  { %v12705_v8 = vadd.f32 %v7696_v6, %v5716_v10  ;;  %9690 = vmatmul.mubr.bf16.gmra.mrb[172].mxu1 %v18968_v24  ;;  %v10172_v30 = vmax.f32 %v12701_v45, 0.0  ;;  %v21006_v24 = vld [vmem:[#allocation123_spill] sm:$0xff] }
 0x64b   :  { %v10175_v47 = vmax.f32 %v12703_v11, 0.0  ;;  %9699 = vmatprep.mubr.bf16.mxu1 %v18970_v36  ;;  %v5724_v26 = vadd.f32 %v21006_v24, %v19586_v41  ;;  %v5726_v36 = vadd.f32 %v21007_v55, %v19591_v63  ;;  %v5740_v11 = vadd.f32 %v21012_v42, %v19586_v41 }
 0x64c   :  { %v10176_v60 = vmax.f32 %v12705_v8, 0.0  ;;  %v21013_v8 = vld [vmem:[#allocation130_spill] sm:$0xff] }
 0x64d   :  { %v10307_v20 = vpack.c.bf16 %v10175_v47, %v10171_v48  ;;  %v5742_v48 = vadd.f32 %v21013_v8, %v19591_v63 }
 0x64e   :  { %v10308_v9 = vpack.c.bf16 %v10176_v60, %v10172_v30  ;;  %v7700_v19 = vpop.f32.mrb[68].mxu0  ;;  %v21014_v30 = vld [vmem:[#allocation131_spill] sm:$0xff] }
 0x64f   :  { %v12707_v56 = vadd.f32 %v7700_v19, %v5720_v28  ;;  %v7702_v12 = vpop.f32.mrb[69].mxu0  ;;  %v5744_v60 = vadd.f32 %v21014_v30, %v19586_v41 }
 0x650   :  { %v12709_v4 = vadd.f32 %v7702_v12, %v5722_v58  ;;  %v7704_v0 = vpop.f32.mrb[70].mxu0  ;;  %10766 = vmatprep.mubr.bf16.mxu0 %v10308_v9 }
 0x651   :  { %v12711_v29 = vadd.f32 %v7704_v0, %v5724_v26  ;;  %v7706_v53 = vpop.f32.mrb[71].mxu0  ;;  %10767 = vmatmul.mubr.bf16.gmra.mrb[164].mxu0 %v10307_v20  ;;  %v10179_v7 = vmax.f32 %v12707_v56, 0.0  ;;  %v15111_v56 = vld [vmem:[%s20269_s3 + $0xb0] sm:$0xff]  }
 0x652   :  { %v12713_v49 = vadd.f32 %v7706_v53, %v5726_v36  ;;  %9700 = vmatmul.mubr.bf16.gmra.mrb[176].mxu1 %v18982_v35  ;;  %v10180_v2 = vmax.f32 %v12709_v4, 0.0  ;;  %v21010_v35 = vld [vmem:[#allocation127_spill] sm:$0xff]  ;;  %v21016_v36 = vld [vmem:[#allocation133_spill] sm:$0xff]  ;;  %10852 = vmatpush1.bf16.msra.mxu0 %v15111_v56 }
 0x653   :  { %v10183_v46 = vmax.f32 %v12711_v29, 0.0  ;;  %9709 = vmatprep.mubr.bf16.mxu1 %v18984_v62  ;;  %v5734_v51 = vadd.f32 %v21010_v35, %v19586_v41  ;;  %v5736_v62 = vadd.f32 %v21011_v14, %v19591_v63  ;;  %v5750_v4 = vadd.f32 %v21016_v36, %v19586_v41  ;;  %v21017_v29 = vld [vmem:[#allocation134_spill] sm:$0xff]  ;;  %10853 = vmatprep.subr.bf16.mxu0 %v20852_v61 }
 0x654   :  { %v10184_v21 = vmax.f32 %v12713_v49, 0.0  ;;  %v5752_v53 = vadd.f32 %v21017_v29, %v19591_v63 }
 0x655   :  { %v10311_v32 = vpack.c.bf16 %v10183_v46, %v10179_v7 }
 0x656   :  { %v10312_v1 = vpack.c.bf16 %v10184_v21, %v10180_v2  ;;  %v7710_v3 = vpop.f32.mrb[72].mxu0  ;;  %v21019_v21 = vld [vmem:[#allocation136_spill] sm:$0xff] }
 0x657   :  { %v12715_v5 = vadd.f32 %v7710_v3, %v5730_v38  ;;  %v7712_v27 = vpop.f32.mrb[73].mxu0 }
 0x658   :  { %v12717_v18 = vadd.f32 %v7712_v27, %v5732_v39  ;;  %v7714_v43 = vpop.f32.mrb[74].mxu0  ;;  %10774 = vmatprep.mubr.bf16.mxu0 %v10312_v1  ;;  %v21020_v27 = vld [vmem:[#allocation137_spill] sm:$0xff] }
 0x659   :  { %v12719_v31 = vadd.f32 %v7714_v43, %v5734_v51  ;;  %v7716_v33 = vpop.f32.mrb[75].mxu0  ;;  %10775 = vmatmul.mubr.bf16.gmra.mrb[168].mxu0 %v10311_v32  ;;  %v10187_v50 = vmax.f32 %v12715_v5, 0.0  ;;  %v15112_v5 = vld [vmem:[%s20269_s3 + $0xb8] sm:$0xff]   ;;  %v5760_v14 = vadd.f32 %v21020_v27, %v19586_v41 }
 0x65a   :  { %v12721_v16 = vadd.f32 %v7716_v33, %v5736_v62  ;;  %9710 = vmatmul.mubr.bf16.gmra.mrb[180].mxu1 %v18996_v22  ;;  %v10188_v10 = vmax.f32 %v12717_v18, 0.0  ;;  %v21015_v22 = vld [vmem:[#allocation132_spill] sm:$0xff]  ;;  %v21021_v18 = vld [vmem:[#allocation138_spill] sm:$0xff]  ;;  %10854 = vmatpush1.bf16.msra.mxu0 %v15112_v5 }
 0x65b   :  { %v10191_v23 = vmax.f32 %v12719_v31, 0.0  ;;  %9719 = vmatprep.mubr.bf16.mxu1 %v18998_v15  ;;  %v5746_v20 = vadd.f32 %v21015_v22, %v19591_v63  ;;  %v5762_v43 = vadd.f32 %v21021_v18, %v19591_v63  ;;  %10855 = vmatprep.subr.bf16.mxu0 %v20852_v61 }
 0x65c   :  { %v10192_v45 = vmax.f32 %v12721_v16, 0.0 }
 0x65d   :  { %v10315_v6 = vpack.c.bf16 %v10191_v23, %v10187_v50 }
 0x65e   :  { %v10316_v47 = vpack.c.bf16 %v10192_v45, %v10188_v10  ;;  %v7720_v34 = vpop.f32.mrb[76].mxu0 }
 0x65f   :  { %v12723_v44 = vadd.f32 %v7720_v34, %v5740_v11  ;;  %v7722_v28 = vpop.f32.mrb[77].mxu0 }
 0x660   :  { %v12725_v57 = vadd.f32 %v7722_v28, %v5742_v48  ;;  %v7724_v58 = vpop.f32.mrb[78].mxu0  ;;  %10782 = vmatprep.mubr.bf16.mxu0 %v10316_v47 }
 0x661   :  { %v12727_v15 = vadd.f32 %v7724_v58, %v5744_v60  ;;  %v7726_v9 = vpop.f32.mrb[79].mxu0  ;;  %10783 = vmatmul.mubr.bf16.gmra.mrb[172].mxu0 %v10315_v6  ;;  %v10195_v24 = vmax.f32 %v12723_v44, 0.0  ;;  %v21024_v60 = vld [vmem:[#allocation49_spill] sm:$0xff] }
 0x662   :  { %v12729_v19 = vadd.f32 %v7726_v9, %v5746_v20  ;;  %9720 = vmatmul.mubr.bf16.gmra.mrb[184].mxu1 %v19010_v25  ;;  %v10196_v12 = vmax.f32 %v12725_v57, 0.0  ;;  %v21018_v25 = vld [vmem:[#allocation135_spill] sm:$0xff]  ;;  %v21025_v44 = vld [vmem:[#allocation141_spill] sm:$0xff]  ;;  %v21026_v20 = vld [vmem:[#allocation142_spill] sm:$0xff] }
 0x663   :  { %v10199_v26 = vmax.f32 %v12727_v15, 0.0  ;;  %9729 = vmatprep.mubr.bf16.mxu1 %v19012_v37  ;;  %v5754_v46 = vadd.f32 %v21018_v25, %v19586_v41  ;;  %v5756_v37 = vadd.f32 %v21019_v21, %v19591_v63  ;;  %v5770_v28 = vadd.f32 %v21025_v44, %v19586_v41  ;;  %v21027_v9 = vld [vmem:[#allocation143_spill] sm:$0xff] }
 0x664   :  { %v10200_v55 = vmax.f32 %v12729_v19, 0.0  ;;  %v5772_v57 = vadd.f32 %v21026_v20, %v19591_v63  ;;  %v5774_v19 = vadd.f32 %v21027_v9, %v19586_v41 }
 0x665   :  { %v10319_v0 = vpack.c.bf16 %v10199_v26, %v10195_v24 }
 0x666   :  { %v10320_v49 = vpack.c.bf16 %v10200_v55, %v10196_v12  ;;  %v7730_v7 = vpop.f32.mrb[80].mxu0 }
 0x667   :  { %v12731_v52 = vadd.f32 %v7730_v7, %v5750_v4  ;;  %v7732_v2 = vpop.f32.mrb[81].mxu0  ;;  %v15113_v7 = vld [vmem:[%s20269_s3 + $0xc0] sm:$0xff]  }
 0x668   :  { %v12733_v17 = vadd.f32 %v7732_v2, %v5752_v53  ;;  %v7734_v38 = vpop.f32.mrb[82].mxu0  ;;  %10790 = vmatprep.mubr.bf16.mxu0 %v10320_v49  ;;  %v21029_v49 = vld [vmem:[#allocation50_spill] sm:$0xff]  ;;  %v21031_v2 = vld [vmem:[#allocation145_spill] sm:$0xff]  ;;  %10856 = vmatpush1.bf16.msra.mxu0 %v15113_v7  ;;  %v21049_v7 = vld [vmem:[#allocation4_spill] sm:$0xff] }
 0x669   :  { %v12735_v32 = vadd.f32 %v7734_v38, %v5754_v46  ;;  %v7736_v13 = vpop.f32.mrb[83].mxu0  ;;  %10791 = vmatmul.mubr.bf16.gmra.mrb[176].mxu0 %v10319_v0  ;;  %v10203_v1 = vmax.f32 %v12731_v52, 0.0  ;;  %v21030_v52 = vld [vmem:[#allocation154_spill] sm:$0xff]  ;;  %v5780_v21 = vadd.f32 %v21031_v2, %v19586_v41  ;;  %10857 = vmatprep.subr.bf16.mxu0 %v20852_v61  ;;  %v21052_v2 = vld [vmem:[#allocation7_spill] sm:$0xff] }
 0x66a   :  { %v12737_v39 = vadd.f32 %v7736_v13, %v5756_v37  ;;  %9730 = vmatmul.mubr.bf16.gmra.mrb[188].mxu1 %v19024_v59  ;;  %v10204_v35 = vmax.f32 %v12733_v17, 0.0  ;;  %v21022_v59 = vld [vmem:[#allocation139_spill] sm:$0xff]  ;;  %v21032_v17 = vld [vmem:[#allocation146_spill] sm:$0xff] }
 0x66b   :  { %v10207_v3 = vmax.f32 %v12735_v32, 0.0  ;;  %9739 = vmatprep.mubr.bf16.mxu1 %v19026_v40  ;;  %v5764_v16 = vadd.f32 %v21022_v59, %v19586_v41  ;;  %v21023_v40 = vld [vmem:[#allocation140_spill] sm:$0xff]  ;;  %v5782_v38 = vadd.f32 %v21032_v17, %v19591_v63  ;;  %v21035_v59 = vld [vmem:[#allocation155_spill] sm:$0xff]  ;;  %v21054_v17 = vld [vmem:[#allocation9_spill] sm:$0xff] }
 0x66c   :  { %v10208_v51 = vmax.f32 %v12737_v39, 0.0  ;;  %v5766_v10 = vadd.f32 %v21023_v40, %v19591_v63  ;;  %v21033_v39 = vld [vmem:[#allocation147_spill] sm:$0xff]  ;;  %v21037_v40 = vld [vmem:[#allocation149_spill] sm:$0xff] }
 0x66d   :  { %v10323_v62 = vpack.c.bf16 %v10207_v3, %v10203_v1  ;;  %v5784_v1 = vadd.f32 %v21033_v39, %v19586_v41  ;;  %v21057_v39 = vld [vmem:[#allocation11_spill] sm:$0xff] }
 0x66e   :  { %v10324_v31 = vpack.c.bf16 %v10208_v51, %v10204_v35  ;;  %v7740_v33 = vpop.f32.mrb[84].mxu0  ;;  %v21034_v51 = vld [vmem:[#allocation148_spill] sm:$0xff] }
 0x66f   :  { %v12739_v50 = vadd.f32 %v7740_v33, %v5760_v14  ;;  %v7742_v23 = vpop.f32.mrb[85].mxu0  ;;  %v5786_v5 = vadd.f32 %v21034_v51, %v19591_v63  ;;  %v15120_v51 = vld [vmem:[%s20269_s3 + $0xf8] sm:$0xff]  }
 0x670   :  { %v12741_v45 = vadd.f32 %v7742_v23, %v5762_v43  ;;  %v7744_v42 = vpop.f32.mrb[86].mxu0  ;;  %10798 = vmatprep.mubr.bf16.mxu0 %v10324_v31  ;;  %v21036_v23 = vld [vmem:[#allocation156_spill] sm:$0xff] }
 0x671   :  { %v12743_v11 = vadd.f32 %v7744_v42, %v5764_v16  ;;  %v7746_v6 = vpop.f32.mrb[87].mxu0  ;;  %10799 = vmatmul.mubr.bf16.gmra.mrb[180].mxu0 %v10323_v62  ;;  %v10211_v48 = vmax.f32 %v12739_v50, 0.0  ;;  %v21038_v42 = vld [vmem:[#allocation150_spill] sm:$0xff] }
 0x672   :  { %v12745_v8 = vadd.f32 %v7746_v6, %v5766_v10  ;;  %9740 = vmatmul.mubr.bf16.gmra.mrb[192].mxu1 %v19038_v54  ;;  %v10212_v34 = vmax.f32 %v12741_v45, 0.0  ;;  %v21028_v54 = vld [vmem:[#allocation144_spill] sm:$0xff]  ;;  %v5790_v10 = vadd.f32 %v21037_v40, %v19586_v41 }
 0x673   :  { %v10215_v47 = vmax.f32 %v12743_v11, 0.0  ;;  %9749 = vmatprep.mubr.bf16.mxu1 %v21024_v60  ;;  %v5776_v56 = vadd.f32 %v21028_v54, %v19591_v63  ;;  %v5792_v11 = vadd.f32 %v21038_v42, %v19591_v63  ;;  %v21040_v60 = vld [vmem:[#allocation153_spill] sm:$0xff]  ;;  %v21042_v54 = vld [vmem:[#allocation158_spill] sm:$0xff]  ;;  %v21074_v40 = vld [vmem:[#allocation28_spill] sm:$0xff] }
 0x674   :  { %v10216_v30 = vmax.f32 %v12745_v8, 0.0  ;;  %v5796_v44 = vadd.f32 %v21040_v60, %v19591_v63  ;;  %v21077_v42 = vld [vmem:[#allocation31_spill] sm:$0xff] }
 0x675   :  { %v10327_v22 = vpack.c.bf16 %v10215_v47, %v10211_v48  ;;  %v21039_v48 = vld [vmem:[#allocation151_spill] sm:$0xff] }
 0x676   :  { %v10328_v58 = vpack.c.bf16 %v10216_v30, %v10212_v34  ;;  %v7750_v15 = vpop.f32.mrb[88].mxu0  ;;  %v5794_v47 = vadd.f32 %v21039_v48, %v19586_v41  ;;  %v15114_v41 = vld [vmem:[%s20269_s3 + $0xc8] sm:$0xff]  }
 0x677   :  { %v12747_v24 = vadd.f32 %v7750_v15, %v5770_v28  ;;  %v7752_v26 = vpop.f32.mrb[89].mxu0  ;;  %10858 = vmatpush1.bf16.msra.mxu0 %v15114_v41  ;;  %v21081_v48 = vld [vmem:[#allocation35_spill] sm:$0xff] }
 0x678   :  { %v12749_v12 = vadd.f32 %v7752_v26, %v5772_v57  ;;  %v7754_v55 = vpop.f32.mrb[90].mxu0  ;;  %10806 = vmatprep.mubr.bf16.mxu0 %v10328_v58  ;;  %10859 = vmatprep.subr.bf16.mxu0 %v20852_v61  ;;  %v21085_v60 = vld [vmem:[#allocation39_spill] sm:$0xff] }
 0x679   :  { %v12751_v36 = vadd.f32 %v7754_v55, %v5774_v19  ;;  %v7756_v4 = vpop.f32.mrb[91].mxu0  ;;  %10807 = vmatmul.mubr.bf16.gmra.mrb[184].mxu0 %v10327_v22  ;;  %v10219_v29 = vmax.f32 %v12747_v24, 0.0  ;;  %v21041_v19 = vld [vmem:[#allocation157_spill] sm:$0xff]  ;;  %v15115_v55 = vld [vmem:[%s20269_s3 + $0xd0] sm:$0xff]  }
 0x67a   :  { %v12753_v0 = vadd.f32 %v7756_v4, %v5776_v56  ;;  %9750 = vmatmul.mubr.bf16.gmra.mrb[196].mxu1 %v21029_v49  ;;  %v10220_v25 = vmax.f32 %v12749_v12, 0.0  ;;  %v21043_v12 = vld [vmem:[#allocation51_spill] sm:$0xff]  ;;  %v21045_v4 = vld [vmem:[#allocation52_spill] sm:$0xff] }
 0x67b   :  { %v10223_v53 = vmax.f32 %v12751_v36, 0.0  ;;  %9792 = vmatprep.mubr.bf16.mxu1 %v21030_v52  ;;  %v21044_v36 = vld [vmem:[#allocation159_spill] sm:$0xff]  ;;  %10860 = vmatpush1.bf16.msra.mxu0 %v15115_v55  ;;  %v21051_v52 = vld [vmem:[#allocation6_spill] sm:$0xff] }
 0x67c   :  { %v10224_v46 = vmax.f32 %v12753_v0, 0.0  ;;  %10861 = vmatprep.subr.bf16.mxu0 %v20852_v61  ;;  %v21046_v0 = vld [vmem:[#allocation152_spill] sm:$0xff]  ;;  %v21048_v49 = vld [vmem:[#allocation3_spill] sm:$0xff] }
 0x67d   :  { %v10331_v37 = vpack.c.bf16 %v10223_v53, %v10219_v29  ;;  %v21047_v29 = vld [vmem:[#allocation2_spill] sm:$0xff]  ;;  %v15116_v53 = vld [vmem:[%s20269_s3 + $0xd8] sm:$0xff]  }
 0x67e   :  { %v10332_v32 = vpack.c.bf16 %v10224_v46, %v10220_v25  ;;  %v7760_v13 = vpop.f32.mrb[92].mxu0  ;;  %v15117_v25 = vld [vmem:[%s20269_s3 + $0xe0] sm:$0xff]   ;;  %v21050_v46 = vld [vmem:[#allocation5_spill] sm:$0xff] }
 0x67f   :  { %v12755_v3 = vadd.f32 %v7760_v13, %v5780_v21  ;;  %v7762_v35 = vpop.f32.mrb[93].mxu0  ;;  %10862 = vmatpush1.bf16.msra.mxu0 %v15116_v53  ;;  %v21053_v21 = vld [vmem:[#allocation8_spill] sm:$0xff] }
 0x680   :  { %v12757_v27 = vadd.f32 %v7762_v35, %v5782_v38  ;;  %v7764_v14 = vpop.f32.mrb[94].mxu0  ;;  %10814 = vmatprep.mubr.bf16.mxu0 %v10332_v32  ;;  %10863 = vmatprep.subr.bf16.mxu0 %v20852_v61  ;;  %v21055_v38 = vld [vmem:[#allocation10_spill] sm:$0xff]  ;;  %v15119_v32 = vld [vmem:[%s20269_s3 + $0xf0] sm:$0xff]  }
 0x681   :  { %v12759_v62 = vadd.f32 %v7764_v14, %v5784_v1  ;;  %v7766_v18 = vpop.f32.mrb[95].mxu0  ;;  %10815 = vmatmul.mubr.bf16.gmra.mrb[188].mxu0 %v10331_v37  ;;  %v10227_v31 = vmax.f32 %v12755_v3, 0.0  ;;  %v15118_v37 = vld [vmem:[%s20269_s3 + $0xe8] sm:$0xff]   ;;  %v21056_v13 = vld [vmem:[#allocation160_spill] sm:$0xff]  ;;  %v21059_v3 = vld [vmem:[#allocation13_spill] sm:$0xff] }
 0x682   :  { %v12761_v43 = vadd.f32 %v7766_v18, %v5786_v5  ;;  %9793 = vmatmul.mubr.bf16.vlgmr.msra.gmra.mrb[100].mxu1 %v21035_v59  ;;  %v10228_v16 = vmax.f32 %v12757_v27, 0.0  ;;  %v21058_v1 = vld [vmem:[#allocation12_spill] sm:$0xff]  ;;  %v21060_v35 = vld [vmem:[#allocation14_spill] sm:$0xff]  ;;  %v21061_v5 = vld [vmem:[#allocation15_spill] sm:$0xff] }
 0x683   :  { %v10231_v33 = vmax.f32 %v12759_v62, 0.0  ;;  %9802 = vmatprep.mubr.bf16.mxu1 %v21036_v23  ;;  %10864 = vmatpush1.bf16.msra.mxu0 %v15117_v25  ;;  %v21062_v27 = vld [vmem:[#allocation16_spill] sm:$0xff]  ;;  %v21063_v14 = vld [vmem:[#allocation17_spill] sm:$0xff]  ;;  %v21065_v62 = vld [vmem:[#allocation19_spill] sm:$0xff] }
 0x684   :  { %v10232_v50 = vmax.f32 %v12761_v43, 0.0  ;;  %10865 = vmatprep.subr.bf16.mxu0 %v20852_v61  ;;  %v21066_v18 = vld [vmem:[#allocation20_spill] sm:$0xff]  ;;  %v21067_v43 = vld [vmem:[#allocation21_spill] sm:$0xff]  ;;  %v21073_v23 = vld [vmem:[#allocation27_spill] sm:$0xff] }
 0x685   :  { %v10335_v45 = vpack.c.bf16 %v10231_v33, %v10227_v31  ;;  %v21068_v31 = vld [vmem:[#allocation22_spill] sm:$0xff]  ;;  %v21069_v33 = vld [vmem:[#allocation23_spill] sm:$0xff]  ;;  %v21070_v59 = vld [vmem:[#allocation24_spill] sm:$0xff] }
 0x686   :  { %v10336_v6 = vpack.c.bf16 %v10232_v50, %v10228_v16  ;;  %v7770_v8 = vpop.f32.mrb[96].mxu0  ;;  %v21071_v16 = vld [vmem:[#allocation25_spill] sm:$0xff]  ;;  %v21072_v50 = vld [vmem:[#allocation26_spill] sm:$0xff] }
 0x687   :  { %v12763_v34 = vadd.f32 %v7770_v8, %v5790_v10  ;;  %v7772_v30 = vpop.f32.mrb[97].mxu0  ;;  %10866 = vmatpush1.bf16.msra.mxu0 %v15118_v37  ;;  %v21075_v10 = vld [vmem:[#allocation29_spill] sm:$0xff]  ;;  %v21080_v8 = vld [vmem:[#allocation34_spill] sm:$0xff] }
 0x688   :  { %v12765_v28 = vadd.f32 %v7772_v30, %v5792_v11  ;;  %v7774_v22 = vpop.f32.mrb[98].mxu0  ;;  %10822 = vmatprep.mubr.bf16.mxu0 %v10336_v6  ;;  %10867 = vmatprep.subr.bf16.mxu0 %v20852_v61  ;;  %v21078_v11 = vld [vmem:[#allocation32_spill] sm:$0xff]  ;;  %v21079_v6 = vld [vmem:[#allocation33_spill] sm:$0xff]  ;;  %v21084_v30 = vld [vmem:[#allocation38_spill] sm:$0xff] }
 0x689   :  { %v12767_v20 = vadd.f32 %v7774_v22, %v5794_v47  ;;  %v7776_v57 = vpop.f32.mrb[99].mxu0  ;;  %10823 = vmatmul.mubr.bf16.gmra.mrb[192].mxu0 %v10335_v45  ;;  %v10235_v15 = vmax.f32 %v12763_v34, 0.0  ;;  %v21076_v45 = vld [vmem:[#allocation30_spill] sm:$0xff]  ;;  %v21082_v47 = vld [vmem:[#allocation36_spill] sm:$0xff]  ;;  %v21083_v34 = vld [vmem:[#allocation37_spill] sm:$0xff] }
 0x68a   :  { %v12769_v58 = vadd.f32 %v7776_v57, %v5796_v44  ;;  %9803 = vmatmul.mubr.bf16.gmra.mrb[104].mxu1 %v21041_v19  ;;  %v10236_v24 = vmax.f32 %v12765_v28, 0.0  ;;  %v21086_v44 = vld [vmem:[#allocation40_spill] sm:$0xff]  ;;  %v21087_v28 = vld [vmem:[#allocation41_spill] sm:$0xff]  ;;  %v21088_v22 = vld [vmem:[#allocation42_spill] sm:$0xff] }
 0x68b   :  { %v10239_v9 = vmax.f32 %v12767_v20, 0.0  ;;  %9812 = vmatprep.mubr.bf16.mxu1 %v21042_v54  ;;  %10868 = vmatpush1.bf16.msra.mxu0 %v15119_v32  ;;  %v945_v20 = vsub.s32 2, %v21088_v22  ;;  %v949_v57 = vsub.s32 3, %v21088_v22 }
 0x68c   :  { %v10240_v26 = vmax.f32 %v12769_v58, 0.0  ;;  %10869 = vmatprep.subr.bf16.mxu0 %v20852_v61  ;;  %v21064_v61 = vld [vmem:[#allocation18_spill] sm:$0xff] }
 0x68d   :  { %v10339_v63 = vpack.c.bf16 %v10239_v9, %v10235_v15  ;;  %v15121_v58 = vld [vmem:[%s20270_s2] sm:$0xf] }
 0x68e   :  { %v10340_v56 = vpack.c.bf16 %v10240_v26, %v10236_v24  ;;  %v20033_v15 = vrot.slane %v15121_v58, %v945_v20  ;;  %v20035_v9 = vrot.slane %v15121_v58, %v949_v57 }
 0x68f   :  { %10870 = vmatpush1.bf16.msra.mxu0 %v15120_v51 }
 0x690   :  { %10830 = vmatprep.mubr.bf16.mxu0 %v10340_v56 }
 0x691   :  { %10831 = vmatmul.mubr.bf16.gmra.mrb[196].mxu0 %v10339_v63 }
 0x692   :  { %9813 = vmatmul.mubr.bf16.gmra.mrb[108].mxu1 %v21043_v12 }
 0x693   :  { %9822 = vmatprep.mubr.bf16.mxu1 %v21044_v36 }
 0x69a   :  { %9823 = vmatmul.mubr.bf16.gmra.mrb[112].mxu1 %v21045_v4 }
 0x69b   :  { %9832 = vmatprep.mubr.bf16.mxu1 %v21046_v0 }
 0x6a2   :  { %9833 = vmatmul.mubr.bf16.gmra.mrb[116].mxu1 %v21047_v29 }
 0x6a3   :  { %9842 = vmatprep.mubr.bf16.mxu1 %v21048_v49 }
 0x6aa   :  { %9843 = vmatmul.mubr.bf16.gmra.mrb[120].mxu1 %v21049_v7 }
 0x6ab   :  { %9852 = vmatprep.mubr.bf16.mxu1 %v21050_v46 }
 0x6b2   :  { %9853 = vmatmul.mubr.bf16.gmra.mrb[124].mxu1 %v21051_v52 }
 0x6b3   :  { %9862 = vmatprep.mubr.bf16.mxu1 %v21052_v2 }
 0x6ba   :  { %9863 = vmatmul.mubr.bf16.gmra.mrb[128].mxu1 %v21053_v21 }
 0x6bb   :  { %9872 = vmatprep.mubr.bf16.mxu1 %v21054_v17 }
 0x6c2   :  { %9873 = vmatmul.mubr.bf16.gmra.mrb[132].mxu1 %v21055_v38 }
 0x6c3   :  { %9882 = vmatprep.mubr.bf16.mxu1 %v21056_v13 }
 0x6ca   :  { %9883 = vmatmul.mubr.bf16.gmra.mrb[136].mxu1 %v21057_v39 }
 0x6cb   :  { %9892 = vmatprep.mubr.bf16.mxu1 %v21058_v1 }
 0x6d2   :  { %9893 = vmatmul.mubr.bf16.gmra.mrb[140].mxu1 %v21059_v3 }
 0x6d3   :  { %9902 = vmatprep.mubr.bf16.mxu1 %v21060_v35 }
 0x6da   :  { %9903 = vmatmul.mubr.bf16.gmra.mrb[144].mxu1 %v21061_v5 }
 0x6db   :  { %9912 = vmatprep.mubr.bf16.mxu1 %v21062_v27 }
 0x6e2   :  { %9913 = vmatmul.mubr.bf16.gmra.mrb[148].mxu1 %v21063_v14 }
 0x6e3   :  { %9922 = vmatprep.mubr.bf16.mxu1 %v21064_v61 }
 0x6ea   :  { %9923 = vmatmul.mubr.bf16.gmra.mrb[152].mxu1 %v21065_v62 }
 0x6eb   :  { %9932 = vmatprep.mubr.bf16.mxu1 %v21066_v18 }
 0x6f2   :  { %9933 = vmatmul.mubr.bf16.gmra.mrb[156].mxu1 %v21067_v43 }
 0x6f3   :  { %9942 = vmatprep.mubr.bf16.mxu1 %v21068_v31 }
 0x6fa   :  { %9943 = vmatmul.mubr.bf16.gmra.mrb[160].mxu1 %v21069_v33 }
 0x6fb   :  { %9952 = vmatprep.mubr.bf16.mxu1 %v21070_v59 }
 0x702   :  { %9953 = vmatmul.mubr.bf16.gmra.mrb[164].mxu1 %v21071_v16 }
 0x703   :  { %9962 = vmatprep.mubr.bf16.mxu1 %v21072_v50 }
 0x70a   :  { %9963 = vmatmul.mubr.bf16.gmra.mrb[168].mxu1 %v21073_v23 }
 0x70b   :  { %9972 = vmatprep.mubr.bf16.mxu1 %v21074_v40 }
 0x712   :  { %9973 = vmatmul.mubr.bf16.gmra.mrb[172].mxu1 %v21075_v10 }
 0x713   :  { %9982 = vmatprep.mubr.bf16.mxu1 %v21076_v45 }
 0x71a   :  { %9983 = vmatmul.mubr.bf16.gmra.mrb[176].mxu1 %v21077_v42 }
 0x71b   :  { %9992 = vmatprep.mubr.bf16.mxu1 %v21078_v11 }
 0x722   :  { %9993 = vmatmul.mubr.bf16.gmra.mrb[180].mxu1 %v21079_v6 }
 0x723   :  { %10002 = vmatprep.mubr.bf16.mxu1 %v21080_v8 }
 0x72a   :  { %10003 = vmatmul.mubr.bf16.gmra.mrb[184].mxu1 %v21081_v48 }
 0x72b   :  { %10012 = vmatprep.mubr.bf16.mxu1 %v21082_v47 }
 0x732   :  { %10013 = vmatmul.mubr.bf16.gmra.mrb[188].mxu1 %v21083_v34 }
 0x733   :  { %10022 = vmatprep.mubr.bf16.mxu1 %v21084_v30 }
 0x73a   :  { %10023 = vmatmul.mubr.bf16.gmra.mrb[192].mxu1 %v21085_v60 }
 0x73b   :  { %10032 = vmatprep.mubr.bf16.mxu1 %v21086_v44 }
 0x742   :  { %10033 = vmatmul.mubr.bf16.gmra.mrb[196].mxu1 %v21087_v28 }
 0x755   :  { %v9794_v19 = vpop.f32.mrb[100].mxu1 }
 0x756   :  { %v12770_v41 = vadd.f32 %v9794_v19, %v20033_v15  ;;  %v9796_v24 = vpop.f32.mrb[101].mxu1 }
 0x757   :  { %v12771_v26 = vadd.f32 %v9796_v24, %v20035_v9  ;;  %v9798_v54 = vpop.f32.mrb[102].mxu1 }
 0x758   :  { %v12772_v63 = vadd.f32 %v9798_v54, %v20033_v15  ;;  %v9800_v56 = vpop.f32.mrb[103].mxu1  ;;  %v10045_v55 = vmax.f32 %v12770_v41, 0.0 }
 0x759   :  { %v12773_v12 = vadd.f32 %v9800_v56, %v20035_v9  ;;  %v10046_v4 = vmax.f32 %v12771_v26, 0.0 }
 0x75a   :  { %v10049_v36 = vmax.f32 %v12772_v63, 0.0 }
 0x75b   :  { %v10050_v0 = vmax.f32 %v12773_v12, 0.0 }
 0x75c   :  { %v10245_v29 = vpack.c.bf16 %v10049_v36, %v10045_v55 }
 0x75d   :  { %v10246_v53 = vpack.c.bf16 %v10050_v0, %v10046_v4  ;;  %v9804_v49 = vpop.f32.mrb[104].mxu1 }
 0x75e   :  { %v12774_v7 = vadd.f32 %v9804_v49, %v20033_v15  ;;  %v9806_v25 = vpop.f32.mrb[105].mxu1 }
 0x75f   :  { %v12775_v46 = vadd.f32 %v9806_v25, %v20035_v9  ;;  %v9808_v52 = vpop.f32.mrb[106].mxu1  ;;  %10871 = vmatprep.mubr.bf16.mxu0 %v10246_v53 }
 0x760   :  { %v12776_v2 = vadd.f32 %v9808_v52, %v20033_v15  ;;  %v9810_v21 = vpop.f32.mrb[107].mxu1  ;;  %10872 = vmatmul.mubr.bf16.vlgmr.msra.gmra.mrb[100].mxu0 %v10245_v29  ;;  %v10053_v17 = vmax.f32 %v12774_v7, 0.0 }
 0x761   :  { %v12777_v37 = vadd.f32 %v9810_v21, %v20035_v9  ;;  %v10054_v32 = vmax.f32 %v12775_v46, 0.0 }
 0x762   :  { %v10057_v38 = vmax.f32 %v12776_v2, 0.0 }
 0x763   :  { %v10058_v13 = vmax.f32 %v12777_v37, 0.0 }
 0x764   :  { %v10249_v39 = vpack.c.bf16 %v10057_v38, %v10053_v17 }
 0x765   :  { %v10250_v1 = vpack.c.bf16 %v10058_v13, %v10054_v32  ;;  %v9814_v3 = vpop.f32.mrb[108].mxu1 }
 0x766   :  { %v12778_v35 = vadd.f32 %v9814_v3, %v20033_v15  ;;  %v9816_v51 = vpop.f32.mrb[109].mxu1 }
 0x767   :  { %v12779_v5 = vadd.f32 %v9816_v51, %v20035_v9  ;;  %v9818_v27 = vpop.f32.mrb[110].mxu1  ;;  %10879 = vmatprep.mubr.bf16.mxu0 %v10250_v1 }
 0x768   :  { %v12780_v14 = vadd.f32 %v9818_v27, %v20033_v15  ;;  %v9820_v61 = vpop.f32.mrb[111].mxu1  ;;  %10880 = vmatmul.mubr.bf16.gmra.mrb[104].mxu0 %v10249_v39  ;;  %v10061_v18 = vmax.f32 %v12778_v35, 0.0 }
 0x769   :  { %v12781_v62 = vadd.f32 %v9820_v61, %v20035_v9  ;;  %v10062_v31 = vmax.f32 %v12779_v5, 0.0 }
 0x76a   :  { %v10065_v43 = vmax.f32 %v12780_v14, 0.0 }
 0x76b   :  { %v10066_v33 = vmax.f32 %v12781_v62, 0.0 }
 0x76c   :  { %v10253_v59 = vpack.c.bf16 %v10065_v43, %v10061_v18 }
 0x76d   :  { %v10254_v16 = vpack.c.bf16 %v10066_v33, %v10062_v31  ;;  %v9824_v50 = vpop.f32.mrb[112].mxu1 }
 0x76e   :  { %v12782_v23 = vadd.f32 %v9824_v50, %v20033_v15  ;;  %v9826_v40 = vpop.f32.mrb[113].mxu1 }
 0x76f   :  { %v12783_v10 = vadd.f32 %v9826_v40, %v20035_v9  ;;  %v9828_v45 = vpop.f32.mrb[114].mxu1  ;;  %10887 = vmatprep.mubr.bf16.mxu0 %v10254_v16 }
 0x770   :  { %v12784_v42 = vadd.f32 %v9828_v45, %v20033_v15  ;;  %v9830_v11 = vpop.f32.mrb[115].mxu1  ;;  %10888 = vmatmul.mubr.bf16.gmra.mrb[108].mxu0 %v10253_v59  ;;  %v10069_v8 = vmax.f32 %v12782_v23, 0.0 }
 0x771   :  { %v12785_v6 = vadd.f32 %v9830_v11, %v20035_v9  ;;  %v10070_v47 = vmax.f32 %v12783_v10, 0.0 }
 0x772   :  { %v10073_v48 = vmax.f32 %v12784_v42, 0.0 }
 0x773   :  { %v10074_v34 = vmax.f32 %v12785_v6, 0.0 }
 0x774   :  { %v10257_v30 = vpack.c.bf16 %v10073_v48, %v10069_v8 }
 0x775   :  { %v10258_v60 = vpack.c.bf16 %v10074_v34, %v10070_v47  ;;  %v9834_v44 = vpop.f32.mrb[116].mxu1 }
 0x776   :  { %v12786_v28 = vadd.f32 %v9834_v44, %v20033_v15  ;;  %v9836_v22 = vpop.f32.mrb[117].mxu1 }
 0x777   :  { %v12787_v20 = vadd.f32 %v9836_v22, %v20035_v9  ;;  %v9838_v57 = vpop.f32.mrb[118].mxu1  ;;  %10895 = vmatprep.mubr.bf16.mxu0 %v10258_v60 }
 0x778   :  { %v12788_v58 = vadd.f32 %v9838_v57, %v20033_v15  ;;  %v9840_v19 = vpop.f32.mrb[119].mxu1  ;;  %10896 = vmatmul.mubr.bf16.gmra.mrb[112].mxu0 %v10257_v30  ;;  %v10077_v24 = vmax.f32 %v12786_v28, 0.0 }
 0x779   :  { %v12789_v41 = vadd.f32 %v9840_v19, %v20035_v9  ;;  %v10078_v54 = vmax.f32 %v12787_v20, 0.0 }
 0x77a   :  { %v10081_v26 = vmax.f32 %v12788_v58, 0.0 }
 0x77b   :  { %v10082_v63 = vmax.f32 %v12789_v41, 0.0 }
 0x77c   :  { %v10261_v56 = vpack.c.bf16 %v10081_v26, %v10077_v24 }
 0x77d   :  { %v10262_v12 = vpack.c.bf16 %v10082_v63, %v10078_v54  ;;  %v9844_v55 = vpop.f32.mrb[120].mxu1 }
 0x77e   :  { %v12790_v36 = vadd.f32 %v9844_v55, %v20033_v15  ;;  %v9846_v4 = vpop.f32.mrb[121].mxu1 }
 0x77f   :  { %v12791_v0 = vadd.f32 %v9846_v4, %v20035_v9  ;;  %v9848_v29 = vpop.f32.mrb[122].mxu1  ;;  %10903 = vmatprep.mubr.bf16.mxu0 %v10262_v12 }
 0x780   :  { %v12792_v53 = vadd.f32 %v9848_v29, %v20033_v15  ;;  %v9850_v49 = vpop.f32.mrb[123].mxu1  ;;  %10904 = vmatmul.mubr.bf16.gmra.mrb[116].mxu0 %v10261_v56  ;;  %v10085_v25 = vmax.f32 %v12790_v36, 0.0 }
 0x781   :  { %v12793_v7 = vadd.f32 %v9850_v49, %v20035_v9  ;;  %v10086_v52 = vmax.f32 %v12791_v0, 0.0 }
 0x782   :  { %v10089_v46 = vmax.f32 %v12792_v53, 0.0 }
 0x783   :  { %v10090_v2 = vmax.f32 %v12793_v7, 0.0 }
 0x784   :  { %v10265_v21 = vpack.c.bf16 %v10089_v46, %v10085_v25 }
 0x785   :  { %v10266_v37 = vpack.c.bf16 %v10090_v2, %v10086_v52  ;;  %v9854_v17 = vpop.f32.mrb[124].mxu1 }
 0x786   :  { %v12794_v38 = vadd.f32 %v9854_v17, %v20033_v15  ;;  %v9856_v32 = vpop.f32.mrb[125].mxu1 }
 0x787   :  { %v12795_v13 = vadd.f32 %v9856_v32, %v20035_v9  ;;  %v9858_v39 = vpop.f32.mrb[126].mxu1  ;;  %10911 = vmatprep.mubr.bf16.mxu0 %v10266_v37 }
 0x788   :  { %v12796_v1 = vadd.f32 %v9858_v39, %v20033_v15  ;;  %v9860_v3 = vpop.f32.mrb[127].mxu1  ;;  %10912 = vmatmul.mubr.bf16.gmra.mrb[120].mxu0 %v10265_v21  ;;  %v10093_v51 = vmax.f32 %v12794_v38, 0.0 }
 0x789   :  { %v12797_v35 = vadd.f32 %v9860_v3, %v20035_v9  ;;  %v10094_v27 = vmax.f32 %v12795_v13, 0.0 }
 0x78a   :  { %v10097_v5 = vmax.f32 %v12796_v1, 0.0 }
 0x78b   :  { %v10098_v14 = vmax.f32 %v12797_v35, 0.0 }
 0x78c   :  { %v10269_v61 = vpack.c.bf16 %v10097_v5, %v10093_v51 }
 0x78d   :  { %v10270_v62 = vpack.c.bf16 %v10098_v14, %v10094_v27  ;;  %v9864_v18 = vpop.f32.mrb[128].mxu1 }
 0x78e   :  { %v12798_v43 = vadd.f32 %v9864_v18, %v20033_v15  ;;  %v9866_v31 = vpop.f32.mrb[129].mxu1 }
 0x78f   :  { %v12799_v33 = vadd.f32 %v9866_v31, %v20035_v9  ;;  %v9868_v59 = vpop.f32.mrb[130].mxu1  ;;  %10919 = vmatprep.mubr.bf16.mxu0 %v10270_v62 }
 0x790   :  { %v12800_v16 = vadd.f32 %v9868_v59, %v20033_v15  ;;  %v9870_v50 = vpop.f32.mrb[131].mxu1  ;;  %10920 = vmatmul.mubr.bf16.gmra.mrb[124].mxu0 %v10269_v61  ;;  %v10101_v40 = vmax.f32 %v12798_v43, 0.0 }
 0x791   :  { %v12801_v23 = vadd.f32 %v9870_v50, %v20035_v9  ;;  %v10102_v45 = vmax.f32 %v12799_v33, 0.0 }
 0x792   :  { %v10105_v10 = vmax.f32 %v12800_v16, 0.0 }
 0x793   :  { %v10106_v42 = vmax.f32 %v12801_v23, 0.0 }
 0x794   :  { %v10273_v11 = vpack.c.bf16 %v10105_v10, %v10101_v40 }
 0x795   :  { %v10274_v6 = vpack.c.bf16 %v10106_v42, %v10102_v45  ;;  %v9874_v8 = vpop.f32.mrb[132].mxu1 }
 0x796   :  { %v12802_v48 = vadd.f32 %v9874_v8, %v20033_v15  ;;  %v9876_v47 = vpop.f32.mrb[133].mxu1 }
 0x797   :  { %v12803_v34 = vadd.f32 %v9876_v47, %v20035_v9  ;;  %v9878_v30 = vpop.f32.mrb[134].mxu1  ;;  %10927 = vmatprep.mubr.bf16.mxu0 %v10274_v6 }
 0x798   :  { %v12804_v60 = vadd.f32 %v9878_v30, %v20033_v15  ;;  %v9880_v44 = vpop.f32.mrb[135].mxu1  ;;  %10928 = vmatmul.mubr.bf16.gmra.mrb[128].mxu0 %v10273_v11  ;;  %v10109_v22 = vmax.f32 %v12802_v48, 0.0 }
 0x799   :  { %v12805_v28 = vadd.f32 %v9880_v44, %v20035_v9  ;;  %v10110_v57 = vmax.f32 %v12803_v34, 0.0 }
 0x79a   :  { %v10113_v20 = vmax.f32 %v12804_v60, 0.0 }
 0x79b   :  { %v10114_v58 = vmax.f32 %v12805_v28, 0.0 }
 0x79c   :  { %v10277_v19 = vpack.c.bf16 %v10113_v20, %v10109_v22 }
 0x79d   :  { %v10278_v41 = vpack.c.bf16 %v10114_v58, %v10110_v57  ;;  %v9884_v24 = vpop.f32.mrb[136].mxu1 }
 0x79e   :  { %v12806_v26 = vadd.f32 %v9884_v24, %v20033_v15  ;;  %v9886_v54 = vpop.f32.mrb[137].mxu1 }
 0x79f   :  { %v12807_v63 = vadd.f32 %v9886_v54, %v20035_v9  ;;  %v9888_v56 = vpop.f32.mrb[138].mxu1  ;;  %10935 = vmatprep.mubr.bf16.mxu0 %v10278_v41 }
 0x7a0   :  { %v12808_v12 = vadd.f32 %v9888_v56, %v20033_v15  ;;  %v9890_v55 = vpop.f32.mrb[139].mxu1  ;;  %10936 = vmatmul.mubr.bf16.gmra.mrb[132].mxu0 %v10277_v19  ;;  %v10117_v4 = vmax.f32 %v12806_v26, 0.0 }
 0x7a1   :  { %v12809_v36 = vadd.f32 %v9890_v55, %v20035_v9  ;;  %v10118_v29 = vmax.f32 %v12807_v63, 0.0 }
 0x7a2   :  { %v10121_v0 = vmax.f32 %v12808_v12, 0.0 }
 0x7a3   :  { %v10122_v53 = vmax.f32 %v12809_v36, 0.0 }
 0x7a4   :  { %v10281_v49 = vpack.c.bf16 %v10121_v0, %v10117_v4 }
 0x7a5   :  { %v10282_v7 = vpack.c.bf16 %v10122_v53, %v10118_v29  ;;  %v9894_v25 = vpop.f32.mrb[140].mxu1 }
 0x7a6   :  { %v12810_v46 = vadd.f32 %v9894_v25, %v20033_v15  ;;  %v9896_v52 = vpop.f32.mrb[141].mxu1 }
 0x7a7   :  { %v12811_v2 = vadd.f32 %v9896_v52, %v20035_v9  ;;  %v9898_v21 = vpop.f32.mrb[142].mxu1  ;;  %10943 = vmatprep.mubr.bf16.mxu0 %v10282_v7 }
 0x7a8   :  { %v12812_v37 = vadd.f32 %v9898_v21, %v20033_v15  ;;  %v9900_v17 = vpop.f32.mrb[143].mxu1  ;;  %10944 = vmatmul.mubr.bf16.gmra.mrb[136].mxu0 %v10281_v49  ;;  %v10125_v32 = vmax.f32 %v12810_v46, 0.0 }
 0x7a9   :  { %v12813_v38 = vadd.f32 %v9900_v17, %v20035_v9  ;;  %v10126_v39 = vmax.f32 %v12811_v2, 0.0 }
 0x7aa   :  { %v10129_v13 = vmax.f32 %v12812_v37, 0.0 }
 0x7ab   :  { %v10130_v1 = vmax.f32 %v12813_v38, 0.0 }
 0x7ac   :  { %v10285_v3 = vpack.c.bf16 %v10129_v13, %v10125_v32 }
 0x7ad   :  { %v10286_v35 = vpack.c.bf16 %v10130_v1, %v10126_v39  ;;  %v9904_v51 = vpop.f32.mrb[144].mxu1 }
 0x7ae   :  { %v12814_v5 = vadd.f32 %v9904_v51, %v20033_v15  ;;  %v9906_v27 = vpop.f32.mrb[145].mxu1 }
 0x7af   :  { %v12815_v14 = vadd.f32 %v9906_v27, %v20035_v9  ;;  %v9908_v61 = vpop.f32.mrb[146].mxu1  ;;  %10951 = vmatprep.mubr.bf16.mxu0 %v10286_v35 }
 0x7b0   :  { %v12816_v62 = vadd.f32 %v9908_v61, %v20033_v15  ;;  %v9910_v18 = vpop.f32.mrb[147].mxu1  ;;  %10952 = vmatmul.mubr.bf16.gmra.mrb[140].mxu0 %v10285_v3  ;;  %v10133_v31 = vmax.f32 %v12814_v5, 0.0 }
 0x7b1   :  { %v12817_v43 = vadd.f32 %v9910_v18, %v20035_v9  ;;  %v10134_v59 = vmax.f32 %v12815_v14, 0.0 }
 0x7b2   :  { %v10137_v33 = vmax.f32 %v12816_v62, 0.0 }
 0x7b3   :  { %v10138_v16 = vmax.f32 %v12817_v43, 0.0 }
 0x7b4   :  { %v10289_v50 = vpack.c.bf16 %v10137_v33, %v10133_v31 }
 0x7b5   :  { %v10290_v23 = vpack.c.bf16 %v10138_v16, %v10134_v59  ;;  %v9914_v40 = vpop.f32.mrb[148].mxu1 }
 0x7b6   :  { %v12818_v10 = vadd.f32 %v9914_v40, %v20033_v15  ;;  %v9916_v45 = vpop.f32.mrb[149].mxu1 }
 0x7b7   :  { %v12819_v42 = vadd.f32 %v9916_v45, %v20035_v9  ;;  %v9918_v11 = vpop.f32.mrb[150].mxu1  ;;  %10959 = vmatprep.mubr.bf16.mxu0 %v10290_v23 }
 0x7b8   :  { %v12820_v6 = vadd.f32 %v9918_v11, %v20033_v15  ;;  %v9920_v8 = vpop.f32.mrb[151].mxu1  ;;  %10960 = vmatmul.mubr.bf16.gmra.mrb[144].mxu0 %v10289_v50  ;;  %v10141_v47 = vmax.f32 %v12818_v10, 0.0 }
 0x7b9   :  { %v12821_v48 = vadd.f32 %v9920_v8, %v20035_v9  ;;  %v10142_v30 = vmax.f32 %v12819_v42, 0.0 }
 0x7ba   :  { %v10145_v34 = vmax.f32 %v12820_v6, 0.0 }
 0x7bb   :  { %v10146_v60 = vmax.f32 %v12821_v48, 0.0 }
 0x7bc   :  { %v10293_v44 = vpack.c.bf16 %v10145_v34, %v10141_v47 }
 0x7bd   :  { %v10294_v28 = vpack.c.bf16 %v10146_v60, %v10142_v30  ;;  %v9924_v22 = vpop.f32.mrb[152].mxu1 }
 0x7be   :  { %v12822_v20 = vadd.f32 %v9924_v22, %v20033_v15  ;;  %v9926_v57 = vpop.f32.mrb[153].mxu1 }
 0x7bf   :  { %v12823_v58 = vadd.f32 %v9926_v57, %v20035_v9  ;;  %v9928_v19 = vpop.f32.mrb[154].mxu1  ;;  %10967 = vmatprep.mubr.bf16.mxu0 %v10294_v28 }
 0x7c0   :  { %v12824_v41 = vadd.f32 %v9928_v19, %v20033_v15  ;;  %v9930_v24 = vpop.f32.mrb[155].mxu1  ;;  %10968 = vmatmul.mubr.bf16.gmra.mrb[148].mxu0 %v10293_v44  ;;  %v10149_v54 = vmax.f32 %v12822_v20, 0.0 }
 0x7c1   :  { %v12825_v26 = vadd.f32 %v9930_v24, %v20035_v9  ;;  %v10150_v56 = vmax.f32 %v12823_v58, 0.0 }
 0x7c2   :  { %v10153_v63 = vmax.f32 %v12824_v41, 0.0 }
 0x7c3   :  { %v10154_v12 = vmax.f32 %v12825_v26, 0.0 }
 0x7c4   :  { %v10297_v55 = vpack.c.bf16 %v10153_v63, %v10149_v54 }
 0x7c5   :  { %v10298_v36 = vpack.c.bf16 %v10154_v12, %v10150_v56  ;;  %v9934_v4 = vpop.f32.mrb[156].mxu1 }
 0x7c6   :  { %v12826_v0 = vadd.f32 %v9934_v4, %v20033_v15  ;;  %v9936_v29 = vpop.f32.mrb[157].mxu1 }
 0x7c7   :  { %v12827_v53 = vadd.f32 %v9936_v29, %v20035_v9  ;;  %v9938_v49 = vpop.f32.mrb[158].mxu1  ;;  %10975 = vmatprep.mubr.bf16.mxu0 %v10298_v36 }
 0x7c8   :  { %v12828_v7 = vadd.f32 %v9938_v49, %v20033_v15  ;;  %v9940_v25 = vpop.f32.mrb[159].mxu1  ;;  %10976 = vmatmul.mubr.bf16.gmra.mrb[152].mxu0 %v10297_v55  ;;  %v10157_v52 = vmax.f32 %v12826_v0, 0.0 }
 0x7c9   :  { %v12829_v46 = vadd.f32 %v9940_v25, %v20035_v9  ;;  %v10158_v21 = vmax.f32 %v12827_v53, 0.0 }
 0x7ca   :  { %v10161_v2 = vmax.f32 %v12828_v7, 0.0 }
 0x7cb   :  { %v10162_v37 = vmax.f32 %v12829_v46, 0.0 }
 0x7cc   :  { %v10301_v17 = vpack.c.bf16 %v10161_v2, %v10157_v52 }
 0x7cd   :  { %v10302_v38 = vpack.c.bf16 %v10162_v37, %v10158_v21  ;;  %v9944_v32 = vpop.f32.mrb[160].mxu1 }
 0x7ce   :  { %v12830_v13 = vadd.f32 %v9944_v32, %v20033_v15  ;;  %v9946_v39 = vpop.f32.mrb[161].mxu1 }
 0x7cf   :  { %v12831_v1 = vadd.f32 %v9946_v39, %v20035_v9  ;;  %v9948_v3 = vpop.f32.mrb[162].mxu1  ;;  %10983 = vmatprep.mubr.bf16.mxu0 %v10302_v38 }
 0x7d0   :  { %v12832_v35 = vadd.f32 %v9948_v3, %v20033_v15  ;;  %v9950_v51 = vpop.f32.mrb[163].mxu1  ;;  %10984 = vmatmul.mubr.bf16.gmra.mrb[156].mxu0 %v10301_v17  ;;  %v10165_v27 = vmax.f32 %v12830_v13, 0.0 }
 0x7d1   :  { %v12833_v5 = vadd.f32 %v9950_v51, %v20035_v9  ;;  %v10166_v61 = vmax.f32 %v12831_v1, 0.0 }
 0x7d2   :  { %v10169_v14 = vmax.f32 %v12832_v35, 0.0 }
 0x7d3   :  { %v10170_v62 = vmax.f32 %v12833_v5, 0.0 }
 0x7d4   :  { %v10305_v18 = vpack.c.bf16 %v10169_v14, %v10165_v27 }
 0x7d5   :  { %v10306_v43 = vpack.c.bf16 %v10170_v62, %v10166_v61  ;;  %v9954_v31 = vpop.f32.mrb[164].mxu1 }
 0x7d6   :  { %v12834_v33 = vadd.f32 %v9954_v31, %v20033_v15  ;;  %v9956_v59 = vpop.f32.mrb[165].mxu1 }
 0x7d7   :  { %v12835_v16 = vadd.f32 %v9956_v59, %v20035_v9  ;;  %v9958_v50 = vpop.f32.mrb[166].mxu1  ;;  %10991 = vmatprep.mubr.bf16.mxu0 %v10306_v43 }
 0x7d8   :  { %v12836_v23 = vadd.f32 %v9958_v50, %v20033_v15  ;;  %v9960_v40 = vpop.f32.mrb[167].mxu1  ;;  %10992 = vmatmul.mubr.bf16.gmra.mrb[160].mxu0 %v10305_v18  ;;  %v10173_v45 = vmax.f32 %v12834_v33, 0.0 }
 0x7d9   :  { %v12837_v10 = vadd.f32 %v9960_v40, %v20035_v9  ;;  %v10174_v11 = vmax.f32 %v12835_v16, 0.0 }
 0x7da   :  { %v10177_v42 = vmax.f32 %v12836_v23, 0.0 }
 0x7db   :  { %v10178_v6 = vmax.f32 %v12837_v10, 0.0 }
 0x7dc   :  { %v10309_v8 = vpack.c.bf16 %v10177_v42, %v10173_v45 }
 0x7dd   :  { %v10310_v48 = vpack.c.bf16 %v10178_v6, %v10174_v11  ;;  %v9964_v47 = vpop.f32.mrb[168].mxu1 }
 0x7de   :  { %v12838_v34 = vadd.f32 %v9964_v47, %v20033_v15  ;;  %v9966_v30 = vpop.f32.mrb[169].mxu1 }
 0x7df   :  { %v12839_v60 = vadd.f32 %v9966_v30, %v20035_v9  ;;  %v9968_v44 = vpop.f32.mrb[170].mxu1  ;;  %10999 = vmatprep.mubr.bf16.mxu0 %v10310_v48 }
 0x7e0   :  { %v12840_v28 = vadd.f32 %v9968_v44, %v20033_v15  ;;  %v9970_v22 = vpop.f32.mrb[171].mxu1  ;;  %11000 = vmatmul.mubr.bf16.gmra.mrb[164].mxu0 %v10309_v8  ;;  %v10181_v57 = vmax.f32 %v12838_v34, 0.0 }
 0x7e1   :  { %v12841_v20 = vadd.f32 %v9970_v22, %v20035_v9  ;;  %v10182_v19 = vmax.f32 %v12839_v60, 0.0 }
 0x7e2   :  { %v10185_v58 = vmax.f32 %v12840_v28, 0.0 }
 0x7e3   :  { %v10186_v41 = vmax.f32 %v12841_v20, 0.0 }
 0x7e4   :  { %v10313_v24 = vpack.c.bf16 %v10185_v58, %v10181_v57 }
 0x7e5   :  { %v10314_v26 = vpack.c.bf16 %v10186_v41, %v10182_v19  ;;  %v9974_v54 = vpop.f32.mrb[172].mxu1 }
 0x7e6   :  { %v12842_v63 = vadd.f32 %v9974_v54, %v20033_v15  ;;  %v9976_v56 = vpop.f32.mrb[173].mxu1 }
 0x7e7   :  { %v12843_v12 = vadd.f32 %v9976_v56, %v20035_v9  ;;  %v9978_v55 = vpop.f32.mrb[174].mxu1  ;;  %11007 = vmatprep.mubr.bf16.mxu0 %v10314_v26 }
 0x7e8   :  { %v12844_v36 = vadd.f32 %v9978_v55, %v20033_v15  ;;  %v9980_v4 = vpop.f32.mrb[175].mxu1  ;;  %11008 = vmatmul.mubr.bf16.gmra.mrb[168].mxu0 %v10313_v24  ;;  %v10189_v29 = vmax.f32 %v12842_v63, 0.0 }
 0x7e9   :  { %v12845_v0 = vadd.f32 %v9980_v4, %v20035_v9  ;;  %v10190_v49 = vmax.f32 %v12843_v12, 0.0 }
 0x7ea   :  { %v10193_v53 = vmax.f32 %v12844_v36, 0.0 }
 0x7eb   :  { %v10194_v7 = vmax.f32 %v12845_v0, 0.0 }
 0x7ec   :  { %v10317_v25 = vpack.c.bf16 %v10193_v53, %v10189_v29 }
 0x7ed   :  { %v10318_v46 = vpack.c.bf16 %v10194_v7, %v10190_v49  ;;  %v9984_v52 = vpop.f32.mrb[176].mxu1 }
 0x7ee   :  { %v12846_v2 = vadd.f32 %v9984_v52, %v20033_v15  ;;  %v9986_v21 = vpop.f32.mrb[177].mxu1 }
 0x7ef   :  { %v12847_v37 = vadd.f32 %v9986_v21, %v20035_v9  ;;  %v9988_v17 = vpop.f32.mrb[178].mxu1  ;;  %11015 = vmatprep.mubr.bf16.mxu0 %v10318_v46 }
 0x7f0   :  { %v12848_v38 = vadd.f32 %v9988_v17, %v20033_v15  ;;  %v9990_v32 = vpop.f32.mrb[179].mxu1  ;;  %11016 = vmatmul.mubr.bf16.gmra.mrb[172].mxu0 %v10317_v25  ;;  %v10197_v39 = vmax.f32 %v12846_v2, 0.0 }
 0x7f1   :  { %v12849_v13 = vadd.f32 %v9990_v32, %v20035_v9  ;;  %v10198_v3 = vmax.f32 %v12847_v37, 0.0 }
 0x7f2   :  { %v10201_v1 = vmax.f32 %v12848_v38, 0.0 }
 0x7f3   :  { %v10202_v35 = vmax.f32 %v12849_v13, 0.0 }
 0x7f4   :  { %v10321_v51 = vpack.c.bf16 %v10201_v1, %v10197_v39 }
 0x7f5   :  { %v10322_v5 = vpack.c.bf16 %v10202_v35, %v10198_v3  ;;  %v9994_v27 = vpop.f32.mrb[180].mxu1 }
 0x7f6   :  { %v12850_v14 = vadd.f32 %v9994_v27, %v20033_v15  ;;  %v9996_v61 = vpop.f32.mrb[181].mxu1 }
 0x7f7   :  { %v12851_v62 = vadd.f32 %v9996_v61, %v20035_v9  ;;  %v9998_v18 = vpop.f32.mrb[182].mxu1  ;;  %11023 = vmatprep.mubr.bf16.mxu0 %v10322_v5 }
 0x7f8   :  { %v12852_v43 = vadd.f32 %v9998_v18, %v20033_v15  ;;  %v10000_v31 = vpop.f32.mrb[183].mxu1  ;;  %11024 = vmatmul.mubr.bf16.gmra.mrb[176].mxu0 %v10321_v51  ;;  %v10205_v59 = vmax.f32 %v12850_v14, 0.0 }
 0x7f9   :  { %v12853_v33 = vadd.f32 %v10000_v31, %v20035_v9  ;;  %v10206_v50 = vmax.f32 %v12851_v62, 0.0 }
 0x7fa   :  { %v10209_v16 = vmax.f32 %v12852_v43, 0.0 }
 0x7fb   :  { %v10210_v23 = vmax.f32 %v12853_v33, 0.0 }
 0x7fc   :  { %v10325_v40 = vpack.c.bf16 %v10209_v16, %v10205_v59  ;;  %v20140_v59 = vld [vmem:[%s20271_s4] ss:$0 sm:$0xff] }
 0x7fd   :  { %v10326_v10 = vpack.c.bf16 %v10210_v23, %v10206_v50  ;;  %v10004_v45 = vpop.f32.mrb[184].mxu1 }
 0x7fe   :  { %v12854_v42 = vadd.f32 %v10004_v45, %v20033_v15  ;;  %v10006_v11 = vpop.f32.mrb[185].mxu1 }
 0x7ff   :  { %v12855_v6 = vadd.f32 %v10006_v11, %v20035_v9  ;;  %v10008_v8 = vpop.f32.mrb[186].mxu1  ;;  %11031 = vmatprep.mubr.bf16.mxu0 %v10326_v10 }
 0x800   :  { %v12856_v48 = vadd.f32 %v10008_v8, %v20033_v15  ;;  %v10010_v47 = vpop.f32.mrb[187].mxu1  ;;  %11032 = vmatmul.mubr.bf16.gmra.mrb[180].mxu0 %v10325_v40  ;;  %v10213_v30 = vmax.f32 %v12854_v42, 0.0 }
 0x801   :  { %v12857_v34 = vadd.f32 %v10010_v47, %v20035_v9  ;;  %v10214_v44 = vmax.f32 %v12855_v6, 0.0 }
 0x802   :  { %v10217_v60 = vmax.f32 %v12856_v48, 0.0 }
 0x803   :  { %v10218_v28 = vmax.f32 %v12857_v34, 0.0 }
 0x804   :  { %v10329_v22 = vpack.c.bf16 %v10217_v60, %v10213_v30 }
 0x805   :  { %v10330_v20 = vpack.c.bf16 %v10218_v28, %v10214_v44  ;;  %v10014_v57 = vpop.f32.mrb[188].mxu1 }
 0x806   :  { %v12858_v58 = vadd.f32 %v10014_v57, %v20033_v15  ;;  %v10016_v19 = vpop.f32.mrb[189].mxu1 }
 0x807   :  { %v12859_v41 = vadd.f32 %v10016_v19, %v20035_v9  ;;  %v10018_v24 = vpop.f32.mrb[190].mxu1  ;;  %11039 = vmatprep.mubr.bf16.mxu0 %v10330_v20 }
 0x808   :  { %v12860_v26 = vadd.f32 %v10018_v24, %v20033_v15  ;;  %v10020_v54 = vpop.f32.mrb[191].mxu1  ;;  %11040 = vmatmul.mubr.bf16.gmra.mrb[184].mxu0 %v10329_v22  ;;  %v10221_v56 = vmax.f32 %v12858_v58, 0.0 }
 0x809   :  { %v12861_v63 = vadd.f32 %v10020_v54, %v20035_v9  ;;  %v10222_v55 = vmax.f32 %v12859_v41, 0.0 }
 0x80a   :  { %v10225_v12 = vmax.f32 %v12860_v26, 0.0 }
 0x80b   :  { %v10226_v36 = vmax.f32 %v12861_v63, 0.0 }
 0x80c   :  { %v10333_v4 = vpack.c.bf16 %v10225_v12, %v10221_v56 }
 0x80d   :  { %v10334_v0 = vpack.c.bf16 %v10226_v36, %v10222_v55  ;;  %v10024_v29 = vpop.f32.mrb[192].mxu1 }
 0x80e   :  { %v12862_v53 = vadd.f32 %v10024_v29, %v20033_v15  ;;  %v10026_v49 = vpop.f32.mrb[193].mxu1 }
 0x80f   :  { %v12863_v7 = vadd.f32 %v10026_v49, %v20035_v9  ;;  %v10028_v25 = vpop.f32.mrb[194].mxu1  ;;  %11047 = vmatprep.mubr.bf16.mxu0 %v10334_v0 }
 0x810   :  { %v12864_v46 = vadd.f32 %v10028_v25, %v20033_v15  ;;  %v10030_v52 = vpop.f32.mrb[195].mxu1  ;;  %11048 = vmatmul.mubr.bf16.gmra.mrb[188].mxu0 %v10333_v4  ;;  %v10229_v21 = vmax.f32 %v12862_v53, 0.0 }
 0x811   :  { %v12865_v2 = vadd.f32 %v10030_v52, %v20035_v9  ;;  %v10230_v17 = vmax.f32 %v12863_v7, 0.0 }
 0x812   :  { %v10233_v37 = vmax.f32 %v12864_v46, 0.0 }
 0x813   :  { %v10234_v38 = vmax.f32 %v12865_v2, 0.0 }
 0x814   :  { %v10337_v32 = vpack.c.bf16 %v10233_v37, %v10229_v21 }
 0x815   :  { %v10338_v13 = vpack.c.bf16 %v10234_v38, %v10230_v17  ;;  %v10034_v39 = vpop.f32.mrb[196].mxu1 }
 0x816   :  { %v12866_v1 = vadd.f32 %v10034_v39, %v20033_v15  ;;  %v10036_v3 = vpop.f32.mrb[197].mxu1 }
 0x817   :  { %v12867_v35 = vadd.f32 %v10036_v3, %v20035_v9  ;;  %v10038_v51 = vpop.f32.mrb[198].mxu1  ;;  %11055 = vmatprep.mubr.bf16.mxu0 %v10338_v13 }
 0x818   :  { %v12868_v5 = vadd.f32 %v10038_v51, %v20033_v15  ;;  %v10040_v27 = vpop.f32.mrb[199].mxu1  ;;  %11056 = vmatmul.mubr.bf16.gmra.mrb[192].mxu0 %v10337_v32  ;;  %v10237_v61 = vmax.f32 %v12866_v1, 0.0 }
 0x819   :  { %v12869_v14 = vadd.f32 %v10040_v27, %v20035_v9  ;;  %v10238_v18 = vmax.f32 %v12867_v35, 0.0 }
 0x81a   :  { %v10241_v62 = vmax.f32 %v12868_v5, 0.0 }
 0x81b   :  { %v10242_v43 = vmax.f32 %v12869_v14, 0.0 }
 0x81c   :  { %v10341_v31 = vpack.c.bf16 %v10241_v62, %v10237_v61 }
 0x81d   :  { %v10342_v33 = vpack.c.bf16 %v10242_v43, %v10238_v18 }
 0x81f   :  { %11063 = vmatprep.mubr.bf16.mxu0 %v10342_v33 }
 0x820   :  { %11064 = vmatmul.mubr.bf16.gmra.mrb[196].mxu0 %v10341_v31 }
 0x833   :  { %v10873_v16 = vpop.f32.mrb[100].mxu0 }
 0x834   :  { %v12870_v15 = vadd.f32 %v20140_v59, %v10873_v16  ;;  %v10875_v50 = vpop.f32.mrb[101].mxu0 }
 0x835   :  { %v10876_v23 = vpop.f32.mrb[102].mxu0 }
 0x836   :  { %v12871_v9 = vadd.f32 %v20140_v59, %v10876_v23  ;;  %v10878_v40 = vpop.f32.mrb[103].mxu0  ;;  %v11072_v10 = vmax.f32 %v12870_v15, 0.0 }
 0x838   :  { %v11073_v45 = vmax.f32 %v12871_v9, 0.0 }
 0x83a   :  { %v12424_v42 = vpack.c.bf16 %v11073_v45, %v11072_v10 }
 0x83b   :  { %v10881_v11 = vpop.f32.mrb[104].mxu0 }
 0x83c   :  { %12425 = vst [vmem:[%s20272_s5] sm:$0xff] %v12424_v42   ;;  %v12872_v6 = vadd.f32 %v20140_v59, %v10881_v11  ;;  %v10883_v8 = vpop.f32.mrb[105].mxu0 }
 0x83d   :  { %v10884_v48 = vpop.f32.mrb[106].mxu0 }
 0x83e   :  { %v12873_v47 = vadd.f32 %v20140_v59, %v10884_v48  ;;  %v10886_v34 = vpop.f32.mrb[107].mxu0  ;;  %v11074_v30 = vmax.f32 %v12872_v6, 0.0 }
 0x840   :  { %v11075_v60 = vmax.f32 %v12873_v47, 0.0 }
 0x842   :  { %v12429_v44 = vpack.c.bf16 %v11075_v60, %v11074_v30 }
 0x843   :  { %v10889_v28 = vpop.f32.mrb[108].mxu0 }
 0x844   :  { %12546 = vst [vmem:[%s20272_s5 + $0x8] sm:$0xff] %v12429_v44   ;;  %v12874_v22 = vadd.f32 %v20140_v59, %v10889_v28  ;;  %v10891_v20 = vpop.f32.mrb[109].mxu0 }
 0x845   :  { %v10892_v57 = vpop.f32.mrb[110].mxu0 }
 0x846   :  { %v12875_v58 = vadd.f32 %v20140_v59, %v10892_v57  ;;  %v10894_v19 = vpop.f32.mrb[111].mxu0  ;;  %v11076_v41 = vmax.f32 %v12874_v22, 0.0 }
 0x848   :  { %v11077_v24 = vmax.f32 %v12875_v58, 0.0 }
 0x84a   :  { %v12434_v26 = vpack.c.bf16 %v11077_v24, %v11076_v41 }
 0x84b   :  { %v10897_v54 = vpop.f32.mrb[112].mxu0 }
 0x84c   :  { %12547 = vst [vmem:[%s20272_s5 + $0x10] sm:$0xff] %v12434_v26   ;;  %v12876_v63 = vadd.f32 %v20140_v59, %v10897_v54  ;;  %v10899_v56 = vpop.f32.mrb[113].mxu0 }
 0x84d   :  { %v10900_v12 = vpop.f32.mrb[114].mxu0 }
 0x84e   :  { %v12877_v55 = vadd.f32 %v20140_v59, %v10900_v12  ;;  %v10902_v36 = vpop.f32.mrb[115].mxu0  ;;  %v11078_v4 = vmax.f32 %v12876_v63, 0.0 }
 0x850   :  { %v11079_v0 = vmax.f32 %v12877_v55, 0.0 }
 0x852   :  { %v12439_v29 = vpack.c.bf16 %v11079_v0, %v11078_v4 }
 0x853   :  { %v10905_v53 = vpop.f32.mrb[116].mxu0 }
 0x854   :  { %12548 = vst [vmem:[%s20272_s5 + $0x18] sm:$0xff] %v12439_v29   ;;  %v12878_v49 = vadd.f32 %v20140_v59, %v10905_v53  ;;  %v10907_v7 = vpop.f32.mrb[117].mxu0 }
 0x855   :  { %v10908_v25 = vpop.f32.mrb[118].mxu0 }
 0x856   :  { %v12879_v46 = vadd.f32 %v20140_v59, %v10908_v25  ;;  %v10910_v52 = vpop.f32.mrb[119].mxu0  ;;  %v11080_v2 = vmax.f32 %v12878_v49, 0.0 }
 0x858   :  { %v11081_v21 = vmax.f32 %v12879_v46, 0.0 }
 0x85a   :  { %v12444_v37 = vpack.c.bf16 %v11081_v21, %v11080_v2 }
 0x85b   :  { %v10913_v17 = vpop.f32.mrb[120].mxu0 }
 0x85c   :  { %12549 = vst [vmem:[%s20272_s5 + $0x20] sm:$0xff] %v12444_v37   ;;  %v12880_v38 = vadd.f32 %v20140_v59, %v10913_v17  ;;  %v10915_v32 = vpop.f32.mrb[121].mxu0 }
 0x85d   :  { %v10916_v13 = vpop.f32.mrb[122].mxu0 }
 0x85e   :  { %v12881_v39 = vadd.f32 %v20140_v59, %v10916_v13  ;;  %v10918_v1 = vpop.f32.mrb[123].mxu0  ;;  %v11082_v3 = vmax.f32 %v12880_v38, 0.0 }
 0x860   :  { %v11083_v35 = vmax.f32 %v12881_v39, 0.0 }
 0x862   :  { %v12449_v51 = vpack.c.bf16 %v11083_v35, %v11082_v3 }
 0x863   :  { %v10921_v5 = vpop.f32.mrb[124].mxu0 }
 0x864   :  { %12550 = vst [vmem:[%s20272_s5 + $0x28] sm:$0xff] %v12449_v51   ;;  %v12882_v27 = vadd.f32 %v20140_v59, %v10921_v5  ;;  %v10923_v14 = vpop.f32.mrb[125].mxu0 }
 0x865   :  { %v10924_v61 = vpop.f32.mrb[126].mxu0 }
 0x866   :  { %v12883_v62 = vadd.f32 %v20140_v59, %v10924_v61  ;;  %v10926_v18 = vpop.f32.mrb[127].mxu0  ;;  %v11084_v43 = vmax.f32 %v12882_v27, 0.0 }
 0x868   :  { %v11085_v31 = vmax.f32 %v12883_v62, 0.0 }
 0x86a   :  { %v12454_v33 = vpack.c.bf16 %v11085_v31, %v11084_v43 }
 0x86b   :  { %v10929_v16 = vpop.f32.mrb[128].mxu0 }
 0x86c   :  { %12551 = vst [vmem:[%s20272_s5 + $0x30] sm:$0xff] %v12454_v33   ;;  %v12884_v15 = vadd.f32 %v20140_v59, %v10929_v16  ;;  %v10931_v50 = vpop.f32.mrb[129].mxu0 }
 0x86d   :  { %v10932_v23 = vpop.f32.mrb[130].mxu0 }
 0x86e   :  { %v12885_v9 = vadd.f32 %v20140_v59, %v10932_v23  ;;  %v10934_v40 = vpop.f32.mrb[131].mxu0  ;;  %v11086_v10 = vmax.f32 %v12884_v15, 0.0 }
 0x870   :  { %v11087_v45 = vmax.f32 %v12885_v9, 0.0 }
 0x872   :  { %v12459_v42 = vpack.c.bf16 %v11087_v45, %v11086_v10 }
 0x873   :  { %v10937_v11 = vpop.f32.mrb[132].mxu0 }
 0x874   :  { %12552 = vst [vmem:[%s20272_s5 + $0x38] sm:$0xff] %v12459_v42   ;;  %v12886_v6 = vadd.f32 %v20140_v59, %v10937_v11  ;;  %v10939_v8 = vpop.f32.mrb[133].mxu0 }
 0x875   :  { %v10940_v48 = vpop.f32.mrb[134].mxu0 }
 0x876   :  { %v12887_v47 = vadd.f32 %v20140_v59, %v10940_v48  ;;  %v10942_v34 = vpop.f32.mrb[135].mxu0  ;;  %v11088_v30 = vmax.f32 %v12886_v6, 0.0 }
 0x878   :  { %v11089_v60 = vmax.f32 %v12887_v47, 0.0 }
 0x87a   :  { %v12464_v44 = vpack.c.bf16 %v11089_v60, %v11088_v30 }
 0x87b   :  { %v10945_v28 = vpop.f32.mrb[136].mxu0 }
 0x87c   :  { %12553 = vst [vmem:[%s20272_s5 + $0x40] sm:$0xff] %v12464_v44   ;;  %v12888_v22 = vadd.f32 %v20140_v59, %v10945_v28  ;;  %v10947_v20 = vpop.f32.mrb[137].mxu0 }
 0x87d   :  { %v10948_v57 = vpop.f32.mrb[138].mxu0 }
 0x87e   :  { %v12889_v58 = vadd.f32 %v20140_v59, %v10948_v57  ;;  %v10950_v19 = vpop.f32.mrb[139].mxu0  ;;  %v11090_v41 = vmax.f32 %v12888_v22, 0.0 }
 0x880   :  { %v11091_v24 = vmax.f32 %v12889_v58, 0.0 }
 0x882   :  { %v12469_v26 = vpack.c.bf16 %v11091_v24, %v11090_v41 }
 0x883   :  { %v10953_v54 = vpop.f32.mrb[140].mxu0 }
 0x884   :  { %12554 = vst [vmem:[%s20272_s5 + $0x48] sm:$0xff] %v12469_v26   ;;  %v12890_v63 = vadd.f32 %v20140_v59, %v10953_v54  ;;  %v10955_v56 = vpop.f32.mrb[141].mxu0 }
 0x885   :  { %v10956_v12 = vpop.f32.mrb[142].mxu0 }
 0x886   :  { %v12891_v55 = vadd.f32 %v20140_v59, %v10956_v12  ;;  %v10958_v36 = vpop.f32.mrb[143].mxu0  ;;  %v11092_v4 = vmax.f32 %v12890_v63, 0.0 }
 0x888   :  { %v11093_v0 = vmax.f32 %v12891_v55, 0.0 }
 0x88a   :  { %v12474_v29 = vpack.c.bf16 %v11093_v0, %v11092_v4 }
 0x88b   :  { %v10961_v53 = vpop.f32.mrb[144].mxu0 }
 0x88c   :  { %12555 = vst [vmem:[%s20272_s5 + $0x50] sm:$0xff] %v12474_v29   ;;  %v12892_v49 = vadd.f32 %v20140_v59, %v10961_v53  ;;  %v10963_v7 = vpop.f32.mrb[145].mxu0 }
 0x88d   :  { %v10964_v25 = vpop.f32.mrb[146].mxu0 }
 0x88e   :  { %v12893_v46 = vadd.f32 %v20140_v59, %v10964_v25  ;;  %v10966_v52 = vpop.f32.mrb[147].mxu0  ;;  %v11094_v2 = vmax.f32 %v12892_v49, 0.0 }
 0x890   :  { %v11095_v21 = vmax.f32 %v12893_v46, 0.0 }
 0x892   :  { %v12479_v37 = vpack.c.bf16 %v11095_v21, %v11094_v2 }
 0x893   :  { %v10969_v17 = vpop.f32.mrb[148].mxu0 }
 0x894   :  { %12556 = vst [vmem:[%s20272_s5 + $0x58] sm:$0xff] %v12479_v37   ;;  %v12894_v38 = vadd.f32 %v20140_v59, %v10969_v17  ;;  %v10971_v32 = vpop.f32.mrb[149].mxu0 }
 0x895   :  { %v10972_v13 = vpop.f32.mrb[150].mxu0 }
 0x896   :  { %v12895_v39 = vadd.f32 %v20140_v59, %v10972_v13  ;;  %v10974_v1 = vpop.f32.mrb[151].mxu0  ;;  %v11096_v3 = vmax.f32 %v12894_v38, 0.0 }
 0x898   :  { %v11097_v35 = vmax.f32 %v12895_v39, 0.0 }
 0x89a   :  { %v12484_v51 = vpack.c.bf16 %v11097_v35, %v11096_v3 }
 0x89b   :  { %v10977_v5 = vpop.f32.mrb[152].mxu0 }
 0x89c   :  { %12557 = vst [vmem:[%s20272_s5 + $0x60] sm:$0xff] %v12484_v51   ;;  %v12896_v27 = vadd.f32 %v20140_v59, %v10977_v5  ;;  %v10979_v14 = vpop.f32.mrb[153].mxu0 }
 0x89d   :  { %v10980_v61 = vpop.f32.mrb[154].mxu0 }
 0x89e   :  { %v12897_v62 = vadd.f32 %v20140_v59, %v10980_v61  ;;  %v10982_v18 = vpop.f32.mrb[155].mxu0  ;;  %v11098_v43 = vmax.f32 %v12896_v27, 0.0 }
 0x8a0   :  { %v11099_v31 = vmax.f32 %v12897_v62, 0.0 }
 0x8a2   :  { %v12489_v33 = vpack.c.bf16 %v11099_v31, %v11098_v43 }
 0x8a3   :  { %v10985_v16 = vpop.f32.mrb[156].mxu0 }
 0x8a4   :  { %12558 = vst [vmem:[%s20272_s5 + $0x68] sm:$0xff] %v12489_v33   ;;  %v12898_v15 = vadd.f32 %v20140_v59, %v10985_v16  ;;  %v10987_v50 = vpop.f32.mrb[157].mxu0 }
 0x8a5   :  { %v10988_v23 = vpop.f32.mrb[158].mxu0 }
 0x8a6   :  { %v12899_v9 = vadd.f32 %v20140_v59, %v10988_v23  ;;  %v10990_v40 = vpop.f32.mrb[159].mxu0  ;;  %v11100_v10 = vmax.f32 %v12898_v15, 0.0 }
 0x8a8   :  { %v11101_v45 = vmax.f32 %v12899_v9, 0.0 }
 0x8aa   :  { %v12494_v42 = vpack.c.bf16 %v11101_v45, %v11100_v10 }
 0x8ab   :  { %v10993_v11 = vpop.f32.mrb[160].mxu0 }
 0x8ac   :  { %12559 = vst [vmem:[%s20272_s5 + $0x70] sm:$0xff] %v12494_v42   ;;  %v12900_v6 = vadd.f32 %v20140_v59, %v10993_v11  ;;  %v10995_v8 = vpop.f32.mrb[161].mxu0 }
 0x8ad   :  { %v10996_v48 = vpop.f32.mrb[162].mxu0 }
 0x8ae   :  { %v12901_v47 = vadd.f32 %v20140_v59, %v10996_v48  ;;  %v10998_v34 = vpop.f32.mrb[163].mxu0  ;;  %v11102_v30 = vmax.f32 %v12900_v6, 0.0 }
 0x8b0   :  { %v11103_v60 = vmax.f32 %v12901_v47, 0.0 }
 0x8b2   :  { %v12499_v44 = vpack.c.bf16 %v11103_v60, %v11102_v30 }
 0x8b3   :  { %v11001_v28 = vpop.f32.mrb[164].mxu0 }
 0x8b4   :  { %12560 = vst [vmem:[%s20272_s5 + $0x78] sm:$0xff] %v12499_v44   ;;  %v12902_v22 = vadd.f32 %v20140_v59, %v11001_v28  ;;  %v11003_v20 = vpop.f32.mrb[165].mxu0 }
 0x8b5   :  { %v11004_v57 = vpop.f32.mrb[166].mxu0 }
 0x8b6   :  { %v12903_v58 = vadd.f32 %v20140_v59, %v11004_v57  ;;  %v11006_v19 = vpop.f32.mrb[167].mxu0  ;;  %v11104_v41 = vmax.f32 %v12902_v22, 0.0 }
 0x8b8   :  { %v11105_v24 = vmax.f32 %v12903_v58, 0.0 }
 0x8ba   :  { %v12504_v26 = vpack.c.bf16 %v11105_v24, %v11104_v41 }
 0x8bb   :  { %v11009_v54 = vpop.f32.mrb[168].mxu0 }
 0x8bc   :  { %12561 = vst [vmem:[%s20272_s5 + $0x80] sm:$0xff] %v12504_v26   ;;  %v12904_v63 = vadd.f32 %v20140_v59, %v11009_v54  ;;  %v11011_v56 = vpop.f32.mrb[169].mxu0 }
 0x8bd   :  { %v11012_v12 = vpop.f32.mrb[170].mxu0 }
 0x8be   :  { %v12905_v55 = vadd.f32 %v20140_v59, %v11012_v12  ;;  %v11014_v36 = vpop.f32.mrb[171].mxu0  ;;  %v11106_v4 = vmax.f32 %v12904_v63, 0.0 }
 0x8c0   :  { %v11107_v0 = vmax.f32 %v12905_v55, 0.0 }
 0x8c2   :  { %v12509_v29 = vpack.c.bf16 %v11107_v0, %v11106_v4 }
 0x8c3   :  { %v11017_v53 = vpop.f32.mrb[172].mxu0 }
 0x8c4   :  { %12562 = vst [vmem:[%s20272_s5 + $0x88] sm:$0xff] %v12509_v29   ;;  %v12906_v49 = vadd.f32 %v20140_v59, %v11017_v53  ;;  %v11019_v7 = vpop.f32.mrb[173].mxu0 }
 0x8c5   :  { %v11020_v25 = vpop.f32.mrb[174].mxu0 }
 0x8c6   :  { %v12907_v46 = vadd.f32 %v20140_v59, %v11020_v25  ;;  %v11022_v52 = vpop.f32.mrb[175].mxu0  ;;  %v11108_v2 = vmax.f32 %v12906_v49, 0.0 }
 0x8c8   :  { %v11109_v21 = vmax.f32 %v12907_v46, 0.0 }
 0x8ca   :  { %v12514_v37 = vpack.c.bf16 %v11109_v21, %v11108_v2 }
 0x8cb   :  { %v11025_v17 = vpop.f32.mrb[176].mxu0 }
 0x8cc   :  { %12563 = vst [vmem:[%s20272_s5 + $0x90] sm:$0xff] %v12514_v37   ;;  %v12908_v38 = vadd.f32 %v20140_v59, %v11025_v17  ;;  %v11027_v32 = vpop.f32.mrb[177].mxu0 }
 0x8cd   :  { %v11028_v13 = vpop.f32.mrb[178].mxu0 }
 0x8ce   :  { %v12909_v39 = vadd.f32 %v20140_v59, %v11028_v13  ;;  %v11030_v1 = vpop.f32.mrb[179].mxu0  ;;  %v11110_v3 = vmax.f32 %v12908_v38, 0.0 }
 0x8d0   :  { %v11111_v35 = vmax.f32 %v12909_v39, 0.0 }
 0x8d2   :  { %v12519_v51 = vpack.c.bf16 %v11111_v35, %v11110_v3 }
 0x8d3   :  { %v11033_v5 = vpop.f32.mrb[180].mxu0 }
 0x8d4   :  { %12564 = vst [vmem:[%s20272_s5 + $0x98] sm:$0xff] %v12519_v51   ;;  %v12910_v27 = vadd.f32 %v20140_v59, %v11033_v5  ;;  %v11035_v14 = vpop.f32.mrb[181].mxu0 }
 0x8d5   :  { %v11036_v61 = vpop.f32.mrb[182].mxu0 }
 0x8d6   :  { %v12911_v62 = vadd.f32 %v20140_v59, %v11036_v61  ;;  %v11038_v18 = vpop.f32.mrb[183].mxu0  ;;  %v11112_v43 = vmax.f32 %v12910_v27, 0.0 }
 0x8d8   :  { %v11113_v31 = vmax.f32 %v12911_v62, 0.0 }
 0x8da   :  { %v12524_v33 = vpack.c.bf16 %v11113_v31, %v11112_v43 }
 0x8db   :  { %v11041_v16 = vpop.f32.mrb[184].mxu0 }
 0x8dc   :  { %12565 = vst [vmem:[%s20272_s5 + $0xa0] sm:$0xff] %v12524_v33   ;;  %v12912_v15 = vadd.f32 %v20140_v59, %v11041_v16  ;;  %v11043_v50 = vpop.f32.mrb[185].mxu0 }
 0x8dd   :  { %v11044_v23 = vpop.f32.mrb[186].mxu0 }
 0x8de   :  { %v12913_v9 = vadd.f32 %v20140_v59, %v11044_v23  ;;  %v11046_v40 = vpop.f32.mrb[187].mxu0  ;;  %v11114_v10 = vmax.f32 %v12912_v15, 0.0 }
 0x8e0   :  { %v11115_v45 = vmax.f32 %v12913_v9, 0.0 }
 0x8e2   :  { %v12529_v42 = vpack.c.bf16 %v11115_v45, %v11114_v10 }
 0x8e3   :  { %v11049_v11 = vpop.f32.mrb[188].mxu0 }
 0x8e4   :  { %12566 = vst [vmem:[%s20272_s5 + $0xa8] sm:$0xff] %v12529_v42   ;;  %v12914_v6 = vadd.f32 %v20140_v59, %v11049_v11  ;;  %v11051_v8 = vpop.f32.mrb[189].mxu0 }
 0x8e5   :  { %v11052_v48 = vpop.f32.mrb[190].mxu0 }
 0x8e6   :  { %v12915_v47 = vadd.f32 %v20140_v59, %v11052_v48  ;;  %v11054_v34 = vpop.f32.mrb[191].mxu0  ;;  %v11116_v30 = vmax.f32 %v12914_v6, 0.0 }
 0x8e8   :  { %v11117_v60 = vmax.f32 %v12915_v47, 0.0 }
 0x8ea   :  { %v12534_v44 = vpack.c.bf16 %v11117_v60, %v11116_v30 }
 0x8eb   :  { %v11057_v28 = vpop.f32.mrb[192].mxu0 }
 0x8ec   :  { %12567 = vst [vmem:[%s20272_s5 + $0xb0] sm:$0xff] %v12534_v44   ;;  %v12916_v22 = vadd.f32 %v20140_v59, %v11057_v28  ;;  %v11059_v20 = vpop.f32.mrb[193].mxu0 }
 0x8ed   :  { %v11060_v57 = vpop.f32.mrb[194].mxu0 }
 0x8ee   :  { %v12917_v58 = vadd.f32 %v20140_v59, %v11060_v57  ;;  %v11062_v19 = vpop.f32.mrb[195].mxu0  ;;  %v11118_v41 = vmax.f32 %v12916_v22, 0.0 }
 0x8f0   :  { %v11119_v24 = vmax.f32 %v12917_v58, 0.0 }
 0x8f2   :  { %v12539_v26 = vpack.c.bf16 %v11119_v24, %v11118_v41 }
 0x8f3   :  { %v11065_v54 = vpop.f32.mrb[196].mxu0 }
 0x8f4   :  { %12568 = vst [vmem:[%s20272_s5 + $0xb8] sm:$0xff] %v12539_v26   ;;  %v12918_v63 = vadd.f32 %v20140_v59, %v11065_v54  ;;  %v11067_v56 = vpop.f32.mrb[197].mxu0 }
 0x8f5   :  { %v11068_v12 = vpop.f32.mrb[198].mxu0 }
 0x8f6   :  { %v12919_v55 = vadd.f32 %v20140_v59, %v11068_v12  ;;  %v11070_v36 = vpop.f32.mrb[199].mxu0  ;;  %v11120_v4 = vmax.f32 %v12918_v63, 0.0 }
 0x8f8   :  { %v11121_v0 = vmax.f32 %v12919_v55, 0.0 }
 0x8fa   :  { %v12544_v29 = vpack.c.bf16 %v11121_v0, %v11120_v4 }
 0x8fc   :  { %12569 = vst [vmem:[%s20272_s5 + $0xc0] sm:$0xff] %v12544_v29  }

// kernel: vln_embeddings_forward.3
= control target key start
LH: loop header
LB: loop body
LE: loop exit
PB: predicated region body
PF: predicated region fallthrough
CT: control target
= control target key end

     0   :  { %vm19_vm0 = vcmask 261120   ;;  %vm32_vm1 = vcmask 257024   ;;  %s203_s0 = inlined_call_operand.vmem [shape: f32[36,32], index: 0, kind: input, shape index: {}]   ;;  %s204_s1 = inlined_call_operand.vmem [shape: f32[1,32], index: 1, kind: input, shape index: {}]   ;;  %s205_s2 = inlined_call_operand.vmem [shape: f32[1,32], index: 2, kind: input, shape index: {}]   ;;  %s206_s3 = inlined_call_operand.vmem [shape: f32[36,32], index: 3, kind: output, shape index: {}]  }
   0x1   :  { %v14_v0 = vld [vmem:[%s203_s0] sm:$0xff]  ;;  %v16_v1 = vld [vmem:[%s203_s0 + $0x10] sm:$0xff]  ;;  %v15_v2 = vld [vmem:[%s203_s0 + $0x8] sm:$0xff] }
   0x2   :  { %v20_v3 = vsel %vm19_vm0, %v14_v0, 0.0  ;;  %v26_v4 = vsel %vm19_vm0, %v16_v1, 0.0  ;;  %v17_v5 = vld [vmem:[%s203_s0 + $0x18] sm:$0xff]  ;;  %v23_v6 = vsel %vm19_vm0, %v15_v2, 0.0  ;;  %v18_v8 = vld [vmem:[%s203_s0 + $0x20] sm:$0xf] }
   0x3   :  { %21 = vadd.xlane.f32.xlu0 %v20_v3  ;;  %27 = vadd.xlane.f32.xlu1 %v26_v4  ;;  %v29_v7 = vsel %vm19_vm0, %v17_v5, 0.0  ;;  %v33_v9 = vsel %vm32_vm1, %v18_v8, 0.0  ;;  %v120_v51 = vld [vmem:[%s204_s1] ss:$0 sm:$0xff] }
   0x4   :  { %v121_v53 = vld [vmem:[%s205_s2] ss:$0 sm:$0xff] }
   0x7   :  { %24 = vadd.xlane.f32.xlu0 %v23_v6  ;;  %30 = vadd.xlane.f32.xlu1 %v29_v7 }
   0xb   :  { %34 = vadd.xlane.f32.xlu0 %v33_v9 }
  0x90   :  { %v22_v10 = vpop.xlane.xlu0 %21  ;;  %v28_v11 = vpop.xlane.xlu1 %27 }
  0x91   :  { %v37_v12 = vmul.f32 0.03125, %v22_v10  ;;  %v39_v13 = vmul.f32 0.03125, %v28_v11 }
  0x93   :  { %v42_v14 = vsub.f32 %v14_v0, %v37_v12  ;;  %v44_v15 = vsub.f32 %v16_v1, %v39_v13 }
  0x94   :  { %v25_v16 = vpop.xlane.xlu0 %24  ;;  %v31_v17 = vpop.xlane.xlu1 %30 }
  0x95   :  { %v38_v18 = vmul.f32 0.03125, %v25_v16  ;;  %v40_v19 = vmul.f32 0.03125, %v31_v17  ;;  %v47_v20 = vmul.f32 %v42_v14, %v42_v14  ;;  %v49_v21 = vmul.f32 %v44_v15, %v44_v15 }
  0x97   :  { %v43_v22 = vsub.f32 %v15_v2, %v38_v18  ;;  %v45_v23 = vsub.f32 %v17_v5, %v40_v19  ;;  %v52_v24 = vsel %vm19_vm0, %v47_v20, 0.0  ;;  %v58_v27 = vsel %vm19_vm0, %v49_v21, 0.0 }
  0x98   :  { %53 = vadd.xlane.f32.xlu1 %v52_v24  ;;  %v35_v25 = vpop.xlane.xlu0 %34 }
  0x99   :  { %v41_v26 = vmul.f32 0.03125, %v35_v25  ;;  %v48_v28 = vmul.f32 %v43_v22, %v43_v22  ;;  %v50_v29 = vmul.f32 %v45_v23, %v45_v23 }
  0x9b   :  { %v46_v30 = vsub.f32 %v18_v8, %v41_v26  ;;  %v55_v31 = vsel %vm19_vm0, %v48_v28, 0.0  ;;  %v61_v32 = vsel %vm19_vm0, %v50_v29, 0.0 }
  0x9c   :  { %59 = vadd.xlane.f32.xlu1 %v58_v27  ;;  %56 = vadd.xlane.f32.xlu0 %v55_v31 }
  0x9d   :  { %v51_v33 = vmul.f32 %v46_v30, %v46_v30 }
  0x9f   :  { %v64_v34 = vsel %vm32_vm1, %v51_v33, 0.0 }
  0xa0   :  { %62 = vadd.xlane.f32.xlu0 %v61_v32  ;;  %65 = vadd.xlane.f32.xlu1 %v64_v34 }
 0x125   :  { %v54_v35 = vpop.xlane.xlu1 %53 }
 0x126   :  { %v67_v36 = vmul.f32 0.03125, %v54_v35 }
 0x128   :  { %v72_v37 = vadd.f32 1e-12, %v67_v36 }
 0x129   :  { %v60_v38 = vpop.xlane.xlu1 %59  ;;  %v57_v39 = vpop.xlane.xlu0 %56 }
 0x12a   :  { %122 = vrsqrt.f32 %v72_v37  ;;  %v69_v40 = vmul.f32 0.03125, %v60_v38  ;;  %v68_v41 = vmul.f32 0.03125, %v57_v39 }
 0x12c   :  { %v74_v42 = vadd.f32 1e-12, %v69_v40  ;;  %v73_v43 = vadd.f32 1e-12, %v68_v41 }
 0x12d   :  { %v66_v44 = vpop.xlane.xlu1 %65  ;;  %v63_v45 = vpop.xlane.xlu0 %62 }
 0x12e   :  { %124 = vrsqrt.f32 %v74_v42  ;;  %v71_v46 = vmul.f32 0.03125, %v66_v44  ;;  %v70_v47 = vmul.f32 0.03125, %v63_v45 }
 0x12f   :  { %126 = vrsqrt.f32 %v73_v43 }
 0x130   :  { %v76_v48 = vadd.f32 1e-12, %v71_v46  ;;  %v75_v49 = vadd.f32 1e-12, %v70_v47 }
 0x132   :  { %128 = vrsqrt.f32 %v76_v48 }
 0x133   :  { %130 = vrsqrt.f32 %v75_v49 }
 0x134   :  { %v123_v50 = vpop.eup %122 }
 0x135   :  { %v82_v52 = vmul.f32 %v123_v50, %v42_v14 }
 0x137   :  { %v94_v54 = vmul.f32 %v120_v51, %v82_v52 }
 0x138   :  { %v125_v55 = vpop.eup %124 }
 0x139   :  { %v127_v56 = vpop.eup %126  ;;  %v106_v57 = vadd.f32 %v121_v53, %v94_v54  ;;  %v84_v58 = vmul.f32 %v125_v55, %v44_v15 }
 0x13a   :  { %v83_v59 = vmul.f32 %v127_v56, %v43_v22 }
 0x13b   :  { %111 = vst.msk [vmem:[%s206_s3] sm:$0xff] %vm19_vm0, %v106_v57  ;;  %v96_v60 = vmul.f32 %v120_v51, %v84_v58 }
 0x13c   :  { %v129_v61 = vpop.eup %128  ;;  %v95_v62 = vmul.f32 %v120_v51, %v83_v59 }
 0x13d   :  { %v131_v63 = vpop.eup %130  ;;  %v108_v0 = vadd.f32 %v121_v53, %v96_v60  ;;  %v86_v1 = vmul.f32 %v129_v61, %v46_v30 }
 0x13e   :  { %v107_v2 = vadd.f32 %v121_v53, %v95_v62  ;;  %v85_v3 = vmul.f32 %v131_v63, %v45_v23 }
 0x13f   :  { %113 = vst.msk [vmem:[%s206_s3 + $0x10] sm:$0xff] %vm19_vm0, %v108_v0  ;;  %v98_v4 = vmul.f32 %v120_v51, %v86_v1 }
 0x140   :  { %112 = vst.msk [vmem:[%s206_s3 + $0x8] sm:$0xff] %vm19_vm0, %v107_v2  ;;  %v97_v5 = vmul.f32 %v120_v51, %v85_v3 }
 0x141   :  { %v110_v6 = vadd.f32 %v121_v53, %v98_v4 }
 0x142   :  { %v109_v7 = vadd.f32 %v121_v53, %v97_v5 }
 0x143   :  { %115 = vst.msk [vmem:[%s206_s3 + $0x20] sm:$0xf] %vm32_vm1, %v110_v6 }
 0x144   :  { %114 = vst.msk [vmem:[%s206_s3 + $0x18] sm:$0xff] %vm19_vm0, %v109_v7 }

</bundles_post_ra>
